<compile_context>
chip_gen: v6e
topology: v6e:2x2x1
jax: 0.10.0
libtpu: 0.0.40
codegen_flags: <defaults>
</compile_context>

<pallas_src>
import jax
import jax.numpy as jnp
from jax.experimental import pallas as pl
from jax.experimental.pallas import tpu as pltpu

NEG_SLOPE = 0.01   # nn.LeakyReLU default negative_slope
BN_EPS = 1e-5      # nn.BatchNorm3d default eps


def _leaky(x):
    return jnp.where(x > 0, x, NEG_SLOPE * x)


def _zero_halo(ref):
    """Zero only the six halo faces of a (Dp, Hp, Wp, C) padded scratch."""
    Dp, Hp, Wp, C = ref.shape
    ref[0] = jnp.zeros((Hp, Wp, C), ref.dtype)
    ref[Dp - 1] = jnp.zeros((Hp, Wp, C), ref.dtype)

    @pl.loop(1, Dp - 1)
    def _(d):
        ref[d, pl.ds(0, 1), :, :] = jnp.zeros((1, Wp, C), ref.dtype)
        ref[d, pl.ds(Hp - 1, 1), :, :] = jnp.zeros((1, Wp, C), ref.dtype)
        ref[d, :, pl.ds(0, 1), :] = jnp.zeros((Hp, 1, C), ref.dtype)
        ref[d, :, pl.ds(Wp - 1, 1), :] = jnp.zeros((Hp, 1, C), ref.dtype)


def _make_kernel(identity_shortcut):
    """Build the fused SEResNetBlock kernel, statically specialized on the shortcut."""

    def kernel(
        x_ref,       # (D, H, W, Cin)       unpadded input block, f32
        w1_ref,      # (27*Cin, Cout)       conv1 weights (BN1 folded), bf16
        b1_ref,      # (1, Cout)            conv1 bias (BN1 folded), f32
        w2_ref,      # (27*Cout, Cout)      conv2 weights (BN2 folded), bf16
        b2_ref,      # (1, Cout)
        wsc_ref,     # (Cin, Cout)          shortcut 1x1 conv (unused if identity)
        bsc_ref,     # (1, Cout)
        fc1w_ref,    # (Cout, Chid)         SE fc1 (pre-transposed: y = x @ W + b)
        fc1b_ref,    # (1, Chid)
        fc2w_ref,    # (Chid, Cout)
        fc2b_ref,    # (1, Cout)
        out_ref,     # (D, H*W, Cout)       output block, f32
        xpad_ref,    # scratch (Dp, Hp, Wp, Cin)   bf16, padded input
        h1pad_ref,   # scratch (Dp, Hp, Wp, Cout)  bf16, padded conv1 activation
        im1_ref,     # scratch (H*W, 27*Cin)       bf16, conv1 im2col slab
        im2_ref,     # scratch (H*W, 27*Cout)      bf16, conv2 im2col slab
        pooled_ref,  # scratch (1, Cout)           f32, SE global-average accumulator
    ):
        D, H, W, Cin = x_ref.shape
        Cout = out_ref.shape[-1]
        HW = H * W
        inv_n = 1.0 / float(D * HW)

        # Fresh per-grid-step state -> no cross-iteration carry, safe with "parallel".
        _zero_halo(xpad_ref)
        _zero_halo(h1pad_ref)
        pooled_ref[...] = jnp.zeros_like(pooled_ref)

        # ---- in-kernel padding: copy the f32 input block into the bf16 padded scratch
        @pl.loop(0, D)
        def _(d):
            xpad_ref[d + 1, pl.ds(1, H), pl.ds(1, W), :] = x_ref[d].astype(xpad_ref.dtype)

        # ---- conv1 (3x3x3, pad 1) + folded BN1 + LeakyReLU
        # One im2col matmul per depth plane: K = 27*Cin instead of 27 K=Cin dots.
        @pl.loop(0, D)
        def _(d):
            for kd in range(3):
                for kh in range(3):
                    for kw in range(3):
                        tap = (kd * 3 + kh) * 3 + kw
                        slab = xpad_ref[d + kd, pl.ds(kh, H), pl.ds(kw, W), :]
                        # (H, W, Cin) -> (HW, Cin) is layout-free when W % 8 == 0.
                        im1_ref[:, tap * Cin:(tap + 1) * Cin] = slab.reshape(HW, Cin)
            acc = jnp.dot(im1_ref[...], w1_ref[...],
                          preferred_element_type=jnp.float32)          # (HW, Cout) f32
            h1 = _leaky(acc + b1_ref[...])
            h1pad_ref[d + 1, pl.ds(1, H), pl.ds(1, W), :] = (
                h1.reshape(H, W, Cout).astype(h1pad_ref.dtype))

        # ---- conv2 (3x3x3, pad 1) + folded BN2; write pre-gate result directly into
        #      out_ref (no h2 scratch) and accumulate the SE global average on the fly.
        @pl.loop(0, D)
        def _(d):
            for kd in range(3):
                for kh in range(3):
                    for kw in range(3):
                        tap = (kd * 3 + kh) * 3 + kw
                        slab = h1pad_ref[d + kd, pl.ds(kh, H), pl.ds(kw, W), :]
                        im2_ref[:, tap * Cout:(tap + 1) * Cout] = slab.reshape(HW, Cout)
            h2 = jnp.dot(im2_ref[...], w2_ref[...],
                         preferred_element_type=jnp.float32) + b2_ref[...]   # (HW, Cout)
            out_ref[d] = h2
            pooled_ref[...] += jnp.sum(h2, axis=0, keepdims=True)

        # ---- SE gate: global average -> fc1 -> ReLU -> fc2 -> sigmoid (all f32, tiny)
        pooled = pooled_ref[...] * inv_n                                     # (1, Cout)
        z = jnp.maximum(
            jnp.dot(pooled, fc1w_ref[...], preferred_element_type=jnp.float32)
            + fc1b_ref[...], 0.0)                                            # (1, Chid)
        gate = jax.nn.sigmoid(
            jnp.dot(z, fc2w_ref[...], preferred_element_type=jnp.float32)
            + fc2b_ref[...])                                                 # (1, Cout)

        # ---- epilogue: RMW out_ref — scale by gate, add shortcut, final LeakyReLU
        @pl.loop(0, D)
        def _(d):
            h2 = out_ref[d]                                  # (HW, Cout) f32
            xs = x_ref[d].reshape(HW, Cin)                   # f32 residual source
            if identity_shortcut:
                res = xs                                     # Cin == Cout, no matmul
            else:
                res = jnp.dot(xs, wsc_ref[...],
                              preferred_element_type=jnp.float32) + bsc_ref[...]
            out_ref[d] = _leaky(h2 * gate + res)

    return kernel


def _fold_bn(w, b, gamma, beta, mean, var, eps=BN_EPS):
    """Fold eval-mode BatchNorm into conv weight (..., Cin, Cout) and bias (Cout,)."""
    scale = gamma / jnp.sqrt(var + eps)
    return w * scale, (b - mean) * scale + beta


@jax.jit
def se_resnet_block_forward(x_ncdhw, params):
    """Eval-mode SEResNetBlock forward (stride=1). x: (B, Cin, D, H, W) -> (B, Cout, D, H, W)."""
    B, Cin, D, H, W = x_ncdhw.shape
    w1 = params["conv1_w"]                       # (3, 3, 3, Cin, Cout)
    Cout = w1.shape[-1]
    Chid = params["fc1_w"].shape[-1]
    identity = "sc_w" not in params              # identity shortcut iff no projection params

    # Channels-last, UNPADDED (halo handled in-kernel; no extra HBM round trip).
    x_cl = jnp.transpose(x_ncdhw, (0, 2, 3, 4, 1)).astype(jnp.float32)

    # Fold the eval-mode BatchNorms into the convs (f32), then cast conv weights to bf16.
    w1f, b1f = _fold_bn(w1, params["conv1_b"], params["bn1_gamma"],
                        params["bn1_beta"], params["bn1_mean"], params["bn1_var"])
    w2f, b2f = _fold_bn(params["conv2_w"], params["conv2_b"], params["bn2_gamma"],
                        params["bn2_beta"], params["bn2_mean"], params["bn2_var"])
    if identity:
        wscf = jnp.zeros((Cin, Cout), jnp.float32)   # unused (static identity path)
        bscf = jnp.zeros((Cout,), jnp.float32)
    else:
        wscf, bscf = _fold_bn(params["sc_w"], params["sc_b"], params["bnsc_gamma"],
                              params["bnsc_beta"], params["bnsc_mean"], params["bnsc_var"])

    # (3,3,3,C,Cout) -> (27*C, Cout): rows ordered tap-major then channel, matching
    # the in-kernel im2col column layout.
    w1cat = w1f.reshape(27 * Cin, Cout).astype(jnp.bfloat16)
    w2cat = w2f.reshape(27 * Cout, Cout).astype(jnp.bfloat16)

    Dp, Hp, Wp = D + 2, H + 2, W + 2
    HW = H * W

    # VMEM budget sized from the real working set (double-buffered I/O + scratches).
    f32b, bf16b = 4, 2
    work = (2 * D * H * W * Cin * f32b            # input block, double-buffered
            + 2 * D * HW * Cout * f32b            # output block, double-buffered
            + Dp * Hp * Wp * Cin * bf16b          # xpad scratch
            + Dp * Hp * Wp * Cout * bf16b         # h1pad scratch
            + HW * 27 * Cin * bf16b               # conv1 im2col
            + HW * 27 * Cout * bf16b              # conv2 im2col
            + 27 * Cin * Cout * bf16b + 27 * Cout * Cout * bf16b
            + (Cin + 4) * Cout * f32b + 2 * Cout * Chid * f32b)
    vmem_limit = int(min(128 * 1024 * 1024, max(32 * 1024 * 1024, 2 * work + (4 << 20))))

    out = pl.pallas_call(
        _make_kernel(identity),
        out_shape=jax.ShapeDtypeStruct((B, D, HW, Cout), jnp.float32),
        grid=(B,),
        in_specs=[
            pl.BlockSpec((None, D, H, W, Cin), lambda b: (b, 0, 0, 0, 0)),
            pl.BlockSpec((27 * Cin, Cout), lambda b: (0, 0)),
            pl.BlockSpec((1, Cout), lambda b: (0, 0)),
            pl.BlockSpec((27 * Cout, Cout), lambda b: (0, 0)),
            pl.BlockSpec((1, Cout), lambda b: (0, 0)),
            pl.BlockSpec((Cin, Cout), lambda b: (0, 0)),
            pl.BlockSpec((1, Cout), lambda b: (0, 0)),
            pl.BlockSpec((Cout, Chid), lambda b: (0, 0)),
            pl.BlockSpec((1, Chid), lambda b: (0, 0)),
            pl.BlockSpec((Chid, Cout), lambda b: (0, 0)),
            pl.BlockSpec((1, Cout), lambda b: (0, 0)),
        ],
        out_specs=pl.BlockSpec((None, D, HW, Cout), lambda b: (b, 0, 0, 0)),
        scratch_shapes=[
            pltpu.VMEM((Dp, Hp, Wp, Cin), jnp.bfloat16),    # padded input
            pltpu.VMEM((Dp, Hp, Wp, Cout), jnp.bfloat16),   # padded conv1 activation
            pltpu.VMEM((HW, 27 * Cin), jnp.bfloat16),       # conv1 im2col slab
            pltpu.VMEM((HW, 27 * Cout), jnp.bfloat16),      # conv2 im2col slab
            pltpu.VMEM((1, Cout), jnp.float32),             # SE pooled accumulator
        ],
        compiler_params=pltpu.CompilerParams(
            dimension_semantics=("parallel",),
            vmem_limit_bytes=vmem_limit),
    )(x_cl, w1cat, b1f[None, :], w2cat, b2f[None, :], wscf, bscf[None, :],
      params["fc1_w"], params["fc1_b"][None, :],
      params["fc2_w"], params["fc2_b"][None, :])

    out = out.reshape(B, D, H, W, Cout)
    return jnp.transpose(out, (0, 4, 1, 2, 3))   # back to NCDHW


# ------------------------- pure-JAX reference (spec) -------------------------

def _bn_eval(x, gamma, beta, mean, var, eps=BN_EPS):
    return (x - mean) * (gamma / jnp.sqrt(var + eps)) + beta


def _conv3d_cl(x_cl, w, b):
    y = jax.lax.conv_general_dilated(
        x_cl, w, window_strides=(1, 1, 1),
        padding=((1, 1), (1, 1), (1, 1)),
        dimension_numbers=("NDHWC", "DHWIO", "NDHWC"))
    return y + b


def reference_forward(x_ncdhw, p):
    x = jnp.transpose(x_ncdhw, (0, 2, 3, 4, 1)).astype(jnp.float32)
    h = _leaky(_bn_eval(_conv3d_cl(x, p["conv1_w"], p["conv1_b"]),
                        p["bn1_gamma"], p["bn1_beta"], p["bn1_mean"], p["bn1_var"]))
    h = _bn_eval(_conv3d_cl(h, p["conv2_w"], p["conv2_b"]),
                 p["bn2_gamma"], p["bn2_beta"], p["bn2_mean"], p["bn2_var"])
    pooled = h.mean(axis=(1, 2, 3))
    z = jnp.maximum(pooled @ p["fc1_w"] + p["fc1_b"], 0.0)
    gate = jax.nn.sigmoid(z @ p["fc2_w"] + p["fc2_b"])
    h = h * gate[:, None, None, None, :]
    if "sc_w" in p:
        res = jnp.einsum("bdhwc,co->bdhwo", x, p["sc_w"]) + p["sc_b"]
        res = _bn_eval(res, p["bnsc_gamma"], p["bnsc_beta"], p["bnsc_mean"], p["bnsc_var"])
    else:
        res = x
    return jnp.transpose(_leaky(h + res), (0, 4, 1, 2, 3))


if __name__ == "__main__":
    def make_params(key, cin, cout, reduction=16, with_shortcut=True):
        chid = max(cout // reduction, 1)
        ks = jax.random.split(key, 24)

        def normal(k, shape, scale=0.1):
            return scale * jax.random.normal(k, shape, jnp.float32)

        def uni(k, shape):
            return jax.random.uniform(k, shape, jnp.float32, 0.5, 1.5)

        p = {
            "conv1_w": normal(ks[0], (3, 3, 3, cin, cout)),
            "conv1_b": normal(ks[1], (cout,)),
            "bn1_gamma": uni(ks[2], (cout,)), "bn1_beta": normal(ks[3], (cout,)),
            "bn1_mean": normal(ks[4], (cout,)), "bn1_var": uni(ks[5], (cout,)),
            "conv2_w": normal(ks[6], (3, 3, 3, cout, cout)),
            "conv2_b": normal(ks[7], (cout,)),
            "bn2_gamma": uni(ks[8], (cout,)), "bn2_beta": normal(ks[9], (cout,)),
            "bn2_mean": normal(ks[10], (cout,)), "bn2_var": uni(ks[11], (cout,)),
            "fc1_w": normal(ks[18], (cout, chid), 0.3),
            "fc1_b": normal(ks[19], (chid,), 0.1),
            "fc2_w": normal(ks[20], (chid, cout), 0.3),
            "fc2_b": normal(ks[21], (cout,), 0.1),
        }
        if with_shortcut:
            p.update({
                "sc_w": normal(ks[12], (cin, cout)),
                "sc_b": normal(ks[13], (cout,)),
                "bnsc_gamma": uni(ks[14], (cout,)), "bnsc_beta": normal(ks[15], (cout,)),
                "bnsc_mean": normal(ks[16], (cout,)), "bnsc_var": uni(ks[17], (cout,)),
            })
        return p

    key = jax.random.PRNGKey(0)
    k1, k2, kx1, kx2 = jax.random.split(key, 4)

    # Case 1: Cin != Cout -> projection (1x1x1 conv + BN) shortcut.
    B, Cin, Cout, D, H, W = 2, 4, 32, 8, 8, 8
    p1 = make_params(k1, Cin, Cout, with_shortcut=True)
    x1 = jax.random.normal(kx1, (B, Cin, D, H, W), jnp.float32)
    out1 = se_resnet_block_forward(x1, p1)
    jax.block_until_ready(out1)
    assert out1.shape == (B, Cout, D, H, W)
    ref1 = reference_forward(x1, p1)
    err1 = float(jnp.max(jnp.abs(out1 - ref1)))
    tol1 = 1e-2 + 2e-2 * float(jnp.max(jnp.abs(ref1)))   # bf16 matmul operands
    assert err1 < tol1, f"projection-shortcut mismatch: max abs err {err1} >= {tol1}"

    # Case 2: Cin == Cout -> identity shortcut (specialized path, no 1x1 matmul).
    Cin2 = Cout2 = 32
    p2 = make_params(k2, Cin2, Cout2, with_shortcut=False)
    x2 = jax.random.normal(kx2, (B, Cin2, D, H, W), jnp.float32)
    out2 = se_resnet_block_forward(x2, p2)
    jax.block_until_ready(out2)
    assert out2.shape == (B, Cout2, D, H, W)
    ref2 = reference_forward(x2, p2)
    err2 = float(jnp.max(jnp.abs(out2 - ref2)))
    tol2 = 1e-2 + 2e-2 * float(jnp.max(jnp.abs(ref2)))
    assert err2 < tol2, f"identity-shortcut mismatch: max abs err {err2} >= {tol2}"

    print("KERNEL_OK")
</pallas_src>

<mosaic_0001>
module attributes {stable_mosaic.version = 11 : i64} {
  func.func @kernel(%arg0: i32, %arg1: memref<1x8x8x8x4xf32, #tpu.memory_space<vmem>>, %arg2: memref<108x32xbf16, #tpu.memory_space<vmem>>, %arg3: memref<1x32xf32, #tpu.memory_space<vmem>>, %arg4: memref<864x32xbf16, #tpu.memory_space<vmem>>, %arg5: memref<1x32xf32, #tpu.memory_space<vmem>>, %arg6: memref<4x32xf32, #tpu.memory_space<vmem>>, %arg7: memref<1x32xf32, #tpu.memory_space<vmem>>, %arg8: memref<32x2xf32, #tpu.memory_space<vmem>>, %arg9: memref<1x2xf32, #tpu.memory_space<vmem>>, %arg10: memref<2x32xf32, #tpu.memory_space<vmem>>, %arg11: memref<1x32xf32, #tpu.memory_space<vmem>>, %arg12: memref<1x8x64x32xf32, #tpu.memory_space<vmem>>, %arg13: memref<10x10x10x4xbf16, #tpu.memory_space<vmem>>, %arg14: memref<10x10x10x32xbf16, #tpu.memory_space<vmem>>, %arg15: memref<64x108xbf16, #tpu.memory_space<vmem>>, %arg16: memref<64x864xbf16, #tpu.memory_space<vmem>>, %arg17: memref<1x32xf32, #tpu.memory_space<vmem>>) attributes {dimension_semantics = [#tpu.dimension_semantics<parallel>], iteration_bounds = array<i64: 2>, scalar_prefetch = 0 : i64, scratch_operands = 5 : i64, tpu.core_type = #tpu.core_type<tc>, window_params = [{transform_indices = @transform_0, window_bounds = array<i64: 1, 8, 8, 8, 4>}, {pipeline_mode = #tpu.pipeline_mode<synchronous>, transform_indices = @transform_1, window_bounds = array<i64: 108, 32>}, {pipeline_mode = #tpu.pipeline_mode<synchronous>, transform_indices = @transform_2, window_bounds = array<i64: 1, 32>}, {pipeline_mode = #tpu.pipeline_mode<synchronous>, transform_indices = @transform_3, window_bounds = array<i64: 864, 32>}, {pipeline_mode = #tpu.pipeline_mode<synchronous>, transform_indices = @transform_4, window_bounds = array<i64: 1, 32>}, {pipeline_mode = #tpu.pipeline_mode<synchronous>, transform_indices = @transform_5, window_bounds = array<i64: 4, 32>}, {pipeline_mode = #tpu.pipeline_mode<synchronous>, transform_indices = @transform_6, window_bounds = array<i64: 1, 32>}, {pipeline_mode = #tpu.pipeline_mode<synchronous>, transform_indices = @transform_7, window_bounds = array<i64: 32, 2>}, {pipeline_mode = #tpu.pipeline_mode<synchronous>, transform_indices = @transform_8, window_bounds = array<i64: 1, 2>}, {pipeline_mode = #tpu.pipeline_mode<synchronous>, transform_indices = @transform_9, window_bounds = array<i64: 2, 32>}, {pipeline_mode = #tpu.pipeline_mode<synchronous>, transform_indices = @transform_10, window_bounds = array<i64: 1, 32>}, {transform_indices = @transform_11, window_bounds = array<i64: 1, 8, 64, 32>}]} {
    %cst = arith.constant 0.000000e+00 : bf16
    %0 = vector.broadcast %cst : bf16 to vector<10x10x4xbf16>
    %c0 = arith.constant 0 : index
    %c0_0 = arith.constant 0 : index
    %c0_1 = arith.constant 0 : index
    %c0_2 = arith.constant 0 : index
    %1 = vector.load %arg13[%c0, %c0_0, %c0_1, %c0_2] : memref<10x10x10x4xbf16, #tpu.memory_space<vmem>>, vector<1x10x10x4xbf16>
    %2 = vector.shape_cast %1 : vector<1x10x10x4xbf16> to vector<10x10x4xbf16>
    %3 = vector.shape_cast %0 : vector<10x10x4xbf16> to vector<1x10x10x4xbf16>
    tpu.vector_store %arg13[%c0, %c0_0, %c0_1, %c0_2], %3 {strides = array<i32>} : memref<10x10x10x4xbf16, #tpu.memory_space<vmem>>, vector<1x10x10x4xbf16>,
    %cst_3 = arith.constant 0.000000e+00 : bf16
    %4 = vector.broadcast %cst_3 : bf16 to vector<10x10x4xbf16>
    %c9 = arith.constant 9 : index
    %c0_4 = arith.constant 0 : index
    %c0_5 = arith.constant 0 : index
    %c0_6 = arith.constant 0 : index
    %5 = vector.load %arg13[%c9, %c0_4, %c0_5, %c0_6] : memref<10x10x10x4xbf16, #tpu.memory_space<vmem>>, vector<1x10x10x4xbf16>
    %6 = vector.shape_cast %5 : vector<1x10x10x4xbf16> to vector<10x10x4xbf16>
    %7 = vector.shape_cast %4 : vector<10x10x4xbf16> to vector<1x10x10x4xbf16>
    tpu.vector_store %arg13[%c9, %c0_4, %c0_5, %c0_6], %7 {strides = array<i32>} : memref<10x10x10x4xbf16, #tpu.memory_space<vmem>>, vector<1x10x10x4xbf16>,
    %c0_i32 = arith.constant 0 : i32
    %c8_i32 = arith.constant 8 : i32
    %8 = arith.addi %c0_i32, %c8_i32 : i32
    %c1_i32 = arith.constant 1 : i32
    scf.for %arg18 = %c0_i32 to %8 step %c1_i32  : i32 {
      %c1_i32_56 = arith.constant 1 : i32
      %42 = arith.muli %arg18, %c1_i32_56 : i32
      %c1_i32_57 = arith.constant 1 : i32
      %43 = arith.addi %c1_i32_57, %42 : i32
      %cst_58 = arith.constant 0.000000e+00 : bf16
      %44 = vector.broadcast %cst_58 : bf16 to vector<1x10x4xbf16>
      %45 = arith.index_cast %43 : i32 to index
      %c0_59 = arith.constant 0 : index
      %c0_60 = arith.constant 0 : index
      %c0_61 = arith.constant 0 : index
      %46 = vector.load %arg13[%45, %c0_59, %c0_60, %c0_61] : memref<10x10x10x4xbf16, #tpu.memory_space<vmem>>, vector<1x1x10x4xbf16>
      %47 = vector.shape_cast %46 : vector<1x1x10x4xbf16> to vector<1x10x4xbf16>
      %48 = vector.shape_cast %44 : vector<1x10x4xbf16> to vector<1x1x10x4xbf16>
      tpu.vector_store %arg13[%45, %c0_59, %c0_60, %c0_61], %48 {strides = array<i32>} : memref<10x10x10x4xbf16, #tpu.memory_space<vmem>>, vector<1x1x10x4xbf16>,
      %cst_62 = arith.constant 0.000000e+00 : bf16
      %49 = vector.broadcast %cst_62 : bf16 to vector<1x10x4xbf16>
      %50 = arith.index_cast %43 : i32 to index
      %c9_63 = arith.constant 9 : index
      %c0_64 = arith.constant 0 : index
      %c0_65 = arith.constant 0 : index
      %51 = vector.load %arg13[%50, %c9_63, %c0_64, %c0_65] : memref<10x10x10x4xbf16, #tpu.memory_space<vmem>>, vector<1x1x10x4xbf16>
      %52 = vector.shape_cast %51 : vector<1x1x10x4xbf16> to vector<1x10x4xbf16>
      %53 = vector.shape_cast %49 : vector<1x10x4xbf16> to vector<1x1x10x4xbf16>
      tpu.vector_store %arg13[%50, %c9_63, %c0_64, %c0_65], %53 {strides = array<i32>} : memref<10x10x10x4xbf16, #tpu.memory_space<vmem>>, vector<1x1x10x4xbf16>,
      %cst_66 = arith.constant 0.000000e+00 : bf16
      %54 = vector.broadcast %cst_66 : bf16 to vector<10x1x4xbf16>
      %55 = arith.index_cast %43 : i32 to index
      %c0_67 = arith.constant 0 : index
      %c0_68 = arith.constant 0 : index
      %c0_69 = arith.constant 0 : index
      %56 = vector.load %arg13[%55, %c0_67, %c0_68, %c0_69] : memref<10x10x10x4xbf16, #tpu.memory_space<vmem>>, vector<1x10x1x4xbf16>
      %57 = vector.shape_cast %56 : vector<1x10x1x4xbf16> to vector<10x1x4xbf16>
      %58 = vector.shape_cast %54 : vector<10x1x4xbf16> to vector<1x10x1x4xbf16>
      tpu.vector_store %arg13[%55, %c0_67, %c0_68, %c0_69], %58 {strides = array<i32>} : memref<10x10x10x4xbf16, #tpu.memory_space<vmem>>, vector<1x10x1x4xbf16>,
      %cst_70 = arith.constant 0.000000e+00 : bf16
      %59 = vector.broadcast %cst_70 : bf16 to vector<10x1x4xbf16>
      %60 = arith.index_cast %43 : i32 to index
      %c0_71 = arith.constant 0 : index
      %c9_72 = arith.constant 9 : index
      %c0_73 = arith.constant 0 : index
      %61 = vector.load %arg13[%60, %c0_71, %c9_72, %c0_73] : memref<10x10x10x4xbf16, #tpu.memory_space<vmem>>, vector<1x10x1x4xbf16>
      %62 = vector.shape_cast %61 : vector<1x10x1x4xbf16> to vector<10x1x4xbf16>
      %63 = vector.shape_cast %59 : vector<10x1x4xbf16> to vector<1x10x1x4xbf16>
      tpu.vector_store %arg13[%60, %c0_71, %c9_72, %c0_73], %63 {strides = array<i32>} : memref<10x10x10x4xbf16, #tpu.memory_space<vmem>>, vector<1x10x1x4xbf16>,
    }
    %c8_i32_7 = arith.constant 8 : i32
    %cst_8 = arith.constant 0.000000e+00 : bf16
    %9 = vector.broadcast %cst_8 : bf16 to vector<10x10x32xbf16>
    %c0_9 = arith.constant 0 : index
    %c0_10 = arith.constant 0 : index
    %c0_11 = arith.constant 0 : index
    %c0_12 = arith.constant 0 : index
    %10 = vector.load %arg14[%c0_9, %c0_10, %c0_11, %c0_12] : memref<10x10x10x32xbf16, #tpu.memory_space<vmem>>, vector<1x10x10x32xbf16>
    %11 = vector.shape_cast %10 : vector<1x10x10x32xbf16> to vector<10x10x32xbf16>
    %12 = vector.shape_cast %9 : vector<10x10x32xbf16> to vector<1x10x10x32xbf16>
    tpu.vector_store %arg14[%c0_9, %c0_10, %c0_11, %c0_12], %12 {strides = array<i32>} : memref<10x10x10x32xbf16, #tpu.memory_space<vmem>>, vector<1x10x10x32xbf16>,
    %cst_13 = arith.constant 0.000000e+00 : bf16
    %13 = vector.broadcast %cst_13 : bf16 to vector<10x10x32xbf16>
    %c9_14 = arith.constant 9 : index
    %c0_15 = arith.constant 0 : index
    %c0_16 = arith.constant 0 : index
    %c0_17 = arith.constant 0 : index
    %14 = vector.load %arg14[%c9_14, %c0_15, %c0_16, %c0_17] : memref<10x10x10x32xbf16, #tpu.memory_space<vmem>>, vector<1x10x10x32xbf16>
    %15 = vector.shape_cast %14 : vector<1x10x10x32xbf16> to vector<10x10x32xbf16>
    %16 = vector.shape_cast %13 : vector<10x10x32xbf16> to vector<1x10x10x32xbf16>
    tpu.vector_store %arg14[%c9_14, %c0_15, %c0_16, %c0_17], %16 {strides = array<i32>} : memref<10x10x10x32xbf16, #tpu.memory_space<vmem>>, vector<1x10x10x32xbf16>,
    %c0_i32_18 = arith.constant 0 : i32
    %c8_i32_19 = arith.constant 8 : i32
    %17 = arith.addi %c0_i32_18, %c8_i32_19 : i32
    %c1_i32_20 = arith.constant 1 : i32
    scf.for %arg18 = %c0_i32_18 to %17 step %c1_i32_20  : i32 {
      %c1_i32_56 = arith.constant 1 : i32
      %42 = arith.muli %arg18, %c1_i32_56 : i32
      %c1_i32_57 = arith.constant 1 : i32
      %43 = arith.addi %c1_i32_57, %42 : i32
      %cst_58 = arith.constant 0.000000e+00 : bf16
      %44 = vector.broadcast %cst_58 : bf16 to vector<1x10x32xbf16>
      %45 = arith.index_cast %43 : i32 to index
      %c0_59 = arith.constant 0 : index
      %c0_60 = arith.constant 0 : index
      %c0_61 = arith.constant 0 : index
      %46 = vector.load %arg14[%45, %c0_59, %c0_60, %c0_61] : memref<10x10x10x32xbf16, #tpu.memory_space<vmem>>, vector<1x1x10x32xbf16>
      %47 = vector.shape_cast %46 : vector<1x1x10x32xbf16> to vector<1x10x32xbf16>
      %48 = vector.shape_cast %44 : vector<1x10x32xbf16> to vector<1x1x10x32xbf16>
      tpu.vector_store %arg14[%45, %c0_59, %c0_60, %c0_61], %48 {strides = array<i32>} : memref<10x10x10x32xbf16, #tpu.memory_space<vmem>>, vector<1x1x10x32xbf16>,
      %cst_62 = arith.constant 0.000000e+00 : bf16
      %49 = vector.broadcast %cst_62 : bf16 to vector<1x10x32xbf16>
      %50 = arith.index_cast %43 : i32 to index
      %c9_63 = arith.constant 9 : index
      %c0_64 = arith.constant 0 : index
      %c0_65 = arith.constant 0 : index
      %51 = vector.load %arg14[%50, %c9_63, %c0_64, %c0_65] : memref<10x10x10x32xbf16, #tpu.memory_space<vmem>>, vector<1x1x10x32xbf16>
      %52 = vector.shape_cast %51 : vector<1x1x10x32xbf16> to vector<1x10x32xbf16>
      %53 = vector.shape_cast %49 : vector<1x10x32xbf16> to vector<1x1x10x32xbf16>
      tpu.vector_store %arg14[%50, %c9_63, %c0_64, %c0_65], %53 {strides = array<i32>} : memref<10x10x10x32xbf16, #tpu.memory_space<vmem>>, vector<1x1x10x32xbf16>,
      %cst_66 = arith.constant 0.000000e+00 : bf16
      %54 = vector.broadcast %cst_66 : bf16 to vector<10x1x32xbf16>
      %55 = arith.index_cast %43 : i32 to index
      %c0_67 = arith.constant 0 : index
      %c0_68 = arith.constant 0 : index
      %c0_69 = arith.constant 0 : index
      %56 = vector.load %arg14[%55, %c0_67, %c0_68, %c0_69] : memref<10x10x10x32xbf16, #tpu.memory_space<vmem>>, vector<1x10x1x32xbf16>
      %57 = vector.shape_cast %56 : vector<1x10x1x32xbf16> to vector<10x1x32xbf16>
      %58 = vector.shape_cast %54 : vector<10x1x32xbf16> to vector<1x10x1x32xbf16>
      tpu.vector_store %arg14[%55, %c0_67, %c0_68, %c0_69], %58 {strides = array<i32>} : memref<10x10x10x32xbf16, #tpu.memory_space<vmem>>, vector<1x10x1x32xbf16>,
      %cst_70 = arith.constant 0.000000e+00 : bf16
      %59 = vector.broadcast %cst_70 : bf16 to vector<10x1x32xbf16>
      %60 = arith.index_cast %43 : i32 to index
      %c0_71 = arith.constant 0 : index
      %c9_72 = arith.constant 9 : index
      %c0_73 = arith.constant 0 : index
      %61 = vector.load %arg14[%60, %c0_71, %c9_72, %c0_73] : memref<10x10x10x32xbf16, #tpu.memory_space<vmem>>, vector<1x10x1x32xbf16>
      %62 = vector.shape_cast %61 : vector<1x10x1x32xbf16> to vector<10x1x32xbf16>
      %63 = vector.shape_cast %59 : vector<10x1x32xbf16> to vector<1x10x1x32xbf16>
      tpu.vector_store %arg14[%60, %c0_71, %c9_72, %c0_73], %63 {strides = array<i32>} : memref<10x10x10x32xbf16, #tpu.memory_space<vmem>>, vector<1x10x1x32xbf16>,
    }
    %c8_i32_21 = arith.constant 8 : i32
    %cst_22 = arith.constant 0.000000e+00 : f32
    %18 = vector.broadcast %cst_22 : f32 to vector<1x32xf32>
    %c0_23 = arith.constant 0 : index
    %c0_24 = arith.constant 0 : index
    %19 = vector.load %arg17[%c0_23, %c0_24] : memref<1x32xf32, #tpu.memory_space<vmem>>, vector<1x32xf32>
    tpu.vector_store %arg17[%c0_23, %c0_24], %18 {strides = array<i32>} : memref<1x32xf32, #tpu.memory_space<vmem>>, vector<1x32xf32>,
    %c0_i32_25 = arith.constant 0 : i32
    %c8_i32_26 = arith.constant 8 : i32
    %20 = arith.addi %c0_i32_25, %c8_i32_26 : i32
    %c1_i32_27 = arith.constant 1 : i32
    scf.for %arg18 = %c0_i32_25 to %20 step %c1_i32_27  : i32 {
      %c1_i32_56 = arith.constant 1 : i32
      %42 = arith.muli %arg18, %c1_i32_56 : i32
      %c0_i32_57 = arith.constant 0 : i32
      %43 = arith.addi %c0_i32_57, %42 : i32
      %c0_58 = arith.constant 0 : index
      %44 = arith.index_cast %43 : i32 to index
      %c0_59 = arith.constant 0 : index
      %c0_60 = arith.constant 0 : index
      %c0_61 = arith.constant 0 : index
      %45 = vector.load %arg1[%c0_58, %44, %c0_59, %c0_60, %c0_61] : memref<1x8x8x8x4xf32, #tpu.memory_space<vmem>>, vector<1x1x8x8x4xf32>
      %46 = vector.shape_cast %45 : vector<1x1x8x8x4xf32> to vector<8x8x4xf32>
      %47 = arith.truncf %46 : vector<8x8x4xf32> to vector<8x8x4xbf16>
      %c1_i32_62 = arith.constant 1 : i32
      %48 = arith.addi %43, %c1_i32_62 : i32
      %49 = arith.index_cast %48 : i32 to index
      %c1 = arith.constant 1 : index
      %c1_63 = arith.constant 1 : index
      %c0_64 = arith.constant 0 : index
      %50 = vector.load %arg13[%49, %c1, %c1_63, %c0_64] : memref<10x10x10x4xbf16, #tpu.memory_space<vmem>>, vector<1x8x8x4xbf16>
      %51 = vector.shape_cast %50 : vector<1x8x8x4xbf16> to vector<8x8x4xbf16>
      %52 = vector.shape_cast %47 : vector<8x8x4xbf16> to vector<1x8x8x4xbf16>
      tpu.vector_store %arg13[%49, %c1, %c1_63, %c0_64], %52 {strides = array<i32>} : memref<10x10x10x4xbf16, #tpu.memory_space<vmem>>, vector<1x8x8x4xbf16>,
    }
    %c8_i32_28 = arith.constant 8 : i32
    %c0_i32_29 = arith.constant 0 : i32
    %c8_i32_30 = arith.constant 8 : i32
    %21 = arith.addi %c0_i32_29, %c8_i32_30 : i32
    %c1_i32_31 = arith.constant 1 : i32
    scf.for %arg18 = %c0_i32_29 to %21 step %c1_i32_31  : i32 {
      %c1_i32_56 = arith.constant 1 : i32
      %42 = arith.muli %arg18, %c1_i32_56 : i32
      %c0_i32_57 = arith.constant 0 : i32
      %43 = arith.addi %c0_i32_57, %42 : i32
      %c0_i32_58 = arith.constant 0 : i32
      %44 = arith.addi %43, %c0_i32_58 : i32
      %45 = arith.index_cast %44 : i32 to index
      %c0_59 = arith.constant 0 : index
      %c0_60 = arith.constant 0 : index
      %c0_61 = arith.constant 0 : index
      %46 = vector.load %arg13[%45, %c0_59, %c0_60, %c0_61] : memref<10x10x10x4xbf16, #tpu.memory_space<vmem>>, vector<1x8x8x4xbf16>
      %47 = vector.shape_cast %46 : vector<1x8x8x4xbf16> to vector<8x8x4xbf16>
      %48 = vector.shape_cast %47 : vector<8x8x4xbf16> to vector<64x4xbf16>
      %c0_62 = arith.constant 0 : index
      %c0_63 = arith.constant 0 : index
      %49 = vector.load %arg15[%c0_62, %c0_63] : memref<64x108xbf16, #tpu.memory_space<vmem>>, vector<64x4xbf16>
      tpu.vector_store %arg15[%c0_62, %c0_63], %48 {strides = array<i32>} : memref<64x108xbf16, #tpu.memory_space<vmem>>, vector<64x4xbf16>,
      %c0_i32_64 = arith.constant 0 : i32
      %50 = arith.addi %43, %c0_i32_64 : i32
      %51 = arith.index_cast %50 : i32 to index
      %c0_65 = arith.constant 0 : index
      %c1 = arith.constant 1 : index
      %c0_66 = arith.constant 0 : index
      %52 = vector.load %arg13[%51, %c0_65, %c1, %c0_66] : memref<10x10x10x4xbf16, #tpu.memory_space<vmem>>, vector<1x8x8x4xbf16>
      %53 = vector.shape_cast %52 : vector<1x8x8x4xbf16> to vector<8x8x4xbf16>
      %54 = vector.shape_cast %53 : vector<8x8x4xbf16> to vector<64x4xbf16>
      %c0_67 = arith.constant 0 : index
      %c4 = arith.constant 4 : index
      %55 = vector.load %arg15[%c0_67, %c4] : memref<64x108xbf16, #tpu.memory_space<vmem>>, vector<64x4xbf16>
      tpu.vector_store %arg15[%c0_67, %c4], %54 {strides = array<i32>} : memref<64x108xbf16, #tpu.memory_space<vmem>>, vector<64x4xbf16>,
      %c0_i32_68 = arith.constant 0 : i32
      %56 = arith.addi %43, %c0_i32_68 : i32
      %57 = arith.index_cast %56 : i32 to index
      %c0_69 = arith.constant 0 : index
      %c2 = arith.constant 2 : index
      %c0_70 = arith.constant 0 : index
      %58 = vector.load %arg13[%57, %c0_69, %c2, %c0_70] : memref<10x10x10x4xbf16, #tpu.memory_space<vmem>>, vector<1x8x8x4xbf16>
      %59 = vector.shape_cast %58 : vector<1x8x8x4xbf16> to vector<8x8x4xbf16>
      %60 = vector.shape_cast %59 : vector<8x8x4xbf16> to vector<64x4xbf16>
      %c0_71 = arith.constant 0 : index
      %c8 = arith.constant 8 : index
      %61 = vector.load %arg15[%c0_71, %c8] : memref<64x108xbf16, #tpu.memory_space<vmem>>, vector<64x4xbf16>
      tpu.vector_store %arg15[%c0_71, %c8], %60 {strides = array<i32>} : memref<64x108xbf16, #tpu.memory_space<vmem>>, vector<64x4xbf16>,
      %c0_i32_72 = arith.constant 0 : i32
      %62 = arith.addi %43, %c0_i32_72 : i32
      %63 = arith.index_cast %62 : i32 to index
      %c1_73 = arith.constant 1 : index
      %c0_74 = arith.constant 0 : index
      %c0_75 = arith.constant 0 : index
      %64 = vector.load %arg13[%63, %c1_73, %c0_74, %c0_75] : memref<10x10x10x4xbf16, #tpu.memory_space<vmem>>, vector<1x8x8x4xbf16>
      %65 = vector.shape_cast %64 : vector<1x8x8x4xbf16> to vector<8x8x4xbf16>
      %66 = vector.shape_cast %65 : vector<8x8x4xbf16> to vector<64x4xbf16>
      %c0_76 = arith.constant 0 : index
      %c12 = arith.constant 12 : index
      %67 = vector.load %arg15[%c0_76, %c12] : memref<64x108xbf16, #tpu.memory_space<vmem>>, vector<64x4xbf16>
      tpu.vector_store %arg15[%c0_76, %c12], %66 {strides = array<i32>} : memref<64x108xbf16, #tpu.memory_space<vmem>>, vector<64x4xbf16>,
      %c0_i32_77 = arith.constant 0 : i32
      %68 = arith.addi %43, %c0_i32_77 : i32
      %69 = arith.index_cast %68 : i32 to index
      %c1_78 = arith.constant 1 : index
      %c1_79 = arith.constant 1 : index
      %c0_80 = arith.constant 0 : index
      %70 = vector.load %arg13[%69, %c1_78, %c1_79, %c0_80] : memref<10x10x10x4xbf16, #tpu.memory_space<vmem>>, vector<1x8x8x4xbf16>
      %71 = vector.shape_cast %70 : vector<1x8x8x4xbf16> to vector<8x8x4xbf16>
      %72 = vector.shape_cast %71 : vector<8x8x4xbf16> to vector<64x4xbf16>
      %c0_81 = arith.constant 0 : index
      %c16 = arith.constant 16 : index
      %73 = vector.load %arg15[%c0_81, %c16] : memref<64x108xbf16, #tpu.memory_space<vmem>>, vector<64x4xbf16>
      tpu.vector_store %arg15[%c0_81, %c16], %72 {strides = array<i32>} : memref<64x108xbf16, #tpu.memory_space<vmem>>, vector<64x4xbf16>,
      %c0_i32_82 = arith.constant 0 : i32
      %74 = arith.addi %43, %c0_i32_82 : i32
      %75 = arith.index_cast %74 : i32 to index
      %c1_83 = arith.constant 1 : index
      %c2_84 = arith.constant 2 : index
      %c0_85 = arith.constant 0 : index
      %76 = vector.load %arg13[%75, %c1_83, %c2_84, %c0_85] : memref<10x10x10x4xbf16, #tpu.memory_space<vmem>>, vector<1x8x8x4xbf16>
      %77 = vector.shape_cast %76 : vector<1x8x8x4xbf16> to vector<8x8x4xbf16>
      %78 = vector.shape_cast %77 : vector<8x8x4xbf16> to vector<64x4xbf16>
      %c0_86 = arith.constant 0 : index
      %c20 = arith.constant 20 : index
      %79 = vector.load %arg15[%c0_86, %c20] : memref<64x108xbf16, #tpu.memory_space<vmem>>, vector<64x4xbf16>
      tpu.vector_store %arg15[%c0_86, %c20], %78 {strides = array<i32>} : memref<64x108xbf16, #tpu.memory_space<vmem>>, vector<64x4xbf16>,
      %c0_i32_87 = arith.constant 0 : i32
      %80 = arith.addi %43, %c0_i32_87 : i32
      %81 = arith.index_cast %80 : i32 to index
      %c2_88 = arith.constant 2 : index
      %c0_89 = arith.constant 0 : index
      %c0_90 = arith.constant 0 : index
      %82 = vector.load %arg13[%81, %c2_88, %c0_89, %c0_90] : memref<10x10x10x4xbf16, #tpu.memory_space<vmem>>, vector<1x8x8x4xbf16>
      %83 = vector.shape_cast %82 : vector<1x8x8x4xbf16> to vector<8x8x4xbf16>
      %84 = vector.shape_cast %83 : vector<8x8x4xbf16> to vector<64x4xbf16>
      %c0_91 = arith.constant 0 : index
      %c24 = arith.constant 24 : index
      %85 = vector.load %arg15[%c0_91, %c24] : memref<64x108xbf16, #tpu.memory_space<vmem>>, vector<64x4xbf16>
      tpu.vector_store %arg15[%c0_91, %c24], %84 {strides = array<i32>} : memref<64x108xbf16, #tpu.memory_space<vmem>>, vector<64x4xbf16>,
      %c0_i32_92 = arith.constant 0 : i32
      %86 = arith.addi %43, %c0_i32_92 : i32
      %87 = arith.index_cast %86 : i32 to index
      %c2_93 = arith.constant 2 : index
      %c1_94 = arith.constant 1 : index
      %c0_95 = arith.constant 0 : index
      %88 = vector.load %arg13[%87, %c2_93, %c1_94, %c0_95] : memref<10x10x10x4xbf16, #tpu.memory_space<vmem>>, vector<1x8x8x4xbf16>
      %89 = vector.shape_cast %88 : vector<1x8x8x4xbf16> to vector<8x8x4xbf16>
      %90 = vector.shape_cast %89 : vector<8x8x4xbf16> to vector<64x4xbf16>
      %c0_96 = arith.constant 0 : index
      %c28 = arith.constant 28 : index
      %91 = vector.load %arg15[%c0_96, %c28] : memref<64x108xbf16, #tpu.memory_space<vmem>>, vector<64x4xbf16>
      tpu.vector_store %arg15[%c0_96, %c28], %90 {strides = array<i32>} : memref<64x108xbf16, #tpu.memory_space<vmem>>, vector<64x4xbf16>,
      %c0_i32_97 = arith.constant 0 : i32
      %92 = arith.addi %43, %c0_i32_97 : i32
      %93 = arith.index_cast %92 : i32 to index
      %c2_98 = arith.constant 2 : index
      %c2_99 = arith.constant 2 : index
      %c0_100 = arith.constant 0 : index
      %94 = vector.load %arg13[%93, %c2_98, %c2_99, %c0_100] : memref<10x10x10x4xbf16, #tpu.memory_space<vmem>>, vector<1x8x8x4xbf16>
      %95 = vector.shape_cast %94 : vector<1x8x8x4xbf16> to vector<8x8x4xbf16>
      %96 = vector.shape_cast %95 : vector<8x8x4xbf16> to vector<64x4xbf16>
      %c0_101 = arith.constant 0 : index
      %c32 = arith.constant 32 : index
      %97 = vector.load %arg15[%c0_101, %c32] : memref<64x108xbf16, #tpu.memory_space<vmem>>, vector<64x4xbf16>
      tpu.vector_store %arg15[%c0_101, %c32], %96 {strides = array<i32>} : memref<64x108xbf16, #tpu.memory_space<vmem>>, vector<64x4xbf16>,
      %c1_i32_102 = arith.constant 1 : i32
      %98 = arith.addi %43, %c1_i32_102 : i32
      %99 = arith.index_cast %98 : i32 to index
      %c0_103 = arith.constant 0 : index
      %c0_104 = arith.constant 0 : index
      %c0_105 = arith.constant 0 : index
      %100 = vector.load %arg13[%99, %c0_103, %c0_104, %c0_105] : memref<10x10x10x4xbf16, #tpu.memory_space<vmem>>, vector<1x8x8x4xbf16>
      %101 = vector.shape_cast %100 : vector<1x8x8x4xbf16> to vector<8x8x4xbf16>
      %102 = vector.shape_cast %101 : vector<8x8x4xbf16> to vector<64x4xbf16>
      %c0_106 = arith.constant 0 : index
      %c36 = arith.constant 36 : index
      %103 = vector.load %arg15[%c0_106, %c36] : memref<64x108xbf16, #tpu.memory_space<vmem>>, vector<64x4xbf16>
      tpu.vector_store %arg15[%c0_106, %c36], %102 {strides = array<i32>} : memref<64x108xbf16, #tpu.memory_space<vmem>>, vector<64x4xbf16>,
      %c1_i32_107 = arith.constant 1 : i32
      %104 = arith.addi %43, %c1_i32_107 : i32
      %105 = arith.index_cast %104 : i32 to index
      %c0_108 = arith.constant 0 : index
      %c1_109 = arith.constant 1 : index
      %c0_110 = arith.constant 0 : index
      %106 = vector.load %arg13[%105, %c0_108, %c1_109, %c0_110] : memref<10x10x10x4xbf16, #tpu.memory_space<vmem>>, vector<1x8x8x4xbf16>
      %107 = vector.shape_cast %106 : vector<1x8x8x4xbf16> to vector<8x8x4xbf16>
      %108 = vector.shape_cast %107 : vector<8x8x4xbf16> to vector<64x4xbf16>
      %c0_111 = arith.constant 0 : index
      %c40 = arith.constant 40 : index
      %109 = vector.load %arg15[%c0_111, %c40] : memref<64x108xbf16, #tpu.memory_space<vmem>>, vector<64x4xbf16>
      tpu.vector_store %arg15[%c0_111, %c40], %108 {strides = array<i32>} : memref<64x108xbf16, #tpu.memory_space<vmem>>, vector<64x4xbf16>,
      %c1_i32_112 = arith.constant 1 : i32
      %110 = arith.addi %43, %c1_i32_112 : i32
      %111 = arith.index_cast %110 : i32 to index
      %c0_113 = arith.constant 0 : index
      %c2_114 = arith.constant 2 : index
      %c0_115 = arith.constant 0 : index
      %112 = vector.load %arg13[%111, %c0_113, %c2_114, %c0_115] : memref<10x10x10x4xbf16, #tpu.memory_space<vmem>>, vector<1x8x8x4xbf16>
      %113 = vector.shape_cast %112 : vector<1x8x8x4xbf16> to vector<8x8x4xbf16>
      %114 = vector.shape_cast %113 : vector<8x8x4xbf16> to vector<64x4xbf16>
      %c0_116 = arith.constant 0 : index
      %c44 = arith.constant 44 : index
      %115 = vector.load %arg15[%c0_116, %c44] : memref<64x108xbf16, #tpu.memory_space<vmem>>, vector<64x4xbf16>
      tpu.vector_store %arg15[%c0_116, %c44], %114 {strides = array<i32>} : memref<64x108xbf16, #tpu.memory_space<vmem>>, vector<64x4xbf16>,
      %c1_i32_117 = arith.constant 1 : i32
      %116 = arith.addi %43, %c1_i32_117 : i32
      %117 = arith.index_cast %116 : i32 to index
      %c1_118 = arith.constant 1 : index
      %c0_119 = arith.constant 0 : index
      %c0_120 = arith.constant 0 : index
      %118 = vector.load %arg13[%117, %c1_118, %c0_119, %c0_120] : memref<10x10x10x4xbf16, #tpu.memory_space<vmem>>, vector<1x8x8x4xbf16>
      %119 = vector.shape_cast %118 : vector<1x8x8x4xbf16> to vector<8x8x4xbf16>
      %120 = vector.shape_cast %119 : vector<8x8x4xbf16> to vector<64x4xbf16>
      %c0_121 = arith.constant 0 : index
      %c48 = arith.constant 48 : index
      %121 = vector.load %arg15[%c0_121, %c48] : memref<64x108xbf16, #tpu.memory_space<vmem>>, vector<64x4xbf16>
      tpu.vector_store %arg15[%c0_121, %c48], %120 {strides = array<i32>} : memref<64x108xbf16, #tpu.memory_space<vmem>>, vector<64x4xbf16>,
      %c1_i32_122 = arith.constant 1 : i32
      %122 = arith.addi %43, %c1_i32_122 : i32
      %123 = arith.index_cast %122 : i32 to index
      %c1_123 = arith.constant 1 : index
      %c1_124 = arith.constant 1 : index
      %c0_125 = arith.constant 0 : index
      %124 = vector.load %arg13[%123, %c1_123, %c1_124, %c0_125] : memref<10x10x10x4xbf16, #tpu.memory_space<vmem>>, vector<1x8x8x4xbf16>
      %125 = vector.shape_cast %124 : vector<1x8x8x4xbf16> to vector<8x8x4xbf16>
      %126 = vector.shape_cast %125 : vector<8x8x4xbf16> to vector<64x4xbf16>
      %c0_126 = arith.constant 0 : index
      %c52 = arith.constant 52 : index
      %127 = vector.load %arg15[%c0_126, %c52] : memref<64x108xbf16, #tpu.memory_space<vmem>>, vector<64x4xbf16>
      tpu.vector_store %arg15[%c0_126, %c52], %126 {strides = array<i32>} : memref<64x108xbf16, #tpu.memory_space<vmem>>, vector<64x4xbf16>,
      %c1_i32_127 = arith.constant 1 : i32
      %128 = arith.addi %43, %c1_i32_127 : i32
      %129 = arith.index_cast %128 : i32 to index
      %c1_128 = arith.constant 1 : index
      %c2_129 = arith.constant 2 : index
      %c0_130 = arith.constant 0 : index
      %130 = vector.load %arg13[%129, %c1_128, %c2_129, %c0_130] : memref<10x10x10x4xbf16, #tpu.memory_space<vmem>>, vector<1x8x8x4xbf16>
      %131 = vector.shape_cast %130 : vector<1x8x8x4xbf16> to vector<8x8x4xbf16>
      %132 = vector.shape_cast %131 : vector<8x8x4xbf16> to vector<64x4xbf16>
      %c0_131 = arith.constant 0 : index
      %c56 = arith.constant 56 : index
      %133 = vector.load %arg15[%c0_131, %c56] : memref<64x108xbf16, #tpu.memory_space<vmem>>, vector<64x4xbf16>
      tpu.vector_store %arg15[%c0_131, %c56], %132 {strides = array<i32>} : memref<64x108xbf16, #tpu.memory_space<vmem>>, vector<64x4xbf16>,
      %c1_i32_132 = arith.constant 1 : i32
      %134 = arith.addi %43, %c1_i32_132 : i32
      %135 = arith.index_cast %134 : i32 to index
      %c2_133 = arith.constant 2 : index
      %c0_134 = arith.constant 0 : index
      %c0_135 = arith.constant 0 : index
      %136 = vector.load %arg13[%135, %c2_133, %c0_134, %c0_135] : memref<10x10x10x4xbf16, #tpu.memory_space<vmem>>, vector<1x8x8x4xbf16>
      %137 = vector.shape_cast %136 : vector<1x8x8x4xbf16> to vector<8x8x4xbf16>
      %138 = vector.shape_cast %137 : vector<8x8x4xbf16> to vector<64x4xbf16>
      %c0_136 = arith.constant 0 : index
      %c60 = arith.constant 60 : index
      %139 = vector.load %arg15[%c0_136, %c60] : memref<64x108xbf16, #tpu.memory_space<vmem>>, vector<64x4xbf16>
      tpu.vector_store %arg15[%c0_136, %c60], %138 {strides = array<i32>} : memref<64x108xbf16, #tpu.memory_space<vmem>>, vector<64x4xbf16>,
      %c1_i32_137 = arith.constant 1 : i32
      %140 = arith.addi %43, %c1_i32_137 : i32
      %141 = arith.index_cast %140 : i32 to index
      %c2_138 = arith.constant 2 : index
      %c1_139 = arith.constant 1 : index
      %c0_140 = arith.constant 0 : index
      %142 = vector.load %arg13[%141, %c2_138, %c1_139, %c0_140] : memref<10x10x10x4xbf16, #tpu.memory_space<vmem>>, vector<1x8x8x4xbf16>
      %143 = vector.shape_cast %142 : vector<1x8x8x4xbf16> to vector<8x8x4xbf16>
      %144 = vector.shape_cast %143 : vector<8x8x4xbf16> to vector<64x4xbf16>
      %c0_141 = arith.constant 0 : index
      %c64 = arith.constant 64 : index
      %145 = vector.load %arg15[%c0_141, %c64] : memref<64x108xbf16, #tpu.memory_space<vmem>>, vector<64x4xbf16>
      tpu.vector_store %arg15[%c0_141, %c64], %144 {strides = array<i32>} : memref<64x108xbf16, #tpu.memory_space<vmem>>, vector<64x4xbf16>,
      %c1_i32_142 = arith.constant 1 : i32
      %146 = arith.addi %43, %c1_i32_142 : i32
      %147 = arith.index_cast %146 : i32 to index
      %c2_143 = arith.constant 2 : index
      %c2_144 = arith.constant 2 : index
      %c0_145 = arith.constant 0 : index
      %148 = vector.load %arg13[%147, %c2_143, %c2_144, %c0_145] : memref<10x10x10x4xbf16, #tpu.memory_space<vmem>>, vector<1x8x8x4xbf16>
      %149 = vector.shape_cast %148 : vector<1x8x8x4xbf16> to vector<8x8x4xbf16>
      %150 = vector.shape_cast %149 : vector<8x8x4xbf16> to vector<64x4xbf16>
      %c0_146 = arith.constant 0 : index
      %c68 = arith.constant 68 : index
      %151 = vector.load %arg15[%c0_146, %c68] : memref<64x108xbf16, #tpu.memory_space<vmem>>, vector<64x4xbf16>
      tpu.vector_store %arg15[%c0_146, %c68], %150 {strides = array<i32>} : memref<64x108xbf16, #tpu.memory_space<vmem>>, vector<64x4xbf16>,
      %c2_i32 = arith.constant 2 : i32
      %152 = arith.addi %43, %c2_i32 : i32
      %153 = arith.index_cast %152 : i32 to index
      %c0_147 = arith.constant 0 : index
      %c0_148 = arith.constant 0 : index
      %c0_149 = arith.constant 0 : index
      %154 = vector.load %arg13[%153, %c0_147, %c0_148, %c0_149] : memref<10x10x10x4xbf16, #tpu.memory_space<vmem>>, vector<1x8x8x4xbf16>
      %155 = vector.shape_cast %154 : vector<1x8x8x4xbf16> to vector<8x8x4xbf16>
      %156 = vector.shape_cast %155 : vector<8x8x4xbf16> to vector<64x4xbf16>
      %c0_150 = arith.constant 0 : index
      %c72 = arith.constant 72 : index
      %157 = vector.load %arg15[%c0_150, %c72] : memref<64x108xbf16, #tpu.memory_space<vmem>>, vector<64x4xbf16>
      tpu.vector_store %arg15[%c0_150, %c72], %156 {strides = array<i32>} : memref<64x108xbf16, #tpu.memory_space<vmem>>, vector<64x4xbf16>,
      %c2_i32_151 = arith.constant 2 : i32
      %158 = arith.addi %43, %c2_i32_151 : i32
      %159 = arith.index_cast %158 : i32 to index
      %c0_152 = arith.constant 0 : index
      %c1_153 = arith.constant 1 : index
      %c0_154 = arith.constant 0 : index
      %160 = vector.load %arg13[%159, %c0_152, %c1_153, %c0_154] : memref<10x10x10x4xbf16, #tpu.memory_space<vmem>>, vector<1x8x8x4xbf16>
      %161 = vector.shape_cast %160 : vector<1x8x8x4xbf16> to vector<8x8x4xbf16>
      %162 = vector.shape_cast %161 : vector<8x8x4xbf16> to vector<64x4xbf16>
      %c0_155 = arith.constant 0 : index
      %c76 = arith.constant 76 : index
      %163 = vector.load %arg15[%c0_155, %c76] : memref<64x108xbf16, #tpu.memory_space<vmem>>, vector<64x4xbf16>
      tpu.vector_store %arg15[%c0_155, %c76], %162 {strides = array<i32>} : memref<64x108xbf16, #tpu.memory_space<vmem>>, vector<64x4xbf16>,
      %c2_i32_156 = arith.constant 2 : i32
      %164 = arith.addi %43, %c2_i32_156 : i32
      %165 = arith.index_cast %164 : i32 to index
      %c0_157 = arith.constant 0 : index
      %c2_158 = arith.constant 2 : index
      %c0_159 = arith.constant 0 : index
      %166 = vector.load %arg13[%165, %c0_157, %c2_158, %c0_159] : memref<10x10x10x4xbf16, #tpu.memory_space<vmem>>, vector<1x8x8x4xbf16>
      %167 = vector.shape_cast %166 : vector<1x8x8x4xbf16> to vector<8x8x4xbf16>
      %168 = vector.shape_cast %167 : vector<8x8x4xbf16> to vector<64x4xbf16>
      %c0_160 = arith.constant 0 : index
      %c80 = arith.constant 80 : index
      %169 = vector.load %arg15[%c0_160, %c80] : memref<64x108xbf16, #tpu.memory_space<vmem>>, vector<64x4xbf16>
      tpu.vector_store %arg15[%c0_160, %c80], %168 {strides = array<i32>} : memref<64x108xbf16, #tpu.memory_space<vmem>>, vector<64x4xbf16>,
      %c2_i32_161 = arith.constant 2 : i32
      %170 = arith.addi %43, %c2_i32_161 : i32
      %171 = arith.index_cast %170 : i32 to index
      %c1_162 = arith.constant 1 : index
      %c0_163 = arith.constant 0 : index
      %c0_164 = arith.constant 0 : index
      %172 = vector.load %arg13[%171, %c1_162, %c0_163, %c0_164] : memref<10x10x10x4xbf16, #tpu.memory_space<vmem>>, vector<1x8x8x4xbf16>
      %173 = vector.shape_cast %172 : vector<1x8x8x4xbf16> to vector<8x8x4xbf16>
      %174 = vector.shape_cast %173 : vector<8x8x4xbf16> to vector<64x4xbf16>
      %c0_165 = arith.constant 0 : index
      %c84 = arith.constant 84 : index
      %175 = vector.load %arg15[%c0_165, %c84] : memref<64x108xbf16, #tpu.memory_space<vmem>>, vector<64x4xbf16>
      tpu.vector_store %arg15[%c0_165, %c84], %174 {strides = array<i32>} : memref<64x108xbf16, #tpu.memory_space<vmem>>, vector<64x4xbf16>,
      %c2_i32_166 = arith.constant 2 : i32
      %176 = arith.addi %43, %c2_i32_166 : i32
      %177 = arith.index_cast %176 : i32 to index
      %c1_167 = arith.constant 1 : index
      %c1_168 = arith.constant 1 : index
      %c0_169 = arith.constant 0 : index
      %178 = vector.load %arg13[%177, %c1_167, %c1_168, %c0_169] : memref<10x10x10x4xbf16, #tpu.memory_space<vmem>>, vector<1x8x8x4xbf16>
      %179 = vector.shape_cast %178 : vector<1x8x8x4xbf16> to vector<8x8x4xbf16>
      %180 = vector.shape_cast %179 : vector<8x8x4xbf16> to vector<64x4xbf16>
      %c0_170 = arith.constant 0 : index
      %c88 = arith.constant 88 : index
      %181 = vector.load %arg15[%c0_170, %c88] : memref<64x108xbf16, #tpu.memory_space<vmem>>, vector<64x4xbf16>
      tpu.vector_store %arg15[%c0_170, %c88], %180 {strides = array<i32>} : memref<64x108xbf16, #tpu.memory_space<vmem>>, vector<64x4xbf16>,
      %c2_i32_171 = arith.constant 2 : i32
      %182 = arith.addi %43, %c2_i32_171 : i32
      %183 = arith.index_cast %182 : i32 to index
      %c1_172 = arith.constant 1 : index
      %c2_173 = arith.constant 2 : index
      %c0_174 = arith.constant 0 : index
      %184 = vector.load %arg13[%183, %c1_172, %c2_173, %c0_174] : memref<10x10x10x4xbf16, #tpu.memory_space<vmem>>, vector<1x8x8x4xbf16>
      %185 = vector.shape_cast %184 : vector<1x8x8x4xbf16> to vector<8x8x4xbf16>
      %186 = vector.shape_cast %185 : vector<8x8x4xbf16> to vector<64x4xbf16>
      %c0_175 = arith.constant 0 : index
      %c92 = arith.constant 92 : index
      %187 = vector.load %arg15[%c0_175, %c92] : memref<64x108xbf16, #tpu.memory_space<vmem>>, vector<64x4xbf16>
      tpu.vector_store %arg15[%c0_175, %c92], %186 {strides = array<i32>} : memref<64x108xbf16, #tpu.memory_space<vmem>>, vector<64x4xbf16>,
      %c2_i32_176 = arith.constant 2 : i32
      %188 = arith.addi %43, %c2_i32_176 : i32
      %189 = arith.index_cast %188 : i32 to index
      %c2_177 = arith.constant 2 : index
      %c0_178 = arith.constant 0 : index
      %c0_179 = arith.constant 0 : index
      %190 = vector.load %arg13[%189, %c2_177, %c0_178, %c0_179] : memref<10x10x10x4xbf16, #tpu.memory_space<vmem>>, vector<1x8x8x4xbf16>
      %191 = vector.shape_cast %190 : vector<1x8x8x4xbf16> to vector<8x8x4xbf16>
      %192 = vector.shape_cast %191 : vector<8x8x4xbf16> to vector<64x4xbf16>
      %c0_180 = arith.constant 0 : index
      %c96 = arith.constant 96 : index
      %193 = vector.load %arg15[%c0_180, %c96] : memref<64x108xbf16, #tpu.memory_space<vmem>>, vector<64x4xbf16>
      tpu.vector_store %arg15[%c0_180, %c96], %192 {strides = array<i32>} : memref<64x108xbf16, #tpu.memory_space<vmem>>, vector<64x4xbf16>,
      %c2_i32_181 = arith.constant 2 : i32
      %194 = arith.addi %43, %c2_i32_181 : i32
      %195 = arith.index_cast %194 : i32 to index
      %c2_182 = arith.constant 2 : index
      %c1_183 = arith.constant 1 : index
      %c0_184 = arith.constant 0 : index
      %196 = vector.load %arg13[%195, %c2_182, %c1_183, %c0_184] : memref<10x10x10x4xbf16, #tpu.memory_space<vmem>>, vector<1x8x8x4xbf16>
      %197 = vector.shape_cast %196 : vector<1x8x8x4xbf16> to vector<8x8x4xbf16>
      %198 = vector.shape_cast %197 : vector<8x8x4xbf16> to vector<64x4xbf16>
      %c0_185 = arith.constant 0 : index
      %c100 = arith.constant 100 : index
      %199 = vector.load %arg15[%c0_185, %c100] : memref<64x108xbf16, #tpu.memory_space<vmem>>, vector<64x4xbf16>
      tpu.vector_store %arg15[%c0_185, %c100], %198 {strides = array<i32>} : memref<64x108xbf16, #tpu.memory_space<vmem>>, vector<64x4xbf16>,
      %c2_i32_186 = arith.constant 2 : i32
      %200 = arith.addi %43, %c2_i32_186 : i32
      %201 = arith.index_cast %200 : i32 to index
      %c2_187 = arith.constant 2 : index
      %c2_188 = arith.constant 2 : index
      %c0_189 = arith.constant 0 : index
      %202 = vector.load %arg13[%201, %c2_187, %c2_188, %c0_189] : memref<10x10x10x4xbf16, #tpu.memory_space<vmem>>, vector<1x8x8x4xbf16>
      %203 = vector.shape_cast %202 : vector<1x8x8x4xbf16> to vector<8x8x4xbf16>
      %204 = vector.shape_cast %203 : vector<8x8x4xbf16> to vector<64x4xbf16>
      %c0_190 = arith.constant 0 : index
      %c104 = arith.constant 104 : index
      %205 = vector.load %arg15[%c0_190, %c104] : memref<64x108xbf16, #tpu.memory_space<vmem>>, vector<64x4xbf16>
      tpu.vector_store %arg15[%c0_190, %c104], %204 {strides = array<i32>} : memref<64x108xbf16, #tpu.memory_space<vmem>>, vector<64x4xbf16>,
      %c0_191 = arith.constant 0 : index
      %c0_192 = arith.constant 0 : index
      %206 = vector.load %arg15[%c0_191, %c0_192] : memref<64x108xbf16, #tpu.memory_space<vmem>>, vector<64x108xbf16>
      %c0_193 = arith.constant 0 : index
      %c0_194 = arith.constant 0 : index
      %207 = vector.load %arg2[%c0_193, %c0_194] : memref<108x32xbf16, #tpu.memory_space<vmem>>, vector<108x32xbf16>
      %cst_195 = arith.constant dense<0.000000e+00> : vector<64x32xf32>
      %208 = tpu.matmul %206, %207, %cst_195 {dimension_numbers = #tpu.dot_dimension_numbers<[1], [0], [0], [1], [0, 0, 1, 1], [], []>} : vector<64x108xbf16>, vector<108x32xbf16>, vector<64x32xf32> -> vector<64x32xf32>
      %c0_196 = arith.constant 0 : index
      %c0_197 = arith.constant 0 : index
      %209 = vector.load %arg3[%c0_196, %c0_197] : memref<1x32xf32, #tpu.memory_space<vmem>>, vector<1x32xf32>
      %210 = vector.broadcast %209 : vector<1x32xf32> to vector<64x32xf32>
      %211 = arith.addf %208, %210 : vector<64x32xf32>
      %cst_198 = arith.constant 0.000000e+00 : f32
      %212 = vector.broadcast %cst_198 : f32 to vector<64x32xf32>
      %213 = arith.cmpf ogt, %211, %212 : vector<64x32xf32>
      %cst_199 = arith.constant 0.00999999977 : f32
      %214 = vector.broadcast %cst_199 : f32 to vector<64x32xf32>
      %215 = arith.mulf %214, %211 : vector<64x32xf32>
      %216 = arith.select %213, %211, %215 : vector<64x32xi1>, vector<64x32xf32>
      %217 = vector.shape_cast %216 : vector<64x32xf32> to vector<8x8x32xf32>
      %218 = arith.truncf %217 : vector<8x8x32xf32> to vector<8x8x32xbf16>
      %c1_i32_200 = arith.constant 1 : i32
      %219 = arith.addi %43, %c1_i32_200 : i32
      %220 = arith.index_cast %219 : i32 to index
      %c1_201 = arith.constant 1 : index
      %c1_202 = arith.constant 1 : index
      %c0_203 = arith.constant 0 : index
      %221 = vector.load %arg14[%220, %c1_201, %c1_202, %c0_203] : memref<10x10x10x32xbf16, #tpu.memory_space<vmem>>, vector<1x8x8x32xbf16>
      %222 = vector.shape_cast %221 : vector<1x8x8x32xbf16> to vector<8x8x32xbf16>
      %223 = vector.shape_cast %218 : vector<8x8x32xbf16> to vector<1x8x8x32xbf16>
      tpu.vector_store %arg14[%220, %c1_201, %c1_202, %c0_203], %223 {strides = array<i32>} : memref<10x10x10x32xbf16, #tpu.memory_space<vmem>>, vector<1x8x8x32xbf16>,
    }
    %c8_i32_32 = arith.constant 8 : i32
    %c0_i32_33 = arith.constant 0 : i32
    %c8_i32_34 = arith.constant 8 : i32
    %22 = arith.addi %c0_i32_33, %c8_i32_34 : i32
    %c1_i32_35 = arith.constant 1 : i32
    scf.for %arg18 = %c0_i32_33 to %22 step %c1_i32_35  : i32 {
      %c1_i32_56 = arith.constant 1 : i32
      %42 = arith.muli %arg18, %c1_i32_56 : i32
      %c0_i32_57 = arith.constant 0 : i32
      %43 = arith.addi %c0_i32_57, %42 : i32
      %c0_i32_58 = arith.constant 0 : i32
      %44 = arith.addi %43, %c0_i32_58 : i32
      %45 = arith.index_cast %44 : i32 to index
      %c0_59 = arith.constant 0 : index
      %c0_60 = arith.constant 0 : index
      %c0_61 = arith.constant 0 : index
      %46 = vector.load %arg14[%45, %c0_59, %c0_60, %c0_61] : memref<10x10x10x32xbf16, #tpu.memory_space<vmem>>, vector<1x8x8x32xbf16>
      %47 = vector.shape_cast %46 : vector<1x8x8x32xbf16> to vector<8x8x32xbf16>
      %48 = vector.shape_cast %47 : vector<8x8x32xbf16> to vector<64x32xbf16>
      %c0_62 = arith.constant 0 : index
      %c0_63 = arith.constant 0 : index
      %49 = vector.load %arg16[%c0_62, %c0_63] : memref<64x864xbf16, #tpu.memory_space<vmem>>, vector<64x32xbf16>
      tpu.vector_store %arg16[%c0_62, %c0_63], %48 {strides = array<i32>} : memref<64x864xbf16, #tpu.memory_space<vmem>>, vector<64x32xbf16>,
      %c0_i32_64 = arith.constant 0 : i32
      %50 = arith.addi %43, %c0_i32_64 : i32
      %51 = arith.index_cast %50 : i32 to index
      %c0_65 = arith.constant 0 : index
      %c1 = arith.constant 1 : index
      %c0_66 = arith.constant 0 : index
      %52 = vector.load %arg14[%51, %c0_65, %c1, %c0_66] : memref<10x10x10x32xbf16, #tpu.memory_space<vmem>>, vector<1x8x8x32xbf16>
      %53 = vector.shape_cast %52 : vector<1x8x8x32xbf16> to vector<8x8x32xbf16>
      %54 = vector.shape_cast %53 : vector<8x8x32xbf16> to vector<64x32xbf16>
      %c0_67 = arith.constant 0 : index
      %c32 = arith.constant 32 : index
      %55 = vector.load %arg16[%c0_67, %c32] : memref<64x864xbf16, #tpu.memory_space<vmem>>, vector<64x32xbf16>
      tpu.vector_store %arg16[%c0_67, %c32], %54 {strides = array<i32>} : memref<64x864xbf16, #tpu.memory_space<vmem>>, vector<64x32xbf16>,
      %c0_i32_68 = arith.constant 0 : i32
      %56 = arith.addi %43, %c0_i32_68 : i32
      %57 = arith.index_cast %56 : i32 to index
      %c0_69 = arith.constant 0 : index
      %c2 = arith.constant 2 : index
      %c0_70 = arith.constant 0 : index
      %58 = vector.load %arg14[%57, %c0_69, %c2, %c0_70] : memref<10x10x10x32xbf16, #tpu.memory_space<vmem>>, vector<1x8x8x32xbf16>
      %59 = vector.shape_cast %58 : vector<1x8x8x32xbf16> to vector<8x8x32xbf16>
      %60 = vector.shape_cast %59 : vector<8x8x32xbf16> to vector<64x32xbf16>
      %c0_71 = arith.constant 0 : index
      %c64 = arith.constant 64 : index
      %61 = vector.load %arg16[%c0_71, %c64] : memref<64x864xbf16, #tpu.memory_space<vmem>>, vector<64x32xbf16>
      tpu.vector_store %arg16[%c0_71, %c64], %60 {strides = array<i32>} : memref<64x864xbf16, #tpu.memory_space<vmem>>, vector<64x32xbf16>,
      %c0_i32_72 = arith.constant 0 : i32
      %62 = arith.addi %43, %c0_i32_72 : i32
      %63 = arith.index_cast %62 : i32 to index
      %c1_73 = arith.constant 1 : index
      %c0_74 = arith.constant 0 : index
      %c0_75 = arith.constant 0 : index
      %64 = vector.load %arg14[%63, %c1_73, %c0_74, %c0_75] : memref<10x10x10x32xbf16, #tpu.memory_space<vmem>>, vector<1x8x8x32xbf16>
      %65 = vector.shape_cast %64 : vector<1x8x8x32xbf16> to vector<8x8x32xbf16>
      %66 = vector.shape_cast %65 : vector<8x8x32xbf16> to vector<64x32xbf16>
      %c0_76 = arith.constant 0 : index
      %c96 = arith.constant 96 : index
      %67 = vector.load %arg16[%c0_76, %c96] : memref<64x864xbf16, #tpu.memory_space<vmem>>, vector<64x32xbf16>
      tpu.vector_store %arg16[%c0_76, %c96], %66 {strides = array<i32>} : memref<64x864xbf16, #tpu.memory_space<vmem>>, vector<64x32xbf16>,
      %c0_i32_77 = arith.constant 0 : i32
      %68 = arith.addi %43, %c0_i32_77 : i32
      %69 = arith.index_cast %68 : i32 to index
      %c1_78 = arith.constant 1 : index
      %c1_79 = arith.constant 1 : index
      %c0_80 = arith.constant 0 : index
      %70 = vector.load %arg14[%69, %c1_78, %c1_79, %c0_80] : memref<10x10x10x32xbf16, #tpu.memory_space<vmem>>, vector<1x8x8x32xbf16>
      %71 = vector.shape_cast %70 : vector<1x8x8x32xbf16> to vector<8x8x32xbf16>
      %72 = vector.shape_cast %71 : vector<8x8x32xbf16> to vector<64x32xbf16>
      %c0_81 = arith.constant 0 : index
      %c128 = arith.constant 128 : index
      %73 = vector.load %arg16[%c0_81, %c128] : memref<64x864xbf16, #tpu.memory_space<vmem>>, vector<64x32xbf16>
      tpu.vector_store %arg16[%c0_81, %c128], %72 {strides = array<i32>} : memref<64x864xbf16, #tpu.memory_space<vmem>>, vector<64x32xbf16>,
      %c0_i32_82 = arith.constant 0 : i32
      %74 = arith.addi %43, %c0_i32_82 : i32
      %75 = arith.index_cast %74 : i32 to index
      %c1_83 = arith.constant 1 : index
      %c2_84 = arith.constant 2 : index
      %c0_85 = arith.constant 0 : index
      %76 = vector.load %arg14[%75, %c1_83, %c2_84, %c0_85] : memref<10x10x10x32xbf16, #tpu.memory_space<vmem>>, vector<1x8x8x32xbf16>
      %77 = vector.shape_cast %76 : vector<1x8x8x32xbf16> to vector<8x8x32xbf16>
      %78 = vector.shape_cast %77 : vector<8x8x32xbf16> to vector<64x32xbf16>
      %c0_86 = arith.constant 0 : index
      %c160 = arith.constant 160 : index
      %79 = vector.load %arg16[%c0_86, %c160] : memref<64x864xbf16, #tpu.memory_space<vmem>>, vector<64x32xbf16>
      tpu.vector_store %arg16[%c0_86, %c160], %78 {strides = array<i32>} : memref<64x864xbf16, #tpu.memory_space<vmem>>, vector<64x32xbf16>,
      %c0_i32_87 = arith.constant 0 : i32
      %80 = arith.addi %43, %c0_i32_87 : i32
      %81 = arith.index_cast %80 : i32 to index
      %c2_88 = arith.constant 2 : index
      %c0_89 = arith.constant 0 : index
      %c0_90 = arith.constant 0 : index
      %82 = vector.load %arg14[%81, %c2_88, %c0_89, %c0_90] : memref<10x10x10x32xbf16, #tpu.memory_space<vmem>>, vector<1x8x8x32xbf16>
      %83 = vector.shape_cast %82 : vector<1x8x8x32xbf16> to vector<8x8x32xbf16>
      %84 = vector.shape_cast %83 : vector<8x8x32xbf16> to vector<64x32xbf16>
      %c0_91 = arith.constant 0 : index
      %c192 = arith.constant 192 : index
      %85 = vector.load %arg16[%c0_91, %c192] : memref<64x864xbf16, #tpu.memory_space<vmem>>, vector<64x32xbf16>
      tpu.vector_store %arg16[%c0_91, %c192], %84 {strides = array<i32>} : memref<64x864xbf16, #tpu.memory_space<vmem>>, vector<64x32xbf16>,
      %c0_i32_92 = arith.constant 0 : i32
      %86 = arith.addi %43, %c0_i32_92 : i32
      %87 = arith.index_cast %86 : i32 to index
      %c2_93 = arith.constant 2 : index
      %c1_94 = arith.constant 1 : index
      %c0_95 = arith.constant 0 : index
      %88 = vector.load %arg14[%87, %c2_93, %c1_94, %c0_95] : memref<10x10x10x32xbf16, #tpu.memory_space<vmem>>, vector<1x8x8x32xbf16>
      %89 = vector.shape_cast %88 : vector<1x8x8x32xbf16> to vector<8x8x32xbf16>
      %90 = vector.shape_cast %89 : vector<8x8x32xbf16> to vector<64x32xbf16>
      %c0_96 = arith.constant 0 : index
      %c224 = arith.constant 224 : index
      %91 = vector.load %arg16[%c0_96, %c224] : memref<64x864xbf16, #tpu.memory_space<vmem>>, vector<64x32xbf16>
      tpu.vector_store %arg16[%c0_96, %c224], %90 {strides = array<i32>} : memref<64x864xbf16, #tpu.memory_space<vmem>>, vector<64x32xbf16>,
      %c0_i32_97 = arith.constant 0 : i32
      %92 = arith.addi %43, %c0_i32_97 : i32
      %93 = arith.index_cast %92 : i32 to index
      %c2_98 = arith.constant 2 : index
      %c2_99 = arith.constant 2 : index
      %c0_100 = arith.constant 0 : index
      %94 = vector.load %arg14[%93, %c2_98, %c2_99, %c0_100] : memref<10x10x10x32xbf16, #tpu.memory_space<vmem>>, vector<1x8x8x32xbf16>
      %95 = vector.shape_cast %94 : vector<1x8x8x32xbf16> to vector<8x8x32xbf16>
      %96 = vector.shape_cast %95 : vector<8x8x32xbf16> to vector<64x32xbf16>
      %c0_101 = arith.constant 0 : index
      %c256 = arith.constant 256 : index
      %97 = vector.load %arg16[%c0_101, %c256] : memref<64x864xbf16, #tpu.memory_space<vmem>>, vector<64x32xbf16>
      tpu.vector_store %arg16[%c0_101, %c256], %96 {strides = array<i32>} : memref<64x864xbf16, #tpu.memory_space<vmem>>, vector<64x32xbf16>,
      %c1_i32_102 = arith.constant 1 : i32
      %98 = arith.addi %43, %c1_i32_102 : i32
      %99 = arith.index_cast %98 : i32 to index
      %c0_103 = arith.constant 0 : index
      %c0_104 = arith.constant 0 : index
      %c0_105 = arith.constant 0 : index
      %100 = vector.load %arg14[%99, %c0_103, %c0_104, %c0_105] : memref<10x10x10x32xbf16, #tpu.memory_space<vmem>>, vector<1x8x8x32xbf16>
      %101 = vector.shape_cast %100 : vector<1x8x8x32xbf16> to vector<8x8x32xbf16>
      %102 = vector.shape_cast %101 : vector<8x8x32xbf16> to vector<64x32xbf16>
      %c0_106 = arith.constant 0 : index
      %c288 = arith.constant 288 : index
      %103 = vector.load %arg16[%c0_106, %c288] : memref<64x864xbf16, #tpu.memory_space<vmem>>, vector<64x32xbf16>
      tpu.vector_store %arg16[%c0_106, %c288], %102 {strides = array<i32>} : memref<64x864xbf16, #tpu.memory_space<vmem>>, vector<64x32xbf16>,
      %c1_i32_107 = arith.constant 1 : i32
      %104 = arith.addi %43, %c1_i32_107 : i32
      %105 = arith.index_cast %104 : i32 to index
      %c0_108 = arith.constant 0 : index
      %c1_109 = arith.constant 1 : index
      %c0_110 = arith.constant 0 : index
      %106 = vector.load %arg14[%105, %c0_108, %c1_109, %c0_110] : memref<10x10x10x32xbf16, #tpu.memory_space<vmem>>, vector<1x8x8x32xbf16>
      %107 = vector.shape_cast %106 : vector<1x8x8x32xbf16> to vector<8x8x32xbf16>
      %108 = vector.shape_cast %107 : vector<8x8x32xbf16> to vector<64x32xbf16>
      %c0_111 = arith.constant 0 : index
      %c320 = arith.constant 320 : index
      %109 = vector.load %arg16[%c0_111, %c320] : memref<64x864xbf16, #tpu.memory_space<vmem>>, vector<64x32xbf16>
      tpu.vector_store %arg16[%c0_111, %c320], %108 {strides = array<i32>} : memref<64x864xbf16, #tpu.memory_space<vmem>>, vector<64x32xbf16>,
      %c1_i32_112 = arith.constant 1 : i32
      %110 = arith.addi %43, %c1_i32_112 : i32
      %111 = arith.index_cast %110 : i32 to index
      %c0_113 = arith.constant 0 : index
      %c2_114 = arith.constant 2 : index
      %c0_115 = arith.constant 0 : index
      %112 = vector.load %arg14[%111, %c0_113, %c2_114, %c0_115] : memref<10x10x10x32xbf16, #tpu.memory_space<vmem>>, vector<1x8x8x32xbf16>
      %113 = vector.shape_cast %112 : vector<1x8x8x32xbf16> to vector<8x8x32xbf16>
      %114 = vector.shape_cast %113 : vector<8x8x32xbf16> to vector<64x32xbf16>
      %c0_116 = arith.constant 0 : index
      %c352 = arith.constant 352 : index
      %115 = vector.load %arg16[%c0_116, %c352] : memref<64x864xbf16, #tpu.memory_space<vmem>>, vector<64x32xbf16>
      tpu.vector_store %arg16[%c0_116, %c352], %114 {strides = array<i32>} : memref<64x864xbf16, #tpu.memory_space<vmem>>, vector<64x32xbf16>,
      %c1_i32_117 = arith.constant 1 : i32
      %116 = arith.addi %43, %c1_i32_117 : i32
      %117 = arith.index_cast %116 : i32 to index
      %c1_118 = arith.constant 1 : index
      %c0_119 = arith.constant 0 : index
      %c0_120 = arith.constant 0 : index
      %118 = vector.load %arg14[%117, %c1_118, %c0_119, %c0_120] : memref<10x10x10x32xbf16, #tpu.memory_space<vmem>>, vector<1x8x8x32xbf16>
      %119 = vector.shape_cast %118 : vector<1x8x8x32xbf16> to vector<8x8x32xbf16>
      %120 = vector.shape_cast %119 : vector<8x8x32xbf16> to vector<64x32xbf16>
      %c0_121 = arith.constant 0 : index
      %c384 = arith.constant 384 : index
      %121 = vector.load %arg16[%c0_121, %c384] : memref<64x864xbf16, #tpu.memory_space<vmem>>, vector<64x32xbf16>
      tpu.vector_store %arg16[%c0_121, %c384], %120 {strides = array<i32>} : memref<64x864xbf16, #tpu.memory_space<vmem>>, vector<64x32xbf16>,
      %c1_i32_122 = arith.constant 1 : i32
      %122 = arith.addi %43, %c1_i32_122 : i32
      %123 = arith.index_cast %122 : i32 to index
      %c1_123 = arith.constant 1 : index
      %c1_124 = arith.constant 1 : index
      %c0_125 = arith.constant 0 : index
      %124 = vector.load %arg14[%123, %c1_123, %c1_124, %c0_125] : memref<10x10x10x32xbf16, #tpu.memory_space<vmem>>, vector<1x8x8x32xbf16>
      %125 = vector.shape_cast %124 : vector<1x8x8x32xbf16> to vector<8x8x32xbf16>
      %126 = vector.shape_cast %125 : vector<8x8x32xbf16> to vector<64x32xbf16>
      %c0_126 = arith.constant 0 : index
      %c416 = arith.constant 416 : index
      %127 = vector.load %arg16[%c0_126, %c416] : memref<64x864xbf16, #tpu.memory_space<vmem>>, vector<64x32xbf16>
      tpu.vector_store %arg16[%c0_126, %c416], %126 {strides = array<i32>} : memref<64x864xbf16, #tpu.memory_space<vmem>>, vector<64x32xbf16>,
      %c1_i32_127 = arith.constant 1 : i32
      %128 = arith.addi %43, %c1_i32_127 : i32
      %129 = arith.index_cast %128 : i32 to index
      %c1_128 = arith.constant 1 : index
      %c2_129 = arith.constant 2 : index
      %c0_130 = arith.constant 0 : index
      %130 = vector.load %arg14[%129, %c1_128, %c2_129, %c0_130] : memref<10x10x10x32xbf16, #tpu.memory_space<vmem>>, vector<1x8x8x32xbf16>
      %131 = vector.shape_cast %130 : vector<1x8x8x32xbf16> to vector<8x8x32xbf16>
      %132 = vector.shape_cast %131 : vector<8x8x32xbf16> to vector<64x32xbf16>
      %c0_131 = arith.constant 0 : index
      %c448 = arith.constant 448 : index
      %133 = vector.load %arg16[%c0_131, %c448] : memref<64x864xbf16, #tpu.memory_space<vmem>>, vector<64x32xbf16>
      tpu.vector_store %arg16[%c0_131, %c448], %132 {strides = array<i32>} : memref<64x864xbf16, #tpu.memory_space<vmem>>, vector<64x32xbf16>,
      %c1_i32_132 = arith.constant 1 : i32
      %134 = arith.addi %43, %c1_i32_132 : i32
      %135 = arith.index_cast %134 : i32 to index
      %c2_133 = arith.constant 2 : index
      %c0_134 = arith.constant 0 : index
      %c0_135 = arith.constant 0 : index
      %136 = vector.load %arg14[%135, %c2_133, %c0_134, %c0_135] : memref<10x10x10x32xbf16, #tpu.memory_space<vmem>>, vector<1x8x8x32xbf16>
      %137 = vector.shape_cast %136 : vector<1x8x8x32xbf16> to vector<8x8x32xbf16>
      %138 = vector.shape_cast %137 : vector<8x8x32xbf16> to vector<64x32xbf16>
      %c0_136 = arith.constant 0 : index
      %c480 = arith.constant 480 : index
      %139 = vector.load %arg16[%c0_136, %c480] : memref<64x864xbf16, #tpu.memory_space<vmem>>, vector<64x32xbf16>
      tpu.vector_store %arg16[%c0_136, %c480], %138 {strides = array<i32>} : memref<64x864xbf16, #tpu.memory_space<vmem>>, vector<64x32xbf16>,
      %c1_i32_137 = arith.constant 1 : i32
      %140 = arith.addi %43, %c1_i32_137 : i32
      %141 = arith.index_cast %140 : i32 to index
      %c2_138 = arith.constant 2 : index
      %c1_139 = arith.constant 1 : index
      %c0_140 = arith.constant 0 : index
      %142 = vector.load %arg14[%141, %c2_138, %c1_139, %c0_140] : memref<10x10x10x32xbf16, #tpu.memory_space<vmem>>, vector<1x8x8x32xbf16>
      %143 = vector.shape_cast %142 : vector<1x8x8x32xbf16> to vector<8x8x32xbf16>
      %144 = vector.shape_cast %143 : vector<8x8x32xbf16> to vector<64x32xbf16>
      %c0_141 = arith.constant 0 : index
      %c512 = arith.constant 512 : index
      %145 = vector.load %arg16[%c0_141, %c512] : memref<64x864xbf16, #tpu.memory_space<vmem>>, vector<64x32xbf16>
      tpu.vector_store %arg16[%c0_141, %c512], %144 {strides = array<i32>} : memref<64x864xbf16, #tpu.memory_space<vmem>>, vector<64x32xbf16>,
      %c1_i32_142 = arith.constant 1 : i32
      %146 = arith.addi %43, %c1_i32_142 : i32
      %147 = arith.index_cast %146 : i32 to index
      %c2_143 = arith.constant 2 : index
      %c2_144 = arith.constant 2 : index
      %c0_145 = arith.constant 0 : index
      %148 = vector.load %arg14[%147, %c2_143, %c2_144, %c0_145] : memref<10x10x10x32xbf16, #tpu.memory_space<vmem>>, vector<1x8x8x32xbf16>
      %149 = vector.shape_cast %148 : vector<1x8x8x32xbf16> to vector<8x8x32xbf16>
      %150 = vector.shape_cast %149 : vector<8x8x32xbf16> to vector<64x32xbf16>
      %c0_146 = arith.constant 0 : index
      %c544 = arith.constant 544 : index
      %151 = vector.load %arg16[%c0_146, %c544] : memref<64x864xbf16, #tpu.memory_space<vmem>>, vector<64x32xbf16>
      tpu.vector_store %arg16[%c0_146, %c544], %150 {strides = array<i32>} : memref<64x864xbf16, #tpu.memory_space<vmem>>, vector<64x32xbf16>,
      %c2_i32 = arith.constant 2 : i32
      %152 = arith.addi %43, %c2_i32 : i32
      %153 = arith.index_cast %152 : i32 to index
      %c0_147 = arith.constant 0 : index
      %c0_148 = arith.constant 0 : index
      %c0_149 = arith.constant 0 : index
      %154 = vector.load %arg14[%153, %c0_147, %c0_148, %c0_149] : memref<10x10x10x32xbf16, #tpu.memory_space<vmem>>, vector<1x8x8x32xbf16>
      %155 = vector.shape_cast %154 : vector<1x8x8x32xbf16> to vector<8x8x32xbf16>
      %156 = vector.shape_cast %155 : vector<8x8x32xbf16> to vector<64x32xbf16>
      %c0_150 = arith.constant 0 : index
      %c576 = arith.constant 576 : index
      %157 = vector.load %arg16[%c0_150, %c576] : memref<64x864xbf16, #tpu.memory_space<vmem>>, vector<64x32xbf16>
      tpu.vector_store %arg16[%c0_150, %c576], %156 {strides = array<i32>} : memref<64x864xbf16, #tpu.memory_space<vmem>>, vector<64x32xbf16>,
      %c2_i32_151 = arith.constant 2 : i32
      %158 = arith.addi %43, %c2_i32_151 : i32
      %159 = arith.index_cast %158 : i32 to index
      %c0_152 = arith.constant 0 : index
      %c1_153 = arith.constant 1 : index
      %c0_154 = arith.constant 0 : index
      %160 = vector.load %arg14[%159, %c0_152, %c1_153, %c0_154] : memref<10x10x10x32xbf16, #tpu.memory_space<vmem>>, vector<1x8x8x32xbf16>
      %161 = vector.shape_cast %160 : vector<1x8x8x32xbf16> to vector<8x8x32xbf16>
      %162 = vector.shape_cast %161 : vector<8x8x32xbf16> to vector<64x32xbf16>
      %c0_155 = arith.constant 0 : index
      %c608 = arith.constant 608 : index
      %163 = vector.load %arg16[%c0_155, %c608] : memref<64x864xbf16, #tpu.memory_space<vmem>>, vector<64x32xbf16>
      tpu.vector_store %arg16[%c0_155, %c608], %162 {strides = array<i32>} : memref<64x864xbf16, #tpu.memory_space<vmem>>, vector<64x32xbf16>,
      %c2_i32_156 = arith.constant 2 : i32
      %164 = arith.addi %43, %c2_i32_156 : i32
      %165 = arith.index_cast %164 : i32 to index
      %c0_157 = arith.constant 0 : index
      %c2_158 = arith.constant 2 : index
      %c0_159 = arith.constant 0 : index
      %166 = vector.load %arg14[%165, %c0_157, %c2_158, %c0_159] : memref<10x10x10x32xbf16, #tpu.memory_space<vmem>>, vector<1x8x8x32xbf16>
      %167 = vector.shape_cast %166 : vector<1x8x8x32xbf16> to vector<8x8x32xbf16>
      %168 = vector.shape_cast %167 : vector<8x8x32xbf16> to vector<64x32xbf16>
      %c0_160 = arith.constant 0 : index
      %c640 = arith.constant 640 : index
      %169 = vector.load %arg16[%c0_160, %c640] : memref<64x864xbf16, #tpu.memory_space<vmem>>, vector<64x32xbf16>
      tpu.vector_store %arg16[%c0_160, %c640], %168 {strides = array<i32>} : memref<64x864xbf16, #tpu.memory_space<vmem>>, vector<64x32xbf16>,
      %c2_i32_161 = arith.constant 2 : i32
      %170 = arith.addi %43, %c2_i32_161 : i32
      %171 = arith.index_cast %170 : i32 to index
      %c1_162 = arith.constant 1 : index
      %c0_163 = arith.constant 0 : index
      %c0_164 = arith.constant 0 : index
      %172 = vector.load %arg14[%171, %c1_162, %c0_163, %c0_164] : memref<10x10x10x32xbf16, #tpu.memory_space<vmem>>, vector<1x8x8x32xbf16>
      %173 = vector.shape_cast %172 : vector<1x8x8x32xbf16> to vector<8x8x32xbf16>
      %174 = vector.shape_cast %173 : vector<8x8x32xbf16> to vector<64x32xbf16>
      %c0_165 = arith.constant 0 : index
      %c672 = arith.constant 672 : index
      %175 = vector.load %arg16[%c0_165, %c672] : memref<64x864xbf16, #tpu.memory_space<vmem>>, vector<64x32xbf16>
      tpu.vector_store %arg16[%c0_165, %c672], %174 {strides = array<i32>} : memref<64x864xbf16, #tpu.memory_space<vmem>>, vector<64x32xbf16>,
      %c2_i32_166 = arith.constant 2 : i32
      %176 = arith.addi %43, %c2_i32_166 : i32
      %177 = arith.index_cast %176 : i32 to index
      %c1_167 = arith.constant 1 : index
      %c1_168 = arith.constant 1 : index
      %c0_169 = arith.constant 0 : index
      %178 = vector.load %arg14[%177, %c1_167, %c1_168, %c0_169] : memref<10x10x10x32xbf16, #tpu.memory_space<vmem>>, vector<1x8x8x32xbf16>
      %179 = vector.shape_cast %178 : vector<1x8x8x32xbf16> to vector<8x8x32xbf16>
      %180 = vector.shape_cast %179 : vector<8x8x32xbf16> to vector<64x32xbf16>
      %c0_170 = arith.constant 0 : index
      %c704 = arith.constant 704 : index
      %181 = vector.load %arg16[%c0_170, %c704] : memref<64x864xbf16, #tpu.memory_space<vmem>>, vector<64x32xbf16>
      tpu.vector_store %arg16[%c0_170, %c704], %180 {strides = array<i32>} : memref<64x864xbf16, #tpu.memory_space<vmem>>, vector<64x32xbf16>,
      %c2_i32_171 = arith.constant 2 : i32
      %182 = arith.addi %43, %c2_i32_171 : i32
      %183 = arith.index_cast %182 : i32 to index
      %c1_172 = arith.constant 1 : index
      %c2_173 = arith.constant 2 : index
      %c0_174 = arith.constant 0 : index
      %184 = vector.load %arg14[%183, %c1_172, %c2_173, %c0_174] : memref<10x10x10x32xbf16, #tpu.memory_space<vmem>>, vector<1x8x8x32xbf16>
      %185 = vector.shape_cast %184 : vector<1x8x8x32xbf16> to vector<8x8x32xbf16>
      %186 = vector.shape_cast %185 : vector<8x8x32xbf16> to vector<64x32xbf16>
      %c0_175 = arith.constant 0 : index
      %c736 = arith.constant 736 : index
      %187 = vector.load %arg16[%c0_175, %c736] : memref<64x864xbf16, #tpu.memory_space<vmem>>, vector<64x32xbf16>
      tpu.vector_store %arg16[%c0_175, %c736], %186 {strides = array<i32>} : memref<64x864xbf16, #tpu.memory_space<vmem>>, vector<64x32xbf16>,
      %c2_i32_176 = arith.constant 2 : i32
      %188 = arith.addi %43, %c2_i32_176 : i32
      %189 = arith.index_cast %188 : i32 to index
      %c2_177 = arith.constant 2 : index
      %c0_178 = arith.constant 0 : index
      %c0_179 = arith.constant 0 : index
      %190 = vector.load %arg14[%189, %c2_177, %c0_178, %c0_179] : memref<10x10x10x32xbf16, #tpu.memory_space<vmem>>, vector<1x8x8x32xbf16>
      %191 = vector.shape_cast %190 : vector<1x8x8x32xbf16> to vector<8x8x32xbf16>
      %192 = vector.shape_cast %191 : vector<8x8x32xbf16> to vector<64x32xbf16>
      %c0_180 = arith.constant 0 : index
      %c768 = arith.constant 768 : index
      %193 = vector.load %arg16[%c0_180, %c768] : memref<64x864xbf16, #tpu.memory_space<vmem>>, vector<64x32xbf16>
      tpu.vector_store %arg16[%c0_180, %c768], %192 {strides = array<i32>} : memref<64x864xbf16, #tpu.memory_space<vmem>>, vector<64x32xbf16>,
      %c2_i32_181 = arith.constant 2 : i32
      %194 = arith.addi %43, %c2_i32_181 : i32
      %195 = arith.index_cast %194 : i32 to index
      %c2_182 = arith.constant 2 : index
      %c1_183 = arith.constant 1 : index
      %c0_184 = arith.constant 0 : index
      %196 = vector.load %arg14[%195, %c2_182, %c1_183, %c0_184] : memref<10x10x10x32xbf16, #tpu.memory_space<vmem>>, vector<1x8x8x32xbf16>
      %197 = vector.shape_cast %196 : vector<1x8x8x32xbf16> to vector<8x8x32xbf16>
      %198 = vector.shape_cast %197 : vector<8x8x32xbf16> to vector<64x32xbf16>
      %c0_185 = arith.constant 0 : index
      %c800 = arith.constant 800 : index
      %199 = vector.load %arg16[%c0_185, %c800] : memref<64x864xbf16, #tpu.memory_space<vmem>>, vector<64x32xbf16>
      tpu.vector_store %arg16[%c0_185, %c800], %198 {strides = array<i32>} : memref<64x864xbf16, #tpu.memory_space<vmem>>, vector<64x32xbf16>,
      %c2_i32_186 = arith.constant 2 : i32
      %200 = arith.addi %43, %c2_i32_186 : i32
      %201 = arith.index_cast %200 : i32 to index
      %c2_187 = arith.constant 2 : index
      %c2_188 = arith.constant 2 : index
      %c0_189 = arith.constant 0 : index
      %202 = vector.load %arg14[%201, %c2_187, %c2_188, %c0_189] : memref<10x10x10x32xbf16, #tpu.memory_space<vmem>>, vector<1x8x8x32xbf16>
      %203 = vector.shape_cast %202 : vector<1x8x8x32xbf16> to vector<8x8x32xbf16>
      %204 = vector.shape_cast %203 : vector<8x8x32xbf16> to vector<64x32xbf16>
      %c0_190 = arith.constant 0 : index
      %c832 = arith.constant 832 : index
      %205 = vector.load %arg16[%c0_190, %c832] : memref<64x864xbf16, #tpu.memory_space<vmem>>, vector<64x32xbf16>
      tpu.vector_store %arg16[%c0_190, %c832], %204 {strides = array<i32>} : memref<64x864xbf16, #tpu.memory_space<vmem>>, vector<64x32xbf16>,
      %c0_191 = arith.constant 0 : index
      %c0_192 = arith.constant 0 : index
      %206 = vector.load %arg16[%c0_191, %c0_192] : memref<64x864xbf16, #tpu.memory_space<vmem>>, vector<64x864xbf16>
      %c0_193 = arith.constant 0 : index
      %c0_194 = arith.constant 0 : index
      %207 = vector.load %arg4[%c0_193, %c0_194] : memref<864x32xbf16, #tpu.memory_space<vmem>>, vector<864x32xbf16>
      %cst_195 = arith.constant dense<0.000000e+00> : vector<64x32xf32>
      %208 = tpu.matmul %206, %207, %cst_195 {dimension_numbers = #tpu.dot_dimension_numbers<[1], [0], [0], [1], [0, 0, 1, 1], [], []>} : vector<64x864xbf16>, vector<864x32xbf16>, vector<64x32xf32> -> vector<64x32xf32>
      %c0_196 = arith.constant 0 : index
      %c0_197 = arith.constant 0 : index
      %209 = vector.load %arg5[%c0_196, %c0_197] : memref<1x32xf32, #tpu.memory_space<vmem>>, vector<1x32xf32>
      %210 = vector.broadcast %209 : vector<1x32xf32> to vector<64x32xf32>
      %211 = arith.addf %208, %210 : vector<64x32xf32>
      %c0_198 = arith.constant 0 : index
      %212 = arith.index_cast %43 : i32 to index
      %c0_199 = arith.constant 0 : index
      %c0_200 = arith.constant 0 : index
      %213 = vector.load %arg12[%c0_198, %212, %c0_199, %c0_200] : memref<1x8x64x32xf32, #tpu.memory_space<vmem>>, vector<1x1x64x32xf32>
      %214 = vector.shape_cast %213 : vector<1x1x64x32xf32> to vector<64x32xf32>
      %215 = vector.shape_cast %211 : vector<64x32xf32> to vector<1x1x64x32xf32>
      tpu.vector_store %arg12[%c0_198, %212, %c0_199, %c0_200], %215 {strides = array<i32>} : memref<1x8x64x32xf32, #tpu.memory_space<vmem>>, vector<1x1x64x32xf32>,
      %c0_201 = arith.constant 0 : index
      %c0_202 = arith.constant 0 : index
      %216 = vector.load %arg17[%c0_201, %c0_202] : memref<1x32xf32, #tpu.memory_space<vmem>>, vector<1x32xf32>
      %cst_203 = arith.constant dense<0.000000e+00> : vector<32xf32>
      %217 = vector.multi_reduction <add>, %211, %cst_203 [0] : vector<64x32xf32> to vector<32xf32>
      %218 = vector.shape_cast %217 : vector<32xf32> to vector<1x32xf32>
      %219 = arith.addf %216, %218 : vector<1x32xf32>
      %c0_204 = arith.constant 0 : index
      %c0_205 = arith.constant 0 : index
      %220 = vector.load %arg17[%c0_204, %c0_205] : memref<1x32xf32, #tpu.memory_space<vmem>>, vector<1x32xf32>
      tpu.vector_store %arg17[%c0_204, %c0_205], %219 {strides = array<i32>} : memref<1x32xf32, #tpu.memory_space<vmem>>, vector<1x32xf32>,
    }
    %c8_i32_36 = arith.constant 8 : i32
    %c0_37 = arith.constant 0 : index
    %c0_38 = arith.constant 0 : index
    %23 = vector.load %arg17[%c0_37, %c0_38] : memref<1x32xf32, #tpu.memory_space<vmem>>, vector<1x32xf32>
    %cst_39 = arith.constant 0.001953125 : f32
    %24 = vector.broadcast %cst_39 : f32 to vector<1x32xf32>
    %25 = arith.mulf %23, %24 : vector<1x32xf32>
    %c0_40 = arith.constant 0 : index
    %c0_41 = arith.constant 0 : index
    %26 = vector.load %arg8[%c0_40, %c0_41] : memref<32x2xf32, #tpu.memory_space<vmem>>, vector<32x2xf32>
    %cst_42 = arith.constant dense<0.000000e+00> : vector<1x2xf32>
    %27 = tpu.matmul %25, %26, %cst_42 {dimension_numbers = #tpu.dot_dimension_numbers<[1], [0], [0], [1], [0, 0, 1, 1], [], []>} : vector<1x32xf32>, vector<32x2xf32>, vector<1x2xf32> -> vector<1x2xf32>
    %c0_43 = arith.constant 0 : index
    %c0_44 = arith.constant 0 : index
    %28 = vector.load %arg9[%c0_43, %c0_44] : memref<1x2xf32, #tpu.memory_space<vmem>>, vector<1x2xf32>
    %29 = arith.addf %27, %28 : vector<1x2xf32>
    %cst_45 = arith.constant 0.000000e+00 : f32
    %30 = vector.broadcast %cst_45 : f32 to vector<1x2xf32>
    %31 = arith.maximumf %29, %30 : vector<1x2xf32>
    %c0_46 = arith.constant 0 : index
    %c0_47 = arith.constant 0 : index
    %32 = vector.load %arg10[%c0_46, %c0_47] : memref<2x32xf32, #tpu.memory_space<vmem>>, vector<2x32xf32>
    %cst_48 = arith.constant dense<0.000000e+00> : vector<1x32xf32>
    %33 = tpu.matmul %31, %32, %cst_48 {dimension_numbers = #tpu.dot_dimension_numbers<[1], [0], [0], [1], [0, 0, 1, 1], [], []>} : vector<1x2xf32>, vector<2x32xf32>, vector<1x32xf32> -> vector<1x32xf32>
    %c0_49 = arith.constant 0 : index
    %c0_50 = arith.constant 0 : index
    %34 = vector.load %arg11[%c0_49, %c0_50] : memref<1x32xf32, #tpu.memory_space<vmem>>, vector<1x32xf32>
    %35 = arith.addf %33, %34 : vector<1x32xf32>
    %36 = arith.negf %35 : vector<1x32xf32>
    %37 = math.exp %36 : vector<1x32xf32>
    %cst_51 = arith.constant 1.000000e+00 : f32
    %38 = vector.broadcast %cst_51 : f32 to vector<1x32xf32>
    %39 = arith.addf %38, %37 : vector<1x32xf32>
    %40 = arith.divf %38, %39 : vector<1x32xf32>
    %c0_i32_52 = arith.constant 0 : i32
    %c8_i32_53 = arith.constant 8 : i32
    %41 = arith.addi %c0_i32_52, %c8_i32_53 : i32
    %c1_i32_54 = arith.constant 1 : i32
    scf.for %arg18 = %c0_i32_52 to %41 step %c1_i32_54  : i32 {
      %c1_i32_56 = arith.constant 1 : i32
      %42 = arith.muli %arg18, %c1_i32_56 : i32
      %c0_i32_57 = arith.constant 0 : i32
      %43 = arith.addi %c0_i32_57, %42 : i32
      %c0_58 = arith.constant 0 : index
      %44 = arith.index_cast %43 : i32 to index
      %c0_59 = arith.constant 0 : index
      %c0_60 = arith.constant 0 : index
      %45 = vector.load %arg12[%c0_58, %44, %c0_59, %c0_60] : memref<1x8x64x32xf32, #tpu.memory_space<vmem>>, vector<1x1x64x32xf32>
      %46 = vector.shape_cast %45 : vector<1x1x64x32xf32> to vector<64x32xf32>
      %c0_61 = arith.constant 0 : index
      %47 = arith.index_cast %43 : i32 to index
      %c0_62 = arith.constant 0 : index
      %c0_63 = arith.constant 0 : index
      %c0_64 = arith.constant 0 : index
      %48 = vector.load %arg1[%c0_61, %47, %c0_62, %c0_63, %c0_64] : memref<1x8x8x8x4xf32, #tpu.memory_space<vmem>>, vector<1x1x8x8x4xf32>
      %49 = vector.shape_cast %48 : vector<1x1x8x8x4xf32> to vector<8x8x4xf32>
      %50 = vector.shape_cast %49 : vector<8x8x4xf32> to vector<64x4xf32>
      %c0_65 = arith.constant 0 : index
      %c0_66 = arith.constant 0 : index
      %51 = vector.load %arg6[%c0_65, %c0_66] : memref<4x32xf32, #tpu.memory_space<vmem>>, vector<4x32xf32>
      %cst_67 = arith.constant dense<0.000000e+00> : vector<64x32xf32>
      %52 = tpu.matmul %50, %51, %cst_67 {dimension_numbers = #tpu.dot_dimension_numbers<[1], [0], [0], [1], [0, 0, 1, 1], [], []>} : vector<64x4xf32>, vector<4x32xf32>, vector<64x32xf32> -> vector<64x32xf32>
      %c0_68 = arith.constant 0 : index
      %c0_69 = arith.constant 0 : index
      %53 = vector.load %arg7[%c0_68, %c0_69] : memref<1x32xf32, #tpu.memory_space<vmem>>, vector<1x32xf32>
      %54 = vector.broadcast %53 : vector<1x32xf32> to vector<64x32xf32>
      %55 = arith.addf %52, %54 : vector<64x32xf32>
      %56 = vector.broadcast %40 : vector<1x32xf32> to vector<64x32xf32>
      %57 = arith.mulf %46, %56 : vector<64x32xf32>
      %58 = arith.addf %57, %55 : vector<64x32xf32>
      %cst_70 = arith.constant 0.000000e+00 : f32
      %59 = vector.broadcast %cst_70 : f32 to vector<64x32xf32>
      %60 = arith.cmpf ogt, %58, %59 : vector<64x32xf32>
      %cst_71 = arith.constant 0.00999999977 : f32
      %61 = vector.broadcast %cst_71 : f32 to vector<64x32xf32>
      %62 = arith.mulf %61, %58 : vector<64x32xf32>
      %63 = arith.select %60, %58, %62 : vector<64x32xi1>, vector<64x32xf32>
      %c0_72 = arith.constant 0 : index
      %64 = arith.index_cast %43 : i32 to index
      %c0_73 = arith.constant 0 : index
      %c0_74 = arith.constant 0 : index
      %65 = vector.load %arg12[%c0_72, %64, %c0_73, %c0_74] : memref<1x8x64x32xf32, #tpu.memory_space<vmem>>, vector<1x1x64x32xf32>
      %66 = vector.shape_cast %65 : vector<1x1x64x32xf32> to vector<64x32xf32>
      %67 = vector.shape_cast %63 : vector<64x32xf32> to vector<1x1x64x32xf32>
      tpu.vector_store %arg12[%c0_72, %64, %c0_73, %c0_74], %67 {strides = array<i32>} : memref<1x8x64x32xf32, #tpu.memory_space<vmem>>, vector<1x1x64x32xf32>,
    }
    %c8_i32_55 = arith.constant 8 : i32
    return
  }
  func.func @transform_0(%arg0: i32) -> (i32, i32, i32, i32, i32) {
    %c0_i32 = arith.constant 0 : i32
    %c0_i32_0 = arith.constant 0 : i32
    %c0_i32_1 = arith.constant 0 : i32
    %c0_i32_2 = arith.constant 0 : i32
    %c0_i32_3 = arith.constant 0 : i32
    return %arg0, %c0_i32, %c0_i32_0, %c0_i32_1, %c0_i32_2 : i32, i32, i32, i32, i32
  }
  func.func @transform_1(%arg0: i32) -> (i32, i32) {
    %c0_i32 = arith.constant 0 : i32
    %c0_i32_0 = arith.constant 0 : i32
    %c0_i32_1 = arith.constant 0 : i32
    return %c0_i32, %c0_i32_0 : i32, i32
  }
  func.func @transform_2(%arg0: i32) -> (i32, i32) {
    %c0_i32 = arith.constant 0 : i32
    %c0_i32_0 = arith.constant 0 : i32
    %c0_i32_1 = arith.constant 0 : i32
    return %c0_i32, %c0_i32_0 : i32, i32
  }
  func.func @transform_3(%arg0: i32) -> (i32, i32) {
    %c0_i32 = arith.constant 0 : i32
    %c0_i32_0 = arith.constant 0 : i32
    %c0_i32_1 = arith.constant 0 : i32
    return %c0_i32, %c0_i32_0 : i32, i32
  }
  func.func @transform_4(%arg0: i32) -> (i32, i32) {
    %c0_i32 = arith.constant 0 : i32
    %c0_i32_0 = arith.constant 0 : i32
    %c0_i32_1 = arith.constant 0 : i32
    return %c0_i32, %c0_i32_0 : i32, i32
  }
  func.func @transform_5(%arg0: i32) -> (i32, i32) {
    %c0_i32 = arith.constant 0 : i32
    %c0_i32_0 = arith.constant 0 : i32
    %c0_i32_1 = arith.constant 0 : i32
    return %c0_i32, %c0_i32_0 : i32, i32
  }
  func.func @transform_6(%arg0: i32) -> (i32, i32) {
    %c0_i32 = arith.constant 0 : i32
    %c0_i32_0 = arith.constant 0 : i32
    %c0_i32_1 = arith.constant 0 : i32
    return %c0_i32, %c0_i32_0 : i32, i32
  }
  func.func @transform_7(%arg0: i32) -> (i32, i32) {
    %c0_i32 = arith.constant 0 : i32
    %c0_i32_0 = arith.constant 0 : i32
    %c0_i32_1 = arith.constant 0 : i32
    return %c0_i32, %c0_i32_0 : i32, i32
  }
  func.func @transform_8(%arg0: i32) -> (i32, i32) {
    %c0_i32 = arith.constant 0 : i32
    %c0_i32_0 = arith.constant 0 : i32
    %c0_i32_1 = arith.constant 0 : i32
    return %c0_i32, %c0_i32_0 : i32, i32
  }
  func.func @transform_9(%arg0: i32) -> (i32, i32) {
    %c0_i32 = arith.constant 0 : i32
    %c0_i32_0 = arith.constant 0 : i32
    %c0_i32_1 = arith.constant 0 : i32
    return %c0_i32, %c0_i32_0 : i32, i32
  }
  func.func @transform_10(%arg0: i32) -> (i32, i32) {
    %c0_i32 = arith.constant 0 : i32
    %c0_i32_0 = arith.constant 0 : i32
    %c0_i32_1 = arith.constant 0 : i32
    return %c0_i32, %c0_i32_0 : i32, i32
  }
  func.func @transform_11(%arg0: i32) -> (i32, i32, i32, i32) {
    %c0_i32 = arith.constant 0 : i32
    %c0_i32_0 = arith.constant 0 : i32
    %c0_i32_1 = arith.constant 0 : i32
    %c0_i32_2 = arith.constant 0 : i32
    return %arg0, %c0_i32, %c0_i32_0, %c0_i32_1 : i32, i32, i32, i32
  }
}

</mosaic_0001>

<bundles_post_ra>
// kernel: se_resnet_block_forward.1
= control target key start
LH: loop header
LB: loop body
LE: loop exit
PB: predicated region body
PF: predicated region fallthrough
CT: control target
= control target key end

     0   :  { %s13522_s0 = inlined_call_operand.vmem [shape: f32[2,8,8,8,4], index: 0, kind: input, shape index: {}]   ;;  %s13523_s1 = inlined_call_operand.vmem [shape: bf16[108,32], index: 1, kind: input, shape index: {}]   ;;  %s13524_s2 = inlined_call_operand.vmem [shape: f32[1,32], index: 2, kind: input, shape index: {}]   ;;  %s13525_s3 = inlined_call_operand.vmem [shape: bf16[864,32], index: 3, kind: input, shape index: {}]   ;;  %s13526_s4 = inlined_call_operand.vmem [shape: f32[1,32], index: 4, kind: input, shape index: {}]   ;;  %s13527_s5 = inlined_call_operand.vmem [shape: f32[4,32], index: 5, kind: input, shape index: {}]   ;;  %s13528_s6 = inlined_call_operand.vmem [shape: f32[1,32], index: 6, kind: input, shape index: {}]   ;;  %s13529_s7 = inlined_call_operand.vmem [shape: f32[32,2], index: 7, kind: input, shape index: {}]   ;;  %s13530_s8 = inlined_call_operand.vmem [shape: f32[1,2], index: 8, kind: input, shape index: {}]   ;;  %s13531_s9 = inlined_call_operand.vmem [shape: f32[2,32], index: 9, kind: input, shape index: {}]   ;;  %s13532_s10 = inlined_call_operand.vmem [shape: f32[1,32], index: 10, kind: input, shape index: {}]   ;;  %s13533_s11 = inlined_call_operand.hbm [shape: f32[2,8,64,32], index: 11, kind: output, shape index: {}]  }
   0x1   :  { %13537 = sst [smem:[#allocation10_spill]] %s13522_s0 }
   0x2   :  { %13538 = sst [smem:[#allocation11_spill]] %s13523_s1 }
   0x3   :  { %13539 = sst [smem:[#allocation12_spill]] %s13524_s2 }
   0x4   :  { %16 = vsyncpa [#allocation8], 0 }
   0x5   :  { %18 = vsyncpa [#allocation8 + $0x1], 0  ;;  %s9884_s17 = smov 0   ;;  %s9886_s18 = smov 0  }
   0x6   :  { %s9888_s19 = smov 0   ;;  %s9890_s20 = smov 0  }
   0x7 LB: > { %s9905_s21 = sadd.s32 4294967295, %s9761_s20   ;;  %s8085_s22 = sadd.s32 4294967294, %s9761_s20   ;;  %s9761_s20 = sphi %s9890_s20, %s13573_s20   ;;  %s9757_s19 = sphi %s9888_s19, %s13572_s19   ;;  %s9753_s18 = sphi %s9886_s18, %s13571_s18   ;;  %s9749_s17 = sphi %s9884_s17, %s13570_s17  }
   0x8   : > { %s9909_s23 = sadd.s32 1, %s9761_s20   ;;  %s267_s24 = sadd.s32 1, %s9757_s19 }
   0x9   : > { %s264_s25 = ssub.s32 %s9761_s20, %s9909_s23  ;;  %p277_p0 = scmp.ne.s32.totalorder %s9757_s19, %s9753_s18 }
   0xa   : > { %p265_p1 = scmp.eq.s32.totalorder %s264_s25, 0  ;;  %p278_p2 = scmp.eq.s32.totalorder %s9905_s21, 1 }
   0xb   : > { %p283_p3 = scmp.ne.s32.totalorder %s9753_s18, %s9749_s17  ;;  %p284_p4 = scmp.eq.s32.totalorder %s8085_s22, 1 }
   0xc   : > { %s9920_s26 = scalar_select %p265_p1, %s9757_s19, %s267_s24  }
   0xd   : > { %p9922_p5 = por %p278_p2, %p277_p0  ;;  %p9926_p6 = por %p284_p4, %p283_p3 }
   0xe   : > { %p8088_p7 = scmp.ge.s32.totalorder %s9761_s20, 1  ;;  %p340_p8 = scmp.lt.s32.totalorder %s9761_s20, 3 }
  0x10   : > { %p341_p9 = pnand %p8088_p7, %p340_p8 }
  0x11   : > { %s13534_s29 = sand.u32 (!%p341_p9), 1, %s9753_s18   ;;  %p380_p10 = scmp.lt.s32.totalorder (!%p341_p9), %s9905_s21, 1 }
  0x12   : > { %344 = sbr.rel (%p341_p9) target bundleno = 2254 (0x8ce), region = 64  ;;  %s9936_s30 = sshll.u32 (!%p341_p9), %s13534_s29, 9 }
  0x13   : > { %s13542_s0 = sld [smem:[#allocation10_spill]] (!%p341_p9)  ;;  %s10027_s22 = scalar_lea.vmem (!%p341_p9), [#allocation7], %s9936_s30 }
  0x14   : > { %s10029_s24 = smov (!%p341_p9), 0  }
  0x17   : > { %vm386_vm0 = vcmask 27648   ;;  %vm388_vm1 = vcmask 24576   ;;  %v9787_v0 = vmov 0   ;;  %s381_s12 = scalar_select %p380_p10, %s9905_s21, 1 }
  0x18   : > { %387 = vst.msk [vmem:[#allocation2] sm:$0xf] %vm386_vm0, %v9787_v0  ;;  %390 = vst.msk [vmem:[#allocation2 + $0x8] sm:$0xf] %vm386_vm0, %v9787_v0 }
  0x19   : > { %392 = vst.msk [vmem:[#allocation2 + $0x10] sm:$0xf] %vm386_vm0, %v9787_v0  ;;  %394 = vst.msk [vmem:[#allocation2 + $0x18] sm:$0xf] %vm386_vm0, %v9787_v0  ;;  %s9187_s13 = sshll.u32 %s381_s12, 9 }
  0x1a   : > { %396 = vst.msk [vmem:[#allocation2 + $0x20] sm:$0xf] %vm386_vm0, %v9787_v0  ;;  %398 = vst.msk [vmem:[#allocation2 + $0x28] sm:$0xf] %vm386_vm0, %v9787_v0  ;;  %s10024_s16 = scalar_lea.vmem %s13542_s0, %s9187_s13 }
  0x1b   : > { %400 = vst.msk [vmem:[#allocation2 + $0x30] sm:$0xf] %vm386_vm0, %v9787_v0  ;;  %402 = vst.msk [vmem:[#allocation2 + $0x38] sm:$0xf] %vm386_vm0, %v9787_v0 }
  0x1c   : > { %404 = vst.msk [vmem:[#allocation2 + $0x40] sm:$0xf] %vm386_vm0, %v9787_v0  ;;  %406 = vst.msk [vmem:[#allocation2 + $0x48] sm:$0xf] %vm386_vm0, %v9787_v0 }
  0x1d   : > { %409 = vst.msk [vmem:[#allocation2 + $0x2d0] sm:$0xf] %vm386_vm0, %v9787_v0  ;;  %411 = vst.msk [vmem:[#allocation2 + $0x2d8] sm:$0xf] %vm386_vm0, %v9787_v0 }
  0x1e   : > { %413 = vst.msk [vmem:[#allocation2 + $0x2e0] sm:$0xf] %vm386_vm0, %v9787_v0  ;;  %415 = vst.msk [vmem:[#allocation2 + $0x2e8] sm:$0xf] %vm386_vm0, %v9787_v0 }
  0x1f   : > { %417 = vst.msk [vmem:[#allocation2 + $0x2f0] sm:$0xf] %vm386_vm0, %v9787_v0  ;;  %419 = vst.msk [vmem:[#allocation2 + $0x2f8] sm:$0xf] %vm386_vm0, %v9787_v0 }
  0x20   : > { %421 = vst.msk [vmem:[#allocation2 + $0x300] sm:$0xf] %vm386_vm0, %v9787_v0  ;;  %423 = vst.msk [vmem:[#allocation2 + $0x308] sm:$0xf] %vm386_vm0, %v9787_v0 }
  0x21   : > { %425 = vst.msk [vmem:[#allocation2 + $0x310] sm:$0xf] %vm386_vm0, %v9787_v0  ;;  %427 = vst.msk [vmem:[#allocation2 + $0x318] sm:$0xf] %vm386_vm0, %v9787_v0 }
  0x22   : > { %389 = vst.msk [vmem:[#allocation2 + $0x4] sm:$0x1] %vm388_vm1, %v9787_v0  ;;  %391 = vst.msk [vmem:[#allocation2 + $0xc] sm:$0x1] %vm388_vm1, %v9787_v0 }
  0x23   : > { %393 = vst.msk [vmem:[#allocation2 + $0x14] sm:$0x1] %vm388_vm1, %v9787_v0  ;;  %395 = vst.msk [vmem:[#allocation2 + $0x1c] sm:$0x1] %vm388_vm1, %v9787_v0 }
  0x24   : > { %397 = vst.msk [vmem:[#allocation2 + $0x24] sm:$0x1] %vm388_vm1, %v9787_v0  ;;  %399 = vst.msk [vmem:[#allocation2 + $0x2c] sm:$0x1] %vm388_vm1, %v9787_v0 }
  0x25   : > { %401 = vst.msk [vmem:[#allocation2 + $0x34] sm:$0x1] %vm388_vm1, %v9787_v0  ;;  %403 = vst.msk [vmem:[#allocation2 + $0x3c] sm:$0x1] %vm388_vm1, %v9787_v0 }
  0x26   : > { %405 = vst.msk [vmem:[#allocation2 + $0x44] sm:$0x1] %vm388_vm1, %v9787_v0  ;;  %407 = vst.msk [vmem:[#allocation2 + $0x4c] sm:$0x1] %vm388_vm1, %v9787_v0 }
  0x27   : > { %410 = vst.msk [vmem:[#allocation2 + $0x2d4] sm:$0x1] %vm388_vm1, %v9787_v0  ;;  %412 = vst.msk [vmem:[#allocation2 + $0x2dc] sm:$0x1] %vm388_vm1, %v9787_v0 }
  0x28   : > { %414 = vst.msk [vmem:[#allocation2 + $0x2e4] sm:$0x1] %vm388_vm1, %v9787_v0  ;;  %416 = vst.msk [vmem:[#allocation2 + $0x2ec] sm:$0x1] %vm388_vm1, %v9787_v0 }
  0x29   : > { %418 = vst.msk [vmem:[#allocation2 + $0x2f4] sm:$0x1] %vm388_vm1, %v9787_v0  ;;  %420 = vst.msk [vmem:[#allocation2 + $0x2fc] sm:$0x1] %vm388_vm1, %v9787_v0 }
  0x2a   : > { %422 = vst.msk [vmem:[#allocation2 + $0x304] sm:$0x1] %vm388_vm1, %v9787_v0  ;;  %424 = vst.msk [vmem:[#allocation2 + $0x30c] sm:$0x1] %vm388_vm1, %v9787_v0 }
  0x2b   : > { %426 = vst.msk [vmem:[#allocation2 + $0x314] sm:$0x1] %vm388_vm1, %v9787_v0  ;;  %428 = vst.msk [vmem:[#allocation2 + $0x31c] sm:$0x1] %vm388_vm1, %v9787_v0 }
  0x2c LB: >> { %vm447_vm2 = vsmask.f32 256  ;;  %s7932_s25 = smul.u32 80, %s9765_s24  ;;  %vm479_vm4 = vsmask.f32 7938  ;;  %v9788_v2 = vmov 0   ;;  %s9765_s24 = sphi %s10029_s24, %s434_s24  }
  0x2d   : >> { %vm10037_vm3 = vmand %vm388_vm1, %vm447_vm2  ;;  %s434_s24 = sadd.s32 1, %s9765_s24  }
  0x2e   : >> { %s10041_s12 = scalar_lea.vmem [#allocation2], %s7932_s25  ;;  %vm10070_vm5 = vmand %vm388_vm1, %vm479_vm4  ;;  %p431_p11 = scmp.ge.s32.totalorder %s434_s24, 8  }
  0x2f   : >> { %8092 = vst.msk [vmem:[%s10041_s12 + $0x50] sm:$0xf] %vm386_vm0, %v9788_v2  ;;  %8095 = vst.msk [vmem:[%s10041_s12 + $0x98] sm:$0xf] %vm386_vm0, %v9788_v2  ;;  %vm511_vm6 = vcmask (%p431_p11), 257024   ;;  %vm513_vm7 = vcmask (%p431_p11), 253952  }
  0x30   : >> { %8093 = vst.msk [vmem:[%s10041_s12 + $0x54] sm:$0x1] %vm388_vm1, %v9788_v2  ;;  %8096 = vst.msk [vmem:[%s10041_s12 + $0x9c] sm:$0x1] %vm388_vm1, %v9788_v2  ;;  %s10220_s30 = smov (%p431_p11), 0  }
  0x31   : > { %512 = vst.msk [vmem:[#allocation3] sm:$0xf] (%p431_p11), %vm511_vm6, %v9787_v0  ;;  %515 = vst.msk [vmem:[#allocation3 + $0x8] sm:$0xf] (%p431_p11), %vm511_vm6, %v9787_v0 }
  0x32   : >> { %v8099_v3 = vld [vmem:[%s10041_s12 + $0x58] sm:$0x1]  ;;  %v8101_v4 = vld [vmem:[%s10041_s12 + $0x60] sm:$0x1]  ;;  %v8103_v5 = vld [vmem:[%s10041_s12 + $0x68] sm:$0x1] }
  0x33   : >> { %v453_v6 = vsel %vm10037_vm3, 0, %v8099_v3  ;;  %v456_v7 = vsel %vm10037_vm3, 0, %v8101_v4  ;;  %v459_v8 = vsel %vm10037_vm3, 0, %v8103_v5  ;;  %v8105_v9 = vld [vmem:[%s10041_s12 + $0x70] sm:$0x1] }
  0x34   : >> { %8100 = vst [vmem:[%s10041_s12 + $0x58] sm:$0x1] %v453_v6  ;;  %8102 = vst [vmem:[%s10041_s12 + $0x60] sm:$0x1] %v456_v7  ;;  %v462_v10 = vsel %vm10037_vm3, 0, %v8105_v9 }
  0x35   : >> { %8104 = vst [vmem:[%s10041_s12 + $0x68] sm:$0x1] %v459_v8  ;;  %v8107_v11 = vld [vmem:[%s10041_s12 + $0x78] sm:$0x1]  ;;  %v8109_v12 = vld [vmem:[%s10041_s12 + $0x80] sm:$0x1] }
  0x36   : >> { %8106 = vst [vmem:[%s10041_s12 + $0x70] sm:$0x1] %v462_v10  ;;  %v465_v14 = vsel %vm10037_vm3, 0, %v8107_v11  ;;  %v468_v15 = vsel %vm10037_vm3, 0, %v8109_v12  ;;  %v8111_v16 = vld [vmem:[%s10041_s12 + $0x88] sm:$0x1] }
  0x37   : >> { %v8113_v17 = vld [vmem:[%s10041_s12 + $0x90] sm:$0x1]  ;;  %8108 = vst [vmem:[%s10041_s12 + $0x78] sm:$0x1] %v465_v14  ;;  %8110 = vst [vmem:[%s10041_s12 + $0x80] sm:$0x1] %v468_v15 }
  0x38   : >> { %v471_v18 = vsel %vm10037_vm3, 0, %v8111_v16  ;;  %v474_v19 = vsel %vm10037_vm3, 0, %v8113_v17  ;;  %v8119_v20 = vld [vmem:[%s10041_s12 + $0x5c] sm:$0x1]  ;;  %v8121_v21 = vld [vmem:[%s10041_s12 + $0x64] sm:$0x1] }
  0x39   : >> { %8112 = vst [vmem:[%s10041_s12 + $0x88] sm:$0x1] %v471_v18  ;;  %8114 = vst [vmem:[%s10041_s12 + $0x90] sm:$0x1] %v474_v19  ;;  %v485_v22 = vsel %vm10070_vm5, 0, %v8119_v20  ;;  %v488_v23 = vsel %vm10070_vm5, 0, %v8121_v21 }
  0x3a   : >> { %v8123_v24 = vld [vmem:[%s10041_s12 + $0x6c] sm:$0x1]  ;;  %v8125_v25 = vld [vmem:[%s10041_s12 + $0x74] sm:$0x1]  ;;  %8120 = vst [vmem:[%s10041_s12 + $0x5c] sm:$0x1] %v485_v22 }
  0x3b   : >> { %8122 = vst [vmem:[%s10041_s12 + $0x64] sm:$0x1] %v488_v23  ;;  %v491_v26 = vsel %vm10070_vm5, 0, %v8123_v24  ;;  %v494_v27 = vsel %vm10070_vm5, 0, %v8125_v25  ;;  %v8127_v28 = vld [vmem:[%s10041_s12 + $0x7c] sm:$0x1] }
  0x3c   : >> { %v8129_v29 = vld [vmem:[%s10041_s12 + $0x84] sm:$0x1]  ;;  %v8097_v30 = vld [vmem:[%s10041_s12 + $0x50] sm:$0x1]  ;;  %v8115_v31 = vld [vmem:[%s10041_s12 + $0x98] sm:$0x1] }
  0x3d   : >> { %v8117_v32 = vld [vmem:[%s10041_s12 + $0x54] sm:$0x1]  ;;  %8124 = vst [vmem:[%s10041_s12 + $0x6c] sm:$0x1] %v491_v26  ;;  %8126 = vst [vmem:[%s10041_s12 + $0x74] sm:$0x1] %v494_v27 }
  0x3e   : >> { %v450_v33 = vsel %vm10037_vm3, 0, %v8097_v30  ;;  %v477_v34 = vsel %vm10037_vm3, 0, %v8115_v31  ;;  %v482_v35 = vsel %vm10070_vm5, 0, %v8117_v32  ;;  %v497_v36 = vsel %vm10070_vm5, 0, %v8127_v28  ;;  %v8131_v37 = vld [vmem:[%s10041_s12 + $0x8c] sm:$0x1] }
  0x3f   : >> { %8098 = vst [vmem:[%s10041_s12 + $0x50] sm:$0x1] %v450_v33  ;;  %8116 = vst [vmem:[%s10041_s12 + $0x98] sm:$0x1] %v477_v34  ;;  %v500_v38 = vsel %vm10070_vm5, 0, %v8129_v29  ;;  %v503_v39 = vsel %vm10070_vm5, 0, %v8131_v37 }
  0x40   : >> { %8118 = vst [vmem:[%s10041_s12 + $0x54] sm:$0x1] %v482_v35  ;;  %8128 = vst [vmem:[%s10041_s12 + $0x7c] sm:$0x1] %v497_v36  ;;  %v8133_v40 = vld [vmem:[%s10041_s12 + $0x94] sm:$0x1] }
  0x41   : >> { %v8135_v41 = vld [vmem:[%s10041_s12 + $0x9c] sm:$0x1]  ;;  %8130 = vst [vmem:[%s10041_s12 + $0x84] sm:$0x1] %v500_v38  ;;  %8132 = vst [vmem:[%s10041_s12 + $0x8c] sm:$0x1] %v503_v39 }
  0x42   : >> { %v506_v42 = vsel %vm10070_vm5, 0, %v8133_v40  ;;  %v509_v43 = vsel %vm10070_vm5, 0, %v8135_v41  ;;  %433 = sbr.rel (!%p431_p11) target bundleno = 44 (0x2c), region = 171  ;;  %517 = vst.msk [vmem:[#allocation3 + $0x10] sm:$0xf] (%p431_p11), %vm511_vm6, %v9787_v0 }
  0x43   : >> { %8134 = vst [vmem:[%s10041_s12 + $0x94] sm:$0x1] %v506_v42  ;;  %8136 = vst [vmem:[%s10041_s12 + $0x9c] sm:$0x1] %v509_v43 }
  0x44   : > { %519 = vst.msk [vmem:[#allocation3 + $0x18] sm:$0xf] (%p431_p11), %vm511_vm6, %v9787_v0  ;;  %521 = vst.msk [vmem:[#allocation3 + $0x20] sm:$0xf] (%p431_p11), %vm511_vm6, %v9787_v0 }
  0x45   : > { %523 = vst.msk [vmem:[#allocation3 + $0x28] sm:$0xf] (%p431_p11), %vm511_vm6, %v9787_v0  ;;  %525 = vst.msk [vmem:[#allocation3 + $0x30] sm:$0xf] (%p431_p11), %vm511_vm6, %v9787_v0 }
  0x46   : > { %527 = vst.msk [vmem:[#allocation3 + $0x38] sm:$0xf] (%p431_p11), %vm511_vm6, %v9787_v0  ;;  %529 = vst.msk [vmem:[#allocation3 + $0x40] sm:$0xf] (%p431_p11), %vm511_vm6, %v9787_v0 }
  0x47   : > { %531 = vst.msk [vmem:[#allocation3 + $0x48] sm:$0xf] %vm511_vm6, %v9787_v0  ;;  %534 = vst.msk [vmem:[#allocation3 + $0x2d0] sm:$0xf] %vm511_vm6, %v9787_v0 }
  0x48   : > { %536 = vst.msk [vmem:[#allocation3 + $0x2d8] sm:$0xf] %vm511_vm6, %v9787_v0  ;;  %538 = vst.msk [vmem:[#allocation3 + $0x2e0] sm:$0xf] %vm511_vm6, %v9787_v0 }
  0x49   : > { %540 = vst.msk [vmem:[#allocation3 + $0x2e8] sm:$0xf] %vm511_vm6, %v9787_v0  ;;  %542 = vst.msk [vmem:[#allocation3 + $0x2f0] sm:$0xf] %vm511_vm6, %v9787_v0 }
  0x4a   : > { %544 = vst.msk [vmem:[#allocation3 + $0x2f8] sm:$0xf] %vm511_vm6, %v9787_v0  ;;  %546 = vst.msk [vmem:[#allocation3 + $0x300] sm:$0xf] %vm511_vm6, %v9787_v0 }
  0x4b   : > { %548 = vst.msk [vmem:[#allocation3 + $0x308] sm:$0xf] %vm511_vm6, %v9787_v0  ;;  %550 = vst.msk [vmem:[#allocation3 + $0x310] sm:$0xf] %vm511_vm6, %v9787_v0 }
  0x4c   : > { %552 = vst.msk [vmem:[#allocation3 + $0x318] sm:$0xf] %vm511_vm6, %v9787_v0 }
  0x4d   : > { %514 = vst.msk [vmem:[#allocation3 + $0x4] sm:$0x1] %vm513_vm7, %v9787_v0  ;;  %516 = vst.msk [vmem:[#allocation3 + $0xc] sm:$0x1] %vm513_vm7, %v9787_v0 }
  0x4e   : > { %518 = vst.msk [vmem:[#allocation3 + $0x14] sm:$0x1] %vm513_vm7, %v9787_v0  ;;  %520 = vst.msk [vmem:[#allocation3 + $0x1c] sm:$0x1] %vm513_vm7, %v9787_v0 }
  0x4f   : > { %522 = vst.msk [vmem:[#allocation3 + $0x24] sm:$0x1] %vm513_vm7, %v9787_v0  ;;  %524 = vst.msk [vmem:[#allocation3 + $0x2c] sm:$0x1] %vm513_vm7, %v9787_v0 }
  0x50   : > { %526 = vst.msk [vmem:[#allocation3 + $0x34] sm:$0x1] %vm513_vm7, %v9787_v0  ;;  %528 = vst.msk [vmem:[#allocation3 + $0x3c] sm:$0x1] %vm513_vm7, %v9787_v0 }
  0x51   : > { %530 = vst.msk [vmem:[#allocation3 + $0x44] sm:$0x1] %vm513_vm7, %v9787_v0  ;;  %532 = vst.msk [vmem:[#allocation3 + $0x4c] sm:$0x1] %vm513_vm7, %v9787_v0 }
  0x52   : > { %535 = vst.msk [vmem:[#allocation3 + $0x2d4] sm:$0x1] %vm513_vm7, %v9787_v0  ;;  %537 = vst.msk [vmem:[#allocation3 + $0x2dc] sm:$0x1] %vm513_vm7, %v9787_v0 }
  0x53   : > { %539 = vst.msk [vmem:[#allocation3 + $0x2e4] sm:$0x1] %vm513_vm7, %v9787_v0  ;;  %541 = vst.msk [vmem:[#allocation3 + $0x2ec] sm:$0x1] %vm513_vm7, %v9787_v0 }
  0x54   : > { %543 = vst.msk [vmem:[#allocation3 + $0x2f4] sm:$0x1] %vm513_vm7, %v9787_v0  ;;  %545 = vst.msk [vmem:[#allocation3 + $0x2fc] sm:$0x1] %vm513_vm7, %v9787_v0 }
  0x55   : > { %547 = vst.msk [vmem:[#allocation3 + $0x304] sm:$0x1] %vm513_vm7, %v9787_v0  ;;  %549 = vst.msk [vmem:[#allocation3 + $0x30c] sm:$0x1] %vm513_vm7, %v9787_v0 }
  0x56   : > { %551 = vst.msk [vmem:[#allocation3 + $0x314] sm:$0x1] %vm513_vm7, %v9787_v0  ;;  %553 = vst.msk [vmem:[#allocation3 + $0x31c] sm:$0x1] %vm513_vm7, %v9787_v0 }
  0x57 LB: >> { %s7939_s13 = smul.u32 80, %s9769_s30  ;;  %vm10228_vm8 = vmand %vm513_vm7, %vm447_vm2  ;;  %v9789_v45 = vmov 0   ;;  %s559_s30 = sadd.s32 1, %s9769_s30   ;;  %s9769_s30 = sphi %s10220_s30, %s559_s30  }
  0x58   : >> { %vm10261_vm9 = vmand %vm513_vm7, %vm479_vm4  ;;  %p556_p12 = scmp.ge.s32.totalorder %s559_s30, 8  }
  0x59   : >> { %s10232_s14 = scalar_lea.vmem [#allocation3], %s7939_s13  ;;  %v13535_v24 = vmov (%p556_p12), 0.0   ;;  %s10333_s15 = smov (%p556_p12), 0  }
  0x5a   : >> { %8137 = vst.msk [vmem:[%s10232_s14 + $0x50] sm:$0xf] %vm511_vm6, %v9789_v45  ;;  %8140 = vst.msk [vmem:[%s10232_s14 + $0x98] sm:$0xf] %vm511_vm6, %v9789_v45 }
  0x5b   : >> { %8138 = vst.msk [vmem:[%s10232_s14 + $0x54] sm:$0x1] %vm513_vm7, %v9789_v45  ;;  %8141 = vst.msk [vmem:[%s10232_s14 + $0x9c] sm:$0x1] %vm513_vm7, %v9789_v45 }
  0x5c   : > { %636 = vst.msk [vmem:[#allocation6] sm:$0x1] (%p556_p12), %vm513_vm7, %v13535_v24 }
  0x5d   : >> { %v8144_v46 = vld [vmem:[%s10232_s14 + $0x58] sm:$0x1]  ;;  %v8146_v47 = vld [vmem:[%s10232_s14 + $0x60] sm:$0x1]  ;;  %v8148_v48 = vld [vmem:[%s10232_s14 + $0x68] sm:$0x1] }
  0x5e   : >> { %v578_v49 = vsel %vm10228_vm8, 0, %v8144_v46  ;;  %v581_v50 = vsel %vm10228_vm8, 0, %v8146_v47  ;;  %v584_v51 = vsel %vm10228_vm8, 0, %v8148_v48  ;;  %v8150_v52 = vld [vmem:[%s10232_s14 + $0x70] sm:$0x1] }
  0x5f   : >> { %8145 = vst [vmem:[%s10232_s14 + $0x58] sm:$0x1] %v578_v49  ;;  %8147 = vst [vmem:[%s10232_s14 + $0x60] sm:$0x1] %v581_v50  ;;  %v587_v53 = vsel %vm10228_vm8, 0, %v8150_v52 }
  0x60   : >> { %8149 = vst [vmem:[%s10232_s14 + $0x68] sm:$0x1] %v584_v51  ;;  %v8152_v54 = vld [vmem:[%s10232_s14 + $0x78] sm:$0x1]  ;;  %v8154_v55 = vld [vmem:[%s10232_s14 + $0x80] sm:$0x1] }
  0x61   : >> { %8151 = vst [vmem:[%s10232_s14 + $0x70] sm:$0x1] %v587_v53  ;;  %v590_v57 = vsel %vm10228_vm8, 0, %v8152_v54  ;;  %v593_v58 = vsel %vm10228_vm8, 0, %v8154_v55  ;;  %v8156_v59 = vld [vmem:[%s10232_s14 + $0x88] sm:$0x1] }
  0x62   : >> { %v8158_v60 = vld [vmem:[%s10232_s14 + $0x90] sm:$0x1]  ;;  %8153 = vst [vmem:[%s10232_s14 + $0x78] sm:$0x1] %v590_v57  ;;  %8155 = vst [vmem:[%s10232_s14 + $0x80] sm:$0x1] %v593_v58 }
  0x63   : >> { %v596_v61 = vsel %vm10228_vm8, 0, %v8156_v59  ;;  %v599_v62 = vsel %vm10228_vm8, 0, %v8158_v60  ;;  %v8164_v63 = vld [vmem:[%s10232_s14 + $0x5c] sm:$0x1]  ;;  %v8166_v0 = vld [vmem:[%s10232_s14 + $0x64] sm:$0x1] }
  0x64   : >> { %8157 = vst [vmem:[%s10232_s14 + $0x88] sm:$0x1] %v596_v61  ;;  %8159 = vst [vmem:[%s10232_s14 + $0x90] sm:$0x1] %v599_v62  ;;  %v610_v2 = vsel %vm10261_vm9, 0, %v8164_v63  ;;  %v613_v3 = vsel %vm10261_vm9, 0, %v8166_v0 }
  0x65   : >> { %v8168_v4 = vld [vmem:[%s10232_s14 + $0x6c] sm:$0x1]  ;;  %v8170_v5 = vld [vmem:[%s10232_s14 + $0x74] sm:$0x1]  ;;  %8165 = vst [vmem:[%s10232_s14 + $0x5c] sm:$0x1] %v610_v2 }
  0x66   : >> { %8167 = vst [vmem:[%s10232_s14 + $0x64] sm:$0x1] %v613_v3  ;;  %v616_v6 = vsel %vm10261_vm9, 0, %v8168_v4  ;;  %v619_v7 = vsel %vm10261_vm9, 0, %v8170_v5  ;;  %v8172_v8 = vld [vmem:[%s10232_s14 + $0x7c] sm:$0x1] }
  0x67   : >> { %v8174_v9 = vld [vmem:[%s10232_s14 + $0x84] sm:$0x1]  ;;  %v8142_v10 = vld [vmem:[%s10232_s14 + $0x50] sm:$0x1]  ;;  %v8160_v11 = vld [vmem:[%s10232_s14 + $0x98] sm:$0x1] }
  0x68   : >> { %v8162_v12 = vld [vmem:[%s10232_s14 + $0x54] sm:$0x1]  ;;  %8169 = vst [vmem:[%s10232_s14 + $0x6c] sm:$0x1] %v616_v6  ;;  %8171 = vst [vmem:[%s10232_s14 + $0x74] sm:$0x1] %v619_v7 }
  0x69   : >> { %v575_v13 = vsel %vm10228_vm8, 0, %v8142_v10  ;;  %v602_v14 = vsel %vm10228_vm8, 0, %v8160_v11  ;;  %v607_v15 = vsel %vm10261_vm9, 0, %v8162_v12  ;;  %v622_v16 = vsel %vm10261_vm9, 0, %v8172_v8  ;;  %v8176_v17 = vld [vmem:[%s10232_s14 + $0x8c] sm:$0x1] }
  0x6a   : >> { %8143 = vst [vmem:[%s10232_s14 + $0x50] sm:$0x1] %v575_v13  ;;  %8161 = vst [vmem:[%s10232_s14 + $0x98] sm:$0x1] %v602_v14  ;;  %v625_v18 = vsel %vm10261_vm9, 0, %v8174_v9  ;;  %v628_v19 = vsel %vm10261_vm9, 0, %v8176_v17 }
  0x6b   : >> { %8163 = vst [vmem:[%s10232_s14 + $0x54] sm:$0x1] %v607_v15  ;;  %8173 = vst [vmem:[%s10232_s14 + $0x7c] sm:$0x1] %v622_v16  ;;  %v8178_v20 = vld [vmem:[%s10232_s14 + $0x94] sm:$0x1] }
  0x6c   : >> { %v8180_v21 = vld [vmem:[%s10232_s14 + $0x9c] sm:$0x1]  ;;  %8175 = vst [vmem:[%s10232_s14 + $0x84] sm:$0x1] %v625_v18  ;;  %8177 = vst [vmem:[%s10232_s14 + $0x8c] sm:$0x1] %v628_v19 }
  0x6d   : >> { %v631_v22 = vsel %vm10261_vm9, 0, %v8178_v20  ;;  %v634_v23 = vsel %vm10261_vm9, 0, %v8180_v21  ;;  %558 = sbr.rel (!%p556_p12) target bundleno = 87 (0x57), region = 182 }
  0x6e   : >> { %8179 = vst [vmem:[%s10232_s14 + $0x94] sm:$0x1] %v631_v22  ;;  %8181 = vst [vmem:[%s10232_s14 + $0x9c] sm:$0x1] %v634_v23 }
  0x72 LB: >> { %s8182_s24 = sshll.u32 %s9773_s15, 6  ;;  %s8191_s25 = smul.u32 80, %s9773_s15  ;;  %vm10355_vm10 = vmand %vm386_vm0, %vm479_vm4  ;;  %s9773_s15 = sphi %s10333_s15, %s642_s15  }
  0x73   : >> { %s10341_s12 = scalar_lea.vmem %s10024_s16, %s8182_s24  ;;  %s642_s15 = sadd.s32 1, %s9773_s15  }
  0x74   : >> { %v645_v25 = vld [vmem:[%s10341_s12] sm:$0xff]  ;;  %v646_v26 = vld [vmem:[%s10341_s12 + $0x8] sm:$0xff]  ;;  %v647_v27 = vld [vmem:[%s10341_s12 + $0x10] sm:$0xff]  ;;  %s10348_s30 = scalar_lea.vmem [#allocation2], %s8191_s25  ;;  %p639_p13 = scmp.ge.s32.totalorder %s642_s15, 8  }
  0x75   : >> { %v9188_v28 = vpack.c.bf16 %v645_v25, %v645_v25  ;;  %v9189_v29 = vpack.c.bf16 %v646_v26, %v646_v26  ;;  %v9190_v30 = vpack.c.bf16 %v647_v27, %v647_v27  ;;  %v648_v35 = vld [vmem:[%s10341_s12 + $0x18] sm:$0xff]  ;;  %v649_v36 = vld [vmem:[%s10341_s12 + $0x20] sm:$0xff]  ;;  %v8200_v57 = vld [vmem:[%s10348_s30 + $0x68] sm:$0xf]  ;;  %s10426_s13 = smov (%p639_p13), 0  }
  0x76   : >> { %v8192_v37 = vld [vmem:[%s10348_s30 + $0x58] sm:$0xf]  ;;  %v9191_v40 = vpack.c.bf16 %v648_v35, %v648_v35  ;;  %v9192_v41 = vpack.c.bf16 %v649_v36, %v649_v36  ;;  %v8194_v43 = vld [vmem:[%s10348_s30 + $0x5c] sm:$0x1]  ;;  %v8196_v46 = vld [vmem:[%s10348_s30 + $0x60] sm:$0xf] }
  0x77   : >> { %v687_v31 = vshrl.u32 %v9188_v28, 16  ;;  %v690_v32 = vshll.u32 %v9188_v28, 16  ;;  %v695_v33 = vshrl.u32 %v9189_v29, 16  ;;  %v698_v34 = vshll.u32 %v9189_v29, 16  ;;  %v8198_v48 = vld [vmem:[%s10348_s30 + $0x64] sm:$0x1] }
  0x78   : >> { %v703_v38 = vshrl.u32 %v9190_v30, 16  ;;  %v706_v39 = vshll.u32 %v9190_v30, 16  ;;  %v711_v50 = vshrl.u32 %v9191_v40, 16  ;;  %v714_v51 = vshll.u32 %v9191_v40, 16  ;;  %v8202_v58 = vld [vmem:[%s10348_s30 + $0x6c] sm:$0x1] }
  0x79   : >> { %v689_v42 = vrot.slane %v687_v31, 7  ;;  %v697_v45 = vrot.slane %v695_v33, 7  ;;  %v719_v52 = vshrl.u32 %v9192_v41, 16  ;;  %v650_v63 = vld [vmem:[%s10341_s12 + $0x28] sm:$0xff]  ;;  %v651_v0 = vld [vmem:[%s10341_s12 + $0x30] sm:$0xff]  ;;  %v652_v8 = vld [vmem:[%s10341_s12 + $0x38] sm:$0xff] }
  0x7a   : >> { %v705_v49 = vrot.slane %v703_v38, 7  ;;  %v713_v61 = vrot.slane %v711_v50, 7  ;;  %v8204_v6 = vld [vmem:[%s10348_s30 + $0x70] sm:$0xf]  ;;  %v8206_v7 = vld [vmem:[%s10348_s30 + $0x74] sm:$0x1]  ;;  %v9193_v16 = vpack.c.bf16 %v650_v63, %v650_v63  ;;  %v9194_v17 = vpack.c.bf16 %v651_v0, %v651_v0 }
  0x7b   : >> { %v692_v53 = vor.u32 %v690_v32, %v689_v42  ;;  %v693_v54 = vrot.slane %v689_v42, 4  ;;  %v700_v55 = vor.u32 %v698_v34, %v697_v45  ;;  %v701_v56 = vrot.slane %v697_v45, 4  ;;  %v8210_v13 = vld [vmem:[%s10348_s30 + $0x7c] sm:$0x1]  ;;  %v8208_v20 = vld [vmem:[%s10348_s30 + $0x78] sm:$0xf] }
  0x7c   : >> { %v708_v59 = vor.u32 %v706_v39, %v705_v49  ;;  %v709_v60 = vrot.slane %v705_v49, 4  ;;  %v721_v62 = vrot.slane %v719_v52, 7  ;;  %v716_v11 = vor.u32 %v714_v51, %v713_v61  ;;  %v8212_v33 = vld [vmem:[%s10348_s30 + $0x80] sm:$0xf]  ;;  %v8214_v34 = vld [vmem:[%s10348_s30 + $0x84] sm:$0x1] }
  0x7d   : >> { %v774_v2 = vsel %vm10355_vm10, %v692_v53, %v8192_v37  ;;  %v780_v3 = vsel %vm10037_vm3, %v693_v54, %v8194_v43  ;;  %v783_v4 = vsel %vm10355_vm10, %v700_v55, %v8196_v46  ;;  %v786_v5 = vsel %vm10037_vm3, %v701_v56, %v8198_v48  ;;  %v8216_v36 = vld [vmem:[%s10348_s30 + $0x88] sm:$0xf]  ;;  %v8218_v37 = vld [vmem:[%s10348_s30 + $0x8c] sm:$0x1]  ;;  %v8222_v42 = vld [vmem:[%s10348_s30 + $0x94] sm:$0x1] }
  0x7e   : >> { %8193 = vst [vmem:[%s10348_s30 + $0x58] sm:$0xf] %v774_v2  ;;  %8195 = vst [vmem:[%s10348_s30 + $0x5c] sm:$0x1] %v780_v3  ;;  %v789_v9 = vsel %vm10355_vm10, %v708_v59, %v8200_v57  ;;  %v792_v10 = vsel %vm10037_vm3, %v709_v60, %v8202_v58  ;;  %v717_v12 = vrot.slane %v713_v61, 4  ;;  %v722_v14 = vshll.u32 %v9192_v41, 16 }
  0x7f   : >> { %8197 = vst [vmem:[%s10348_s30 + $0x60] sm:$0xf] %v783_v4  ;;  %8199 = vst [vmem:[%s10348_s30 + $0x64] sm:$0x1] %v786_v5  ;;  %v725_v15 = vrot.slane %v721_v62, 4  ;;  %v795_v18 = vsel %vm10355_vm10, %v716_v11, %v8204_v6  ;;  %v9195_v21 = vpack.c.bf16 %v652_v8, %v652_v8  ;;  %v727_v25 = vshrl.u32 %v9193_v16, 16 }
  0x80   : >> { %8201 = vst [vmem:[%s10348_s30 + $0x68] sm:$0xf] %v789_v9  ;;  %8203 = vst [vmem:[%s10348_s30 + $0x6c] sm:$0x1] %v792_v10  ;;  %v798_v19 = vsel %vm10037_vm3, %v717_v12, %v8206_v7  ;;  %v724_v22 = vor.u32 %v722_v14, %v721_v62  ;;  %v730_v26 = vshll.u32 %v9193_v16, 16  ;;  %v735_v27 = vshrl.u32 %v9194_v17, 16 }
  0x81   : >> { %8205 = vst [vmem:[%s10348_s30 + $0x70] sm:$0xf] %v795_v18  ;;  %8207 = vst [vmem:[%s10348_s30 + $0x74] sm:$0x1] %v798_v19  ;;  %v804_v23 = vsel %vm10037_vm3, %v725_v15, %v8210_v13  ;;  %v738_v28 = vshll.u32 %v9194_v17, 16  ;;  %v743_v29 = vshrl.u32 %v9195_v21, 16 }
  0x82   : >> { %8211 = vst [vmem:[%s10348_s30 + $0x7c] sm:$0x1] %v804_v23  ;;  %v746_v30 = vshll.u32 %v9195_v21, 16  ;;  %v801_v31 = vsel %vm10355_vm10, %v724_v22, %v8208_v20  ;;  %v729_v32 = vrot.slane %v727_v25, 7  ;;  %v737_v35 = vrot.slane %v735_v27, 7 }
  0x83   : >> { %8209 = vst [vmem:[%s10348_s30 + $0x78] sm:$0xf] %v801_v31  ;;  %v745_v38 = vrot.slane %v743_v29, 7  ;;  %v8220_v41 = vld [vmem:[%s10348_s30 + $0x90] sm:$0xf] }
  0x84   : >> { %v732_v39 = vor.u32 %v730_v26, %v729_v32  ;;  %v733_v40 = vrot.slane %v729_v32, 4  ;;  %v740_v43 = vor.u32 %v738_v28, %v737_v35  ;;  %v741_v45 = vrot.slane %v737_v35, 4 }
  0x85   : >> { %v748_v46 = vor.u32 %v746_v30, %v745_v38  ;;  %v749_v48 = vrot.slane %v745_v38, 4  ;;  %641 = sbr.rel (!%p639_p13) target bundleno = 114 (0x72), region = 193 }
  0x86   : >> { %v807_v49 = vsel %vm10355_vm10, %v732_v39, %v8212_v33  ;;  %v810_v50 = vsel %vm10037_vm3, %v733_v40, %v8214_v34  ;;  %v813_v51 = vsel %vm10355_vm10, %v740_v43, %v8216_v36  ;;  %v816_v52 = vsel %vm10037_vm3, %v741_v45, %v8218_v37 }
  0x87   : >> { %8213 = vst [vmem:[%s10348_s30 + $0x80] sm:$0xf] %v807_v49  ;;  %8215 = vst [vmem:[%s10348_s30 + $0x84] sm:$0x1] %v810_v50  ;;  %v819_v53 = vsel %vm10355_vm10, %v748_v46, %v8220_v41  ;;  %v822_v54 = vsel %vm10037_vm3, %v749_v48, %v8222_v42 }
  0x88   : >> { %8217 = vst [vmem:[%s10348_s30 + $0x88] sm:$0xf] %v813_v51  ;;  %8219 = vst [vmem:[%s10348_s30 + $0x8c] sm:$0x1] %v816_v52 }
  0x89   : >> { %8221 = vst [vmem:[%s10348_s30 + $0x90] sm:$0xf] %v819_v53  ;;  %8223 = vst [vmem:[%s10348_s30 + $0x94] sm:$0x1] %v822_v54 }
  0x8a LB: >> { %vm865_vm11 = vsmask.f32 3328  ;;  %s9196_s14 = smul.u32 80, %s9777_s13  ;;  %vm866_vm12 = vsmask.f32 7440  ;;  %vm1045_vm14 = vcmask 1042432   ;;  %s9777_s13 = sphi %s10426_s13, %s829_s13  }
  0x8b   : >> { %vm10447_vm13 = vmor %vm865_vm11, %vm866_vm12  ;;  %s9791_s15 = smov 4   ;;  %vm1046_vm15 = vcmask 1046532   ;;  %s9792_s25 = smov 8   ;;  %vm1004_vm2 = vcmask 60448   ;;  %vm1104_vm3 = vcmask 93248   ;;  %vm1156_vm5 = vcmask 126048  }
  0x8c   : >> { %s10434_s24 = scalar_lea.vmem [#allocation2], %s9196_s14  ;;  %vm10482_vm1 = vmor %vm1045_vm14, %vm1046_vm15  ;;  %s9793_s12 = smov 12   ;;  %vm1317_vm9 = vcmask 158848   ;;  %vm1414_vm10 = vcmask 191648   ;;  %vm1466_vm11 = vcmask 224448   ;;  %vm1627_vm12 = vcmask 257248  }
  0x8d   : >> { %s9794_s30 = smov 16   ;;  %vm1724_vm14 = vcmask 290048   ;;  %vm1777_vm15 = vcmask 322848   ;;  %s13557_s1 = sld [smem:[#allocation11_spill]] }
  0x8e   : >> { %s13558_s2 = sld [smem:[#allocation12_spill]]  ;;  %s829_s13 = sadd.s32 1, %s9777_s13  }
  0x8f   : >> { %p826_p0 = scmp.ge.s32.totalorder %s829_s13, 8  }
  0x90   : >> { %v853_v1 = vld [vmem:[%s10434_s24 + $0x10] sm:$0xf]  ;;  %v854_v47 = vld [vmem:[%s10434_s24 + $0x14] sm:$0x1]  ;;  %v849_v55 = vld [vmem:[%s10434_s24] sm:$0xf] }
  0x91   : >> { %v897_v56 = vshrl.u32 %v853_v1, 16  ;;  %v900_v57 = vshll.u32 %v853_v1, 16  ;;  %v906_v58 = vshll.u32 %v854_v47, 16  ;;  %v850_v59 = vld [vmem:[%s10434_s24 + $0x4] sm:$0x1]  ;;  %v869_v60 = vshrl.u32 %v849_v55, 16 }
  0x92   : >> { %v872_v61 = vshll.u32 %v849_v55, 16  ;;  %v878_v62 = vshll.u32 %v850_v59, 16  ;;  %v855_v63 = vld [vmem:[%s10434_s24 + $0x18] sm:$0xf]  ;;  %v856_v0 = vld [vmem:[%s10434_s24 + $0x1c] sm:$0x1] }
  0x93   : >> { %v899_v2 = vrot.slane %v897_v56, 4  ;;  %v902_v3 = vrot.slane %v900_v57, 5  ;;  %v908_v4 = vrot.slane %v906_v58, 5  ;;  %v871_v5 = vrot.slane %v869_v60, 4  ;;  %v851_v6 = vld [vmem:[%s10434_s24 + $0x8] sm:$0xf] }
  0x94   : >> { %v874_v7 = vrot.slane %v872_v61, 5  ;;  %v880_v8 = vrot.slane %v878_v62, 5  ;;  %v911_v9 = vshrl.u32 %v855_v63, 16  ;;  %v914_v10 = vshll.u32 %v855_v63, 16  ;;  %v852_v11 = vld [vmem:[%s10434_s24 + $0xc] sm:$0x1] }
  0x95   : >> { %v903_v12 = vor.u32 %v902_v3, %v899_v2  ;;  %v920_v13 = vshll.u32 %v856_v0, 16  ;;  %v883_v14 = vshrl.u32 %v851_v6, 16  ;;  %v886_v15 = vshll.u32 %v851_v6, 16  ;;  %v859_v16 = vld [vmem:[%s10434_s24 + $0x28] sm:$0xf] }
  0x96   : >> { %v875_v18 = vor.u32 %v874_v7, %v871_v5  ;;  %v913_v19 = vrot.slane %v911_v9, 4  ;;  %v916_v20 = vrot.slane %v914_v10, 5  ;;  %v892_v21 = vshll.u32 %v852_v11, 16  ;;  %v860_v22 = vld [vmem:[%s10434_s24 + $0x2c] sm:$0x1] }
  0x97   : >> { %v904_v23 = vrot.slane %v903_v12, 4  ;;  %v922_v25 = vrot.slane %v920_v13, 5  ;;  %v885_v26 = vrot.slane %v883_v14, 4  ;;  %v888_v27 = vrot.slane %v886_v15, 5  ;;  %v857_v28 = vld [vmem:[%s10434_s24 + $0x20] sm:$0xf] }
  0x98   : >> { %v876_v29 = vrot.slane %v875_v18, 4  ;;  %v917_v30 = vor.u32 %v916_v20, %v913_v19  ;;  %v894_v31 = vrot.slane %v892_v21, 5  ;;  %v939_v32 = vshrl.u32 %v859_v16, 16  ;;  %v858_v37 = vld [vmem:[%s10434_s24 + $0x24] sm:$0x1] }
  0x99   : >> { %v909_v33 = vsel %vm10447_vm13, %v904_v23, %v908_v4  ;;  %v889_v34 = vor.u32 %v888_v27, %v885_v26  ;;  %v942_v35 = vshll.u32 %v859_v16, 16  ;;  %v948_v36 = vshll.u32 %v860_v22, 16  ;;  %v863_v38 = vld [vmem:[%s10434_s24 + $0x38] sm:$0xf]  ;;  %v864_v43 = vld [vmem:[%s10434_s24 + $0x3c] sm:$0x1] }
  0x9a   : >> { %984 = vrot.lane.b32.xlu1 %v909_v33, %s9791_s15  ;;  %v881_v39 = vsel %vm10447_vm13, %v876_v29, %v880_v8  ;;  %v918_v40 = vrot.slane %v917_v30, 4  ;;  %v941_v41 = vrot.slane %v939_v32, 4  ;;  %v925_v42 = vshrl.u32 %v857_v28, 16  ;;  %v861_v50 = vld [vmem:[%s10434_s24 + $0x30] sm:$0xf] }
  0x9b   : >> { %980 = vrot.lane.b32.xlu0 %v881_v39, %s9791_s15  ;;  %v890_v45 = vrot.slane %v889_v34, 4  ;;  %v944_v46 = vrot.slane %v942_v35, 5  ;;  %v950_v48 = vrot.slane %v948_v36, 5  ;;  %v928_v49 = vshll.u32 %v857_v28, 16  ;;  %v862_v57 = vld [vmem:[%s10434_s24 + $0x34] sm:$0x1] }
  0x9c   : >> { %v923_v51 = vsel %vm10447_vm13, %v918_v40, %v922_v25  ;;  %v927_v52 = vrot.slane %v925_v42, 4  ;;  %v934_v53 = vshll.u32 %v858_v37, 16  ;;  %v967_v54 = vshrl.u32 %v863_v38, 16  ;;  %v1015_v3 = vld [vmem:[%s10434_s24 + $0x8] sm:$0xe] }
  0x9d   : >> { %v895_v1 = vsel %vm10447_vm13, %v890_v45, %v894_v31  ;;  %v945_v47 = vor.u32 %v944_v46, %v941_v41  ;;  %v930_v55 = vrot.slane %v928_v49, 5  ;;  %v970_v56 = vshll.u32 %v863_v38, 16  ;;  %v1016_v7 = vld [vmem:[%s10434_s24 + $0xc] sm:$0x1]  ;;  %v1013_v14 = vld [vmem:[%s10434_s24] sm:$0xe] }
  0x9e   : >> { %986 = vrot.lane.b32.xlu1 %v923_v51, %s9791_s15  ;;  %v936_v58 = vrot.slane %v934_v53, 5  ;;  %v969_v59 = vrot.slane %v967_v54, 4  ;;  %v976_v60 = vshll.u32 %v864_v43, 16  ;;  %v953_v61 = vshrl.u32 %v861_v50, 16  ;;  %v1014_v15 = vld [vmem:[%s10434_s24 + $0x4] sm:$0x1] }
  0x9f   : >> { %982 = vrot.lane.b32.xlu0 %v895_v1, %s9791_s15  ;;  %v946_v62 = vrot.slane %v945_v47, 4  ;;  %v931_v63 = vor.u32 %v930_v55, %v927_v52  ;;  %v972_v0 = vrot.slane %v970_v56, 5  ;;  %v956_v2 = vshll.u32 %v861_v50, 16  ;;  %v1019_v22 = vld [vmem:[%s10434_s24 + $0x18] sm:$0xe] }
  0xa0   : >> { %v978_v4 = vrot.slane %v976_v60, 5  ;;  %v955_v5 = vrot.slane %v953_v61, 4  ;;  %v962_v6 = vshll.u32 %v862_v57, 16  ;;  %v8226_v13 = vrot.slane %v1015_v3, 9  ;;  %v1020_v23 = vld [vmem:[%s10434_s24 + $0x1c] sm:$0x1] }
  0xa1   : >> { %v951_v8 = vsel %vm10447_vm13, %v946_v62, %v950_v48  ;;  %v932_v9 = vrot.slane %v931_v63, 4  ;;  %v973_v10 = vor.u32 %v972_v0, %v969_v59  ;;  %v958_v11 = vrot.slane %v956_v2, 5  ;;  %v1017_v29 = vld [vmem:[%s10434_s24 + $0x10] sm:$0xe]  ;;  %v1018_v30 = vld [vmem:[%s10434_s24 + $0x14] sm:$0x1] }
  0xa2   : >> { %990 = vrot.lane.b32.xlu1 %v951_v8, %s9791_s15  ;;  %v964_v12 = vrot.slane %v962_v6, 5  ;;  %v1054_v20 = vrot.slane %v1016_v7, 5  ;;  %v8225_v27 = vrot.slane %v1013_v14, 9  ;;  %v1050_v28 = vrot.slane %v1014_v15, 5  ;;  %v1023_v35 = vld [vmem:[%s10434_s24 + $0x28] sm:$0xe] }
  0xa3   : >> { %v937_v16 = vsel %vm10447_vm13, %v932_v9, %v936_v58  ;;  %v974_v18 = vrot.slane %v973_v10, 4  ;;  %v959_v19 = vor.u32 %v958_v11, %v955_v5  ;;  %v8228_v33 = vrot.slane %v1019_v22, 9  ;;  %v1024_v36 = vld [vmem:[%s10434_s24 + $0x2c] sm:$0x1]  ;;  %v1021_v40 = vld [vmem:[%s10434_s24 + $0x20] sm:$0xe] }
  0xa4   : >> { %988 = vrot.lane.b32.xlu0 %v937_v16, %s9791_s15  ;;  %v1055_v32 = vsel %vm10482_vm1, %v8226_v13, %v1054_v20  ;;  %v1062_v34 = vrot.slane %v1020_v23, 5  ;;  %v1051_v37 = vsel %vm10482_vm1, %v8225_v27, %v1050_v28  ;;  %v8227_v38 = vrot.slane %v1017_v29, 9  ;;  %v1022_v41 = vld [vmem:[%s10434_s24 + $0x24] sm:$0x1]  ;;  %v1027_v46 = vld [vmem:[%s10434_s24 + $0x38] sm:$0xe] }
  0xa5   : >> { %v979_v25 = vsel %vm10447_vm13, %v974_v18, %v978_v4  ;;  %v960_v26 = vrot.slane %v959_v19, 4  ;;  %v1058_v39 = vrot.slane %v1018_v30, 5  ;;  %v8230_v43 = vrot.slane %v1023_v35, 9  ;;  %v1028_v48 = vld [vmem:[%s10434_s24 + $0x3c] sm:$0x1] }
  0xa6   : >> { %994 = vrot.lane.b32.xlu1 %v979_v25, %s9791_s15  ;;  %v1063_v42 = vsel %vm10482_vm1, %v8228_v33, %v1062_v34  ;;  %v1070_v45 = vrot.slane %v1024_v36, 5  ;;  %v8229_v50 = vrot.slane %v1021_v40, 9  ;;  %v1066_v51 = vrot.slane %v1022_v41, 5  ;;  %v1025_v52 = vld [vmem:[%s10434_s24 + $0x30] sm:$0xe] }
  0xa7   : >> { %v965_v31 = vsel %vm10447_vm13, %v960_v26, %v964_v12  ;;  %v1059_v49 = vsel %vm10482_vm1, %v8227_v38, %v1058_v39  ;;  %v1026_v53 = vld [vmem:[%s10434_s24 + $0x34] sm:$0x1]  ;;  %v8232_v1 = vrot.slane %v1027_v46, 9  ;;  %v1078_v47 = vrot.slane %v1028_v48, 5  ;;  %v8244_v59 = vld [vmem:[%s10434_s24 + $0x10] sm:$0xf] }
  0xa8   : >> { %992 = vrot.lane.b32.xlu0 %v965_v31, %s9791_s15  ;;  %v1071_v54 = vsel %vm10482_vm1, %v8230_v43, %v1070_v45  ;;  %v1067_v55 = vsel %vm10482_vm1, %v8229_v50, %v1066_v51  ;;  %v8231_v56 = vrot.slane %v1025_v52, 9  ;;  %v1074_v57 = vrot.slane %v1026_v53, 5  ;;  %v8242_v61 = vld [vmem:[%s10434_s24 + $0x8] sm:$0xf]  ;;  %v8235_v0 = vld [vmem:[%s10434_s24 + $0x10] sm:$0xf] }
  0xa9   : >> { %v1079_v58 = vsel %vm10482_vm1, %v8232_v1, %v1078_v47  ;;  %v1196_v62 = vshrl.u32 %v8244_v59, 16  ;;  %v1199_v63 = vshll.u32 %v8244_v59, 16  ;;  %v8248_v2 = vld [vmem:[%s10434_s24 + $0x20] sm:$0xf]  ;;  %v1182_v3 = vshrl.u32 %v8242_v61, 16  ;;  %s9795_s15 = smov 20  }
  0xaa   : >> { %1082 = vrot.lane.b32.xlu1 %v1055_v32, %s9792_s25  ;;  %v1075_v60 = vsel %vm10482_vm1, %v8231_v56, %v1074_v57  ;;  %v1185_v4 = vshll.u32 %v8242_v61, 16  ;;  %v8234_v5 = vld [vmem:[%s10434_s24 + $0x8] sm:$0xf]  ;;  %v8246_v6 = vld [vmem:[%s10434_s24 + $0x18] sm:$0xf]  ;;  %v1224_v9 = vshrl.u32 %v8248_v2, 16 }
  0xab   : >> { %v1198_v7 = vrot.slane %v1196_v62, 4  ;;  %v1201_v8 = vrot.slane %v1199_v63, 5  ;;  %v1227_v10 = vshll.u32 %v8248_v2, 16  ;;  %v8237_v11 = vld [vmem:[%s10434_s24 + $0x20] sm:$0xf]  ;;  %v1184_v13 = vrot.slane %v1182_v3, 4 }
  0xac   : >> { %1080 = vrot.lane.b32.xlu0 %v1051_v37, %s9792_s25  ;;  %v8245_v12 = vld [vmem:[%s10434_s24 + $0x14] sm:$0x1]  ;;  %v1187_v14 = vrot.slane %v1185_v4, 5  ;;  %v1210_v15 = vshrl.u32 %v8246_v6, 16  ;;  %v1213_v16 = vshll.u32 %v8246_v6, 16  ;;  %v1226_v26 = vrot.slane %v1224_v9, 4 }
  0xad   : >> { %v8252_v18 = vld [vmem:[%s10434_s24 + $0x30] sm:$0xf]  ;;  %v8236_v19 = vld [vmem:[%s10434_s24 + $0x18] sm:$0xf]  ;;  %v8243_v22 = vld [vmem:[%s10434_s24 + $0xc] sm:$0x1]  ;;  %v1202_v23 = vor.u32 %v1201_v8, %v1198_v7 }
  0xae   : >> { %1086 = vrot.lane.b32.xlu1 %v1063_v42, %s9792_s25  ;;  %v8239_v20 = vld [vmem:[%s10434_s24 + $0x30] sm:$0xf]  ;;  %v1205_v25 = vshll.u32 %v8245_v12, 16  ;;  %v1229_v27 = vrot.slane %v1227_v10, 5  ;;  %v8250_v28 = vld [vmem:[%s10434_s24 + $0x28] sm:$0xf]  ;;  %v1188_v33 = vor.u32 %v1187_v14, %v1184_v13 }
  0xaf   : >> { %v8238_v29 = vld [vmem:[%s10434_s24 + $0x28] sm:$0xf]  ;;  %v8249_v30 = vld [vmem:[%s10434_s24 + $0x24] sm:$0x1]  ;;  %v1252_v31 = vshrl.u32 %v8252_v18, 16  ;;  %v1255_v32 = vshll.u32 %v8252_v18, 16 }
  0xb0   : >> { %1084 = vrot.lane.b32.xlu0 %v1059_v49, %s9792_s25  ;;  %v1191_v34 = vshll.u32 %v8243_v22, 16  ;;  %v1212_v35 = vrot.slane %v1210_v15, 4  ;;  %v1215_v36 = vrot.slane %v1213_v16, 5  ;;  %v8256_v37 = vld [vmem:[%s10434_s24 + $0x40] sm:$0xf]  ;;  %v1238_v40 = vshrl.u32 %v8250_v28, 16 }
  0xb1   : >> { %v8241_v38 = vld [vmem:[%s10434_s24 + $0x40] sm:$0xf]  ;;  %v8247_v39 = vld [vmem:[%s10434_s24 + $0x1c] sm:$0x1]  ;;  %v1241_v41 = vshll.u32 %v8250_v28, 16  ;;  %v1203_v42 = vrot.slane %v1202_v23, 4  ;;  %v1230_v45 = vor.u32 %v1229_v27, %v1226_v26 }
  0xb2   : >> { %1090 = vrot.lane.b32.xlu1 %v1071_v54, %s9792_s25  ;;  %v1207_v43 = vrot.slane %v1205_v25, 5  ;;  %v1233_v46 = vshll.u32 %v8249_v30, 16  ;;  %v8254_v48 = vld [vmem:[%s10434_s24 + $0x38] sm:$0xf]  ;;  %v8253_v49 = vld [vmem:[%s10434_s24 + $0x34] sm:$0x1]  ;;  %v1216_v47 = vor.u32 %v1215_v36, %v1212_v35 }
  0xb3   : >> { %v1254_v50 = vrot.slane %v1252_v31, 4  ;;  %v1257_v51 = vrot.slane %v1255_v32, 5  ;;  %v1280_v52 = vshrl.u32 %v8256_v37, 16  ;;  %v1283_v53 = vshll.u32 %v8256_v37, 16  ;;  %v8240_v56 = vld [vmem:[%s10434_s24 + $0x38] sm:$0xf] }
  0xb4   : >> { %1088 = vrot.lane.b32.xlu0 %v1067_v55, %s9792_s25  ;;  %v1189_v54 = vrot.slane %v1188_v33, 4  ;;  %v1193_v1 = vrot.slane %v1191_v34, 5  ;;  %v1219_v55 = vshll.u32 %v8247_v39, 16  ;;  %v1240_v57 = vrot.slane %v1238_v40, 4  ;;  %v8257_v9 = vld [vmem:[%s10434_s24 + $0x44] sm:$0x1] }
  0xb5   : >> { %v1266_v59 = vshrl.u32 %v8254_v48, 16  ;;  %v1208_v61 = vsel %vm10447_vm13, %v1203_v42, %v1207_v43  ;;  %v1235_v62 = vrot.slane %v1233_v46, 5  ;;  %v1261_v63 = vshll.u32 %v8253_v49, 16  ;;  %v8255_v15 = vld [vmem:[%s10434_s24 + $0x3c] sm:$0x1] }
  0xb6   : >> { %1094 = vrot.lane.b32.xlu1 %v1079_v58, %s9792_s25  ;;  %v1243_v58 = vrot.slane %v1241_v41, 5  ;;  %v1231_v2 = vrot.slane %v1230_v45, 4  ;;  %v1258_v3 = vor.u32 %v1257_v51, %v1254_v50  ;;  %v1282_v4 = vrot.slane %v1280_v52, 4  ;;  %v8260_v31 = vld [vmem:[%s10434_s24 + $0x10] sm:$0xe] }
  0xb7   : >> { %v1194_v6 = vsel %vm10447_vm13, %v1189_v54, %v1193_v1  ;;  %v1217_v7 = vrot.slane %v1216_v47, 4  ;;  %v1221_v8 = vrot.slane %v1219_v55, 5  ;;  %v1268_v12 = vrot.slane %v1266_v59, 4  ;;  %v8261_v32 = vld [vmem:[%s10434_s24 + $0x14] sm:$0x1] }
  0xb8   : >> { %1092 = vrot.lane.b32.xlu0 %v1075_v60, %s9792_s25  ;;  %v1269_v60 = vshll.u32 %v8254_v48, 16  ;;  %v1244_v10 = vor.u32 %v1243_v58, %v1240_v57  ;;  %v1263_v14 = vrot.slane %v1261_v63, 5  ;;  %v1236_v16 = vsel %vm10447_vm13, %v1231_v2, %v1235_v62  ;;  %v8258_v36 = vld [vmem:[%s10434_s24 + $0x8] sm:$0xe]  ;;  %v8259_v37 = vld [vmem:[%s10434_s24 + $0xc] sm:$0x1] }
  0xb9   : >> { %v1259_v18 = vrot.slane %v1258_v3, 4  ;;  %v1222_v22 = vsel %vm10447_vm13, %v1217_v7, %v1221_v8  ;;  %v1275_v27 = vshll.u32 %v8255_v15, 16  ;;  %v8275_v39 = vrot.slane %v8260_v31, 9  ;;  %v8264_v41 = vld [vmem:[%s10434_s24 + $0x20] sm:$0xe]  ;;  %s9796_s25 = smov 24  }
  0xba   : >> { %1134 = vrot.lane.b32.xlu1 %v8235_v0, %s9793_s12  ;;  %v8251_v0 = vld [vmem:[%s10434_s24 + $0x2c] sm:$0x1]  ;;  %v1271_v13 = vrot.slane %v1269_v60, 5  ;;  %v1245_v23 = vrot.slane %v1244_v10, 4  ;;  %v1364_v40 = vrot.slane %v8261_v32, 5  ;;  %v8274_v45 = vrot.slane %v8258_v36, 9 }
  0xbb   : >> { %v1264_v28 = vsel %vm10447_vm13, %v1259_v18, %v1263_v14  ;;  %v1277_v35 = vrot.slane %v1275_v27, 5  ;;  %v8265_v42 = vld [vmem:[%s10434_s24 + $0x24] sm:$0x1]  ;;  %v1360_v46 = vrot.slane %v8259_v37, 5  ;;  %v835_v48 = vld [vmem:[%s10434_s24 + $0x10] sm:$0xf] }
  0xbc   : >> { %1132 = vrot.lane.b32.xlu0 %v8234_v5, %s9793_s12  ;;  %v1285_v5 = vrot.slane %v1283_v53, 5  ;;  %v1272_v26 = vor.u32 %v1271_v13, %v1268_v12  ;;  %v8262_v49 = vld [vmem:[%s10434_s24 + $0x18] sm:$0xe]  ;;  %v8263_v50 = vld [vmem:[%s10434_s24 + $0x1c] sm:$0x1]  ;;  %v1365_v52 = vsel %vm10482_vm1, %v8275_v39, %v1364_v40  ;;  %v8277_v53 = vrot.slane %v8264_v41, 9 }
  0xbd   : >> { %843 = vst.msk [vmem:[#allocation4 + $0x8] sm:$0xf] %vm386_vm0, %v835_v48  ;;  %v833_v51 = vld [vmem:[%s10434_s24] sm:$0xf]  ;;  %v1372_v54 = vrot.slane %v8265_v42, 5  ;;  %v1361_v55 = vsel %vm10482_vm1, %v8274_v45, %v1360_v46  ;;  %v1368_v57 = vrot.slane %v8263_v50, 5 }
  0xbe   : >> { %1138 = vrot.lane.b32.xlu1 %v8237_v11, %s9793_s12  ;;  %v1247_v11 = vshll.u32 %v8251_v0, 16  ;;  %v1273_v34 = vrot.slane %v1272_v26, 4  ;;  %841 = vst.msk [vmem:[#allocation4] sm:$0xf] %vm386_vm0, %v833_v51  ;;  %v8268_v1 = vld [vmem:[%s10434_s24 + $0x30] sm:$0xe] }
  0xbf   : >> { %v8269_v47 = vld [vmem:[%s10434_s24 + $0x34] sm:$0x1]  ;;  %v836_v58 = vld [vmem:[%s10434_s24 + $0x18] sm:$0xf]  ;;  %v8266_v59 = vld [vmem:[%s10434_s24 + $0x28] sm:$0xe]  ;;  %v1373_v62 = vsel %vm10482_vm1, %v8277_v53, %v1372_v54 }
  0xc0   : >> { %1136 = vrot.lane.b32.xlu0 %v8236_v19, %s9793_s12  ;;  %v1286_v19 = vor.u32 %v1285_v5, %v1282_v4  ;;  %v1249_v25 = vrot.slane %v1247_v11, 5  ;;  %v1278_v43 = vsel %vm10447_vm13, %v1273_v34, %v1277_v35  ;;  %v8267_v60 = vld [vmem:[%s10434_s24 + $0x2c] sm:$0x1]  ;;  %844 = vst.msk [vmem:[#allocation4 + $0xc] sm:$0xf] %vm386_vm0, %v836_v58  ;;  %v8279_v63 = vrot.slane %v8268_v1, 9 }
  0xc1   : >> { %v1380_v0 = vrot.slane %v8269_v47, 5  ;;  %v8272_v2 = vld [vmem:[%s10434_s24 + $0x40] sm:$0xe]  ;;  %v8273_v3 = vld [vmem:[%s10434_s24 + $0x44] sm:$0x1]  ;;  %v8278_v5 = vrot.slane %v8266_v59, 9 }
  0xc2   : >> { %1142 = vrot.lane.b32.xlu1 %v8239_v20, %s9793_s12  ;;  %v1289_v20 = vshll.u32 %v8257_v9, 16  ;;  %v1250_v33 = vsel %vm10447_vm13, %v1245_v23, %v1249_v25  ;;  %v838_v7 = vld [vmem:[%s10434_s24 + $0x28] sm:$0xf]  ;;  %v837_v8 = vld [vmem:[%s10434_s24 + $0x20] sm:$0xf]  ;;  %v8281_v12 = vrot.slane %v8272_v2, 9 }
  0xc3   : >> { %v8270_v9 = vld [vmem:[%s10434_s24 + $0x38] sm:$0xe]  ;;  %v8271_v10 = vld [vmem:[%s10434_s24 + $0x3c] sm:$0x1]  ;;  %846 = vst.msk [vmem:[#allocation4 + $0x14] sm:$0xf] %vm386_vm0, %v838_v7  ;;  %v1381_v11 = vsel %vm10482_vm1, %v8279_v63, %v1380_v0 }
  0xc4   : >> { %1140 = vrot.lane.b32.xlu0 %v8238_v29, %s9793_s12  ;;  %v1287_v29 = vrot.slane %v1286_v19, 4  ;;  %v1291_v30 = vrot.slane %v1289_v20, 5  ;;  %845 = vst.msk [vmem:[#allocation4 + $0x10] sm:$0xf] %vm386_vm0, %v837_v8  ;;  %v1388_v13 = vrot.slane %v8273_v3, 5  ;;  %v8280_v18 = vrot.slane %v8270_v9, 9 }
  0xc5   : >> { %v840_v14 = vld [vmem:[%s10434_s24 + $0x38] sm:$0xf]  ;;  %v839_v15 = vld [vmem:[%s10434_s24 + $0x30] sm:$0xf]  ;;  %v1384_v19 = vrot.slane %v8271_v10, 5 }
  0xc6   : >> { %1146 = vrot.lane.b32.xlu1 %v8241_v38, %s9793_s12  ;;  %v1292_v38 = vsel %vm10447_vm13, %v1287_v29, %v1291_v30  ;;  %848 = vst.msk [vmem:[#allocation4 + $0x1c] sm:$0xf] %vm386_vm0, %v840_v14  ;;  %847 = vst.msk [vmem:[#allocation4 + $0x18] sm:$0xf] %vm386_vm0, %v839_v15  ;;  %v1389_v20 = vsel %vm10482_vm1, %v8281_v12, %v1388_v13  ;;  %v8291_v25 = vld [vmem:[%s10434_s24 + $0x10] sm:$0xf] }
  0xc7   : >> { %v1385_v23 = vsel %vm10482_vm1, %v8280_v18, %v1384_v19  ;;  %v8297_v29 = vld [vmem:[%s10434_s24 + $0x28] sm:$0xf]  ;;  %v1492_v30 = vshrl.u32 %v8291_v25, 16  ;;  %v1495_v31 = vshll.u32 %v8291_v25, 16  ;;  %v8283_v32 = vld [vmem:[%s10434_s24 + $0x10] sm:$0xf] }
  0xc8   : >> { %1144 = vrot.lane.b32.xlu0 %v8240_v56, %s9793_s12  ;;  %v8276_v56 = vrot.slane %v8262_v49, 9  ;;  %v1534_v36 = vshrl.u32 %v8297_v29, 16  ;;  %v1537_v37 = vshll.u32 %v8297_v29, 16  ;;  %v8294_v39 = vld [vmem:[%s10434_s24 + $0x1c] sm:$0x1]  ;;  %s9797_s12 = smov 28  }
  0xc9   : >> { %v1494_v40 = vrot.slane %v1492_v30, 4  ;;  %v1497_v41 = vrot.slane %v1495_v31, 5  ;;  %v8301_v45 = vld [vmem:[%s10434_s24 + $0x38] sm:$0xf]  ;;  %v8285_v46 = vld [vmem:[%s10434_s24 + $0x20] sm:$0xf] }
  0xca   : >> { %1295 = vrot.lane.b32.xlu1 %v1208_v61, %s9794_s30  ;;  %v834_v61 = vld [vmem:[%s10434_s24 + $0x8] sm:$0xf]  ;;  %v1369_v4 = vsel %vm10482_vm1, %v8276_v56, %v1368_v57  ;;  %v8288_v48 = vld [vmem:[%s10434_s24 + $0x38] sm:$0xf]  ;;  %v8292_v49 = vld [vmem:[%s10434_s24 + $0x14] sm:$0x1] }
  0xcb   : >> { %842 = vst.msk [vmem:[#allocation4 + $0x4] sm:$0xf] %vm386_vm0, %v834_v61  ;;  %v1515_v51 = vshll.u32 %v8294_v39, 16  ;;  %v1539_v53 = vrot.slane %v1537_v37, 5  ;;  %v8299_v54 = vld [vmem:[%s10434_s24 + $0x30] sm:$0xf]  ;;  %v1498_v57 = vor.u32 %v1497_v41, %v1494_v40 }
  0xcc   : >> { %1293 = vrot.lane.b32.xlu0 %v1194_v6, %s9794_s30  ;;  %v1376_v6 = vrot.slane %v8267_v60, 5  ;;  %v8287_v1 = vld [vmem:[%s10434_s24 + $0x30] sm:$0xf]  ;;  %v8298_v47 = vld [vmem:[%s10434_s24 + $0x2c] sm:$0x1]  ;;  %v1565_v56 = vshll.u32 %v8301_v45, 16 }
  0xcd   : >> { %v1501_v58 = vshll.u32 %v8292_v49, 16  ;;  %v8305_v61 = vld [vmem:[%s10434_s24 + $0x48] sm:$0xf]  ;;  %v8296_v63 = vld [vmem:[%s10434_s24 + $0x24] sm:$0x1]  ;;  %v1548_v0 = vshrl.u32 %v8299_v54, 16 }
  0xce   : >> { %1299 = vrot.lane.b32.xlu1 %v1236_v16, %s9794_s30  ;;  %v1377_v16 = vsel %vm10482_vm1, %v8278_v5, %v1376_v6  ;;  %v1551_v2 = vshll.u32 %v8299_v54, 16  ;;  %v1543_v6 = vshll.u32 %v8298_v47, 16  ;;  %v8303_v7 = vld [vmem:[%s10434_s24 + $0x40] sm:$0xf]  ;;  %v8302_v8 = vld [vmem:[%s10434_s24 + $0x3c] sm:$0x1] }
  0xcf   : >> { %v1567_v10 = vrot.slane %v1565_v56, 5  ;;  %v1593_v12 = vshll.u32 %v8305_v61, 16  ;;  %v1499_v13 = vrot.slane %v1498_v57, 4  ;;  %v1503_v14 = vrot.slane %v1501_v58, 5  ;;  %v8289_v18 = vld [vmem:[%s10434_s24 + $0x40] sm:$0xf] }
  0xd0   : >> { %1297 = vrot.lane.b32.xlu0 %v1222_v22, %s9794_s30  ;;  %v8293_v22 = vld [vmem:[%s10434_s24 + $0x18] sm:$0xf]  ;;  %v1550_v19 = vrot.slane %v1548_v0, 4  ;;  %v8310_v56 = vld [vmem:[%s10434_s24 + $0x1c] sm:$0x1] }
  0xd1   : >> { %v1506_v26 = vshrl.u32 %v8293_v22, 16  ;;  %v1509_v27 = vshll.u32 %v8293_v22, 16  ;;  %v1576_v22 = vshrl.u32 %v8303_v7, 16  ;;  %v1674_v0 = vrot.slane %v8310_v56, 5  ;;  %v8347_v56 = vld [vmem:[%s10434_s24 + $0x70] sm:$0xf] }
  0xd2   : >> { %1303 = vrot.lane.b32.xlu1 %v1264_v28, %s9794_s30  ;;  %v8284_v28 = vld [vmem:[%s10434_s24 + $0x18] sm:$0xf] }
  0xd3   : >> { %v1508_v34 = vrot.slane %v1506_v26, 4  ;;  %v1511_v35 = vrot.slane %v1509_v27, 5  ;;  %v1545_v26 = vrot.slane %v1543_v6, 5  ;;  %v1571_v27 = vshll.u32 %v8302_v8, 16  ;;  %v8316_v8 = vld [vmem:[%s10434_s24 + $0x34] sm:$0x1] }
  0xd4   : >> { %1301 = vrot.lane.b32.xlu0 %v1250_v33, %s9794_s30  ;;  %v8295_v33 = vld [vmem:[%s10434_s24 + $0x20] sm:$0xf]  ;;  %v1578_v39 = vrot.slane %v1576_v22, 4 }
  0xd5   : >> { %v1520_v42 = vshrl.u32 %v8295_v33, 16  ;;  %v1512_v50 = vor.u32 %v1511_v35, %v1508_v34  ;;  %v1573_v41 = vrot.slane %v1571_v27, 5  ;;  %v8322_v27 = vld [vmem:[%s10434_s24 + $0x4c] sm:$0x1] }
  0xd6   : >> { %1307 = vrot.lane.b32.xlu1 %v1292_v38, %s9794_s30  ;;  %v8286_v38 = vld [vmem:[%s10434_s24 + $0x28] sm:$0xf] }
  0xd7   : >> { %v1522_v59 = vrot.slane %v1520_v42, 4  ;;  %v1513_v3 = vrot.slane %v1512_v50, 4  ;;  %v8304_v42 = vld [vmem:[%s10434_s24 + $0x44] sm:$0x1] }
  0xd8   : >> { %1305 = vrot.lane.b32.xlu0 %v1278_v43, %s9794_s30  ;;  %v1523_v43 = vshll.u32 %v8295_v33, 16  ;;  %v1504_v33 = vsel %vm10447_vm13, %v1499_v13, %v1503_v14  ;;  %v8314_v13 = vld [vmem:[%s10434_s24 + $0x2c] sm:$0x1]  ;;  %s9798_s30 = smov 32  }
  0xda   : >> { %1392 = vrot.lane.b32.xlu1 %v1365_v52, %s9795_s15  ;;  %v1536_v52 = vrot.slane %v1534_v36, 4  ;;  %v1525_v60 = vrot.slane %v1523_v43, 5  ;;  %v8306_v36 = vld [vmem:[%s10434_s24 + $0x4c] sm:$0x1] }
  0xdc   : >> { %1390 = vrot.lane.b32.xlu0 %v1361_v55, %s9795_s15  ;;  %v1562_v55 = vshrl.u32 %v8301_v45, 16  ;;  %v1540_v5 = vor.u32 %v1539_v53, %v1536_v52  ;;  %v1526_v15 = vor.u32 %v1525_v60, %v1522_v59  ;;  %v1585_v53 = vshll.u32 %v8304_v42, 16  ;;  %v8307_v60 = vld [vmem:[%s10434_s24 + $0x10] sm:$0xe] }
  0xde   : >> { %1396 = vrot.lane.b32.xlu1 %v1373_v62, %s9795_s15  ;;  %v8290_v62 = vld [vmem:[%s10434_s24 + $0x48] sm:$0xf]  ;;  %v1564_v9 = vrot.slane %v1562_v55, 4  ;;  %v1541_v29 = vrot.slane %v1540_v5, 4  ;;  %v1527_v34 = vrot.slane %v1526_v15, 4  ;;  %v1587_v59 = vrot.slane %v1585_v53, 5 }
  0xdf   : >> { %v8309_v55 = vld [vmem:[%s10434_s24 + $0x18] sm:$0xe]  ;;  %v8323_v5 = vrot.slane %v8307_v60, 9 }
  0xe0   : >> { %1394 = vrot.lane.b32.xlu0 %v1369_v4, %s9795_s15  ;;  %v1517_v4 = vrot.slane %v1515_v51, 5  ;;  %v1568_v30 = vor.u32 %v1567_v10, %v1564_v9  ;;  %v1546_v43 = vsel %vm10447_vm13, %v1541_v29, %v1545_v26  ;;  %v8321_v26 = vld [vmem:[%s10434_s24 + $0x48] sm:$0xe]  ;;  %v8349_v53 = vld [vmem:[%s10434_s24 + $0x78] sm:$0xf] }
  0xe1   : >> { %v1873_v60 = vshrl.u32 %v8349_v53, 16 }
  0xe2   : >> { %1400 = vrot.lane.b32.xlu1 %v1381_v11, %s9795_s15  ;;  %v1590_v11 = vshrl.u32 %v8305_v61, 16  ;;  %v1518_v25 = vsel %vm10447_vm13, %v1513_v3, %v1517_v4  ;;  %v1569_v45 = vrot.slane %v1568_v30, 4  ;;  %v8308_v61 = vld [vmem:[%s10434_s24 + $0x14] sm:$0x1]  ;;  %v8318_v3 = vld [vmem:[%s10434_s24 + $0x3c] sm:$0x1] }
  0xe3   : >> { %v1670_v6 = vrot.slane %v8308_v61, 5  ;;  %v1876_v61 = vshll.u32 %v8349_v53, 16 }
  0xe4   : >> { %1398 = vrot.lane.b32.xlu0 %v1377_v16, %s9795_s15  ;;  %v1529_v16 = vshll.u32 %v8296_v63, 16  ;;  %v1592_v31 = vrot.slane %v1590_v11, 4  ;;  %v1574_v54 = vsel %vm10447_vm13, %v1569_v45, %v1573_v41  ;;  %v8324_v63 = vrot.slane %v8309_v55, 9  ;;  %v8331_v55 = vld [vmem:[%s10434_s24 + $0x50] sm:$0xf] }
  0xe5   : >> { %v1690_v11 = vrot.slane %v8318_v3, 5  ;;  %v1671_v14 = vsel %vm10482_vm1, %v8323_v5, %v1670_v6  ;;  %v1862_v5 = vshll.u32 %v8347_v56, 16  ;;  %v8345_v6 = vld [vmem:[%s10434_s24 + $0x68] sm:$0xf] }
  0xe6   : >> { %1404 = vrot.lane.b32.xlu1 %v1389_v20, %s9795_s15  ;;  %v1553_v20 = vrot.slane %v1551_v2, 5  ;;  %v1531_v35 = vrot.slane %v1529_v16, 5  ;;  %v8317_v2 = vld [vmem:[%s10434_s24 + $0x38] sm:$0xe]  ;;  %v1675_v9 = vsel %vm10482_vm1, %v8324_v63, %v1674_v0  ;;  %v1686_v16 = vrot.slane %v8316_v8, 5 }
  0xe7   : >> { %v8328_v10 = vrot.slane %v8317_v2, 9  ;;  %v8342_v63 = vld [vmem:[%s10434_s24 + $0x5c] sm:$0x1]  ;;  %v8334_v8 = vld [vmem:[%s10434_s24 + $0x68] sm:$0xf] }
  0xe8   : >> { %1402 = vrot.lane.b32.xlu0 %v1385_v23, %s9795_s15  ;;  %v1579_v23 = vshll.u32 %v8303_v7, 16  ;;  %v1554_v37 = vor.u32 %v1553_v20, %v1550_v19  ;;  %v1532_v49 = vsel %vm10447_vm13, %v1527_v34, %v1531_v35  ;;  %v8315_v7 = vld [vmem:[%s10434_s24 + $0x30] sm:$0xe]  ;;  %v8312_v19 = vld [vmem:[%s10434_s24 + $0x24] sm:$0x1]  ;;  %v8330_v35 = vrot.slane %v8321_v26, 9 }
  0xe9   : >> { %v8327_v15 = vrot.slane %v8315_v7, 9  ;;  %v1691_v20 = vsel %vm10482_vm1, %v8328_v10, %v1690_v11  ;;  %s9799_s15 = smov 36   ;;  %v8335_v7 = vld [vmem:[%s10434_s24 + $0x70] sm:$0xf] }
  0xea   : >> { %1444 = vrot.lane.b32.xlu1 %v8284_v28, %s9796_s25  ;;  %v8300_v28 = vld [vmem:[%s10434_s24 + $0x34] sm:$0x1]  ;;  %v1581_v40 = vrot.slane %v1579_v23, 5  ;;  %v1555_v50 = vrot.slane %v1554_v37, 4  ;;  %v1682_v23 = vrot.slane %v8314_v13, 5  ;;  %v1875_v13 = vrot.slane %v1873_v60, 4 }
  0xeb   : >> { %v1687_v29 = vsel %vm10482_vm1, %v8327_v15, %v1686_v16  ;;  %v8343_v15 = vld [vmem:[%s10434_s24 + $0x60] sm:$0xf] }
  0xec   : >> { %1442 = vrot.lane.b32.xlu0 %v8283_v32, %s9796_s25  ;;  %v1595_v32 = vrot.slane %v1593_v12, 5  ;;  %v1582_v52 = vor.u32 %v1581_v40, %v1578_v39  ;;  %v8313_v12 = vld [vmem:[%s10434_s24 + $0x28] sm:$0xe]  ;;  %v8333_v16 = vld [vmem:[%s10434_s24 + $0x60] sm:$0xf] }
  0xed   : >> { %v8326_v22 = vrot.slane %v8313_v12, 9  ;;  %v1826_v12 = vshll.u32 %v8342_v63, 16 }
  0xee   : >> { %1448 = vrot.lane.b32.xlu1 %v8286_v38, %s9796_s25  ;;  %v1557_v38 = vshll.u32 %v8300_v28, 16  ;;  %v1583_v58 = vrot.slane %v1582_v52, 4  ;;  %v8332_v52 = vld [vmem:[%s10434_s24 + $0x58] sm:$0xf] }
  0xef   : >> { %v1683_v34 = vsel %vm10482_vm1, %v8326_v22, %v1682_v23 }
  0xf0   : >> { %1446 = vrot.lane.b32.xlu0 %v8285_v46, %s9796_s25  ;;  %v1596_v46 = vor.u32 %v1595_v32, %v1592_v31  ;;  %v1559_v51 = vrot.slane %v1557_v38, 5  ;;  %v1588_v4 = vsel %vm10447_vm13, %v1583_v58, %v1587_v59  ;;  %v1678_v31 = vrot.slane %v8312_v19, 5  ;;  %v8319_v32 = vld [vmem:[%s10434_s24 + $0x40] sm:$0xe] }
  0xf1   : >> { %v8329_v40 = vrot.slane %v8319_v32, 9  ;;  %v1845_v19 = vshrl.u32 %v8345_v6, 16  ;;  %v1834_v32 = vshll.u32 %v8343_v15, 16 }
  0xf2   : >> { %1452 = vrot.lane.b32.xlu1 %v8288_v48, %s9796_s25  ;;  %v1599_v48 = vshll.u32 %v8306_v36, 16  ;;  %v1560_v57 = vsel %vm10447_vm13, %v1555_v50, %v1559_v51  ;;  %v1698_v36 = vrot.slane %v8322_v27, 5  ;;  %v1864_v27 = vrot.slane %v1862_v5, 5 }
  0xf3   : >> { %v1836_v53 = vrot.slane %v1834_v32, 5 }
  0xf4   : >> { %1450 = vrot.lane.b32.xlu0 %v8287_v1, %s9796_s25  ;;  %v1597_v1 = vrot.slane %v1596_v46, 4  ;;  %v1601_v47 = vrot.slane %v1599_v48, 5  ;;  %v1699_v42 = vsel %vm10482_vm1, %v8330_v35, %v1698_v36  ;;  %v8339_v48 = vld [vmem:[%s10434_s24 + $0x50] sm:$0xf]  ;;  %v1828_v35 = vrot.slane %v1826_v12, 5 }
  0xf6   : >> { %1456 = vrot.lane.b32.xlu1 %v8290_v62, %s9796_s25  ;;  %v1602_v62 = vsel %vm10447_vm13, %v1597_v1, %v1601_v47  ;;  %v1803_v1 = vshrl.u32 %v8339_v48, 16  ;;  %v1806_v47 = vshll.u32 %v8339_v48, 16 }
  0xf8   : >> { %1454 = vrot.lane.b32.xlu0 %v8289_v18, %s9796_s25  ;;  %v8311_v18 = vld [vmem:[%s10434_s24 + $0x20] sm:$0xe]  ;;  %v1805_v2 = vrot.slane %v1803_v1, 4  ;;  %v1808_v3 = vrot.slane %v1806_v47, 5  ;;  %s9800_s25 = smov 40  }
  0xf9   : >> { %v8325_v30 = vrot.slane %v8311_v18, 9  ;;  %v8350_v18 = vld [vmem:[%s10434_s24 + $0x7c] sm:$0x1] }
  0xfa   : >> { %1605 = vrot.lane.b32.xlu1 %v1518_v25, %s9797_s12  ;;  %v1809_v23 = vor.u32 %v1808_v3, %v1805_v2 }
  0xfb   : >> { %v1679_v39 = vsel %vm10482_vm1, %v8325_v30, %v1678_v31  ;;  %v8348_v30 = vld [vmem:[%s10434_s24 + $0x74] sm:$0x1]  ;;  %v1831_v31 = vshrl.u32 %v8343_v15, 16 }
  0xfc   : >> { %1603 = vrot.lane.b32.xlu0 %v1504_v33, %s9797_s12  ;;  %v8320_v33 = vld [vmem:[%s10434_s24 + $0x44] sm:$0x1] }
  0xfd   : >> { %v1694_v41 = vrot.slane %v8320_v33, 5 }
  0xfe   : >> { %1609 = vrot.lane.b32.xlu1 %v1546_v43, %s9797_s12  ;;  %v8341_v43 = vld [vmem:[%s10434_s24 + $0x58] sm:$0xf] }
  0xff   : >> { %v1695_v46 = vsel %vm10482_vm1, %v8329_v40, %v1694_v41  ;;  %v1817_v50 = vshrl.u32 %v8341_v43, 16  ;;  %v1820_v51 = vshll.u32 %v8341_v43, 16  ;;  %v1847_v40 = vrot.slane %v1845_v19, 4 }
 0x100   : >> { %1607 = vrot.lane.b32.xlu0 %v1532_v49, %s9797_s12 }
 0x101   : >> { %v1819_v58 = vrot.slane %v1817_v50, 4  ;;  %v1822_v59 = vrot.slane %v1820_v51, 5  ;;  %v1868_v50 = vshll.u32 %v8348_v30, 16  ;;  %v8337_v51 = vld [vmem:[%s10434_s24 + $0x80] sm:$0xf] }
 0x102   : >> { %1613 = vrot.lane.b32.xlu1 %v1574_v54, %s9797_s12  ;;  %v8357_v30 = vld [vmem:[%s10434_s24 + $0x58] sm:$0xe] }
 0x103   : >> { %v1823_v11 = vor.u32 %v1822_v59, %v1819_v58  ;;  %v8344_v58 = vld [vmem:[%s10434_s24 + $0x64] sm:$0x1]  ;;  %v1870_v3 = vrot.slane %v1868_v50, 5  ;;  %v8363_v50 = vld [vmem:[%s10434_s24 + $0x70] sm:$0xe] }
 0x104   : >> { %1611 = vrot.lane.b32.xlu0 %v1560_v57, %s9797_s12 }
 0x106   : >> { %1617 = vrot.lane.b32.xlu1 %v1602_v62, %s9797_s12  ;;  %v8336_v62 = vld [vmem:[%s10434_s24 + $0x78] sm:$0xf] }
 0x108   : >> { %1615 = vrot.lane.b32.xlu0 %v1588_v4, %s9797_s12  ;;  %v1859_v4 = vshrl.u32 %v8347_v56, 16  ;;  %s9801_s12 = smov 44  }
 0x10a   : >> { %1702 = vrot.lane.b32.xlu1 %v1675_v9, %s9798_s30  ;;  %v8340_v9 = vld [vmem:[%s10434_s24 + $0x54] sm:$0x1]  ;;  %v1861_v26 = vrot.slane %v1859_v4, 4  ;;  %v8354_v4 = vld [vmem:[%s10434_s24 + $0x8c] sm:$0x1] }
 0x10b   : >> { %v1910_v15 = vshll.u32 %v8354_v4, 16  ;;  %v8370_v4 = vld [vmem:[%s10434_s24 + $0x8c] sm:$0x1] }
 0x10c   : >> { %1700 = vrot.lane.b32.xlu0 %v1671_v14, %s9798_s30  ;;  %v985_v25 = vpop.permute.xlu1 %984  ;;  %v1878_v14 = vrot.slane %v1876_v61, 5 }
 0x10d   : >> { %1007 = vst.msk [vmem:[#allocation4 + $0x8] sm:$0xf] %vm1004_vm2, %v985_v25  ;;  %v981_v28 = vpop.permute.xlu0 %980  ;;  %v1812_v25 = vshll.u32 %v8340_v9, 16 }
 0x10e   : >> { %1005 = vst.msk [vmem:[#allocation4] sm:$0xf] %vm1004_vm2, %v981_v28  ;;  %1710 = vrot.lane.b32.xlu1 %v1691_v20, %s9798_s30  ;;  %v1848_v20 = vshll.u32 %v8345_v6, 16  ;;  %v8353_v28 = vld [vmem:[%s10434_s24 + $0x88] sm:$0xf]  ;;  %v1879_v36 = vor.u32 %v1878_v14, %v1875_v13  ;;  %v1840_v6 = vshll.u32 %v8344_v58, 16 }
 0x10f   : >> { %v1904_v43 = vshll.u32 %v8353_v28, 16  ;;  %v1814_v48 = vrot.slane %v1812_v25, 5 }
 0x110   : >> { %1708 = vrot.lane.b32.xlu0 %v1687_v29, %s9798_s30  ;;  %v987_v37 = vpop.permute.xlu1 %986  ;;  %v8338_v29 = vld [vmem:[%s10434_s24 + $0x88] sm:$0xf]  ;;  %v1850_v41 = vrot.slane %v1848_v20, 5  ;;  %v1880_v59 = vrot.slane %v1879_v36, 4  ;;  %v1842_v20 = vrot.slane %v1840_v6, 5 }
 0x111   : >> { %1008 = vst.msk [vmem:[#allocation4 + $0xc] sm:$0xf] %vm1004_vm2, %v987_v37  ;;  %v983_v38 = vpop.permute.xlu0 %982  ;;  %v1882_v37 = vshll.u32 %v8350_v18, 16  ;;  %v8355_v36 = vld [vmem:[%s10434_s24 + $0x50] sm:$0xe] }
 0x112   : >> { %1006 = vst.msk [vmem:[#allocation4 + $0x4] sm:$0xf] %vm1004_vm2, %v983_v38  ;;  %1706 = vrot.lane.b32.xlu1 %v1683_v34, %s9798_s30  ;;  %v1824_v34 = vrot.slane %v1823_v11, 4  ;;  %v8351_v38 = vld [vmem:[%s10434_s24 + $0x80] sm:$0xf]  ;;  %v1851_v60 = vor.u32 %v1850_v41, %v1847_v40 }
 0x113   : >> { %v1890_v1 = vshll.u32 %v8351_v38, 16  ;;  %v1884_v56 = vrot.slane %v1882_v37, 5  ;;  %v8352_v11 = vld [vmem:[%s10434_s24 + $0x84] sm:$0x1]  ;;  %v8356_v37 = vld [vmem:[%s10434_s24 + $0x54] sm:$0x1] }
 0x114   : >> { %1704 = vrot.lane.b32.xlu0 %v1679_v39, %s9798_s30  ;;  %v991_v45 = vpop.permute.xlu1 %990  ;;  %v8346_v39 = vld [vmem:[%s10434_s24 + $0x6c] sm:$0x1]  ;;  %v1852_v13 = vrot.slane %v1851_v60, 4  ;;  %v8359_v60 = vld [vmem:[%s10434_s24 + $0x60] sm:$0xe] }
 0x115   : >> { %1010 = vst.msk [vmem:[#allocation4 + $0x14] sm:$0xf] %vm1004_vm2, %v991_v45  ;;  %v1885_v12 = vsel %vm10447_vm13, %v1880_v59, %v1884_v56  ;;  %v8373_v6 = vrot.slane %v8359_v60, 9  ;;  %v8399_v60 = vld [vmem:[%s10434_s24 + $0x84] sm:$0x1] }
 0x116   : >> { %v989_v49 = vpop.permute.xlu0 %988  ;;  %1714 = vrot.lane.b32.xlu1 %v1699_v42, %s9798_s30  ;;  %v1901_v42 = vshrl.u32 %v8353_v28, 16  ;;  %v1912_v28 = vrot.slane %v1910_v15, 5 }
 0x117   : >> { %1009 = vst.msk [vmem:[#allocation4 + $0x10] sm:$0xf] %vm1004_vm2, %v989_v49  ;;  %v1865_v49 = vor.u32 %v1864_v27, %v1861_v26 }
 0x118   : >> { %1712 = vrot.lane.b32.xlu0 %v1695_v46, %s9798_s30  ;;  %v995_v54 = vpop.permute.xlu1 %994  ;;  %v1810_v46 = vrot.slane %v1809_v23, 4  ;;  %v1903_v61 = vrot.slane %v1901_v42, 4  ;;  %v1896_v23 = vshll.u32 %v8352_v11, 16  ;;  %v8365_v42 = vld [vmem:[%s10434_s24 + $0x78] sm:$0xe]  ;;  %s9802_s30 = smov 48  }
 0x119   : >> { %1012 = vst.msk [vmem:[#allocation4 + $0x1c] sm:$0xf] %vm1004_vm2, %v995_v54  ;;  %v1887_v54 = vshrl.u32 %v8351_v38, 16  ;;  %v1866_v2 = vrot.slane %v1865_v49, 4 }
 0x11a   : >> { %v993_v57 = vpop.permute.xlu0 %992  ;;  %1755 = vrot.lane.b32.xlu1 %v8332_v52, %s9799_s15  ;;  %v1833_v52 = vrot.slane %v1831_v31, 4  ;;  %v8358_v31 = vld [vmem:[%s10434_s24 + $0x5c] sm:$0x1] }
 0x11b   : >> { %1011 = vst.msk [vmem:[#allocation4 + $0x18] sm:$0xf] %vm1004_vm2, %v993_v57  ;;  %v1854_v57 = vshll.u32 %v8346_v39, 16  ;;  %v1871_v18 = vsel %vm10447_vm13, %v1866_v2, %v1870_v3  ;;  %v8372_v39 = vrot.slane %v8357_v30, 9  ;;  %v1985_v40 = vrot.slane %v8358_v31, 5 }
 0x11c   : >> { %1753 = vrot.lane.b32.xlu0 %v8331_v55, %s9799_s15  ;;  %v1083_v0 = vpop.permute.xlu1 %1082  ;;  %v1829_v55 = vsel %vm10447_vm13, %v1824_v34, %v1828_v35  ;;  %v1837_v5 = vor.u32 %v1836_v53, %v1833_v52  ;;  %v1898_v34 = vrot.slane %v1896_v23, 5  ;;  %v8376_v53 = vrot.slane %v8365_v42, 9  ;;  %v8369_v3 = vld [vmem:[%s10434_s24 + $0x88] sm:$0xe]  ;;  %v8381_v30 = vld [vmem:[%s10434_s24 + $0x60] sm:$0xf] }
 0x11d   : >> { %1106 = vst.msk [vmem:[#allocation4 + $0x4] sm:$0xf] %vm1104_vm3, %v1083_v0  ;;  %v1815_v0 = vsel %vm10447_vm13, %v1810_v46, %v1814_v48  ;;  %v8371_v46 = vrot.slane %v8355_v36, 9  ;;  %v1981_v48 = vrot.slane %v8356_v37, 5  ;;  %v1986_v52 = vsel %vm10482_vm1, %v8372_v39, %v1985_v40  ;;  %v8398_v31 = vld [vmem:[%s10434_s24 + $0x80] sm:$0xf] }
 0x11e   : >> { %v1081_v10 = vpop.permute.xlu0 %1080  ;;  %1763 = vrot.lane.b32.xlu1 %v8336_v62, %s9799_s15  ;;  %v1906_v62 = vrot.slane %v1904_v43, 5  ;;  %v1838_v19 = vrot.slane %v1837_v5, 4  ;;  %v8366_v43 = vld [vmem:[%s10434_s24 + $0x7c] sm:$0x1]  ;;  %v8396_v36 = vld [vmem:[%s10434_s24 + $0x78] sm:$0xf] }
 0x11f   : >> { %1105 = vst.msk [vmem:[#allocation4] sm:$0xf] %vm1104_vm3, %v1081_v10  ;;  %v1856_v10 = vrot.slane %v1854_v57, 5  ;;  %v1982_v56 = vsel %vm10482_vm1, %v8371_v46, %v1981_v48  ;;  %v8375_v57 = vrot.slane %v8363_v50, 9  ;;  %v2183_v40 = vshrl.u32 %v8398_v31, 16 }
 0x120   : >> { %1761 = vrot.lane.b32.xlu0 %v8335_v7, %s9799_s15  ;;  %v1087_v22 = vpop.permute.xlu1 %1086  ;;  %v1889_v7 = vrot.slane %v1887_v54, 4  ;;  %v1907_v14 = vor.u32 %v1906_v62, %v1903_v61  ;;  %v1843_v32 = vsel %vm10447_vm13, %v1838_v19, %v1842_v20  ;;  %v2001_v54 = vrot.slane %v8366_v43, 5  ;;  %v8360_v61 = vld [vmem:[%s10434_s24 + $0x64] sm:$0x1]  ;;  %v8385_v42 = vld [vmem:[%s10434_s24 + $0x80] sm:$0xf] }
 0x121   : >> { %1108 = vst.msk [vmem:[#allocation4 + $0xc] sm:$0xf] %vm1104_vm3, %v1087_v22  ;;  %v1857_v26 = vsel %vm10447_vm13, %v1852_v13, %v1856_v10  ;;  %v8368_v10 = vld [vmem:[%s10434_s24 + $0x84] sm:$0x1]  ;;  %v2009_v13 = vrot.slane %v8370_v4, 5  ;;  %v2172_v50 = vshll.u32 %v8396_v36, 16 }
 0x122   : >> { %v1085_v33 = vpop.permute.xlu0 %1084  ;;  %1759 = vrot.lane.b32.xlu1 %v8334_v8, %s9799_s15  ;;  %v1892_v8 = vrot.slane %v1890_v1, 5  ;;  %v1908_v27 = vrot.slane %v1907_v14, 4  ;;  %v2002_v62 = vsel %vm10482_vm1, %v8376_v53, %v2001_v54  ;;  %v8391_v43 = vld [vmem:[%s10434_s24 + $0x64] sm:$0x1]  ;;  %v8383_v53 = vld [vmem:[%s10434_s24 + $0x70] sm:$0xf] }
 0x123   : >> { %1107 = vst.msk [vmem:[#allocation4 + $0x8] sm:$0xf] %vm1104_vm3, %v1085_v33  ;;  %v8389_v54 = vld [vmem:[%s10434_s24 + $0x5c] sm:$0x1]  ;;  %v2174_v4 = vrot.slane %v2172_v50, 5  ;;  %vm1938_vm2 = vcmask 355648  }
 0x124   : >> { %1757 = vrot.lane.b32.xlu0 %v8333_v16, %s9799_s15  ;;  %v1091_v45 = vpop.permute.xlu1 %1090  ;;  %v1893_v22 = vor.u32 %v1892_v8, %v1889_v7  ;;  %v1913_v38 = vsel %vm10447_vm13, %v1908_v27, %v1912_v28  ;;  %v1989_v7 = vrot.slane %v8360_v61, 5 }
 0x125   : >> { %1110 = vst.msk [vmem:[#allocation4 + $0x14] sm:$0xf] %vm1104_vm3, %v1091_v45 }
 0x126   : >> { %v1089_v47 = vpop.permute.xlu0 %1088  ;;  %1767 = vrot.lane.b32.xlu1 %v8338_v29, %s9799_s15  ;;  %v1894_v33 = vrot.slane %v1893_v22, 4  ;;  %v1990_v15 = vsel %vm10482_vm1, %v8373_v6, %v1989_v7  ;;  %v8390_v22 = vld [vmem:[%s10434_s24 + $0x60] sm:$0xf]  ;;  %v8387_v6 = vld [vmem:[%s10434_s24 + $0x90] sm:$0xf] }
 0x127   : >> { %1109 = vst.msk [vmem:[#allocation4 + $0x10] sm:$0xf] %vm1104_vm3, %v1089_v47  ;;  %v8361_v47 = vld [vmem:[%s10434_s24 + $0x68] sm:$0xe]  ;;  %v2127_v28 = vshrl.u32 %v8390_v22, 16 }
 0x128   : >> { %1765 = vrot.lane.b32.xlu0 %v8337_v51, %s9799_s15  ;;  %v1095_v63 = vpop.permute.xlu1 %1094  ;;  %v1899_v45 = vsel %vm10447_vm13, %v1894_v33, %v1898_v34  ;;  %v8364_v51 = vld [vmem:[%s10434_s24 + $0x74] sm:$0x1]  ;;  %v8397_v7 = vld [vmem:[%s10434_s24 + $0x7c] sm:$0x1]  ;;  %s9803_s15 = smov 52  }
 0x129   : >> { %1112 = vst.msk [vmem:[#allocation4 + $0x1c] sm:$0xf] %vm1104_vm3, %v1095_v63  ;;  %v1997_v58 = vrot.slane %v8364_v51, 5  ;;  %v8374_v63 = vrot.slane %v8361_v47, 9  ;;  %v8394_v51 = vld [vmem:[%s10434_s24 + $0x70] sm:$0xf] }
 0x12a   : >> { %v1093_v9 = vpop.permute.xlu0 %1092  ;;  %1916 = vrot.lane.b32.xlu1 %v1829_v55, %s9800_s25  ;;  %v8362_v55 = vld [vmem:[%s10434_s24 + $0x6c] sm:$0x1]  ;;  %v2155_v61 = vshrl.u32 %v8394_v51, 16 }
 0x12b   : >> { %1111 = vst.msk [vmem:[#allocation4 + $0x18] sm:$0xf] %vm1104_vm3, %v1093_v9  ;;  %v1998_v5 = vsel %vm10482_vm1, %v8375_v57, %v1997_v58  ;;  %v8367_v9 = vld [vmem:[%s10434_s24 + $0x80] sm:$0xe]  ;;  %v8392_v58 = vld [vmem:[%s10434_s24 + $0x68] sm:$0xf] }
 0x12c   : >> { %1914 = vrot.lane.b32.xlu0 %v1815_v0, %s9800_s25  ;;  %v1135_v16 = vpop.permute.xlu1 %1134  ;;  %v1993_v0 = vrot.slane %v8362_v55, 5  ;;  %v2136_v55 = vshll.u32 %v8391_v43, 16  ;;  %vm2035_vm3 = vcmask 388448  }
 0x12d   : >> { %1158 = vst.msk [vmem:[#allocation4 + $0x4] sm:$0xf] %vm1156_vm5, %v1135_v16  ;;  %v8377_v16 = vrot.slane %v8367_v9, 9  ;;  %v2144_v9 = vshll.u32 %v8392_v58, 16 }
 0x12e   : >> { %v1133_v25 = vpop.permute.xlu0 %1132  ;;  %1924 = vrot.lane.b32.xlu1 %v1885_v12, %s9800_s25  ;;  %v1994_v11 = vsel %vm10482_vm1, %v8374_v63, %v1993_v0  ;;  %v8378_v12 = vrot.slane %v8369_v3, 9 }
 0x12f   : >> { %1157 = vst.msk [vmem:[#allocation4] sm:$0xf] %vm1156_vm5, %v1133_v25 }
 0x130   : >> { %1922 = vrot.lane.b32.xlu0 %v1871_v18, %s9800_s25  ;;  %v1139_v29 = vpop.permute.xlu1 %1138  ;;  %v2005_v18 = vrot.slane %v8368_v10, 5  ;;  %v2010_v20 = vsel %vm10482_vm1, %v8378_v12, %v2009_v13  ;;  %v2138_v12 = vrot.slane %v2136_v55, 5 }
 0x131   : >> { %1160 = vst.msk [vmem:[#allocation4 + $0xc] sm:$0xf] %vm1156_vm5, %v1139_v29  ;;  %v2130_v29 = vshll.u32 %v8390_v22, 16 }
 0x132   : >> { %v1137_v35 = vpop.permute.xlu0 %1136  ;;  %1920 = vrot.lane.b32.xlu1 %v1857_v26, %s9800_s25  ;;  %v2006_v25 = vsel %vm10482_vm1, %v8377_v16, %v2005_v18  ;;  %v8388_v26 = vld [vmem:[%s10434_s24 + $0x58] sm:$0xf]  ;;  %v8395_v16 = vld [vmem:[%s10434_s24 + $0x74] sm:$0x1]  ;;  %v2157_v18 = vrot.slane %v2155_v61, 4 }
 0x133   : >> { %1159 = vst.msk [vmem:[#allocation4 + $0x8] sm:$0xf] %vm1156_vm5, %v1137_v35  ;;  %v2113_v33 = vshrl.u32 %v8388_v26, 16  ;;  %v2116_v34 = vshll.u32 %v8388_v26, 16  ;;  %v8380_v35 = vld [vmem:[%s10434_s24 + $0x58] sm:$0xf] }
 0x134   : >> { %1918 = vrot.lane.b32.xlu0 %v1843_v32, %s9800_s25  ;;  %v1143_v41 = vpop.permute.xlu1 %1142  ;;  %v2132_v39 = vrot.slane %v2130_v29, 5  ;;  %v8386_v29 = vld [vmem:[%s10434_s24 + $0x88] sm:$0xf] }
 0x135   : >> { %1162 = vst.msk [vmem:[#allocation4 + $0x14] sm:$0xf] %vm1156_vm5, %v1143_v41  ;;  %v2186_v41 = vshll.u32 %v8398_v31, 16  ;;  %v2115_v46 = vrot.slane %v2113_v33, 4  ;;  %v2118_v48 = vrot.slane %v2116_v34, 5  ;;  %v2146_v31 = vrot.slane %v2144_v9, 5 }
 0x136   : >> { %v1141_v49 = vpop.permute.xlu0 %1140  ;;  %1928 = vrot.lane.b32.xlu1 %v1913_v38, %s9800_s25  ;;  %v2129_v38 = vrot.slane %v2127_v28, 4  ;;  %v2178_v28 = vshll.u32 %v8397_v7, 16  ;;  %v8406_v7 = vld [vmem:[%s10434_s24 + $0x60] sm:$0xe] }
 0x137   : >> { %1161 = vst.msk [vmem:[#allocation4 + $0x10] sm:$0xf] %vm1156_vm5, %v1141_v49  ;;  %v2169_v49 = vshrl.u32 %v8396_v36, 16  ;;  %v2188_v57 = vrot.slane %v2186_v41, 5  ;;  %v2119_v0 = vor.u32 %v2118_v48, %v2115_v46 }
 0x138   : >> { %1926 = vrot.lane.b32.xlu0 %v1899_v45, %s9800_s25  ;;  %v1147_v1 = vpop.permute.xlu1 %1146  ;;  %v2133_v47 = vor.u32 %v2132_v39, %v2129_v38  ;;  %v8393_v38 = vld [vmem:[%s10434_s24 + $0x6c] sm:$0x1]  ;;  %v2180_v48 = vrot.slane %v2178_v28, 5  ;;  %v8412_v28 = vld [vmem:[%s10434_s24 + $0x78] sm:$0xe]  ;;  %s9804_s25 = smov 56  }
 0x139   : >> { %1164 = vst.msk [vmem:[#allocation4 + $0x1c] sm:$0xf] %vm1156_vm5, %v1147_v1  ;;  %v2171_v3 = vrot.slane %v2169_v49, 4  ;;  %v8403_v49 = vld [vmem:[%s10434_s24 + $0x94] sm:$0x1] }
 0x13a   : >> { %v1145_v59 = vpop.permute.xlu0 %1144  ;;  %2013 = vrot.lane.b32.xlu1 %v1986_v52, %s9801_s12  ;;  %v8384_v52 = vld [vmem:[%s10434_s24 + $0x78] sm:$0xf] }
 0x13b   : >> { %1163 = vst.msk [vmem:[#allocation4 + $0x18] sm:$0xf] %vm1156_vm5, %v1145_v59  ;;  %v8382_v59 = vld [vmem:[%s10434_s24 + $0x68] sm:$0xf]  ;;  %vm2087_vm5 = vcmask 421248  }
 0x13c   : >> { %2011 = vrot.lane.b32.xlu0 %v1982_v56, %s9801_s12  ;;  %v1296_v2 = vpop.permute.xlu1 %1295  ;;  %v2185_v56 = vrot.slane %v2183_v40, 4 }
 0x13d   : >> { %1319 = vst.msk [vmem:[#allocation4 + $0x4] sm:$0xf] %vm1317_vm9, %v1296_v2  ;;  %v2122_v2 = vshll.u32 %v8389_v54, 16 }
 0x13e   : >> { %v1294_v8 = vpop.permute.xlu0 %1293  ;;  %2021 = vrot.lane.b32.xlu1 %v2002_v62, %s9801_s12  ;;  %v2158_v62 = vshll.u32 %v8394_v51, 16  ;;  %v2189_v13 = vor.u32 %v2188_v57, %v2185_v56  ;;  %v2150_v51 = vshll.u32 %v8393_v38, 16 }
 0x13f   : >> { %1318 = vst.msk [vmem:[#allocation4] sm:$0xf] %vm1317_vm9, %v1294_v8  ;;  %v2141_v8 = vshrl.u32 %v8392_v58, 16  ;;  %v2124_v26 = vrot.slane %v2122_v2, 5  ;;  %v2220_v58 = vshll.u32 %v8403_v49, 16 }
 0x140   : >> { %2019 = vrot.lane.b32.xlu0 %v1998_v5, %s9801_s12  ;;  %v1300_v14 = vpop.permute.xlu1 %1299  ;;  %v8402_v5 = vld [vmem:[%s10434_s24 + $0x90] sm:$0xf]  ;;  %v2190_v39 = vrot.slane %v2189_v13, 4  ;;  %v8404_v13 = vld [vmem:[%s10434_s24 + $0x58] sm:$0xe] }
 0x141   : >> { %1321 = vst.msk [vmem:[#allocation4 + $0xc] sm:$0xf] %vm1317_vm9, %v1300_v14  ;;  %v2192_v14 = vshll.u32 %v8399_v60, 16  ;;  %v2214_v22 = vshll.u32 %v8402_v5, 16  ;;  %v8419_v49 = vld [vmem:[%s10434_s24 + $0x94] sm:$0x1] }
 0x142   : >> { %v1298_v19 = vpop.permute.xlu0 %1297  ;;  %2017 = vrot.lane.b32.xlu1 %v1994_v11, %s9801_s12  ;;  %v2134_v11 = vrot.slane %v2133_v47, 4  ;;  %v8401_v47 = vld [vmem:[%s10434_s24 + $0x8c] sm:$0x1] }
 0x143   : >> { %1320 = vst.msk [vmem:[#allocation4 + $0x8] sm:$0xf] %vm1317_vm9, %v1298_v19  ;;  %v2160_v19 = vrot.slane %v2158_v62, 5  ;;  %v2194_v36 = vrot.slane %v2192_v14, 5  ;;  %v2152_v62 = vrot.slane %v2150_v51, 5 }
 0x144   : >> { %2015 = vrot.lane.b32.xlu0 %v1990_v15, %s9801_s12  ;;  %v1304_v23 = vpop.permute.xlu1 %1303  ;;  %v8400_v15 = vld [vmem:[%s10434_s24 + $0x88] sm:$0xf]  ;;  %v8405_v14 = vld [vmem:[%s10434_s24 + $0x5c] sm:$0x1] }
 0x145   : >> { %1323 = vst.msk [vmem:[#allocation4 + $0x14] sm:$0xf] %vm1317_vm9, %v1304_v23  ;;  %v2200_v33 = vshll.u32 %v8400_v15, 16  ;;  %v2161_v40 = vor.u32 %v2160_v19, %v2157_v18  ;;  %v2195_v55 = vsel %vm10447_vm13, %v2190_v39, %v2194_v36 }
 0x146   : >> { %v1302_v27 = vpop.permute.xlu0 %1301  ;;  %2025 = vrot.lane.b32.xlu1 %v2010_v20, %s9801_s12  ;;  %v2211_v20 = vshrl.u32 %v8402_v5, 16  ;;  %v2222_v5 = vrot.slane %v2220_v58, 5 }
 0x147   : >> { %1322 = vst.msk [vmem:[#allocation4 + $0x10] sm:$0xf] %vm1317_vm9, %v1302_v27  ;;  %v2175_v27 = vor.u32 %v2174_v4, %v2171_v3  ;;  %v2162_v56 = vrot.slane %v2161_v40, 4  ;;  %v8408_v40 = vld [vmem:[%s10434_s24 + $0x68] sm:$0xe] }
 0x148   : >> { %2023 = vrot.lane.b32.xlu0 %v2006_v25, %s9801_s12  ;;  %v1308_v32 = vpop.permute.xlu1 %1307  ;;  %v2120_v25 = vrot.slane %v2119_v0, 4  ;;  %v2213_v41 = vrot.slane %v2211_v20, 4  ;;  %v2206_v0 = vshll.u32 %v8401_v47, 16  ;;  %v8414_v20 = vld [vmem:[%s10434_s24 + $0x80] sm:$0xe]  ;;  %v8422_v51 = vrot.slane %v8408_v40, 9 }
 0x149   : >> { %1325 = vst.msk [vmem:[#allocation4 + $0x1c] sm:$0xf] %vm1317_vm9, %v1308_v32  ;;  %v2197_v32 = vshrl.u32 %v8400_v15, 16  ;;  %v2176_v46 = vrot.slane %v2175_v27, 4  ;;  %s9805_s12 = smov 60  }
 0x14a   : >> { %v1306_v37 = vpop.permute.xlu0 %1305  ;;  %2065 = vrot.lane.b32.xlu1 %v8381_v30, %s9802_s30  ;;  %v2143_v30 = vrot.slane %v2141_v8, 4  ;;  %v8407_v8 = vld [vmem:[%s10434_s24 + $0x64] sm:$0x1]  ;;  %v8448_v40 = vld [vmem:[%s10434_s24 + $0x8c] sm:$0x1] }
 0x14b   : >> { %1324 = vst.msk [vmem:[#allocation4 + $0x18] sm:$0xf] %vm1317_vm9, %v1306_v37  ;;  %v2164_v37 = vshll.u32 %v8395_v16, 16  ;;  %v2181_v60 = vsel %vm10447_vm13, %v2176_v46, %v2180_v48  ;;  %v8421_v16 = vrot.slane %v8406_v7, 9  ;;  %v2295_v18 = vrot.slane %v8407_v8, 5 }
 0x14c   : >> { %2063 = vrot.lane.b32.xlu0 %v8380_v35, %s9802_s30  ;;  %v1393_v45 = vpop.permute.xlu1 %1392  ;;  %v2139_v35 = vsel %vm10447_vm13, %v2134_v11, %v2138_v12  ;;  %v2147_v50 = vor.u32 %v2146_v31, %v2143_v30  ;;  %v2208_v11 = vrot.slane %v2206_v0, 5  ;;  %v8425_v31 = vrot.slane %v8414_v20, 9  ;;  %v8418_v48 = vld [vmem:[%s10434_s24 + $0x90] sm:$0xe]  ;;  %v8430_v7 = vld [vmem:[%s10434_s24 + $0x68] sm:$0xf] }
 0x14d   : >> { %1416 = vst.msk [vmem:[#allocation4 + $0x4] sm:$0xf] %vm1414_vm10, %v1393_v45  ;;  %v2125_v45 = vsel %vm10447_vm13, %v2120_v25, %v2124_v26  ;;  %v8420_v25 = vrot.slane %v8404_v13, 9  ;;  %v2291_v26 = vrot.slane %v8405_v14, 5  ;;  %v2296_v30 = vsel %vm10482_vm1, %v8421_v16, %v2295_v18  ;;  %v8447_v8 = vld [vmem:[%s10434_s24 + $0x88] sm:$0xf] }
 0x14e   : >> { %v1391_v1 = vpop.permute.xlu0 %1390  ;;  %2073 = vrot.lane.b32.xlu1 %v8385_v42, %s9802_s30  ;;  %v2216_v42 = vrot.slane %v2214_v22, 5  ;;  %v2148_v61 = vrot.slane %v2147_v50, 4  ;;  %v8415_v22 = vld [vmem:[%s10434_s24 + $0x84] sm:$0x1]  ;;  %v8445_v13 = vld [vmem:[%s10434_s24 + $0x80] sm:$0xf] }
 0x14f   : >> { %1415 = vst.msk [vmem:[#allocation4] sm:$0xf] %vm1414_vm10, %v1391_v1  ;;  %v2166_v1 = vrot.slane %v2164_v37, 5  ;;  %v2292_v36 = vsel %vm10482_vm1, %v8420_v25, %v2291_v26  ;;  %v8424_v37 = vrot.slane %v8412_v28, 9  ;;  %v2493_v18 = vshrl.u32 %v8447_v8, 16 }
 0x150   : >> { %2071 = vrot.lane.b32.xlu0 %v8384_v52, %s9802_s30  ;;  %v1397_v63 = vpop.permute.xlu1 %1396  ;;  %v2199_v52 = vrot.slane %v2197_v32, 4  ;;  %v2217_v57 = vor.u32 %v2216_v42, %v2213_v41  ;;  %v2153_v9 = vsel %vm10447_vm13, %v2148_v61, %v2152_v62  ;;  %v2311_v32 = vrot.slane %v8415_v22, 5  ;;  %v8409_v41 = vld [vmem:[%s10434_s24 + $0x6c] sm:$0x1]  ;;  %v8434_v20 = vld [vmem:[%s10434_s24 + $0x88] sm:$0xf] }
 0x151   : >> { %1418 = vst.msk [vmem:[#allocation4 + $0xc] sm:$0xf] %vm1414_vm10, %v1397_v63  ;;  %v2167_v3 = vsel %vm10447_vm13, %v2162_v56, %v2166_v1  ;;  %v8417_v1 = vld [vmem:[%s10434_s24 + $0x8c] sm:$0x1]  ;;  %v2319_v56 = vrot.slane %v8419_v49, 5  ;;  %v2482_v28 = vshll.u32 %v8445_v13, 16 }
 0x152   : >> { %v1395_v10 = vpop.permute.xlu0 %1394  ;;  %2069 = vrot.lane.b32.xlu1 %v8383_v53, %s9802_s30  ;;  %v2202_v53 = vrot.slane %v2200_v33, 5  ;;  %v2218_v4 = vrot.slane %v2217_v57, 4  ;;  %v2312_v42 = vsel %vm10482_vm1, %v8425_v31, %v2311_v32  ;;  %v8440_v22 = vld [vmem:[%s10434_s24 + $0x6c] sm:$0x1]  ;;  %v8432_v31 = vld [vmem:[%s10434_s24 + $0x78] sm:$0xf] }
 0x153   : >> { %1417 = vst.msk [vmem:[#allocation4 + $0x8] sm:$0xf] %vm1414_vm10, %v1395_v10  ;;  %v8438_v32 = vld [vmem:[%s10434_s24 + $0x64] sm:$0x1]  ;;  %v2484_v49 = vrot.slane %v2482_v28, 5  ;;  %vm2248_vm9 = vcmask 454048  }
 0x154   : >> { %2067 = vrot.lane.b32.xlu0 %v8382_v59, %s9802_s30  ;;  %v1401_v23 = vpop.permute.xlu1 %1400  ;;  %v2203_v63 = vor.u32 %v2202_v53, %v2199_v52  ;;  %v2223_v15 = vsel %vm10447_vm13, %v2218_v4, %v2222_v5  ;;  %v2299_v52 = vrot.slane %v8409_v41, 5 }
 0x155   : >> { %1420 = vst.msk [vmem:[#allocation4 + $0x14] sm:$0xf] %vm1414_vm10, %v1401_v23 }
 0x156   : >> { %v1399_v34 = vpop.permute.xlu0 %1398  ;;  %2077 = vrot.lane.b32.xlu1 %v8387_v6, %s9802_s30  ;;  %v2204_v10 = vrot.slane %v2203_v63, 4  ;;  %v2300_v58 = vsel %vm10482_vm1, %v8422_v51, %v2299_v52  ;;  %v8439_v63 = vld [vmem:[%s10434_s24 + $0x68] sm:$0xf]  ;;  %v8436_v51 = vld [vmem:[%s10434_s24 + $0x98] sm:$0xf] }
 0x157   : >> { %1419 = vst.msk [vmem:[#allocation4 + $0x10] sm:$0xf] %vm1414_vm10, %v1399_v34  ;;  %v8410_v34 = vld [vmem:[%s10434_s24 + $0x70] sm:$0xe]  ;;  %v2437_v5 = vshrl.u32 %v8439_v63, 16 }
 0x158   : >> { %2075 = vrot.lane.b32.xlu0 %v8386_v29, %s9802_s30  ;;  %v1405_v43 = vpop.permute.xlu1 %1404  ;;  %v2209_v23 = vsel %vm10447_vm13, %v2204_v10, %v2208_v11  ;;  %v8413_v29 = vld [vmem:[%s10434_s24 + $0x7c] sm:$0x1]  ;;  %v8446_v52 = vld [vmem:[%s10434_s24 + $0x84] sm:$0x1]  ;;  %s9806_s30 = smov 64  }
 0x159   : >> { %1422 = vst.msk [vmem:[#allocation4 + $0x1c] sm:$0xf] %vm1414_vm10, %v1405_v43  ;;  %v2307_v38 = vrot.slane %v8413_v29, 5  ;;  %v8423_v43 = vrot.slane %v8410_v34, 9  ;;  %v8443_v29 = vld [vmem:[%s10434_s24 + $0x78] sm:$0xf] }
 0x15a   : >> { %v1403_v54 = vpop.permute.xlu0 %1402  ;;  %2226 = vrot.lane.b32.xlu1 %v2139_v35, %s9803_s15  ;;  %v8411_v35 = vld [vmem:[%s10434_s24 + $0x74] sm:$0x1]  ;;  %v2465_v41 = vshrl.u32 %v8443_v29, 16 }
 0x15b   : >> { %1421 = vst.msk [vmem:[#allocation4 + $0x18] sm:$0xf] %vm1414_vm10, %v1403_v54  ;;  %v2308_v50 = vsel %vm10482_vm1, %v8424_v37, %v2307_v38  ;;  %v8416_v54 = vld [vmem:[%s10434_s24 + $0x88] sm:$0xe]  ;;  %v8441_v38 = vld [vmem:[%s10434_s24 + $0x70] sm:$0xf] }
 0x15c   : >> { %2224 = vrot.lane.b32.xlu0 %v2125_v45, %s9803_s15  ;;  %v1445_v59 = vpop.permute.xlu1 %1444  ;;  %v2303_v45 = vrot.slane %v8411_v35, 5  ;;  %v2446_v35 = vshll.u32 %v8440_v22, 16  ;;  %vm2345_vm10 = vcmask 486848  }
 0x15d   : >> { %1468 = vst.msk [vmem:[#allocation4 + $0x4] sm:$0xf] %vm1466_vm11, %v1445_v59  ;;  %v8426_v59 = vrot.slane %v8416_v54, 9  ;;  %v2454_v54 = vshll.u32 %v8441_v38, 16 }
 0x15e   : >> { %v1443_v2 = vpop.permute.xlu0 %1442  ;;  %2234 = vrot.lane.b32.xlu1 %v2195_v55, %s9803_s15  ;;  %v2304_v47 = vsel %vm10482_vm1, %v8423_v43, %v2303_v45  ;;  %v8427_v55 = vrot.slane %v8418_v48, 9 }
 0x15f   : >> { %1467 = vst.msk [vmem:[#allocation4] sm:$0xf] %vm1466_vm11, %v1443_v2 }
 0x160   : >> { %2232 = vrot.lane.b32.xlu0 %v2181_v60, %s9803_s15  ;;  %v1449_v6 = vpop.permute.xlu1 %1448  ;;  %v2315_v60 = vrot.slane %v8417_v1, 5  ;;  %v2320_v62 = vsel %vm10482_vm1, %v8427_v55, %v2319_v56  ;;  %v2448_v55 = vrot.slane %v2446_v35, 5 }
 0x161   : >> { %1470 = vst.msk [vmem:[#allocation4 + $0xc] sm:$0xf] %vm1466_vm11, %v1449_v6  ;;  %v2440_v6 = vshll.u32 %v8439_v63, 16 }
 0x162   : >> { %v1447_v12 = vpop.permute.xlu0 %1446  ;;  %2230 = vrot.lane.b32.xlu1 %v2167_v3, %s9803_s15  ;;  %v2316_v2 = vsel %vm10482_vm1, %v8426_v59, %v2315_v60  ;;  %v8437_v3 = vld [vmem:[%s10434_s24 + $0x60] sm:$0xf]  ;;  %v8444_v59 = vld [vmem:[%s10434_s24 + $0x7c] sm:$0x1]  ;;  %v2467_v60 = vrot.slane %v2465_v41, 4 }
 0x163   : >> { %1469 = vst.msk [vmem:[#allocation4 + $0x8] sm:$0xf] %vm1466_vm11, %v1447_v12  ;;  %v2423_v10 = vshrl.u32 %v8437_v3, 16  ;;  %v2426_v11 = vshll.u32 %v8437_v3, 16  ;;  %v8429_v12 = vld [vmem:[%s10434_s24 + $0x60] sm:$0xf] }
 0x164   : >> { %2228 = vrot.lane.b32.xlu0 %v2153_v9, %s9803_s15  ;;  %v1453_v19 = vpop.permute.xlu1 %1452  ;;  %v2442_v16 = vrot.slane %v2440_v6, 5  ;;  %v8435_v6 = vld [vmem:[%s10434_s24 + $0x90] sm:$0xf] }
 0x165   : >> { %1472 = vst.msk [vmem:[#allocation4 + $0x14] sm:$0xf] %vm1466_vm11, %v1453_v19  ;;  %v2496_v19 = vshll.u32 %v8447_v8, 16  ;;  %v2425_v25 = vrot.slane %v2423_v10, 4  ;;  %v2428_v26 = vrot.slane %v2426_v11, 5  ;;  %v2456_v8 = vrot.slane %v2454_v54, 5 }
 0x166   : >> { %v1451_v27 = vpop.permute.xlu0 %1450  ;;  %2238 = vrot.lane.b32.xlu1 %v2223_v15, %s9803_s15  ;;  %v2439_v15 = vrot.slane %v2437_v5, 4  ;;  %v2488_v5 = vshll.u32 %v8446_v52, 16  ;;  %v8455_v52 = vld [vmem:[%s10434_s24 + $0x68] sm:$0xe] }
 0x167   : >> { %1471 = vst.msk [vmem:[#allocation4 + $0x10] sm:$0xf] %vm1466_vm11, %v1451_v27  ;;  %v2479_v27 = vshrl.u32 %v8445_v13, 16  ;;  %v2498_v37 = vrot.slane %v2496_v19, 5  ;;  %v2429_v45 = vor.u32 %v2428_v26, %v2425_v25 }
 0x168   : >> { %2236 = vrot.lane.b32.xlu0 %v2209_v23, %s9803_s15  ;;  %v1457_v33 = vpop.permute.xlu1 %1456  ;;  %v2443_v34 = vor.u32 %v2442_v16, %v2439_v15  ;;  %v8442_v15 = vld [vmem:[%s10434_s24 + $0x74] sm:$0x1]  ;;  %v2490_v26 = vrot.slane %v2488_v5, 5  ;;  %v8461_v5 = vld [vmem:[%s10434_s24 + $0x80] sm:$0xe]  ;;  %s9807_s15 = smov 68  }
 0x169   : >> { %1474 = vst.msk [vmem:[#allocation4 + $0x1c] sm:$0xf] %vm1466_vm11, %v1457_v33  ;;  %v2481_v48 = vrot.slane %v2479_v27, 4  ;;  %v8452_v27 = vld [vmem:[%s10434_s24 + $0x9c] sm:$0x1] }
 0x16a   : >> { %v1455_v39 = vpop.permute.xlu0 %1454  ;;  %2323 = vrot.lane.b32.xlu1 %v2296_v30, %s9804_s25  ;;  %v8433_v30 = vld [vmem:[%s10434_s24 + $0x80] sm:$0xf] }
 0x16b   : >> { %1473 = vst.msk [vmem:[#allocation4 + $0x18] sm:$0xf] %vm1466_vm11, %v1455_v39  ;;  %v8431_v39 = vld [vmem:[%s10434_s24 + $0x70] sm:$0xf]  ;;  %vm2397_vm11 = vcmask 519648  }
 0x16c   : >> { %2321 = vrot.lane.b32.xlu0 %v2292_v36, %s9804_s25  ;;  %v1606_v46 = vpop.permute.xlu1 %1605  ;;  %v2495_v36 = vrot.slane %v2493_v18, 4 }
 0x16d   : >> { %1629 = vst.msk [vmem:[#allocation4 + $0x4] sm:$0xf] %vm1627_vm12, %v1606_v46  ;;  %v2432_v46 = vshll.u32 %v8438_v32, 16 }
 0x16e   : >> { %v1604_v53 = vpop.permute.xlu0 %1603  ;;  %2331 = vrot.lane.b32.xlu1 %v2312_v42, %s9804_s25  ;;  %v2468_v42 = vshll.u32 %v8443_v29, 16  ;;  %v2499_v56 = vor.u32 %v2498_v37, %v2495_v36  ;;  %v2460_v29 = vshll.u32 %v8442_v15, 16 }
 0x16f   : >> { %1628 = vst.msk [vmem:[#allocation4] sm:$0xf] %vm1627_vm12, %v1604_v53  ;;  %v2451_v53 = vshrl.u32 %v8441_v38, 16  ;;  %v2434_v3 = vrot.slane %v2432_v46, 5  ;;  %v2530_v38 = vshll.u32 %v8452_v27, 16 }
 0x170   : >> { %2329 = vrot.lane.b32.xlu0 %v2308_v50, %s9804_s25  ;;  %v1610_v57 = vpop.permute.xlu1 %1609  ;;  %v8451_v50 = vld [vmem:[%s10434_s24 + $0x98] sm:$0xf]  ;;  %v2500_v16 = vrot.slane %v2499_v56, 4  ;;  %v8453_v56 = vld [vmem:[%s10434_s24 + $0x60] sm:$0xe] }
 0x171   : >> { %1631 = vst.msk [vmem:[#allocation4 + $0xc] sm:$0xf] %vm1627_vm12, %v1610_v57  ;;  %v2502_v57 = vshll.u32 %v8448_v40, 16  ;;  %v2524_v63 = vshll.u32 %v8451_v50, 16  ;;  %v8468_v27 = vld [vmem:[%s10434_s24 + $0x9c] sm:$0x1] }
 0x172   : >> { %v1608_v61 = vpop.permute.xlu0 %1607  ;;  %2327 = vrot.lane.b32.xlu1 %v2304_v47, %s9804_s25  ;;  %v2444_v47 = vrot.slane %v2443_v34, 4  ;;  %v8450_v34 = vld [vmem:[%s10434_s24 + $0x94] sm:$0x1] }
 0x173   : >> { %1630 = vst.msk [vmem:[#allocation4 + $0x8] sm:$0xf] %vm1627_vm12, %v1608_v61  ;;  %v2470_v61 = vrot.slane %v2468_v42, 5  ;;  %v2504_v13 = vrot.slane %v2502_v57, 5  ;;  %v2462_v42 = vrot.slane %v2460_v29, 5 }
 0x174   : >> { %2325 = vrot.lane.b32.xlu0 %v2300_v58, %s9804_s25  ;;  %v1614_v0 = vpop.permute.xlu1 %1613  ;;  %v8449_v58 = vld [vmem:[%s10434_s24 + $0x90] sm:$0xf]  ;;  %v8454_v57 = vld [vmem:[%s10434_s24 + $0x64] sm:$0x1] }
 0x175   : >> { %1633 = vst.msk [vmem:[#allocation4 + $0x14] sm:$0xf] %vm1627_vm12, %v1614_v0  ;;  %v2510_v10 = vshll.u32 %v8449_v58, 16  ;;  %v2471_v18 = vor.u32 %v2470_v61, %v2467_v60  ;;  %v2505_v35 = vsel %vm10447_vm13, %v2500_v16, %v2504_v13 }
 0x176   : >> { %v1612_v4 = vpop.permute.xlu0 %1611  ;;  %2335 = vrot.lane.b32.xlu1 %v2320_v62, %s9804_s25  ;;  %v2521_v62 = vshrl.u32 %v8451_v50, 16  ;;  %v2532_v50 = vrot.slane %v2530_v38, 5 }
 0x177   : >> { %1632 = vst.msk [vmem:[#allocation4 + $0x10] sm:$0xf] %vm1627_vm12, %v1612_v4  ;;  %v2485_v4 = vor.u32 %v2484_v49, %v2481_v48  ;;  %v2472_v36 = vrot.slane %v2471_v18, 4  ;;  %v8457_v18 = vld [vmem:[%s10434_s24 + $0x70] sm:$0xe] }
 0x178   : >> { %2333 = vrot.lane.b32.xlu0 %v2316_v2, %s9804_s25  ;;  %v1618_v9 = vpop.permute.xlu1 %1617  ;;  %v2430_v2 = vrot.slane %v2429_v45, 4  ;;  %v2523_v19 = vrot.slane %v2521_v62, 4  ;;  %v2516_v45 = vshll.u32 %v8450_v34, 16  ;;  %v8463_v62 = vld [vmem:[%s10434_s24 + $0x88] sm:$0xe]  ;;  %v8471_v29 = vrot.slane %v8457_v18, 9 }
 0x179   : >> { %1635 = vst.msk [vmem:[#allocation4 + $0x1c] sm:$0xf] %vm1627_vm12, %v1618_v9  ;;  %v2507_v9 = vshrl.u32 %v8449_v58, 16  ;;  %v2486_v25 = vrot.slane %v2485_v4, 4  ;;  %s9808_s25 = smov 72  }
 0x17a   : >> { %v1616_v14 = vpop.permute.xlu0 %1615  ;;  %2375 = vrot.lane.b32.xlu1 %v8430_v7, %s9805_s12  ;;  %v2453_v7 = vrot.slane %v2451_v53, 4  ;;  %v8456_v53 = vld [vmem:[%s10434_s24 + $0x6c] sm:$0x1] }
 0x17b   : >> { %1634 = vst.msk [vmem:[#allocation4 + $0x18] sm:$0xf] %vm1627_vm12, %v1616_v14  ;;  %v2474_v14 = vshll.u32 %v8444_v59, 16  ;;  %v2491_v40 = vsel %vm10447_vm13, %v2486_v25, %v2490_v26  ;;  %v8470_v59 = vrot.slane %v8455_v52, 9  ;;  %v2605_v60 = vrot.slane %v8456_v53, 5 }
 0x17c   : >> { %2373 = vrot.lane.b32.xlu0 %v8429_v12, %s9805_s12  ;;  %v1703_v23 = vpop.permute.xlu1 %1702  ;;  %v2449_v12 = vsel %vm10447_vm13, %v2444_v47, %v2448_v55  ;;  %v2457_v28 = vor.u32 %v2456_v8, %v2453_v7  ;;  %v2518_v47 = vrot.slane %v2516_v45, 5  ;;  %v8474_v8 = vrot.slane %v8463_v62, 9  ;;  %v8467_v26 = vld [vmem:[%s10434_s24 + $0x98] sm:$0xe]  ;;  %v8478_v52 = vld [vmem:[%s10434_s24 + $0xa8] sm:$0xf] }
 0x17d   : >> { %1726 = vst.msk [vmem:[#allocation4 + $0x4] sm:$0xf] %vm1724_vm14, %v1703_v23  ;;  %v2435_v23 = vsel %vm10447_vm13, %v2430_v2, %v2434_v3  ;;  %v8469_v2 = vrot.slane %v8453_v56, 9  ;;  %v2601_v3 = vrot.slane %v8454_v57, 5  ;;  %v2606_v7 = vsel %vm10482_vm1, %v8470_v59, %v2605_v60  ;;  %v8495_v53 = vld [vmem:[%s10434_s24 + $0xc8] sm:$0xf] }
 0x17e   : >> { %v1701_v33 = vpop.permute.xlu0 %1700  ;;  %2383 = vrot.lane.b32.xlu1 %v8434_v20, %s9805_s12  ;;  %v2526_v20 = vrot.slane %v2524_v63, 5  ;;  %v2458_v41 = vrot.slane %v2457_v28, 4  ;;  %v8464_v63 = vld [vmem:[%s10434_s24 + $0x8c] sm:$0x1]  ;;  %v8493_v56 = vld [vmem:[%s10434_s24 + $0xc0] sm:$0xf] }
 0x17f   : >> { %1725 = vst.msk [vmem:[#allocation4] sm:$0xf] %vm1724_vm14, %v1701_v33  ;;  %v2476_v33 = vrot.slane %v2474_v14, 5  ;;  %v2602_v13 = vsel %vm10482_vm1, %v8469_v2, %v2601_v3  ;;  %v8473_v14 = vrot.slane %v8461_v5, 9  ;;  %v2804_v60 = vshrl.u32 %v8495_v53, 16 }
 0x180   : >> { %2381 = vrot.lane.b32.xlu0 %v8433_v30, %s9805_s12  ;;  %v1711_v43 = vpop.permute.xlu1 %1710  ;;  %v2509_v30 = vrot.slane %v2507_v9, 4  ;;  %v2527_v37 = vor.u32 %v2526_v20, %v2523_v19  ;;  %v2463_v54 = vsel %vm10447_vm13, %v2458_v41, %v2462_v42  ;;  %v2621_v9 = vrot.slane %v8464_v63, 5  ;;  %v8458_v19 = vld [vmem:[%s10434_s24 + $0x74] sm:$0x1]  ;;  %v8482_v62 = vld [vmem:[%s10434_s24 + $0xc8] sm:$0xf] }
 0x181   : >> { %1730 = vst.msk [vmem:[#allocation4 + $0x14] sm:$0xf] %vm1724_vm14, %v1711_v43  ;;  %v2477_v48 = vsel %vm10447_vm13, %v2472_v36, %v2476_v33  ;;  %v8466_v33 = vld [vmem:[%s10434_s24 + $0x94] sm:$0x1]  ;;  %v2629_v36 = vrot.slane %v8468_v27, 5  ;;  %v2793_v5 = vshll.u32 %v8493_v56, 16 }
 0x182   : >> { %v1709_v1 = vpop.permute.xlu0 %1708  ;;  %2379 = vrot.lane.b32.xlu1 %v8432_v31, %s9805_s12  ;;  %v2512_v31 = vrot.slane %v2510_v10, 5  ;;  %v2528_v49 = vrot.slane %v2527_v37, 4  ;;  %v2622_v20 = vsel %vm10482_vm1, %v8474_v8, %v2621_v9  ;;  %v8488_v63 = vld [vmem:[%s10434_s24 + $0xac] sm:$0x1]  ;;  %v8480_v8 = vld [vmem:[%s10434_s24 + $0xb8] sm:$0xf] }
 0x183   : >> { %1729 = vst.msk [vmem:[#allocation4 + $0x10] sm:$0xf] %vm1724_vm14, %v1709_v1  ;;  %v8486_v9 = vld [vmem:[%s10434_s24 + $0xa4] sm:$0x1]  ;;  %v8496_v18 = vld [vmem:[%s10434_s24 + $0xcc] sm:$0x1] }
 0x184   : >> { %2377 = vrot.lane.b32.xlu0 %v8431_v39, %s9805_s12  ;;  %v1707_v0 = vpop.permute.xlu1 %1706  ;;  %v2513_v43 = vor.u32 %v2512_v31, %v2509_v30  ;;  %v2533_v58 = vsel %vm10447_vm13, %v2528_v49, %v2532_v50  ;;  %v2609_v30 = vrot.slane %v8458_v19, 5  ;;  %v2795_v27 = vrot.slane %v2793_v5, 5 }
 0x185   : >> { %1728 = vst.msk [vmem:[#allocation4 + $0xc] sm:$0xf] %vm1724_vm14, %v1707_v0  ;;  %vm2558_vm12 = vcmask 552448  }
 0x186   : >> { %v1705_v11 = vpop.permute.xlu0 %1704  ;;  %2387 = vrot.lane.b32.xlu1 %v8436_v51, %s9805_s12  ;;  %v2514_v1 = vrot.slane %v2513_v43, 4  ;;  %v2610_v38 = vsel %vm10482_vm1, %v8471_v29, %v2609_v30  ;;  %v8487_v43 = vld [vmem:[%s10434_s24 + $0xa8] sm:$0xf]  ;;  %v8484_v29 = vld [vmem:[%s10434_s24 + $0xd8] sm:$0xf] }
 0x187   : >> { %1727 = vst.msk [vmem:[#allocation4 + $0x8] sm:$0xf] %vm1724_vm14, %v1705_v11  ;;  %v8459_v11 = vld [vmem:[%s10434_s24 + $0x78] sm:$0xe]  ;;  %v2748_v50 = vshrl.u32 %v8487_v43, 16 }
 0x188   : >> { %2385 = vrot.lane.b32.xlu0 %v8435_v6, %s9805_s12  ;;  %v1715_v22 = vpop.permute.xlu1 %1714  ;;  %v2519_v0 = vsel %vm10447_vm13, %v2514_v1, %v2518_v47  ;;  %v8462_v6 = vld [vmem:[%s10434_s24 + $0x84] sm:$0x1]  ;;  %s9809_s12 = smov 76  }
 0x189   : >> { %1732 = vst.msk [vmem:[#allocation4 + $0x1c] sm:$0xf] %vm1724_vm14, %v1715_v22  ;;  %v2617_v15 = vrot.slane %v8462_v6, 5  ;;  %v8472_v22 = vrot.slane %v8459_v11, 9  ;;  %v8491_v6 = vld [vmem:[%s10434_s24 + $0xb8] sm:$0xf] }
 0x18a   : >> { %v1713_v32 = vpop.permute.xlu0 %1712  ;;  %2536 = vrot.lane.b32.xlu1 %v2449_v12, %s9806_s30  ;;  %v8460_v12 = vld [vmem:[%s10434_s24 + $0x7c] sm:$0x1]  ;;  %v2776_v19 = vshrl.u32 %v8491_v6, 16  ;;  %v8494_v30 = vld [vmem:[%s10434_s24 + $0xc4] sm:$0x1] }
 0x18b   : >> { %1731 = vst.msk [vmem:[#allocation4 + $0x18] sm:$0xf] %vm1724_vm14, %v1713_v32  ;;  %v2618_v28 = vsel %vm10482_vm1, %v8473_v14, %v2617_v15  ;;  %v8465_v32 = vld [vmem:[%s10434_s24 + $0x90] sm:$0xe]  ;;  %vm2655_vm14 = vcmask 585248  }
 0x18c   : >> { %2534 = vrot.lane.b32.xlu0 %v2435_v23, %s9806_s30  ;;  %v1756_v39 = vpop.permute.xlu1 %1755  ;;  %v2613_v23 = vrot.slane %v8460_v12, 5  ;;  %v2757_v12 = vshll.u32 %v8488_v63, 16  ;;  %v8489_v15 = vld [vmem:[%s10434_s24 + $0xb0] sm:$0xf] }
 0x18d   : >> { %1779 = vst.msk [vmem:[#allocation4 + $0x4] sm:$0xf] %vm1777_vm15, %v1756_v39  ;;  %v8475_v39 = vrot.slane %v8465_v32, 9  ;;  %v2765_v32 = vshll.u32 %v8489_v15, 16 }
 0x18e   : >> { %v1754_v46 = vpop.permute.xlu0 %1753  ;;  %2544 = vrot.lane.b32.xlu1 %v2505_v35, %s9806_s30  ;;  %v2614_v34 = vsel %vm10482_vm1, %v8472_v22, %v2613_v23  ;;  %v8476_v35 = vrot.slane %v8467_v26, 9 }
 0x18f   : >> { %1778 = vst.msk [vmem:[#allocation4] sm:$0xf] %vm1777_vm15, %v1754_v46 }
 0x190   : >> { %2542 = vrot.lane.b32.xlu0 %v2491_v40, %s9806_s30  ;;  %v1764_v51 = vpop.permute.xlu1 %1763  ;;  %v2625_v40 = vrot.slane %v8466_v33, 5  ;;  %v2630_v42 = vsel %vm10482_vm1, %v8476_v35, %v2629_v36  ;;  %v2759_v35 = vrot.slane %v2757_v12, 5 }
 0x191   : >> { %1783 = vst.msk [vmem:[#allocation4 + $0x14] sm:$0xf] %vm1777_vm15, %v1764_v51  ;;  %v2751_v51 = vshll.u32 %v8487_v43, 16 }
 0x192   : >> { %v1762_v55 = vpop.permute.xlu0 %1761  ;;  %2540 = vrot.lane.b32.xlu1 %v2477_v48, %s9806_s30  ;;  %v2626_v46 = vsel %vm10482_vm1, %v8475_v39, %v2625_v40  ;;  %v8485_v48 = vld [vmem:[%s10434_s24 + $0xa0] sm:$0xf]  ;;  %v8483_v39 = vld [vmem:[%s10434_s24 + $0xd0] sm:$0xf]  ;;  %v2778_v40 = vrot.slane %v2776_v19, 4 }
 0x193   : >> { %1782 = vst.msk [vmem:[#allocation4 + $0x10] sm:$0xf] %vm1777_vm15, %v1762_v55  ;;  %v2734_v1 = vshrl.u32 %v8485_v48, 16  ;;  %v2737_v47 = vshll.u32 %v8485_v48, 16  ;;  %v8477_v55 = vld [vmem:[%s10434_s24 + $0xa0] sm:$0xf] }
 0x194   : >> { %2538 = vrot.lane.b32.xlu0 %v2463_v54, %s9806_s30  ;;  %v1760_v61 = vpop.permute.xlu1 %1759  ;;  %v2753_v59 = vrot.slane %v2751_v51, 5  ;;  %v8492_v51 = vld [vmem:[%s10434_s24 + $0xbc] sm:$0x1] }
 0x195   : >> { %1781 = vst.msk [vmem:[#allocation4 + $0xc] sm:$0xf] %vm1777_vm15, %v1760_v61  ;;  %v2807_v61 = vshll.u32 %v8495_v53, 16  ;;  %v2736_v2 = vrot.slane %v2734_v1, 4  ;;  %v2739_v3 = vrot.slane %v2737_v47, 5 }
 0x196   : >> { %v1758_v4 = vpop.permute.xlu0 %1757  ;;  %2548 = vrot.lane.b32.xlu1 %v2533_v58, %s9806_s30  ;;  %v2750_v58 = vrot.slane %v2748_v50, 4  ;;  %v2799_v50 = vshll.u32 %v8494_v30, 16  ;;  %v8503_v30 = vld [vmem:[%s10434_s24 + $0xa8] sm:$0xe] }
 0x197   : >> { %1780 = vst.msk [vmem:[#allocation4 + $0x8] sm:$0xf] %vm1777_vm15, %v1758_v4  ;;  %v2790_v4 = vshrl.u32 %v8493_v56, 16  ;;  %v2809_v14 = vrot.slane %v2807_v61, 5  ;;  %v2740_v23 = vor.u32 %v2739_v3, %v2736_v2 }
 0x198   : >> { %2546 = vrot.lane.b32.xlu0 %v2519_v0, %s9806_s30  ;;  %v1768_v10 = vpop.permute.xlu1 %1767  ;;  %v2754_v11 = vor.u32 %v2753_v59, %v2750_v58  ;;  %v2801_v2 = vrot.slane %v2799_v50, 5  ;;  %v8509_v50 = vld [vmem:[%s10434_s24 + $0xc0] sm:$0xe]  ;;  %s9810_s30 = smov 80  }
 0x199   : >> { %1785 = vst.msk [vmem:[#allocation4 + $0x1c] sm:$0xf] %vm1777_vm15, %v1768_v10  ;;  %v2792_v26 = vrot.slane %v2790_v4, 4  ;;  %v8500_v4 = vld [vmem:[%s10434_s24 + $0xdc] sm:$0x1] }
 0x19a   : >> { %v1766_v16 = vpop.permute.xlu0 %1765  ;;  %2633 = vrot.lane.b32.xlu1 %v2606_v7, %s9807_s15  ;;  %v8481_v7 = vld [vmem:[%s10434_s24 + $0xc0] sm:$0xf] }
 0x19b   : >> { %1784 = vst.msk [vmem:[#allocation4 + $0x18] sm:$0xf] %vm1777_vm15, %v1766_v16  ;;  %v8479_v16 = vld [vmem:[%s10434_s24 + $0xb0] sm:$0xf]  ;;  %vm3698_vm15 = vcmask 1045504  }
 0x19c   : >> { %2631 = vrot.lane.b32.xlu0 %v2602_v13, %s9807_s15  ;;  %v1917_v25 = vpop.permute.xlu1 %1916  ;;  %v2806_v13 = vrot.slane %v2804_v60, 4  ;;  %v2785_v60 = vshll.u32 %v8492_v51, 16  ;;  %v8510_v51 = vld [vmem:[%s10434_s24 + $0xc4] sm:$0x1] }
 0x19d   : >> { %1940 = vst.msk [vmem:[#allocation4 + $0x4] sm:$0xf] %vm1938_vm2, %v1917_v25  ;;  %v2743_v25 = vshll.u32 %v8486_v9, 16 }
 0x19e   : >> { %v1915_v31 = vpop.permute.xlu0 %1914  ;;  %2641 = vrot.lane.b32.xlu1 %v2622_v20, %s9807_s15  ;;  %v2779_v20 = vshll.u32 %v8491_v6, 16  ;;  %v2810_v36 = vor.u32 %v2809_v14, %v2806_v13  ;;  %v2787_v13 = vrot.slane %v2785_v60, 5  ;;  %v8505_v60 = vld [vmem:[%s10434_s24 + $0xb0] sm:$0xe] }
 0x19f   : >> { %1939 = vst.msk [vmem:[#allocation4] sm:$0xf] %vm1938_vm2, %v1915_v31  ;;  %v2762_v31 = vshrl.u32 %v8489_v15, 16  ;;  %v2745_v48 = vrot.slane %v2743_v25, 5  ;;  %v2841_v15 = vshll.u32 %v8500_v4, 16 }
 0x1a0   : >> { %2639 = vrot.lane.b32.xlu0 %v2618_v28, %s9807_s15  ;;  %v1925_v37 = vpop.permute.xlu1 %1924  ;;  %v8499_v28 = vld [vmem:[%s10434_s24 + $0xd8] sm:$0xf]  ;;  %v8516_v4 = vld [vmem:[%s10434_s24 + $0xdc] sm:$0x1] }
 0x1a1   : >> { %1944 = vst.msk [vmem:[#allocation4 + $0x14] sm:$0xf] %vm1938_vm2, %v1925_v37  ;;  %v2813_v37 = vshll.u32 %v8496_v18, 16  ;;  %v2835_v43 = vshll.u32 %v8499_v28, 16  ;;  %v2764_v53 = vrot.slane %v2762_v31, 4 }
 0x1a2   : >> { %v1923_v41 = vpop.permute.xlu0 %1922  ;;  %2637 = vrot.lane.b32.xlu1 %v2614_v34, %s9807_s15  ;;  %v2755_v34 = vrot.slane %v2754_v11, 4  ;;  %v8498_v11 = vld [vmem:[%s10434_s24 + $0xd4] sm:$0x1]  ;;  %v8504_v31 = vld [vmem:[%s10434_s24 + $0xac] sm:$0x1] }
 0x1a3   : >> { %1943 = vst.msk [vmem:[#allocation4 + $0x10] sm:$0xf] %vm1938_vm2, %v1923_v41  ;;  %v2781_v41 = vrot.slane %v2779_v20, 5  ;;  %v2815_v58 = vrot.slane %v2813_v37, 5  ;;  %v8502_v37 = vld [vmem:[%s10434_s24 + $0xa4] sm:$0x1] }
 0x1a4   : >> { %2635 = vrot.lane.b32.xlu0 %v2610_v38, %s9807_s15  ;;  %v1921_v45 = vpop.permute.xlu1 %1920  ;;  %v8497_v38 = vld [vmem:[%s10434_s24 + $0xd0] sm:$0xf]  ;;  %v2760_v56 = vsel %vm10447_vm13, %v2755_v34, %v2759_v35 }
 0x1a5   : >> { %1942 = vst.msk [vmem:[#allocation4 + $0xc] sm:$0xf] %vm1938_vm2, %v1921_v45  ;;  %v2818_v1 = vshrl.u32 %v8497_v38, 16  ;;  %v2821_v47 = vshll.u32 %v8497_v38, 16  ;;  %v2782_v59 = vor.u32 %v2781_v41, %v2778_v40  ;;  %v2916_v40 = vrot.slane %v8504_v31, 5 }
 0x1a6   : >> { %v1919_v49 = vpop.permute.xlu0 %1918  ;;  %2645 = vrot.lane.b32.xlu1 %v2630_v42, %s9807_s15  ;;  %v2832_v42 = vshrl.u32 %v8499_v28, 16  ;;  %v2843_v28 = vrot.slane %v2841_v15, 5  ;;  %v8544_v31 = vld [vmem:[%s10434_s24 + $0xd0] sm:$0xf] }
 0x1a7   : >> { %1941 = vst.msk [vmem:[#allocation4 + $0x8] sm:$0xf] %vm1938_vm2, %v1919_v49  ;;  %v2796_v49 = vor.u32 %v2795_v27, %v2792_v26  ;;  %v2783_v12 = vrot.slane %v2782_v59, 4 }
 0x1a8   : >> { %2643 = vrot.lane.b32.xlu0 %v2626_v46, %s9807_s15  ;;  %v1929_v54 = vpop.permute.xlu1 %1928  ;;  %v2741_v46 = vrot.slane %v2740_v23, 4  ;;  %v2834_v61 = vrot.slane %v2832_v42, 4  ;;  %v2827_v23 = vshll.u32 %v8498_v11, 16  ;;  %v8511_v42 = vld [vmem:[%s10434_s24 + $0xc8] sm:$0xe]  ;;  %s9811_s15 = smov 84  }
 0x1a9   : >> { %1946 = vst.msk [vmem:[#allocation4 + $0x1c] sm:$0xf] %vm1938_vm2, %v1929_v54  ;;  %v2767_v54 = vrot.slane %v2765_v32, 5  ;;  %v2797_v5 = vrot.slane %v2796_v49, 4  ;;  %v2788_v26 = vsel %vm10447_vm13, %v2783_v12, %v2787_v13  ;;  %v2940_v13 = vrot.slane %v8516_v4, 5 }
 0x1aa   : >> { %v1927_v57 = vpop.permute.xlu0 %1926  ;;  %2686 = vrot.lane.b32.xlu1 %v8478_v52, %s9808_s25  ;;  %v8490_v52 = vld [vmem:[%s10434_s24 + $0xb4] sm:$0x1]  ;;  %v2829_v34 = vrot.slane %v2827_v23, 5 }
 0x1ab   : >> { %1945 = vst.msk [vmem:[#allocation4 + $0x18] sm:$0xf] %vm1938_vm2, %v1927_v57  ;;  %v2811_v57 = vrot.slane %v2810_v36, 4  ;;  %v2771_v3 = vshll.u32 %v8490_v52, 16  ;;  %v2768_v6 = vor.u32 %v2767_v54, %v2764_v53  ;;  %v2802_v19 = vsel %vm10447_vm13, %v2797_v5, %v2801_v2  ;;  %v8501_v36 = vld [vmem:[%s10434_s24 + $0xa0] sm:$0xe] }
 0x1ac   : >> { %2684 = vrot.lane.b32.xlu0 %v8477_v55, %s9808_s25  ;;  %v2014_v0 = vpop.permute.xlu1 %2013  ;;  %v8522_v53 = vrot.slane %v8511_v42, 9  ;;  %v8531_v42 = vld [vmem:[%s10434_s24 + $0xd0] sm:$0xf]  ;;  %vm2708_vm2 = vcmask 618048  }
 0x1ad   : >> { %2037 = vst.msk [vmem:[#allocation4 + $0x4] sm:$0xf] %vm2035_vm3, %v2014_v0  ;;  %v2746_v0 = vsel %vm10447_vm13, %v2741_v46, %v2745_v48  ;;  %v2773_v18 = vrot.slane %v2771_v3, 5  ;;  %v2769_v20 = vrot.slane %v2768_v6, 4  ;;  %v8517_v46 = vrot.slane %v8501_v36, 9 }
 0x1ae   : >> { %v2012_v10 = vpop.permute.xlu0 %2011  ;;  %2694 = vrot.lane.b32.xlu1 %v8482_v62, %s9808_s25  ;;  %v2837_v62 = vrot.slane %v2835_v43, 5  ;;  %v8512_v43 = vld [vmem:[%s10434_s24 + $0xcc] sm:$0x1]  ;;  %v2912_v48 = vrot.slane %v8502_v37, 5  ;;  %v8515_v3 = vld [vmem:[%s10434_s24 + $0xd8] sm:$0xe] }
 0x1af   : >> { %2036 = vst.msk [vmem:[#allocation4] sm:$0xf] %vm2035_vm3, %v2012_v10  ;;  %v2816_v10 = vsel %vm10447_vm13, %v2811_v57, %v2815_v58  ;;  %v2774_v32 = vsel %vm10447_vm13, %v2769_v20, %v2773_v18  ;;  %v2932_v54 = vrot.slane %v8512_v43, 5  ;;  %v8521_v57 = vrot.slane %v8509_v50, 9  ;;  %v8542_v36 = vld [vmem:[%s10434_s24 + $0xc8] sm:$0xf] }
 0x1b0   : >> { %2692 = vrot.lane.b32.xlu0 %v8481_v7, %s9808_s25  ;;  %v2022_v22 = vpop.permute.xlu1 %2021  ;;  %v2820_v7 = vrot.slane %v2818_v1, 4  ;;  %v2838_v14 = vor.u32 %v2837_v62, %v2834_v61  ;;  %v2928_v58 = vrot.slane %v8510_v51, 5  ;;  %v8506_v61 = vld [vmem:[%s10434_s24 + $0xb4] sm:$0x1]  ;;  %v8519_v6 = vrot.slane %v8505_v60, 9 }
 0x1b1   : >> { %2041 = vst.msk [vmem:[#allocation4 + $0x14] sm:$0xf] %vm2035_vm3, %v2022_v22  ;;  %v2933_v62 = vsel %vm10482_vm1, %v8522_v53, %v2932_v54  ;;  %v8524_v12 = vrot.slane %v8515_v3, 9  ;;  %v8537_v43 = vld [vmem:[%s10434_s24 + $0xb4] sm:$0x1]  ;;  %v3103_v50 = vshll.u32 %v8542_v36, 16 }
 0x1b2   : >> { %v2020_v33 = vpop.permute.xlu0 %2019  ;;  %2690 = vrot.lane.b32.xlu1 %v8480_v8, %s9808_s25  ;;  %v2823_v8 = vrot.slane %v2821_v47, 5  ;;  %v2839_v27 = vrot.slane %v2838_v14, 4  ;;  %v8507_v47 = vld [vmem:[%s10434_s24 + $0xb8] sm:$0xe]  ;;  %v2929_v5 = vsel %vm10482_vm1, %v8521_v57, %v2928_v58  ;;  %v8540_v51 = vld [vmem:[%s10434_s24 + $0xc0] sm:$0xf] }
 0x1b3   : >> { %2040 = vst.msk [vmem:[#allocation4 + $0x10] sm:$0xf] %vm2035_vm3, %v2020_v33  ;;  %v2941_v20 = vsel %vm10482_vm1, %v8524_v12, %v2940_v13  ;;  %v8529_v53 = vld [vmem:[%s10434_s24 + $0xc0] sm:$0xf]  ;;  %v8535_v54 = vld [vmem:[%s10434_s24 + $0xac] sm:$0x1] }
 0x1b4   : >> { %2688 = vrot.lane.b32.xlu0 %v8479_v16, %s9808_s25  ;;  %v2018_v45 = vpop.permute.xlu1 %2017  ;;  %v2824_v22 = vor.u32 %v2823_v8, %v2820_v7  ;;  %v2844_v38 = vsel %vm10447_vm13, %v2839_v27, %v2843_v28  ;;  %v2920_v7 = vrot.slane %v8506_v61, 5  ;;  %v8538_v58 = vld [vmem:[%s10434_s24 + $0xb8] sm:$0xf]  ;;  %v8545_v60 = vld [vmem:[%s10434_s24 + $0xd4] sm:$0x1]  ;;  %v3086_v61 = vshrl.u32 %v8540_v51, 16 }
 0x1b5   : >> { %2039 = vst.msk [vmem:[#allocation4 + $0xc] sm:$0xf] %vm2035_vm3, %v2018_v45  ;;  %v3105_v4 = vrot.slane %v3103_v50, 5 }
 0x1b6   : >> { %v2016_v55 = vpop.permute.xlu0 %2015  ;;  %2698 = vrot.lane.b32.xlu1 %v8484_v29, %s9808_s25  ;;  %v2825_v33 = vrot.slane %v2824_v22, 4  ;;  %v2921_v15 = vsel %vm10482_vm1, %v8519_v6, %v2920_v7  ;;  %v8536_v22 = vld [vmem:[%s10434_s24 + $0xb0] sm:$0xf]  ;;  %v8533_v6 = vld [vmem:[%s10434_s24 + $0xe0] sm:$0xf] }
 0x1b7   : >> { %2038 = vst.msk [vmem:[#allocation4 + $0x8] sm:$0xf] %vm2035_vm3, %v2016_v55  ;;  %v8508_v55 = vld [vmem:[%s10434_s24 + $0xbc] sm:$0x1]  ;;  %v3058_v28 = vshrl.u32 %v8536_v22, 16 }
 0x1b8   : >> { %2696 = vrot.lane.b32.xlu0 %v8483_v39, %s9808_s25  ;;  %v2026_v63 = vpop.permute.xlu1 %2025  ;;  %v8518_v39 = vrot.slane %v8503_v30, 9  ;;  %v2830_v45 = vsel %vm10447_vm13, %v2825_v33, %v2829_v34  ;;  %v8527_v30 = vld [vmem:[%s10434_s24 + $0xb0] sm:$0xf]  ;;  %v8543_v7 = vld [vmem:[%s10434_s24 + $0xcc] sm:$0x1]  ;;  %s9812_s25 = smov 88  }
 0x1b9   : >> { %2043 = vst.msk [vmem:[#allocation4 + $0x1c] sm:$0xf] %vm2035_vm3, %v2026_v63  ;;  %v8520_v63 = vrot.slane %v8507_v47, 9 }
 0x1ba   : >> { %v2024_v9 = vpop.permute.xlu0 %2023  ;;  %2847 = vrot.lane.b32.xlu1 %v2760_v56, %s9809_s12  ;;  %v2917_v52 = vsel %vm10482_vm1, %v8518_v39, %v2916_v40  ;;  %v2913_v56 = vsel %vm10482_vm1, %v8517_v46, %v2912_v48  ;;  %v3114_v40 = vshrl.u32 %v8544_v31, 16 }
 0x1bb   : >> { %2042 = vst.msk [vmem:[#allocation4 + $0x18] sm:$0xf] %vm2035_vm3, %v2024_v9  ;;  %v8513_v9 = vld [vmem:[%s10434_s24 + $0xd0] sm:$0xe]  ;;  %vm2869_vm3 = vcmask 650848  }
 0x1bc   : >> { %2845 = vrot.lane.b32.xlu0 %v2746_v0, %s9809_s12  ;;  %v2066_v16 = vpop.permute.xlu1 %2065  ;;  %v2924_v0 = vrot.slane %v8508_v55, 5  ;;  %v3067_v55 = vshll.u32 %v8537_v43, 16 }
 0x1bd   : >> { %2089 = vst.msk [vmem:[#allocation4 + $0x4] sm:$0xf] %vm2087_vm5, %v2066_v16  ;;  %v8523_v16 = vrot.slane %v8513_v9, 9  ;;  %v3075_v9 = vshll.u32 %v8538_v58, 16 }
 0x1be   : >> { %v2064_v25 = vpop.permute.xlu0 %2063  ;;  %2855 = vrot.lane.b32.xlu1 %v2816_v10, %s9809_s12  ;;  %v8514_v10 = vld [vmem:[%s10434_s24 + $0xd4] sm:$0x1]  ;;  %v2925_v11 = vsel %vm10482_vm1, %v8520_v63, %v2924_v0  ;;  %v3069_v12 = vrot.slane %v3067_v55, 5 }
 0x1bf   : >> { %2088 = vst.msk [vmem:[#allocation4] sm:$0xf] %vm2087_vm5, %v2064_v25  ;;  %v2936_v18 = vrot.slane %v8514_v10, 5 }
 0x1c0   : >> { %2853 = vrot.lane.b32.xlu0 %v2802_v19, %s9809_s12  ;;  %v2074_v29 = vpop.permute.xlu1 %2073 }
 0x1c1   : >> { %2093 = vst.msk [vmem:[#allocation4 + $0x14] sm:$0xf] %vm2087_vm5, %v2074_v29  ;;  %v2937_v25 = vsel %vm10482_vm1, %v8523_v16, %v2936_v18  ;;  %v3061_v29 = vshll.u32 %v8536_v22, 16  ;;  %v8541_v16 = vld [vmem:[%s10434_s24 + $0xc4] sm:$0x1]  ;;  %v3088_v18 = vrot.slane %v3086_v61, 4 }
 0x1c2   : >> { %v2072_v35 = vpop.permute.xlu0 %2071  ;;  %2851 = vrot.lane.b32.xlu1 %v2788_v26, %s9809_s12  ;;  %v8534_v26 = vld [vmem:[%s10434_s24 + $0xa8] sm:$0xf] }
 0x1c3   : >> { %2092 = vst.msk [vmem:[#allocation4 + $0x10] sm:$0xf] %vm2087_vm5, %v2072_v35  ;;  %v3044_v33 = vshrl.u32 %v8534_v26, 16  ;;  %v3047_v34 = vshll.u32 %v8534_v26, 16  ;;  %v8526_v35 = vld [vmem:[%s10434_s24 + $0xa8] sm:$0xf] }
 0x1c4   : >> { %2849 = vrot.lane.b32.xlu0 %v2774_v32, %s9809_s12  ;;  %v2070_v41 = vpop.permute.xlu1 %2069  ;;  %v3063_v39 = vrot.slane %v3061_v29, 5  ;;  %v3109_v29 = vshll.u32 %v8543_v7, 16  ;;  %v8552_v7 = vld [vmem:[%s10434_s24 + $0xb0] sm:$0xe] }
 0x1c5   : >> { %2091 = vst.msk [vmem:[#allocation4 + $0xc] sm:$0xf] %vm2087_vm5, %v2070_v41  ;;  %v3117_v41 = vshll.u32 %v8544_v31, 16  ;;  %v3046_v46 = vrot.slane %v3044_v33, 4  ;;  %v3049_v48 = vrot.slane %v3047_v34, 5 }
 0x1c6   : >> { %v2068_v49 = vpop.permute.xlu0 %2067  ;;  %2859 = vrot.lane.b32.xlu1 %v2844_v38, %s9809_s12  ;;  %v3060_v38 = vrot.slane %v3058_v28, 4 }
 0x1c7   : >> { %2090 = vst.msk [vmem:[#allocation4 + $0x8] sm:$0xf] %vm2087_vm5, %v2068_v49  ;;  %v3100_v49 = vshrl.u32 %v8542_v36, 16  ;;  %v3119_v57 = vrot.slane %v3117_v41, 5  ;;  %v3050_v0 = vor.u32 %v3049_v48, %v3046_v46  ;;  %v3111_v46 = vrot.slane %v3109_v29, 5 }
 0x1c8   : >> { %2857 = vrot.lane.b32.xlu0 %v2830_v45, %s9809_s12  ;;  %v2078_v1 = vpop.permute.xlu1 %2077  ;;  %v3064_v47 = vor.u32 %v3063_v39, %v3060_v38  ;;  %v3095_v38 = vshll.u32 %v8541_v16, 16  ;;  %v8567_v16 = vrot.slane %v8552_v7, 9  ;;  %v8559_v29 = vld [vmem:[%s10434_s24 + $0xcc] sm:$0x1]  ;;  %s9813_s12 = smov 92  }
 0x1c9   : >> { %2095 = vst.msk [vmem:[#allocation4 + $0x1c] sm:$0xf] %vm2087_vm5, %v2078_v1  ;;  %v3102_v3 = vrot.slane %v3100_v49, 4  ;;  %v3051_v26 = vrot.slane %v3050_v0, 4  ;;  %v8549_v49 = vld [vmem:[%s10434_s24 + $0xe4] sm:$0x1] }
 0x1ca   : >> { %v2076_v59 = vpop.permute.xlu0 %2075  ;;  %2944 = vrot.lane.b32.xlu1 %v2917_v52, %s9810_s30  ;;  %v8530_v52 = vld [vmem:[%s10434_s24 + $0xc8] sm:$0xf]  ;;  %v8576_v7 = vld [vmem:[%s10434_s24 + $0xb8] sm:$0xf] }
 0x1cb   : >> { %2094 = vst.msk [vmem:[#allocation4 + $0x18] sm:$0xf] %vm2087_vm5, %v2076_v59  ;;  %v8528_v59 = vld [vmem:[%s10434_s24 + $0xb8] sm:$0xf]  ;;  %v3106_v28 = vor.u32 %v3105_v4, %v3102_v3  ;;  %vm2966_vm5 = vcmask 683648  }
 0x1cc   : >> { %2942 = vrot.lane.b32.xlu0 %v2913_v56, %s9810_s30  ;;  %v2227_v2 = vpop.permute.xlu1 %2226  ;;  %v3116_v56 = vrot.slane %v3114_v40, 4 }
 0x1cd   : >> { %2250 = vst.msk [vmem:[#allocation4 + $0x4] sm:$0xf] %vm2248_vm9, %v2227_v2  ;;  %v3053_v2 = vshll.u32 %v8535_v54, 16  ;;  %v3107_v50 = vrot.slane %v3106_v28, 4  ;;  %v8558_v28 = vld [vmem:[%s10434_s24 + $0xc8] sm:$0xe] }
 0x1ce   : >> { %v2225_v8 = vpop.permute.xlu0 %2224  ;;  %2952 = vrot.lane.b32.xlu1 %v2933_v62, %s9810_s30  ;;  %v3089_v62 = vshll.u32 %v8540_v51, 16  ;;  %v3120_v13 = vor.u32 %v3119_v57, %v3116_v56 }
 0x1cf   : >> { %2249 = vst.msk [vmem:[#allocation4] sm:$0xf] %vm2248_vm9, %v2225_v8  ;;  %v3072_v8 = vshrl.u32 %v8538_v58, 16  ;;  %v3151_v58 = vshll.u32 %v8549_v49, 16  ;;  %v3112_v61 = vsel %vm10447_vm13, %v3107_v50, %v3111_v46  ;;  %v8565_v49 = vld [vmem:[%s10434_s24 + $0xe4] sm:$0x1] }
 0x1d0   : >> { %2950 = vrot.lane.b32.xlu0 %v2929_v5, %s9810_s30  ;;  %v2235_v14 = vpop.permute.xlu1 %2234  ;;  %v8548_v5 = vld [vmem:[%s10434_s24 + $0xe0] sm:$0xf]  ;;  %v3121_v39 = vrot.slane %v3120_v13, 4  ;;  %v8550_v13 = vld [vmem:[%s10434_s24 + $0xa8] sm:$0xe] }
 0x1d1   : >> { %2254 = vst.msk [vmem:[#allocation4 + $0x14] sm:$0xf] %vm2248_vm9, %v2235_v14  ;;  %v3123_v14 = vshll.u32 %v8545_v60, 16  ;;  %v3145_v22 = vshll.u32 %v8548_v5, 16  ;;  %v3074_v31 = vrot.slane %v3072_v8, 4 }
 0x1d2   : >> { %v2233_v19 = vpop.permute.xlu0 %2232  ;;  %2948 = vrot.lane.b32.xlu1 %v2925_v11, %s9810_s30  ;;  %v3065_v11 = vrot.slane %v3064_v47, 4  ;;  %v8547_v47 = vld [vmem:[%s10434_s24 + $0xdc] sm:$0x1]  ;;  %v8553_v8 = vld [vmem:[%s10434_s24 + $0xb4] sm:$0x1] }
 0x1d3   : >> { %2253 = vst.msk [vmem:[#allocation4 + $0x10] sm:$0xf] %vm2248_vm9, %v2233_v19  ;;  %v3091_v19 = vrot.slane %v3089_v62, 5  ;;  %v3137_v0 = vshll.u32 %v8547_v47, 16 }
 0x1d4   : >> { %2946 = vrot.lane.b32.xlu0 %v2921_v15, %s9810_s30  ;;  %v2231_v23 = vpop.permute.xlu1 %2230  ;;  %v8546_v15 = vld [vmem:[%s10434_s24 + $0xd8] sm:$0xf]  ;;  %v3070_v36 = vsel %vm10447_vm13, %v3065_v11, %v3069_v12 }
 0x1d5   : >> { %2252 = vst.msk [vmem:[#allocation4 + $0xc] sm:$0xf] %vm2248_vm9, %v2231_v23  ;;  %v3128_v33 = vshrl.u32 %v8546_v15, 16  ;;  %v3131_v34 = vshll.u32 %v8546_v15, 16  ;;  %v3092_v40 = vor.u32 %v3091_v19, %v3088_v18  ;;  %v3139_v11 = vrot.slane %v3137_v0, 5 }
 0x1d6   : >> { %v2229_v27 = vpop.permute.xlu0 %2228  ;;  %2956 = vrot.lane.b32.xlu1 %v2941_v20, %s9810_s30  ;;  %v3142_v20 = vshrl.u32 %v8548_v5, 16  ;;  %v3153_v5 = vrot.slane %v3151_v58, 5  ;;  %v3226_v18 = vrot.slane %v8553_v8, 5 }
 0x1d7   : >> { %2251 = vst.msk [vmem:[#allocation4 + $0x8] sm:$0xf] %vm2248_vm9, %v2229_v27  ;;  %v3055_v27 = vrot.slane %v3053_v2, 5  ;;  %v3093_v56 = vrot.slane %v3092_v40, 4  ;;  %v8554_v40 = vld [vmem:[%s10434_s24 + $0xb8] sm:$0xe] }
 0x1d8   : >> { %2954 = vrot.lane.b32.xlu0 %v2937_v25, %s9810_s30  ;;  %v2239_v32 = vpop.permute.xlu1 %2238  ;;  %v8532_v25 = vld [vmem:[%s10434_s24 + $0xd8] sm:$0xf]  ;;  %v3144_v41 = vrot.slane %v3142_v20, 4  ;;  %v8560_v20 = vld [vmem:[%s10434_s24 + $0xd0] sm:$0xe]  ;;  %s9814_s30 = smov 96  }
 0x1d9   : >> { %2256 = vst.msk [vmem:[#allocation4 + $0x1c] sm:$0xf] %vm2248_vm9, %v2239_v32  ;;  %v3077_v32 = vrot.slane %v3075_v9, 5 }
 0x1da   : >> { %v2237_v37 = vpop.permute.xlu0 %2236  ;;  %2996 = vrot.lane.b32.xlu1 %v8527_v30, %s9811_s15  ;;  %v8539_v30 = vld [vmem:[%s10434_s24 + $0xbc] sm:$0x1] }
 0x1db   : >> { %2255 = vst.msk [vmem:[#allocation4 + $0x18] sm:$0xf] %vm2248_vm9, %v2237_v37  ;;  %v3125_v37 = vrot.slane %v3123_v14, 5  ;;  %v3081_v48 = vshll.u32 %v8539_v30, 16  ;;  %v3078_v51 = vor.u32 %v3077_v32, %v3074_v31  ;;  %v8551_v14 = vld [vmem:[%s10434_s24 + $0xac] sm:$0x1]  ;;  %v3227_v30 = vsel %vm10482_vm1, %v8567_v16, %v3226_v18 }
 0x1dc   : >> { %2994 = vrot.lane.b32.xlu0 %v8526_v35, %s9811_s15  ;;  %v2324_v45 = vpop.permute.xlu1 %2323  ;;  %v8571_v31 = vrot.slane %v8560_v20, 9  ;;  %v8586_v18 = vld [vmem:[%s10434_s24 + $0xbc] sm:$0x1]  ;;  %vm3018_vm9 = vcmask 716448  }
 0x1dd   : >> { %2347 = vst.msk [vmem:[#allocation4 + $0x4] sm:$0xf] %vm2345_vm10, %v2324_v45  ;;  %v3056_v45 = vsel %vm10447_vm13, %v3051_v26, %v3055_v27  ;;  %v3126_v55 = vsel %vm10447_vm13, %v3121_v39, %v3125_v37  ;;  %v3083_v60 = vrot.slane %v3081_v48, 5  ;;  %v3079_v62 = vrot.slane %v3078_v51, 4  ;;  %v8564_v48 = vld [vmem:[%s10434_s24 + $0xe0] sm:$0xe] }
 0x1de   : >> { %v2322_v1 = vpop.permute.xlu0 %2321  ;;  %3004 = vrot.lane.b32.xlu1 %v8531_v42, %s9811_s15  ;;  %v3147_v42 = vrot.slane %v3145_v22, 5  ;;  %v8561_v22 = vld [vmem:[%s10434_s24 + $0xd4] sm:$0x1]  ;;  %v3222_v26 = vrot.slane %v8551_v14, 5  ;;  %v8570_v37 = vrot.slane %v8558_v28, 9  ;;  %v8568_v51 = vrot.slane %v8554_v40, 9 }
 0x1df   : >> { %2346 = vst.msk [vmem:[#allocation4] sm:$0xf] %vm2345_vm10, %v2322_v1  ;;  %v3097_v1 = vrot.slane %v3095_v38, 5  ;;  %v3084_v9 = vsel %vm10447_vm13, %v3079_v62, %v3083_v60  ;;  %v3242_v32 = vrot.slane %v8561_v22, 5  ;;  %v3238_v38 = vrot.slane %v8559_v29, 5 }
 0x1e0   : >> { %3002 = vrot.lane.b32.xlu0 %v8530_v52, %s9811_s15  ;;  %v2332_v63 = vpop.permute.xlu1 %2331  ;;  %v3130_v52 = vrot.slane %v3128_v33, 4  ;;  %v3148_v57 = vor.u32 %v3147_v42, %v3144_v41  ;;  %v8555_v41 = vld [vmem:[%s10434_s24 + $0xbc] sm:$0x1]  ;;  %v8575_v14 = vld [vmem:[%s10434_s24 + $0xb0] sm:$0xf] }
 0x1e1   : >> { %2351 = vst.msk [vmem:[#allocation4 + $0x14] sm:$0xf] %vm2345_vm10, %v2332_v63  ;;  %v3098_v3 = vsel %vm10447_vm13, %v3093_v56, %v3097_v1  ;;  %v3243_v42 = vsel %vm10482_vm1, %v8571_v31, %v3242_v32  ;;  %v3239_v50 = vsel %vm10482_vm1, %v8570_v37, %v3238_v38  ;;  %v8563_v1 = vld [vmem:[%s10434_s24 + $0xdc] sm:$0x1]  ;;  %v3250_v56 = vrot.slane %v8565_v49, 5 }
 0x1e2   : >> { %v2330_v10 = vpop.permute.xlu0 %2329  ;;  %3000 = vrot.lane.b32.xlu1 %v8529_v53, %s9811_s15  ;;  %v3133_v53 = vrot.slane %v3131_v34, 5  ;;  %v3149_v4 = vrot.slane %v3148_v57, 4  ;;  %v8556_v34 = vld [vmem:[%s10434_s24 + $0xc0] sm:$0xe]  ;;  %v3246_v60 = vrot.slane %v8563_v1, 5 }
 0x1e3   : >> { %2350 = vst.msk [vmem:[#allocation4 + $0x10] sm:$0xf] %vm2345_vm10, %v2330_v10  ;;  %v8579_v32 = vld [vmem:[%s10434_s24 + $0xd0] sm:$0xf]  ;;  %v8587_v40 = vld [vmem:[%s10434_s24 + $0xc0] sm:$0xf] }
 0x1e4   : >> { %2998 = vrot.lane.b32.xlu0 %v8528_v59, %s9811_s15  ;;  %v2328_v23 = vpop.permute.xlu1 %2327  ;;  %v3134_v63 = vor.u32 %v3133_v53, %v3130_v52  ;;  %v3154_v15 = vsel %vm10447_vm13, %v3149_v4, %v3153_v5  ;;  %v3230_v52 = vrot.slane %v8555_v41, 5  ;;  %v8583_v4 = vld [vmem:[%s10434_s24 + $0xb0] sm:$0xf]  ;;  %v8577_v41 = vld [vmem:[%s10434_s24 + $0xc0] sm:$0xf] }
 0x1e5   : >> { %2349 = vst.msk [vmem:[#allocation4 + $0xc] sm:$0xf] %vm2345_vm10, %v2328_v23  ;;  %v3354_v8 = vshrl.u32 %v8583_v4, 16  ;;  %v8592_v1 = vld [vmem:[%s10434_s24 + $0xd4] sm:$0x1] }
 0x1e6   : >> { %v2326_v35 = vpop.permute.xlu0 %2325  ;;  %3008 = vrot.lane.b32.xlu1 %v8533_v6, %s9811_s15  ;;  %v3135_v10 = vrot.slane %v3134_v63, 4  ;;  %v3231_v58 = vsel %vm10482_vm1, %v8568_v51, %v3230_v52  ;;  %v8597_v51 = vld [vmem:[%s10434_s24 + $0xe8] sm:$0xf] }
 0x1e7   : >> { %2348 = vst.msk [vmem:[#allocation4 + $0x8] sm:$0xf] %vm2345_vm10, %v2326_v35  ;;  %v8557_v35 = vld [vmem:[%s10434_s24 + $0xc4] sm:$0x1]  ;;  %v8582_v52 = vld [vmem:[%s10434_s24 + $0xe8] sm:$0xf] }
 0x1e8   : >> { %3006 = vrot.lane.b32.xlu0 %v8532_v25, %s9811_s15  ;;  %v2336_v43 = vpop.permute.xlu1 %2335  ;;  %v3140_v23 = vsel %vm10447_vm13, %v3135_v10, %v3139_v11  ;;  %v8566_v25 = vrot.slane %v8550_v13, 9  ;;  %v3357_v13 = vshll.u32 %v8583_v4, 16  ;;  %v8581_v4 = vld [vmem:[%s10434_s24 + $0xe0] sm:$0xf]  ;;  %s9816_s15 = smov 104  }
 0x1e9   : >> { %2353 = vst.msk [vmem:[#allocation4 + $0x1c] sm:$0xf] %vm2345_vm10, %v2336_v43  ;;  %v8569_v43 = vrot.slane %v8556_v34, 9  ;;  %v3377_v34 = vshll.u32 %v8586_v18, 16 }
 0x1ea   : >> { %v2334_v54 = vpop.permute.xlu0 %2333  ;;  %3157 = vrot.lane.b32.xlu1 %v3070_v36, %s9812_s25  ;;  %v3223_v36 = vsel %vm10482_vm1, %v8566_v25, %v3222_v26  ;;  %v3356_v25 = vrot.slane %v3354_v8, 4  ;;  %v8589_v26 = vld [vmem:[%s10434_s24 + $0xc8] sm:$0xf]  ;;  %v3359_v29 = vrot.slane %v3357_v13, 5 }
 0x1eb   : >> { %2352 = vst.msk [vmem:[#allocation4 + $0x18] sm:$0xf] %vm2345_vm10, %v2334_v54  ;;  %v8562_v54 = vld [vmem:[%s10434_s24 + $0xd8] sm:$0xe]  ;;  %vm3179_vm10 = vcmask 749248  }
 0x1ec   : >> { %3155 = vrot.lane.b32.xlu0 %v3056_v45, %s9812_s25  ;;  %v2376_v59 = vpop.permute.xlu1 %2375  ;;  %v3234_v45 = vrot.slane %v8557_v35, 5 }
 0x1ed   : >> { %2399 = vst.msk [vmem:[#allocation4 + $0x4] sm:$0xf] %vm2397_vm11, %v2376_v59  ;;  %v8572_v59 = vrot.slane %v8562_v54, 9 }
 0x1ee   : >> { %v2374_v2 = vpop.permute.xlu0 %2373  ;;  %3165 = vrot.lane.b32.xlu1 %v3126_v55, %s9812_s25  ;;  %v3235_v47 = vsel %vm10482_vm1, %v8569_v43, %v3234_v45  ;;  %v8573_v55 = vrot.slane %v8564_v48, 9  ;;  %v3399_v43 = vshll.u32 %v8589_v26, 16  ;;  %v3360_v48 = vor.u32 %v3359_v29, %v3356_v25 }
 0x1ef   : >> { %2398 = vst.msk [vmem:[#allocation4] sm:$0xf] %vm2397_vm11, %v2374_v2  ;;  %v3247_v5 = vsel %vm10482_vm1, %v8572_v59, %v3246_v60  ;;  %v8595_v60 = vld [vmem:[%s10434_s24 + $0xe0] sm:$0xf] }
 0x1f0   : >> { %3163 = vrot.lane.b32.xlu0 %v3112_v61, %s9812_s25  ;;  %v2384_v6 = vpop.permute.xlu1 %2383  ;;  %v8585_v61 = vld [vmem:[%s10434_s24 + $0xb8] sm:$0xf]  ;;  %v3251_v63 = vsel %vm10482_vm1, %v8573_v55, %v3250_v56  ;;  %v3385_v55 = vshll.u32 %v8587_v40, 16  ;;  %v3441_v13 = vshll.u32 %v8595_v60, 16 }
 0x1f1   : >> { %2403 = vst.msk [vmem:[#allocation4 + $0x14] sm:$0xf] %vm2397_vm11, %v2384_v6  ;;  %v3368_v2 = vshrl.u32 %v8585_v61, 16 }
 0x1f2   : >> { %v2382_v12 = vpop.permute.xlu0 %2381  ;;  %3161 = vrot.lane.b32.xlu1 %v3098_v3, %s9812_s25  ;;  %v3371_v3 = vshll.u32 %v8585_v61, 16  ;;  %v9577_v61 = vld [vmem:[%s13557_s1 + $0x30] sm:$0x3f]  }
 0x1f3   : >> { %2402 = vst.msk [vmem:[#allocation4 + $0x10] sm:$0xf] %vm2397_vm11, %v2382_v12  ;;  %v3370_v11 = vrot.slane %v3368_v2, 4  ;;  %v3455_v2 = vshll.u32 %v8597_v51, 16  ;;  %9452 = vmatprep.subr.msk.bf16.mxu0 %vm3698_vm15, %v9577_v61  ;;  %v3700_v8 = vsel %vm3698_vm15, %v9577_v61, 0  ;;  %9453 = vmatprep.subr.msk.bf16.mxu1 %vm3698_vm15, %v9577_v61  ;;  %vm3586_vm15 = vcmask 880448  }
 0x1f4   : >> { %3159 = vrot.lane.b32.xlu0 %v3084_v9, %s9812_s25  ;;  %v2380_v19 = vpop.permute.xlu1 %2379  ;;  %v8593_v9 = vld [vmem:[%s10434_s24 + $0xd8] sm:$0xf]  ;;  %v3373_v12 = vrot.slane %v3371_v3, 5  ;;  %9365 = vmatpush3.bf16.msra.mxu0 %v3700_v8  ;;  %v8599_v61 = vld [vmem:[%s10434_s24 + $0xb0] sm:$0xe] }
 0x1f5   : >> { %2401 = vst.msk [vmem:[#allocation4 + $0xc] sm:$0xf] %vm2397_vm11, %v2380_v19  ;;  %v8584_v19 = vld [vmem:[%s10434_s24 + $0xb4] sm:$0x1]  ;;  %v3424_v20 = vshrl.u32 %v8593_v9, 16  ;;  %v3427_v22 = vshll.u32 %v8593_v9, 16  ;;  %9443 = vmatpush3.bf16.msra.mxu1 %v3700_v8 }
 0x1f6   : >> { %v2378_v27 = vpop.permute.xlu0 %2377  ;;  %3169 = vrot.lane.b32.xlu1 %v3154_v15, %s9812_s25  ;;  %v8591_v15 = vld [vmem:[%s10434_s24 + $0xd0] sm:$0xf]  ;;  %v3374_v28 = vor.u32 %v3373_v12, %v3370_v11  ;;  %v3363_v35 = vshll.u32 %v8584_v19, 16  ;;  %v8588_v9 = vld [vmem:[%s10434_s24 + $0xc4] sm:$0x1]  ;;  %v3387_v11 = vrot.slane %v3385_v55, 5 }
 0x1f7   : >> { %2400 = vst.msk [vmem:[#allocation4 + $0x8] sm:$0xf] %vm2397_vm11, %v2378_v27  ;;  %v3413_v31 = vshll.u32 %v8591_v15, 16  ;;  %v3426_v37 = vrot.slane %v3424_v20, 4  ;;  %v3429_v38 = vrot.slane %v3427_v22, 5  ;;  %v3438_v12 = vshrl.u32 %v8595_v60, 16 }
 0x1f8   : >> { %3167 = vrot.lane.b32.xlu0 %v3140_v23, %s9812_s25  ;;  %v2388_v33 = vpop.permute.xlu1 %2387  ;;  %v8580_v23 = vld [vmem:[%s10434_s24 + $0xd8] sm:$0xf]  ;;  %v11370_v54 = vrot.slane %v3363_v35, 5  ;;  %v9578_v19 = vld [vmem:[%s13557_s1 + $0x28] sm:$0xff]   ;;  %v3457_v25 = vrot.slane %v3455_v2, 5  ;;  %v3391_v29 = vshll.u32 %v8588_v9, 16 }
 0x1f9   : >> { %2405 = vst.msk [vmem:[#allocation4 + $0x1c] sm:$0xf] %vm2397_vm11, %v2388_v33  ;;  %v8578_v33 = vld [vmem:[%s10434_s24 + $0xc8] sm:$0xf]  ;;  %9366 = vmatprep.subr.bf16.mxu0 %v9578_v19  ;;  %9437 = vmatprep.subr.bf16.mxu1 %v9578_v19  ;;  %v8601_v55 = vld [vmem:[%s10434_s24 + $0xb8] sm:$0xe] }
 0x1fa   : >> { %v2386_v39 = vpop.permute.xlu0 %2385  ;;  %3254 = vrot.lane.b32.xlu1 %v3227_v30, %s9813_s12  ;;  %v3410_v30 = vshrl.u32 %v8591_v15, 16  ;;  %9367 = vmatpush3.bf16.msra.mxu0 %v9578_v19  ;;  %v8616_v2 = vrot.slane %v8601_v55, 9  ;;  %v8615_v8 = vrot.slane %v8599_v61, 9 }
 0x1fb   : >> { %2404 = vst.msk [vmem:[#allocation4 + $0x18] sm:$0xf] %vm2397_vm11, %v2386_v39  ;;  %v3396_v39 = vshrl.u32 %v8589_v26, 16  ;;  %9444 = vmatpush3.bf16.msra.mxu1 %v9578_v19  ;;  %v8605_v19 = vld [vmem:[%s10434_s24 + $0xc8] sm:$0xe]  ;;  %vm3276_vm11 = vcmask 782048  }
 0x1fc   : >> { %3252 = vrot.lane.b32.xlu0 %v3223_v36, %s9813_s12  ;;  %v2537_v46 = vpop.permute.xlu1 %2536  ;;  %v3412_v49 = vrot.slane %v3410_v30, 4  ;;  %v8598_v30 = vld [vmem:[%s10434_s24 + $0xec] sm:$0x1] }
 0x1fd   : >> { %2560 = vst.msk [vmem:[#allocation4 + $0x4] sm:$0xf] %vm2558_vm12, %v2537_v46  ;;  %v11365_v46 = vrot.slane %v3374_v28, 4  ;;  %v3398_v59 = vrot.slane %v3396_v39, 4 }
 0x1fe   : >> { %v2535_v53 = vpop.permute.xlu0 %2534  ;;  %3262 = vrot.lane.b32.xlu1 %v3243_v42, %s9813_s12  ;;  %v8594_v42 = vld [vmem:[%s10434_s24 + $0xdc] sm:$0x1] }
 0x1ff   : >> { %2559 = vst.msk [vmem:[#allocation4] sm:$0xf] %vm2558_vm12, %v2535_v53  ;;  %v3379_v53 = vrot.slane %v3377_v34, 5  ;;  %v3443_v34 = vrot.slane %v3441_v13, 5  ;;  %v9582_v13 = vld [vmem:[%s13557_s1 + $0x8] sm:$0xff]  }
 0x200   : >> { %3260 = vrot.lane.b32.xlu0 %v3239_v50, %s9813_s12  ;;  %v2545_v57 = vpop.permute.xlu1 %2544  ;;  %v3415_v50 = vrot.slane %v3413_v31, 5 }
 0x201   : >> { %2564 = vst.msk [vmem:[#allocation4 + $0x14] sm:$0xf] %vm2558_vm12, %v2545_v57  ;;  %v3430_v57 = vor.u32 %v3429_v38, %v3426_v37  ;;  %v3380_v15 = vsel %vm10447_vm13, %v11365_v46, %v3379_v53  ;;  %v8596_v37 = vld [vmem:[%s10434_s24 + $0xe4] sm:$0x1] }
 0x202   : >> { %v2543_v62 = vpop.permute.xlu0 %2542  ;;  %3258 = vrot.lane.b32.xlu1 %v3235_v47, %s9813_s12  ;;  %v3382_v47 = vshrl.u32 %v8587_v40, 16  ;;  %v9579_v38 = vld [vmem:[%s13557_s1 + $0x20] sm:$0xff]  }
 0x203   : >> { %2563 = vst.msk [vmem:[#allocation4 + $0x10] sm:$0xf] %vm2558_vm12, %v2543_v62  ;;  %v8590_v62 = vld [vmem:[%s10434_s24 + $0xcc] sm:$0x1]  ;;  %v3431_v20 = vrot.slane %v3430_v57, 4  ;;  %9368 = vmatprep.subr.bf16.mxu0 %v9579_v38  ;;  %9438 = vmatprep.subr.bf16.mxu1 %v9579_v38 }
 0x204   : >> { %3256 = vrot.lane.b32.xlu0 %v3231_v58, %s9813_s12  ;;  %v2541_v0 = vpop.permute.xlu1 %2540  ;;  %v3433_v58 = vshll.u32 %v8594_v42, 16  ;;  %v3405_v18 = vshll.u32 %v8590_v62, 16  ;;  %v3461_v42 = vshll.u32 %v8598_v30, 16  ;;  %9369 = vmatpush3.bf16.msra.mxu0 %v9579_v38  ;;  %v8600_v62 = vld [vmem:[%s10434_s24 + $0xb4] sm:$0x1] }
 0x205   : >> { %2562 = vst.msk [vmem:[#allocation4 + $0xc] sm:$0xf] %vm2558_vm12, %v2541_v0  ;;  %v3452_v0 = vshrl.u32 %v8597_v51, 16  ;;  %9445 = vmatpush3.bf16.msra.mxu1 %v9579_v38  ;;  %v3532_v9 = vrot.slane %v8600_v62, 5 }
 0x206   : >> { %v2539_v6 = vpop.permute.xlu0 %2538  ;;  %3266 = vrot.lane.b32.xlu1 %v3251_v63, %s9813_s12  ;;  %v3401_v63 = vrot.slane %v3399_v43, 5 }
 0x207   : >> { %2561 = vst.msk [vmem:[#allocation4 + $0x8] sm:$0xf] %vm2558_vm12, %v2539_v6  ;;  %v3416_v6 = vor.u32 %v3415_v50, %v3412_v49  ;;  %v3447_v50 = vshll.u32 %v8596_v37, 16 }
 0x208   : >> { %3264 = vrot.lane.b32.xlu0 %v3247_v5, %s9813_s12  ;;  %v2549_v10 = vpop.permute.xlu1 %2548  ;;  %v3361_v5 = vrot.slane %v3360_v48, 4  ;;  %v3402_v22 = vor.u32 %v3401_v63, %v3398_v59  ;;  %v9581_v63 = vld [vmem:[%s13557_s1 + $0x10] sm:$0xff]  }
 0x209   : >> { %2566 = vst.msk [vmem:[#allocation4 + $0x1c] sm:$0xf] %vm2558_vm12, %v2549_v10  ;;  %v3384_v10 = vrot.slane %v3382_v47, 4  ;;  %v3417_v31 = vrot.slane %v3416_v6, 4  ;;  %v3449_v59 = vrot.slane %v3447_v50, 5 }
 0x20a   : >> { %v2547_v16 = vpop.permute.xlu0 %2546  ;;  %3306 = vrot.lane.b32.xlu1 %v8576_v7, %s9814_s30  ;;  %v3419_v7 = vshll.u32 %v8592_v1, 16  ;;  %v3403_v40 = vrot.slane %v3402_v22, 4  ;;  %v3463_v1 = vrot.slane %v3461_v42, 5  ;;  %v8610_v6 = vld [vmem:[%s10434_s24 + $0xdc] sm:$0x1]  ;;  %v3533_v22 = vsel %vm10482_vm1, %v8615_v8, %v3532_v9 }
 0x20b   : >> { %2565 = vst.msk [vmem:[#allocation4 + $0x18] sm:$0xf] %vm2558_vm12, %v2547_v16  ;;  %v3435_v16 = vrot.slane %v3433_v58, 5  ;;  %vm3328_vm12 = vcmask 814848  }
 0x20c   : >> { %3304 = vrot.lane.b32.xlu0 %v8575_v14, %s9814_s30  ;;  %v2634_v27 = vpop.permute.xlu1 %2633  ;;  %v3421_v28 = vrot.slane %v3419_v7, 5 }
 0x20d   : >> { %2657 = vst.msk [vmem:[#allocation4 + $0x4] sm:$0xf] %vm2655_vm14, %v2634_v27  ;;  %v3366_v27 = vsel %vm10447_vm13, %v3361_v5, %v11370_v54  ;;  %v3436_v39 = vsel %vm10447_vm13, %v3431_v20, %v3435_v16  ;;  %v8609_v5 = vld [vmem:[%s10434_s24 + $0xd8] sm:$0xe]  ;;  %v3552_v16 = vrot.slane %v8610_v6, 5 }
 0x20e   : >> { %v2632_v36 = vpop.permute.xlu0 %2631  ;;  %3314 = vrot.lane.b32.xlu1 %v8580_v23, %s9814_s30  ;;  %v3454_v23 = vrot.slane %v3452_v0, 4  ;;  %v3422_v46 = vsel %vm10447_vm13, %v3417_v31, %v3421_v28  ;;  %v8606_v20 = vld [vmem:[%s10434_s24 + $0xcc] sm:$0x1]  ;;  %v8604_v28 = vld [vmem:[%s10434_s24 + $0xc4] sm:$0x1]  ;;  %v8618_v31 = vrot.slane %v8605_v19, 9 }
 0x20f   : >> { %2656 = vst.msk [vmem:[#allocation4] sm:$0xf] %vm2655_vm14, %v2632_v36  ;;  %v3407_v36 = vrot.slane %v3405_v18, 5  ;;  %v3540_v38 = vrot.slane %v8604_v28, 5 }
 0x210   : >> { %3312 = vrot.lane.b32.xlu0 %v8579_v32, %s9814_s30  ;;  %v2642_v45 = vpop.permute.xlu1 %2641  ;;  %v3388_v32 = vor.u32 %v3387_v11, %v3384_v10  ;;  %v8607_v11 = vld [vmem:[%s10434_s24 + $0xd0] sm:$0xe] }
 0x211   : >> { %2661 = vst.msk [vmem:[#allocation4 + $0x14] sm:$0xf] %vm2655_vm14, %v2642_v45  ;;  %v3393_v45 = vrot.slane %v3391_v29, 5  ;;  %v3408_v53 = vsel %vm10447_vm13, %v3403_v40, %v3407_v36  ;;  %v9584_v29 = vld [vmem:[%s13557_s1] sm:$0xff]  }
 0x212   : >> { %v2640_v56 = vpop.permute.xlu0 %2639  ;;  %3310 = vrot.lane.b32.xlu1 %v8578_v33, %s9814_s30  ;;  %v3440_v33 = vrot.slane %v3438_v12, 4  ;;  %v3389_v48 = vrot.slane %v3388_v32, 4  ;;  %v8608_v12 = vld [vmem:[%s10434_s24 + $0xd4] sm:$0x1]  ;;  %v3544_v32 = vrot.slane %v8606_v20, 5 }
 0x213   : >> { %2660 = vst.msk [vmem:[#allocation4 + $0x10] sm:$0xf] %vm2655_vm14, %v2640_v56  ;;  %v8602_v56 = vld [vmem:[%s10434_s24 + $0xbc] sm:$0x1]  ;;  %v8611_v40 = vld [vmem:[%s10434_s24 + $0xe0] sm:$0xe] }
 0x214   : >> { %3308 = vrot.lane.b32.xlu0 %v8577_v41, %s9814_s30  ;;  %v2638_v3 = vpop.permute.xlu1 %2637  ;;  %v3458_v41 = vor.u32 %v3457_v25, %v3454_v23  ;;  %v3444_v49 = vor.u32 %v3443_v34, %v3440_v33  ;;  %v3394_v57 = vsel %vm10447_vm13, %v3389_v48, %v3393_v45  ;;  %v8619_v23 = vrot.slane %v8607_v11, 9  ;;  %v8613_v34 = vld [vmem:[%s10434_s24 + $0xe8] sm:$0xe] }
 0x215   : >> { %2659 = vst.msk [vmem:[#allocation4 + $0xc] sm:$0xf] %vm2655_vm14, %v2638_v3  ;;  %v3536_v3 = vrot.slane %v8602_v56, 5  ;;  %v3548_v25 = vrot.slane %v8608_v12, 5  ;;  %v3545_v42 = vsel %vm10482_vm1, %v8618_v31, %v3544_v32 }
 0x216   : >> { %v2636_v14 = vpop.permute.xlu0 %2635  ;;  %3318 = vrot.lane.b32.xlu1 %v8582_v52, %s9814_s30  ;;  %v9580_v52 = vld [vmem:[%s13557_s1 + $0x18] sm:$0xff]   ;;  %v3459_v54 = vrot.slane %v3458_v41, 4  ;;  %v3445_v58 = vrot.slane %v3444_v49, 4  ;;  %v8612_v41 = vld [vmem:[%s10434_s24 + $0xe4] sm:$0x1]  ;;  %v8621_v49 = vrot.slane %v8611_v40, 9 }
 0x217   : >> { %2658 = vst.msk [vmem:[#allocation4 + $0x8] sm:$0xf] %vm2655_vm14, %v2636_v14  ;;  %9370 = vmatprep.subr.bf16.mxu0 %v9580_v52  ;;  %9439 = vmatprep.subr.bf16.mxu1 %v9580_v52  ;;  %v3537_v14 = vsel %vm10482_vm1, %v8616_v2, %v3536_v3  ;;  %v3549_v36 = vsel %vm10482_vm1, %v8619_v23, %v3548_v25  ;;  %v3556_v50 = vrot.slane %v8612_v41, 5 }
 0x218   : >> { %3316 = vrot.lane.b32.xlu0 %v8581_v4, %s9814_s30  ;;  %v2646_v26 = vpop.permute.xlu1 %2645  ;;  %s9815_s30 = smov 100   ;;  %9371 = vmatpush3.bf16.msra.mxu0 %v9580_v52  ;;  %v3464_v0 = vsel %vm10447_vm13, %v3459_v54, %v3463_v1  ;;  %v3450_v7 = vsel %vm10447_vm13, %v3445_v58, %v3449_v59 }
 0x219   : >> { %2663 = vst.msk [vmem:[#allocation4 + $0x1c] sm:$0xf] %vm2655_vm14, %v2646_v26  ;;  %9446 = vmatpush3.bf16.msra.mxu1 %v9580_v52  ;;  %9372 = vmatprep.subr.bf16.mxu0 %v9581_v63  ;;  %v3557_v54 = vsel %vm10482_vm1, %v8621_v49, %v3556_v50 }
 0x21a   : >> { %v2644_v35 = vpop.permute.xlu0 %2643  ;;  %3467 = vrot.lane.b32.xlu1 %v3380_v15, %s9815_s30  ;;  %9440 = vmatprep.subr.bf16.mxu1 %v9581_v63  ;;  %v8620_v15 = vrot.slane %v8609_v5, 9 }
 0x21b   : >> { %2662 = vst.msk [vmem:[#allocation4 + $0x18] sm:$0xf] %vm2655_vm14, %v2644_v35  ;;  %v8614_v35 = vld [vmem:[%s10434_s24 + $0xec] sm:$0x1]  ;;  %vm3489_vm14 = vcmask 847648  }
 0x21c   : >> { %3465 = vrot.lane.b32.xlu0 %v3366_v27, %s9815_s30  ;;  %v2687_v43 = vpop.permute.xlu1 %2686  ;;  %9373 = vmatpush3.bf16.msra.mxu0 %v9581_v63  ;;  %v8603_v27 = vld [vmem:[%s10434_s24 + $0xc0] sm:$0xe]  ;;  %v3553_v30 = vsel %vm10482_vm1, %v8620_v15, %v3552_v16  ;;  %v3560_v45 = vrot.slane %v8614_v35, 5 }
 0x21d   : >> { %2710 = vst.msk [vmem:[#allocation4 + $0x4] sm:$0xf] %vm2708_vm2, %v2687_v43  ;;  %9447 = vmatpush3.bf16.msra.mxu1 %v9581_v63  ;;  %9374 = vmatprep.subr.bf16.mxu0 %v9582_v13  ;;  %v8617_v37 = vrot.slane %v8603_v27, 9  ;;  %v8622_v43 = vrot.slane %v8613_v34, 9 }
 0x21e   : >> { %v2685_v51 = vpop.permute.xlu0 %2684  ;;  %3475 = vrot.lane.b32.xlu1 %v3436_v39, %s9815_s30  ;;  %9441 = vmatprep.subr.bf16.mxu1 %v9582_v13 }
 0x21f   : >> { %2709 = vst.msk [vmem:[#allocation4] sm:$0xf] %vm2708_vm2, %v2685_v51  ;;  %v3541_v48 = vsel %vm10482_vm1, %v8617_v37, %v3540_v38  ;;  %v3561_v52 = vsel %vm10482_vm1, %v8622_v43, %v3560_v45 }
 0x220   : >> { %3473 = vrot.lane.b32.xlu0 %v3422_v46, %s9815_s30  ;;  %v2695_v47 = vpop.permute.xlu1 %2694  ;;  %9375 = vmatpush3.bf16.msra.mxu0 %v9582_v13 }
 0x221   : >> { %2714 = vst.msk [vmem:[#allocation4 + $0x14] sm:$0xf] %vm2708_vm2, %v2695_v47  ;;  %9448 = vmatpush3.bf16.msra.mxu1 %v9582_v13  ;;  %9376 = vmatprep.subr.bf16.mxu0 %v9584_v29 }
 0x222   : >> { %v2693_v60 = vpop.permute.xlu0 %2692  ;;  %3471 = vrot.lane.b32.xlu1 %v3408_v53, %s9815_s30  ;;  %9442 = vmatprep.subr.bf16.mxu1 %v9584_v29 }
 0x223   : >> { %2713 = vst.msk [vmem:[#allocation4 + $0x10] sm:$0xf] %vm2708_vm2, %v2693_v60 }
 0x224   : >> { %3469 = vrot.lane.b32.xlu0 %v3394_v57, %s9815_s30  ;;  %v2691_v4 = vpop.permute.xlu1 %2690  ;;  %9377 = vmatpush3.bf16.msra.mxu0 %v9584_v29 }
 0x225   : >> { %2712 = vst.msk [vmem:[#allocation4 + $0xc] sm:$0xf] %vm2708_vm2, %v2691_v4  ;;  %9449 = vmatpush3.bf16.msra.mxu1 %v9584_v29 }
 0x226   : >> { %v2689_v10 = vpop.permute.xlu0 %2688  ;;  %3479 = vrot.lane.b32.xlu1 %v3464_v0, %s9815_s30 }
 0x227   : >> { %2711 = vst.msk [vmem:[#allocation4 + $0x8] sm:$0xf] %vm2708_vm2, %v2689_v10 }
 0x228   : >> { %3477 = vrot.lane.b32.xlu0 %v3450_v7, %s9815_s30  ;;  %v2699_v18 = vpop.permute.xlu1 %2698 }
 0x229   : >> { %2716 = vst.msk [vmem:[#allocation4 + $0x1c] sm:$0xf] %vm2708_vm2, %v2699_v18 }
 0x22a   : >> { %v2697_v26 = vpop.permute.xlu0 %2696  ;;  %3564 = vrot.lane.b32.xlu1 %v3537_v14, %s9816_s15 }
 0x22b   : >> { %2715 = vst.msk [vmem:[#allocation4 + $0x18] sm:$0xf] %vm2708_vm2, %v2697_v26  ;;  %vm3685_vm2 = vcmask 883712  }
 0x22c   : >> { %3562 = vrot.lane.b32.xlu0 %v3533_v22, %s9816_s15  ;;  %v2848_v33 = vpop.permute.xlu1 %2847 }
 0x22d   : >> { %2871 = vst.msk [vmem:[#allocation4 + $0x4] sm:$0xf] %vm2869_vm3, %v2848_v33 }
 0x22e   : >> { %v2846_v39 = vpop.permute.xlu0 %2845  ;;  %3572 = vrot.lane.b32.xlu1 %v3553_v30, %s9816_s15 }
 0x22f   : >> { %2870 = vst.msk [vmem:[#allocation4] sm:$0xf] %vm2869_vm3, %v2846_v39 }
 0x230   : >> { %3570 = vrot.lane.b32.xlu0 %v3549_v36, %s9816_s15  ;;  %v2856_v46 = vpop.permute.xlu1 %2855 }
 0x231   : >> { %2875 = vst.msk [vmem:[#allocation4 + $0x14] sm:$0xf] %vm2869_vm3, %v2856_v46 }
 0x232   : >> { %v2854_v51 = vpop.permute.xlu0 %2853  ;;  %3568 = vrot.lane.b32.xlu1 %v3545_v42, %s9816_s15 }
 0x233   : >> { %2874 = vst.msk [vmem:[#allocation4 + $0x10] sm:$0xf] %vm2869_vm3, %v2854_v51 }
 0x234   : >> { %3566 = vrot.lane.b32.xlu0 %v3541_v48, %s9816_s15  ;;  %v2852_v53 = vpop.permute.xlu1 %2851 }
 0x235   : >> { %2873 = vst.msk [vmem:[#allocation4 + $0xc] sm:$0xf] %vm2869_vm3, %v2852_v53 }
 0x236   : >> { %v2850_v1 = vpop.permute.xlu0 %2849  ;;  %3576 = vrot.lane.b32.xlu1 %v3561_v52, %s9816_s15 }
 0x237   : >> { %2872 = vst.msk [vmem:[#allocation4 + $0x8] sm:$0xf] %vm2869_vm3, %v2850_v1 }
 0x238   : >> { %3574 = vrot.lane.b32.xlu0 %v3557_v54, %s9816_s15  ;;  %v2860_v47 = vpop.permute.xlu1 %2859  ;;  %s11568_s15 = scalar_lea.vmem [#allocation3], %s9196_s14  ;;  %s11641_s14 = smov (%p826_p0), 0  }
 0x239   : >> { %2877 = vst.msk [vmem:[#allocation4 + $0x1c] sm:$0xf] %vm2869_vm3, %v2860_v47 }
 0x23a   : >> { %v2858_v55 = vpop.permute.xlu0 %2857 }
 0x23b   : >> { %2876 = vst.msk [vmem:[#allocation4 + $0x18] sm:$0xf] %vm2869_vm3, %v2858_v55 }
 0x23c   : >> { %v2945_v56 = vpop.permute.xlu1 %2944 }
 0x23d   : >> { %2968 = vst.msk [vmem:[#allocation4 + $0x4] sm:$0xf] %vm2966_vm5, %v2945_v56  ;;  %v11553_v56 = vld [vmem:[%s13558_s2] ss:$0 sm:$0xff] }
 0x23e   : >> { %v2943_v57 = vpop.permute.xlu0 %2942 }
 0x23f   : >> { %2967 = vst.msk [vmem:[#allocation4] sm:$0xf] %vm2966_vm5, %v2943_v57 }
 0x240   : >> { %v2953_v58 = vpop.permute.xlu1 %2952 }
 0x241   : >> { %2972 = vst.msk [vmem:[#allocation4 + $0x14] sm:$0xf] %vm2966_vm5, %v2953_v58 }
 0x242   : >> { %v2951_v59 = vpop.permute.xlu0 %2950 }
 0x243   : >> { %2971 = vst.msk [vmem:[#allocation4 + $0x10] sm:$0xf] %vm2966_vm5, %v2951_v59 }
 0x244   : >> { %v2949_v60 = vpop.permute.xlu1 %2948 }
 0x245   : >> { %2970 = vst.msk [vmem:[#allocation4 + $0xc] sm:$0xf] %vm2966_vm5, %v2949_v60 }
 0x246   : >> { %v2947_v61 = vpop.permute.xlu0 %2946 }
 0x247   : >> { %2969 = vst.msk [vmem:[#allocation4 + $0x8] sm:$0xf] %vm2966_vm5, %v2947_v61 }
 0x248   : >> { %v2957_v62 = vpop.permute.xlu1 %2956 }
 0x249   : >> { %2974 = vst.msk [vmem:[#allocation4 + $0x1c] sm:$0xf] %vm2966_vm5, %v2957_v62 }
 0x24a   : >> { %v2955_v63 = vpop.permute.xlu0 %2954 }
 0x24b   : >> { %2973 = vst.msk [vmem:[#allocation4 + $0x18] sm:$0xf] %vm2966_vm5, %v2955_v63 }
 0x24c   : >> { %v2997_v0 = vpop.permute.xlu1 %2996 }
 0x24d   : >> { %3020 = vst.msk [vmem:[#allocation4 + $0x4] sm:$0xf] %vm3018_vm9, %v2997_v0 }
 0x24e   : >> { %v2995_v2 = vpop.permute.xlu0 %2994 }
 0x24f   : >> { %3019 = vst.msk [vmem:[#allocation4] sm:$0xf] %vm3018_vm9, %v2995_v2 }
 0x250   : >> { %v3005_v3 = vpop.permute.xlu1 %3004 }
 0x251   : >> { %3024 = vst.msk [vmem:[#allocation4 + $0x14] sm:$0xf] %vm3018_vm9, %v3005_v3 }
 0x252   : >> { %v3003_v4 = vpop.permute.xlu0 %3002 }
 0x253   : >> { %3023 = vst.msk [vmem:[#allocation4 + $0x10] sm:$0xf] %vm3018_vm9, %v3003_v4 }
 0x254   : >> { %v3001_v5 = vpop.permute.xlu1 %3000 }
 0x255   : >> { %3022 = vst.msk [vmem:[#allocation4 + $0xc] sm:$0xf] %vm3018_vm9, %v3001_v5 }
 0x256   : >> { %v2999_v6 = vpop.permute.xlu0 %2998 }
 0x257   : >> { %3021 = vst.msk [vmem:[#allocation4 + $0x8] sm:$0xf] %vm3018_vm9, %v2999_v6 }
 0x258   : >> { %v3009_v7 = vpop.permute.xlu1 %3008 }
 0x259   : >> { %3026 = vst.msk [vmem:[#allocation4 + $0x1c] sm:$0xf] %vm3018_vm9, %v3009_v7 }
 0x25a   : >> { %v3007_v8 = vpop.permute.xlu0 %3006 }
 0x25b   : >> { %3025 = vst.msk [vmem:[#allocation4 + $0x18] sm:$0xf] %vm3018_vm9, %v3007_v8 }
 0x25c   : >> { %v3158_v9 = vpop.permute.xlu1 %3157 }
 0x25d   : >> { %3181 = vst.msk [vmem:[#allocation4 + $0x4] sm:$0xf] %vm3179_vm10, %v3158_v9 }
 0x25e   : >> { %v3156_v10 = vpop.permute.xlu0 %3155 }
 0x25f   : >> { %3180 = vst.msk [vmem:[#allocation4] sm:$0xf] %vm3179_vm10, %v3156_v10 }
 0x260   : >> { %v3166_v11 = vpop.permute.xlu1 %3165 }
 0x261   : >> { %3185 = vst.msk [vmem:[#allocation4 + $0x14] sm:$0xf] %vm3179_vm10, %v3166_v11 }
 0x262   : >> { %v3164_v12 = vpop.permute.xlu0 %3163 }
 0x263   : >> { %3184 = vst.msk [vmem:[#allocation4 + $0x10] sm:$0xf] %vm3179_vm10, %v3164_v12 }
 0x264   : >> { %v3162_v13 = vpop.permute.xlu1 %3161 }
 0x265   : >> { %3183 = vst.msk [vmem:[#allocation4 + $0xc] sm:$0xf] %vm3179_vm10, %v3162_v13 }
 0x266   : >> { %v3160_v14 = vpop.permute.xlu0 %3159 }
 0x267   : >> { %3182 = vst.msk [vmem:[#allocation4 + $0x8] sm:$0xf] %vm3179_vm10, %v3160_v14 }
 0x268   : >> { %v3170_v15 = vpop.permute.xlu1 %3169 }
 0x269   : >> { %3187 = vst.msk [vmem:[#allocation4 + $0x1c] sm:$0xf] %vm3179_vm10, %v3170_v15 }
 0x26a   : >> { %v3168_v16 = vpop.permute.xlu0 %3167 }
 0x26b   : >> { %3186 = vst.msk [vmem:[#allocation4 + $0x18] sm:$0xf] %vm3179_vm10, %v3168_v16 }
 0x26c   : >> { %v3255_v18 = vpop.permute.xlu1 %3254 }
 0x26d   : >> { %3278 = vst.msk [vmem:[#allocation4 + $0x4] sm:$0xf] %vm3276_vm11, %v3255_v18 }
 0x26e   : >> { %v3253_v19 = vpop.permute.xlu0 %3252 }
 0x26f   : >> { %3277 = vst.msk [vmem:[#allocation4] sm:$0xf] %vm3276_vm11, %v3253_v19 }
 0x270   : >> { %v3263_v20 = vpop.permute.xlu1 %3262 }
 0x271   : >> { %3282 = vst.msk [vmem:[#allocation4 + $0x14] sm:$0xf] %vm3276_vm11, %v3263_v20 }
 0x272   : >> { %v3261_v22 = vpop.permute.xlu0 %3260 }
 0x273   : >> { %3281 = vst.msk [vmem:[#allocation4 + $0x10] sm:$0xf] %vm3276_vm11, %v3261_v22 }
 0x274   : >> { %v3259_v23 = vpop.permute.xlu1 %3258 }
 0x275   : >> { %3280 = vst.msk [vmem:[#allocation4 + $0xc] sm:$0xf] %vm3276_vm11, %v3259_v23 }
 0x276   : >> { %v3257_v25 = vpop.permute.xlu0 %3256 }
 0x277   : >> { %3279 = vst.msk [vmem:[#allocation4 + $0x8] sm:$0xf] %vm3276_vm11, %v3257_v25 }
 0x278   : >> { %v3267_v26 = vpop.permute.xlu1 %3266 }
 0x279   : >> { %3284 = vst.msk [vmem:[#allocation4 + $0x1c] sm:$0xf] %vm3276_vm11, %v3267_v26  ;;  %v8656_v26 = vld [vmem:[%s11568_s15 + $0x68] sm:$0xf] }
 0x27a   : >> { %v3265_v27 = vpop.permute.xlu0 %3264 }
 0x27b   : >> { %3283 = vst.msk [vmem:[#allocation4 + $0x18] sm:$0xf] %vm3276_vm11, %v3265_v27  ;;  %v8658_v27 = vld [vmem:[%s11568_s15 + $0x6c] sm:$0x1] }
 0x27c   : >> { %v3307_v28 = vpop.permute.xlu1 %3306 }
 0x27d   : >> { %3330 = vst.msk [vmem:[#allocation4 + $0x4] sm:$0xf] %vm3328_vm12, %v3307_v28 }
 0x27e   : >> { %v3305_v29 = vpop.permute.xlu0 %3304 }
 0x27f   : >> { %3329 = vst.msk [vmem:[#allocation4] sm:$0xf] %vm3328_vm12, %v3305_v29 }
 0x280   : >> { %v3315_v30 = vpop.permute.xlu1 %3314 }
 0x281   : >> { %3334 = vst.msk [vmem:[#allocation4 + $0x14] sm:$0xf] %vm3328_vm12, %v3315_v30 }
 0x282   : >> { %v3313_v31 = vpop.permute.xlu0 %3312 }
 0x283   : >> { %3333 = vst.msk [vmem:[#allocation4 + $0x10] sm:$0xf] %vm3328_vm12, %v3313_v31 }
 0x284   : >> { %v3311_v32 = vpop.permute.xlu1 %3310 }
 0x285   : >> { %3332 = vst.msk [vmem:[#allocation4 + $0xc] sm:$0xf] %vm3328_vm12, %v3311_v32 }
 0x286   : >> { %v3309_v33 = vpop.permute.xlu0 %3308 }
 0x287   : >> { %3331 = vst.msk [vmem:[#allocation4 + $0x8] sm:$0xf] %vm3328_vm12, %v3309_v33 }
 0x288   : >> { %v3319_v34 = vpop.permute.xlu1 %3318 }
 0x289   : >> { %3336 = vst.msk [vmem:[#allocation4 + $0x1c] sm:$0xf] %vm3328_vm12, %v3319_v34 }
 0x28a   : >> { %v3317_v35 = vpop.permute.xlu0 %3316 }
 0x28b   : >> { %3335 = vst.msk [vmem:[#allocation4 + $0x18] sm:$0xf] %vm3328_vm12, %v3317_v35  ;;  %vm11562_vm12 = vmand %vm511_vm6, %vm479_vm4 }
 0x28c   : >> { %v3468_v36 = vpop.permute.xlu1 %3467 }
 0x28d   : >> { %3491 = vst.msk [vmem:[#allocation4 + $0x4] sm:$0xf] %vm3489_vm14, %v3468_v36  ;;  %v8648_v36 = vld [vmem:[%s11568_s15 + $0x58] sm:$0xf] }
 0x28e   : >> { %v3466_v37 = vpop.permute.xlu0 %3465 }
 0x28f   : >> { %3490 = vst.msk [vmem:[#allocation4] sm:$0xf] %vm3489_vm14, %v3466_v37  ;;  %v8650_v37 = vld [vmem:[%s11568_s15 + $0x5c] sm:$0x1] }
 0x290   : >> { %v3476_v38 = vpop.permute.xlu1 %3475 }
 0x291   : >> { %3495 = vst.msk [vmem:[#allocation4 + $0x14] sm:$0xf] %vm3489_vm14, %v3476_v38 }
 0x292   : >> { %v3474_v39 = vpop.permute.xlu0 %3473 }
 0x293   : >> { %3494 = vst.msk [vmem:[#allocation4 + $0x10] sm:$0xf] %vm3489_vm14, %v3474_v39 }
 0x294   : >> { %v3472_v40 = vpop.permute.xlu1 %3471 }
 0x295   : >> { %3493 = vst.msk [vmem:[#allocation4 + $0xc] sm:$0xf] %vm3489_vm14, %v3472_v40 }
 0x296   : >> { %v3470_v41 = vpop.permute.xlu0 %3469 }
 0x297   : >> { %3492 = vst.msk [vmem:[#allocation4 + $0x8] sm:$0xf] %vm3489_vm14, %v3470_v41 }
 0x298   : >> { %v3480_v42 = vpop.permute.xlu1 %3479 }
 0x299   : >> { %3497 = vst.msk [vmem:[#allocation4 + $0x1c] sm:$0xf] %vm3489_vm14, %v3480_v42 }
 0x29a   : >> { %v3478_v43 = vpop.permute.xlu0 %3477 }
 0x29b   : >> { %3496 = vst.msk [vmem:[#allocation4 + $0x18] sm:$0xf] %vm3489_vm14, %v3478_v43 }
 0x29c   : >> { %v3565_v45 = vpop.permute.xlu1 %3564 }
 0x29d   : >> { %3588 = vst.msk [vmem:[#allocation4 + $0x4] sm:$0xf] %vm3586_vm15, %v3565_v45 }
 0x29e   : >> { %v3563_v46 = vpop.permute.xlu0 %3562 }
 0x29f   : >> { %3587 = vst.msk [vmem:[#allocation4] sm:$0xf] %vm3586_vm15, %v3563_v46 }
 0x2a0   : >> { %v3573_v48 = vpop.permute.xlu1 %3572 }
 0x2a1   : >> { %3592 = vst.msk [vmem:[#allocation4 + $0x14] sm:$0xf] %vm3586_vm15, %v3573_v48  ;;  %v8660_v48 = vld [vmem:[%s11568_s15 + $0x70] sm:$0xf] }
 0x2a2   : >> { %v3571_v49 = vpop.permute.xlu0 %3570 }
 0x2a3   : >> { %3591 = vst.msk [vmem:[#allocation4 + $0x10] sm:$0xf] %vm3586_vm15, %v3571_v49 }
 0x2a4   : >> { %v3569_v50 = vpop.permute.xlu1 %3568 }
 0x2a5   : >> { %3590 = vst.msk [vmem:[#allocation4 + $0xc] sm:$0xf] %vm3586_vm15, %v3569_v50 }
 0x2a6   : >> { %v3567_v51 = vpop.permute.xlu0 %3566  ;;  %v9583_v52 = vld [vmem:[#allocation4] sm:$0xff]  }
 0x2a7   : >> { %3589 = vst.msk [vmem:[#allocation4 + $0x8] sm:$0xf] %vm3586_vm15, %v3567_v51  ;;  %9378 = vmatprep.mubr.msk.bf16.mxu0 %vm3685_vm2, %v9583_v52 }
 0x2a8   : >> { %v3577_v53 = vpop.permute.xlu1 %3576 }
 0x2a9   : >> { %3594 = vst.msk [vmem:[#allocation4 + $0x1c] sm:$0xf] %vm3586_vm15, %v3577_v53 }
 0x2aa   : >> { %v3575_v54 = vpop.permute.xlu0 %3574  ;;  %v9585_v1 = vld [vmem:[#allocation4 + $0x10] sm:$0xff]  }
 0x2ab   : >> { %3593 = vst.msk [vmem:[#allocation4 + $0x18] sm:$0xf] %vm3586_vm15, %v3575_v54  ;;  %9382 = vmatprep.mubr.msk.bf16.mxu1 %vm3685_vm2, %v9585_v1  ;;  %v8662_v1 = vld [vmem:[%s11568_s15 + $0x74] sm:$0x1] }
 0x2ae   : >> { %v9586_v47 = vld [vmem:[#allocation4 + $0x8] sm:$0xff]  }
 0x2af   : >> { %9379 = vmatmul.mubr.msk.bf16.vlgmr.msra.gmra.mxu0 %vm3685_vm2, %v9586_v47 }
 0x2b2   : >> { %v9587_v55 = vld [vmem:[#allocation4 + $0x18] sm:$0xff]  }
 0x2b3   : >> { %9383 = vmatmul.mubr.msk.bf16.vlgmr.msra.gmra.mxu1 %vm3685_vm2, %v9587_v55 }
 0x36f   : >> { %v9380_v57 = vpop.f32.mrf.mxu0 }
 0x370   : >> { %v3745_v58 = vadd.f32 %v9380_v57, %v11553_v56 }
 0x371   : >> { %v3736_v59 = vpop.f32.mrf.mxu0 }
 0x372   : >> { %vm3769_vm3 = vcmp.gt.f32.partialorder %v3745_v58, 0.0  ;;  %v3777_v60 = vmul.f32 0.01, %v3745_v58  ;;  %v3737_v61 = vadd.f32 %v11553_v56, %v3736_v59 }
 0x373   : >> { %v9381_v62 = vpop.f32.mrf.mxu0  ;;  %v9384_v63 = vpop.f32.mrf.mxu1 }
 0x374   : >> { %v3785_v0 = vsel %vm3769_vm3, %v3745_v58, %v3777_v60  ;;  %vm3767_vm5 = vcmp.gt.f32.partialorder %v3737_v61, 0.0  ;;  %v3775_v2 = vmul.f32 0.01, %v3737_v61  ;;  %v3748_v3 = vadd.f32 %v9381_v62, %v11553_v56  ;;  %v8672_v60 = vld [vmem:[%s11568_s15 + $0x88] sm:$0xf] }
 0x375   : >> { %v9199_v4 = vpack.c.bf16 %v3785_v0, %v3785_v0  ;;  %v3761_v5 = vadd.f32 %v9384_v63, %v11553_v56  ;;  %v3739_v6 = vpop.f32.mrf.mxu0  ;;  %v3752_v7 = vpop.f32.mrf.mxu1  ;;  %v8674_v62 = vld [vmem:[%s11568_s15 + $0x8c] sm:$0x1] }
 0x376   : >> { %v3783_v8 = vsel %vm3767_vm5, %v3737_v61, %v3775_v2  ;;  %vm3770_vm9 = vcmp.gt.f32.partialorder %v3748_v3, 0.0  ;;  %v3778_v9 = vmul.f32 0.01, %v3748_v3  ;;  %v3740_v10 = vadd.f32 %v11553_v56, %v3739_v6 }
 0x377   : >> { %v3840_v11 = vshrl.u32 %v9199_v4, 16  ;;  %v3843_v12 = vshll.u32 %v9199_v4, 16  ;;  %v9197_v13 = vpack.c.bf16 %v3783_v8, %v3783_v8  ;;  %vm3773_vm10 = vcmp.gt.f32.partialorder %v3761_v5, 0.0  ;;  %v9385_v14 = vpop.f32.mrf.mxu1  ;;  %v8654_v8 = vld [vmem:[%s11568_s15 + $0x64] sm:$0x1] }
 0x378   : >> { %v3786_v15 = vsel %vm3770_vm9, %v3748_v3, %v3778_v9  ;;  %v3781_v16 = vmul.f32 0.01, %v3761_v5  ;;  %vm3768_vm11 = vcmp.gt.f32.partialorder %v3740_v10, 0.0  ;;  %v3776_v18 = vmul.f32 0.01, %v3740_v10 }
 0x379   : >> { %v3842_v19 = vrot.slane %v3840_v11, 7  ;;  %v3824_v20 = vshrl.u32 %v9197_v13, 16  ;;  %v3827_v22 = vshll.u32 %v9197_v13, 16  ;;  %v9200_v23 = vpack.c.bf16 %v3786_v15, %v3786_v15  ;;  %v3755_v52 = vpop.f32.mrf.mxu1 }
 0x37a   : >> { %v3789_v28 = vsel %vm3773_vm10, %v3761_v5, %v3781_v16  ;;  %v3784_v29 = vsel %vm3768_vm11, %v3740_v10, %v3776_v18  ;;  %v3753_v30 = vadd.f32 %v11553_v56, %v3752_v7  ;;  %v3764_v31 = vadd.f32 %v9385_v14, %v11553_v56  ;;  %v8652_v7 = vld [vmem:[%s11568_s15 + $0x60] sm:$0xf] }
 0x37b   : >> { %v3845_v32 = vor.u32 %v3843_v12, %v3842_v19  ;;  %v3846_v33 = vrot.slane %v3842_v19, 4  ;;  %v3826_v34 = vrot.slane %v3824_v20, 7  ;;  %v3848_v35 = vshrl.u32 %v9200_v23, 16 }
 0x37c   : >> { %v3851_v38 = vshll.u32 %v9200_v23, 16  ;;  %v9203_v39 = vpack.c.bf16 %v3789_v28, %v3789_v28  ;;  %v9198_v40 = vpack.c.bf16 %v3784_v29, %v3784_v29  ;;  %vm3771_vm14 = vcmp.gt.f32.partialorder %v3753_v30, 0.0 }
 0x37d   : >> { %v3924_v41 = vsel %vm11562_vm12, %v3845_v32, %v8656_v26  ;;  %v3927_v42 = vsel %vm10228_vm8, %v3846_v33, %v8658_v27  ;;  %v3829_v43 = vor.u32 %v3827_v22, %v3826_v34  ;;  %v3830_v45 = vrot.slane %v3826_v34, 4  ;;  %v8664_v26 = vld [vmem:[%s11568_s15 + $0x78] sm:$0xf]  ;;  %v8666_v27 = vld [vmem:[%s11568_s15 + $0x7c] sm:$0x1] }
 0x37e   : >> { %8657 = vst [vmem:[%s11568_s15 + $0x68] sm:$0xf] %v3924_v41  ;;  %8659 = vst [vmem:[%s11568_s15 + $0x6c] sm:$0x1] %v3927_v42  ;;  %v3850_v46 = vrot.slane %v3848_v35, 7  ;;  %v3872_v49 = vshrl.u32 %v9203_v39, 16  ;;  %v3756_v2 = vadd.f32 %v11553_v56, %v3755_v52 }
 0x37f   : >> { %v3875_v50 = vshll.u32 %v9203_v39, 16  ;;  %v3832_v51 = vshrl.u32 %v9198_v40, 16  ;;  %v3909_v53 = vsel %vm11562_vm12, %v3829_v43, %v8648_v36  ;;  %v3915_v54 = vsel %vm10228_vm8, %v3830_v45, %v8650_v37  ;;  %v8676_v33 = vld [vmem:[%s11568_s15 + $0x90] sm:$0xf]  ;;  %v8678_v34 = vld [vmem:[%s11568_s15 + $0x94] sm:$0x1] }
 0x380   : >> { %v3835_v47 = vshll.u32 %v9198_v40, 16  ;;  %v3779_v55 = vmul.f32 0.01, %v3753_v30  ;;  %8649 = vst [vmem:[%s11568_s15 + $0x58] sm:$0xf] %v3909_v53  ;;  %v3853_v57 = vor.u32 %v3851_v38, %v3850_v46  ;;  %v3854_v58 = vrot.slane %v3850_v46, 4 }
 0x381   : >> { %8651 = vst [vmem:[%s11568_s15 + $0x5c] sm:$0x1] %v3915_v54  ;;  %v3874_v59 = vrot.slane %v3872_v49, 7  ;;  %v3834_v61 = vrot.slane %v3832_v51, 7  ;;  %vm3774_vm15 = vcmp.gt.f32.partialorder %v3764_v31, 0.0  ;;  %vm3772_vm2 = vcmp.gt.f32.partialorder %v3756_v2, 0.0 }
 0x382   : >> { %v3787_v63 = vsel %vm3771_vm14, %v3753_v30, %v3779_v55  ;;  %v3782_v0 = vmul.f32 0.01, %v3764_v31  ;;  %v3930_v3 = vsel %vm11562_vm12, %v3853_v57, %v8660_v48  ;;  %v3933_v4 = vsel %vm10228_vm8, %v3854_v58, %v8662_v1  ;;  %v8668_v46 = vld [vmem:[%s11568_s15 + $0x80] sm:$0xf]  ;;  %v8670_v48 = vld [vmem:[%s11568_s15 + $0x84] sm:$0x1] }
 0x383   : >> { %v3877_v5 = vor.u32 %v3875_v50, %v3874_v59  ;;  %v3878_v6 = vrot.slane %v3874_v59, 4  ;;  %8661 = vst [vmem:[%s11568_s15 + $0x70] sm:$0xf] %v3930_v3  ;;  %8663 = vst [vmem:[%s11568_s15 + $0x74] sm:$0x1] %v3933_v4  ;;  %v3837_v9 = vor.u32 %v3835_v47, %v3834_v61  ;;  %v3838_v10 = vrot.slane %v3834_v61, 4 }
 0x384   : >> { %v9201_v11 = vpack.c.bf16 %v3787_v63, %v3787_v63  ;;  %v3790_v56 = vsel %vm3774_vm15, %v3764_v31, %v3782_v0  ;;  %v3780_v20 = vmul.f32 0.01, %v3756_v2 }
 0x385   : >> { %v3948_v12 = vsel %vm11562_vm12, %v3877_v5, %v8672_v60  ;;  %v3951_v13 = vsel %vm10228_vm8, %v3878_v6, %v8674_v62  ;;  %v9204_v14 = vpack.c.bf16 %v3790_v56, %v3790_v56  ;;  %v3918_v15 = vsel %vm11562_vm12, %v3837_v9, %v8652_v7 }
 0x386   : >> { %8673 = vst [vmem:[%s11568_s15 + $0x88] sm:$0xf] %v3948_v12  ;;  %8675 = vst [vmem:[%s11568_s15 + $0x8c] sm:$0x1] %v3951_v13  ;;  %v3921_v16 = vsel %vm10228_vm8, %v3838_v10, %v8654_v8  ;;  %v3856_v18 = vshrl.u32 %v9201_v11, 16  ;;  %v3859_v23 = vshll.u32 %v9201_v11, 16  ;;  %v3788_v30 = vsel %vm3772_vm2, %v3756_v2, %v3780_v20 }
 0x387   : >> { %8653 = vst [vmem:[%s11568_s15 + $0x60] sm:$0xf] %v3918_v15  ;;  %8655 = vst [vmem:[%s11568_s15 + $0x64] sm:$0x1] %v3921_v16  ;;  %v3880_v19 = vshrl.u32 %v9204_v14, 16  ;;  %v3883_v29 = vshll.u32 %v9204_v14, 16  ;;  %v9202_v35 = vpack.c.bf16 %v3788_v30, %v3788_v30 }
 0x388   : >> { %v3858_v22 = vrot.slane %v3856_v18, 7 }
 0x389   : >> { %v3882_v28 = vrot.slane %v3880_v19, 7  ;;  %v3864_v40 = vshrl.u32 %v9202_v35, 16  ;;  %v3867_v45 = vshll.u32 %v9202_v35, 16 }
 0x38a   : >> { %v3861_v31 = vor.u32 %v3859_v23, %v3858_v22  ;;  %v3862_v32 = vrot.slane %v3858_v22, 4 }
 0x38b   : >> { %v3885_v36 = vor.u32 %v3883_v29, %v3882_v28  ;;  %v3886_v37 = vrot.slane %v3882_v28, 4  ;;  %v3866_v43 = vrot.slane %v3864_v40, 7 }
 0x38c   : >> { %v3936_v38 = vsel %vm11562_vm12, %v3861_v31, %v8664_v26  ;;  %v3939_v39 = vsel %vm10228_vm8, %v3862_v32, %v8666_v27  ;;  %828 = sbr.rel (!%p826_p0) target bundleno = 138 (0x8a), region = 204 }
 0x38d   : >> { %8665 = vst [vmem:[%s11568_s15 + $0x78] sm:$0xf] %v3936_v38  ;;  %8667 = vst [vmem:[%s11568_s15 + $0x7c] sm:$0x1] %v3939_v39  ;;  %v3954_v41 = vsel %vm11562_vm12, %v3885_v36, %v8676_v33  ;;  %v3957_v42 = vsel %vm10228_vm8, %v3886_v37, %v8678_v34  ;;  %v3869_v49 = vor.u32 %v3867_v45, %v3866_v43  ;;  %v3870_v50 = vrot.slane %v3866_v43, 4 }
 0x38e   : >> { %8677 = vst [vmem:[%s11568_s15 + $0x90] sm:$0xf] %v3954_v41  ;;  %8679 = vst [vmem:[%s11568_s15 + $0x94] sm:$0x1] %v3957_v42 }
 0x38f   : >> { %v3942_v51 = vsel %vm11562_vm12, %v3869_v49, %v8668_v46  ;;  %v3945_v52 = vsel %vm10228_vm8, %v3870_v50, %v8670_v48 }
 0x390   : >> { %8669 = vst [vmem:[%s11568_s15 + $0x80] sm:$0xf] %v3942_v51  ;;  %8671 = vst [vmem:[%s11568_s15 + $0x84] sm:$0x1] %v3945_v52 }
 0x391 LB: >> { %v9588_v25 = vld [vmem:[%s13525_s3 + $0x78] sm:$0xff]   ;;  %s9205_s24 = smul.u32 80, %s9781_s14  ;;  %v9590_v44 = vld [vmem:[%s13525_s3 + $0x70] sm:$0xff]   ;;  %s9817_s29 = smov 64   ;;  %v9592_v56 = vld [vmem:[%s13525_s3 + $0x68] sm:$0xff]   ;;  %vm4139_vm0 = vcmask 519424   ;;  %s9781_s14 = sphi %s11641_s14, %s3964_s14  }
 0x392   : >> { %9218 = vmatprep.subr.bf16.mxu0 %v9588_v25  ;;  %v9589_v53 = vld [vmem:[%s13525_s3 + $0x38] sm:$0xff]   ;;  %v9591_v54 = vld [vmem:[%s13525_s3 + $0x30] sm:$0xff]   ;;  %s9818_s0 = smov 32   ;;  %v9593_v16 = vld [vmem:[%s13525_s3 + $0x28] sm:$0xff]   ;;  %s9819_s1 = smov 96   ;;  %vm4239_vm4 = vcmask 781824  }
 0x393   : >> { %9219 = vmatpush3.bf16.msra.mxu0 %v9589_v53  ;;  %s11659_s2 = scalar_lea.vmem [#allocation3], %s9205_s24  ;;  %v9594_v28 = vld [vmem:[%s13525_s3 + $0x60] sm:$0xff]   ;;  %v9596_v53 = vld [vmem:[%s13525_s3 + $0x58] sm:$0xff]   ;;  %vm4291_vm8 = vcmask 1044224   ;;  %vm7190_vm3 = vcmask 785408   ;;  %vm7465_vm5 = vcmask 261120  }
 0x394   : >> { %9220 = vmatprep.subr.bf16.mxu0 %v9590_v44  ;;  %v9595_v48 = vld [vmem:[%s13525_s3 + $0x20] sm:$0xff]  }
 0x397   : >> { %v8739_v1 = vld [vmem:[%s11659_s2 + $0x10] sm:$0xf]  ;;  %v8714_v47 = vld [vmem:[%s11659_s2 + $0x8] sm:$0xe]  ;;  %v8715_v55 = vld [vmem:[%s11659_s2 + $0xc] sm:$0x1]  ;;  %9221 = vmatpush3.bf16.msra.mxu0 %v9591_v54 }
 0x398   : >> { %4559 = vrot.lane.b32.xlu0 %v8739_v1, %s9817_s29  ;;  %v8730_v57 = vrot.slane %v8714_v47, 9  ;;  %v4478_v58 = vrot.slane %v8715_v55, 5  ;;  %v4148_v59 = vld [vmem:[%s11659_s2] sm:$0xe]  ;;  %v4149_v60 = vld [vmem:[%s11659_s2 + $0x4] sm:$0x1]  ;;  %9222 = vmatprep.subr.bf16.mxu0 %v9592_v56 }
 0x399   : >> { %v8681_v61 = vrot.slane %v4148_v59, 9  ;;  %v4185_v62 = vrot.slane %v4149_v60, 5  ;;  %v8716_v63 = vld [vmem:[%s11659_s2 + $0x10] sm:$0xe]  ;;  %v8717_v0 = vld [vmem:[%s11659_s2 + $0x14] sm:$0x1] }
 0x39a   : >> { %v4479_v2 = vsel %vm10482_vm1, %v8730_v57, %v4478_v58  ;;  %v8731_v3 = vrot.slane %v8716_v63, 9  ;;  %v4482_v4 = vrot.slane %v8717_v0, 5  ;;  %v3984_v5 = vld [vmem:[%s11659_s2] sm:$0xf]  ;;  %v3985_v6 = vld [vmem:[%s11659_s2 + $0x4] sm:$0x1] }
 0x39b   : >> { %4508 = vrot.lane.b32.xlu1 %v4479_v2, %s9818_s0  ;;  %v4186_v7 = vsel %vm10482_vm1, %v8681_v61, %v4185_v62  ;;  %v4004_v8 = vshrl.u32 %v3984_v5, 16  ;;  %v4007_v9 = vshll.u32 %v3984_v5, 16  ;;  %v4013_v10 = vshll.u32 %v3985_v6, 16  ;;  %v4150_v11 = vld [vmem:[%s11659_s2 + $0x8] sm:$0xe]  ;;  %9223 = vmatpush3.bf16.msra.mxu0 %v9593_v16  ;;  %v9597_v60 = vld [vmem:[%s13525_s3 + $0x18] sm:$0xff]  }
 0x39c   : >> { %4215 = vrot.lane.b32.xlu0 %v4186_v7, %s9817_s29  ;;  %v4483_v12 = vsel %vm10482_vm1, %v8731_v3, %v4482_v4  ;;  %v4151_v13 = vld [vmem:[%s11659_s2 + $0xc] sm:$0x1]  ;;  %v8682_v14 = vrot.slane %v4150_v11, 9  ;;  %v3986_v15 = vld [vmem:[%s11659_s2 + $0x8] sm:$0xf]  ;;  %9224 = vmatprep.subr.bf16.mxu0 %v9594_v28  ;;  %v9598_v16 = vld [vmem:[%s13525_s3 + $0x50] sm:$0xff]  }
 0x39d   : >> { %v4006_v18 = vrot.slane %v4004_v8, 4  ;;  %v4009_v19 = vrot.slane %v4007_v9, 5  ;;  %v4189_v20 = vrot.slane %v4151_v13, 5  ;;  %v3987_v22 = vld [vmem:[%s11659_s2 + $0xc] sm:$0x1]  ;;  %v4018_v23 = vshrl.u32 %v3986_v15, 16 }
 0x39e   : >> { %v4021_v26 = vshll.u32 %v3986_v15, 16  ;;  %v4027_v27 = vshll.u32 %v3987_v22, 16  ;;  %v4015_v30 = vrot.slane %v4013_v10, 5  ;;  %v8747_v31 = vld [vmem:[%s11659_s2 + $0x10] sm:$0xf] }
 0x39f   : >> { %4510 = vrot.lane.b32.xlu1 %v4483_v12, %s9818_s0  ;;  %v4010_v29 = vor.u32 %v4009_v19, %v4006_v18  ;;  %v4190_v32 = vsel %vm10482_vm1, %v8682_v14, %v4189_v20  ;;  %v4020_v33 = vrot.slane %v4018_v23, 4  ;;  %v8748_v35 = vld [vmem:[%s11659_s2 + $0x14] sm:$0x1]  ;;  %v4608_v36 = vshrl.u32 %v8747_v31, 16  ;;  %v8749_v40 = vld [vmem:[%s11659_s2 + $0x18] sm:$0xf]  ;;  %9225 = vmatpush3.bf16.msra.mxu0 %v9595_v48 }
 0x3a0   : >> { %v4023_v34 = vrot.slane %v4021_v26, 5  ;;  %v4029_v38 = vrot.slane %v4027_v27, 5  ;;  %v4611_v39 = vshll.u32 %v8747_v31, 16  ;;  %v8750_v43 = vld [vmem:[%s11659_s2 + $0x1c] sm:$0x1]  ;;  %v4622_v45 = vshrl.u32 %v8749_v40, 16  ;;  %9226 = vmatprep.subr.bf16.mxu0 %v9596_v53 }
 0x3a1   : >> { %v4011_v37 = vrot.slane %v4010_v29, 4  ;;  %v4610_v42 = vrot.slane %v4608_v36, 4  ;;  %v4625_v46 = vshll.u32 %v8749_v40, 16  ;;  %v4617_v51 = vshll.u32 %v8748_v35, 16  ;;  %v3988_v25 = vld [vmem:[%s11659_s2 + $0x10] sm:$0xf] }
 0x3a2   : >> { %v4024_v41 = vor.u32 %v4023_v34, %v4020_v33  ;;  %v4613_v50 = vrot.slane %v4611_v39, 5  ;;  %v4631_v52 = vshll.u32 %v8750_v43, 16  ;;  %v8740_v54 = vld [vmem:[%s11659_s2 + $0x18] sm:$0xf]  ;;  %v4624_v1 = vrot.slane %v4622_v45, 4  ;;  %v9599_v26 = vld [vmem:[%s13525_s3 + $0x10] sm:$0xff]  }
 0x3a3   : >> { %v4016_v49 = vsel %vm10447_vm13, %v4011_v37, %v4015_v30  ;;  %4217 = vrot.lane.b32.xlu1 %v4190_v32, %s9817_s29  ;;  %v4627_v47 = vrot.slane %v4625_v46, 5  ;;  %v4032_v55 = vshrl.u32 %v3988_v25, 16  ;;  %v4035_v58 = vshll.u32 %v3988_v25, 16  ;;  %v3990_v59 = vld [vmem:[%s11659_s2 + $0x18] sm:$0xf]  ;;  %9227 = vmatpush3.bf16.msra.mxu0 %v9597_v60  ;;  %v9600_v36 = vld [vmem:[%s13525_s3 + $0x48] sm:$0xff]  }
 0x3a4   : >> { %4115 = vrot.lane.b32.xlu0 %v4016_v49, %s9818_s0  ;;  %v4025_v44 = vrot.slane %v4024_v41, 4  ;;  %v4614_v57 = vor.u32 %v4613_v50, %v4610_v42  ;;  %v3989_v63 = vld [vmem:[%s11659_s2 + $0x14] sm:$0x1]  ;;  %v3991_v2 = vld [vmem:[%s11659_s2 + $0x1c] sm:$0x1]  ;;  %v4046_v3 = vshrl.u32 %v3990_v59, 16  ;;  %9228 = vmatprep.subr.bf16.mxu0 %v9598_v16 }
 0x3a5   : >> { %v4628_v62 = vor.u32 %v4627_v47, %v4624_v1  ;;  %v4034_v0 = vrot.slane %v4032_v55, 4  ;;  %v4619_v4 = vrot.slane %v4617_v51, 5  ;;  %v4037_v5 = vrot.slane %v4035_v58, 5  ;;  %v8691_v7 = vld [vmem:[%s11659_s2 + $0x10] sm:$0xf] }
 0x3a6   : >> { %v4030_v61 = vsel %vm10447_vm13, %v4025_v44, %v4029_v38  ;;  %v4049_v6 = vshll.u32 %v3990_v59, 16  ;;  %v4633_v9 = vrot.slane %v4631_v52, 5  ;;  %v4048_v10 = vrot.slane %v4046_v3, 4  ;;  %v8690_v56 = vld [vmem:[%s11659_s2 + $0x8] sm:$0xf]  ;;  %v9603_v59 = vld [vmem:[%s13525_s3] sm:$0xff]  }
 0x3a7   : >> { %4561 = vrot.lane.b32.xlu1 %v8740_v54, %s9817_s29  ;;  %v4629_v8 = vrot.slane %v4628_v62, 4  ;;  %v4055_v11 = vshll.u32 %v3991_v2, 16  ;;  %v4615_v12 = vrot.slane %v4614_v57, 4  ;;  %v4038_v13 = vor.u32 %v4037_v5, %v4034_v0  ;;  %v8720_v22 = vld [vmem:[%s11659_s2 + $0x20] sm:$0xe]  ;;  %9229 = vmatpush3.bf16.msra.mxu0 %v9599_v26  ;;  %v9601_v52 = vld [vmem:[%s13525_s3 + $0x8] sm:$0xff]  }
 0x3a8   : >> { %4117 = vrot.lane.b32.xlu0 %v4030_v61, %s9818_s0  ;;  %v4041_v14 = vshll.u32 %v3989_v63, 16  ;;  %v4051_v15 = vrot.slane %v4049_v6, 5  ;;  %v8721_v23 = vld [vmem:[%s11659_s2 + $0x24] sm:$0x1]  ;;  %v8718_v31 = vld [vmem:[%s11659_s2 + $0x18] sm:$0xe]  ;;  %9230 = vmatprep.subr.bf16.mxu0 %v9600_v36 }
 0x3a9   : >> { %v4634_v19 = vsel %vm10447_vm13, %v4629_v8, %v4633_v9  ;;  %v4057_v20 = vrot.slane %v4055_v11, 5  ;;  %v4620_v27 = vsel %vm10447_vm13, %v4615_v12, %v4619_v4  ;;  %v4039_v28 = vrot.slane %v4038_v13, 4  ;;  %v8719_v32 = vld [vmem:[%s11659_s2 + $0x1c] sm:$0x1]  ;;  %v4152_v35 = vld [vmem:[%s11659_s2 + $0x10] sm:$0xe] }
 0x3aa   : >> { %v4052_v18 = vor.u32 %v4051_v15, %v4048_v10  ;;  %v4043_v29 = vrot.slane %v4041_v14, 5  ;;  %v8733_v33 = vrot.slane %v8720_v22, 9  ;;  %v4490_v34 = vrot.slane %v8721_v23, 5  ;;  %v4153_v38 = vld [vmem:[%s11659_s2 + $0x14] sm:$0x1]  ;;  %v9602_v54 = vld [vmem:[%s13525_s3 + $0x40] sm:$0xff]  }
 0x3ab   : >> { %4269 = vrot.lane.b32.xlu1 %v8691_v7, %s9819_s1  ;;  %v4154_v39 = vld [vmem:[%s11659_s2 + $0x18] sm:$0xe]  ;;  %v4155_v40 = vld [vmem:[%s11659_s2 + $0x1c] sm:$0x1]  ;;  %v8732_v42 = vrot.slane %v8718_v31, 9  ;;  %v4486_v43 = vrot.slane %v8719_v32, 5  ;;  %9231 = vmatpush3.bf16.msra.mxu0 %v9601_v52 }
 0x3ac   : >> { %4267 = vrot.lane.b32.xlu0 %v8690_v56, %s9819_s1  ;;  %v4053_v30 = vrot.slane %v4052_v18, 4  ;;  %v4044_v41 = vsel %vm10447_vm13, %v4039_v28, %v4043_v29  ;;  %v8753_v45 = vld [vmem:[%s11659_s2 + $0x28] sm:$0xf]  ;;  %v8751_v46 = vld [vmem:[%s11659_s2 + $0x20] sm:$0xf]  ;;  %v8683_v48 = vrot.slane %v4152_v35, 9  ;;  %v4491_v25 = vsel %vm10482_vm1, %v8733_v33, %v4490_v34  ;;  %9232 = vmatprep.subr.bf16.mxu0 %v9602_v54 }
 0x3ad   : >> { %v4193_v49 = vrot.slane %v4153_v38, 5  ;;  %v8684_v50 = vrot.slane %v4154_v39, 9  ;;  %v4197_v51 = vrot.slane %v4155_v40, 5  ;;  %v4650_v53 = vshrl.u32 %v8753_v45, 16  ;;  %v3994_v57 = vld [vmem:[%s11659_s2 + $0x28] sm:$0xf] }
 0x3ae   : >> { %v4058_v37 = vsel %vm10447_vm13, %v4053_v30, %v4057_v20  ;;  %v4653_v44 = vshll.u32 %v8753_v45, 16  ;;  %v4487_v1 = vsel %vm10482_vm1, %v8732_v42, %v4486_v43  ;;  %v4636_v47 = vshrl.u32 %v8751_v46, 16  ;;  %v3992_v58 = vld [vmem:[%s11659_s2 + $0x20] sm:$0xf]  ;;  %v8754_v62 = vld [vmem:[%s11659_s2 + $0x2c] sm:$0x1] }
 0x3af   : >> { %4721 = vrot.lane.b32.xlu1 %v4634_v19, %s9819_s1  ;;  %v4639_v55 = vshll.u32 %v8751_v46, 16  ;;  %v4194_v60 = vsel %vm10482_vm1, %v8683_v48, %v4193_v49  ;;  %v4198_v61 = vsel %vm10482_vm1, %v8684_v50, %v4197_v51  ;;  %v4652_v63 = vrot.slane %v4650_v53, 4  ;;  %9233 = vmatpush3.bf16.msra.mxu0 %v9603_v59  ;;  %v8752_v8 = vld [vmem:[%s11659_s2 + $0x24] sm:$0x1]  ;;  %v8742_v9 = vld [vmem:[%s11659_s2 + $0x28] sm:$0xf] }
 0x3b0   : >> { %4719 = vrot.lane.b32.xlu0 %v4620_v27, %s9819_s1  ;;  %v4655_v0 = vrot.slane %v4653_v44, 5  ;;  %v4074_v2 = vshrl.u32 %v3994_v57, 16  ;;  %v4077_v3 = vshll.u32 %v3994_v57, 16  ;;  %v4638_v4 = vrot.slane %v4636_v47, 4  ;;  %v3993_v56 = vld [vmem:[%s11659_s2 + $0x24] sm:$0x1] }
 0x3b1   : >> { %v4641_v5 = vrot.slane %v4639_v55, 5  ;;  %v4060_v6 = vshrl.u32 %v3992_v58, 16  ;;  %v4063_v7 = vshll.u32 %v3992_v58, 16  ;;  %v4659_v10 = vshll.u32 %v8754_v62, 16  ;;  %v3995_v12 = vld [vmem:[%s11659_s2 + $0x2c] sm:$0x1] }
 0x3b2   : >> { %v4656_v11 = vor.u32 %v4655_v0, %v4652_v63  ;;  %v4076_v13 = vrot.slane %v4074_v2, 4  ;;  %v4079_v14 = vrot.slane %v4077_v3, 5  ;;  %v8741_v15 = vld [vmem:[%s11659_s2 + $0x20] sm:$0xf]  ;;  %v4645_v18 = vshll.u32 %v8752_v8, 16 }
 0x3b3   : >> { %4121 = vrot.lane.b32.xlu1 %v4058_v37, %s9818_s0  ;;  %v4642_v16 = vor.u32 %v4641_v5, %v4638_v4  ;;  %v4062_v19 = vrot.slane %v4060_v6, 4  ;;  %v4065_v20 = vrot.slane %v4063_v7, 5  ;;  %v4069_v22 = vshll.u32 %v3993_v56, 16  ;;  %v8693_v26 = vld [vmem:[%s11659_s2 + $0x20] sm:$0xf] }
 0x3b4   : >> { %4119 = vrot.lane.b32.xlu0 %v4044_v41, %s9818_s0  ;;  %v4083_v23 = vshll.u32 %v3995_v12, 16  ;;  %v4657_v27 = vrot.slane %v4656_v11, 4  ;;  %v4661_v28 = vrot.slane %v4659_v10, 5  ;;  %v4080_v29 = vor.u32 %v4079_v14, %v4076_v13  ;;  %v8692_v30 = vld [vmem:[%s11659_s2 + $0x18] sm:$0xf] }
 0x3b5   : >> { %v4643_v31 = vrot.slane %v4642_v16, 4  ;;  %v4647_v32 = vrot.slane %v4645_v18, 5  ;;  %v4066_v33 = vor.u32 %v4065_v20, %v4062_v19  ;;  %v8846_v34 = vld [vmem:[%s11659_s2 + $0x60] sm:$0xf]  ;;  %v8844_v35 = vld [vmem:[%s11659_s2 + $0x58] sm:$0xf] }
 0x3b6   : >> { %v4071_v36 = vrot.slane %v4069_v22, 5  ;;  %v4085_v37 = vrot.slane %v4083_v23, 5  ;;  %v8722_v38 = vld [vmem:[%s11659_s2 + $0x28] sm:$0xe]  ;;  %v4662_v39 = vsel %vm10447_vm13, %v4657_v27, %v4661_v28  ;;  %v4081_v40 = vrot.slane %v4080_v29, 4 }
 0x3b7   : >> { %4514 = vrot.lane.b32.xlu1 %v4491_v25, %s9818_s0  ;;  %v8724_v41 = vld [vmem:[%s11659_s2 + $0x30] sm:$0xe]  ;;  %v5189_v42 = vshrl.u32 %v8846_v34, 16  ;;  %v5192_v43 = vshll.u32 %v8846_v34, 16  ;;  %v4648_v45 = vsel %vm10447_vm13, %v4643_v31, %v4647_v32  ;;  %v4067_v46 = vrot.slane %v4066_v33, 4 }
 0x3b8   : >> { %4512 = vrot.lane.b32.xlu0 %v4487_v1, %s9818_s0  ;;  %v8725_v48 = vld [vmem:[%s11659_s2 + $0x34] sm:$0x1]  ;;  %v5175_v49 = vshrl.u32 %v8844_v35, 16  ;;  %v5178_v50 = vshll.u32 %v8844_v35, 16  ;;  %v8723_v51 = vld [vmem:[%s11659_s2 + $0x2c] sm:$0x1]  ;;  %v4086_v53 = vsel %vm10447_vm13, %v4081_v40, %v4085_v37 }
 0x3b9   : >> { %v8734_v52 = vrot.slane %v8722_v38, 9  ;;  %v8735_v25 = vrot.slane %v8724_v41, 9  ;;  %v4498_v44 = vrot.slane %v8725_v48, 5  ;;  %v5191_v54 = vrot.slane %v5189_v42, 4  ;;  %v8847_v59 = vld [vmem:[%s11659_s2 + $0x64] sm:$0x1] }
 0x3ba   : >> { %v5194_v1 = vrot.slane %v5192_v43, 5  ;;  %v4072_v47 = vsel %vm10447_vm13, %v4067_v46, %v4071_v36  ;;  %v4494_v55 = vrot.slane %v8723_v51, 5  ;;  %v5177_v57 = vrot.slane %v5175_v49, 4  ;;  %v8797_v5 = vld [vmem:[%s11659_s2 + $0x58] sm:$0xf] }
 0x3bb   : >> { %4221 = vrot.lane.b32.xlu1 %v4198_v61, %s9817_s29  ;;  %v5180_v58 = vrot.slane %v5178_v50, 5  ;;  %v8795_v61 = vld [vmem:[%s11659_s2 + $0x50] sm:$0xf]  ;;  %v4499_v62 = vsel %vm10482_vm1, %v8735_v25, %v4498_v44  ;;  %v5198_v0 = vshll.u32 %v8847_v59, 16  ;;  %v8788_v6 = vld [vmem:[%s11659_s2 + $0x58] sm:$0xf] }
 0x3bc   : >> { %4219 = vrot.lane.b32.xlu0 %v4194_v60, %s9817_s29  ;;  %v8845_v60 = vld [vmem:[%s11659_s2 + $0x5c] sm:$0x1]  ;;  %v5195_v63 = vor.u32 %v5194_v1, %v5191_v54  ;;  %v4495_v2 = vsel %vm10482_vm1, %v8734_v52, %v4494_v55  ;;  %v4900_v7 = vshrl.u32 %v8795_v61, 16  ;;  %v4903_v8 = vshll.u32 %v8795_v61, 16  ;;  %v4157_v10 = vld [vmem:[%s11659_s2 + $0x24] sm:$0x1] }
 0x3bd   : >> { %v5181_v3 = vor.u32 %v5180_v58, %v5177_v57  ;;  %v5184_v4 = vshll.u32 %v8845_v60, 16  ;;  %v4158_v11 = vld [vmem:[%s11659_s2 + $0x28] sm:$0xe]  ;;  %v5200_v12 = vrot.slane %v5198_v0, 5  ;;  %v4159_v13 = vld [vmem:[%s11659_s2 + $0x2c] sm:$0x1] }
 0x3be   : >> { %v5196_v56 = vrot.slane %v5195_v63, 4  ;;  %v4914_v14 = vshrl.u32 %v8797_v5, 16  ;;  %v8787_v16 = vld [vmem:[%s11659_s2 + $0x50] sm:$0xf]  ;;  %v8796_v20 = vld [vmem:[%s11659_s2 + $0x54] sm:$0x1] }
 0x3bf   : >> { %4565 = vrot.lane.b32.xlu1 %v8742_v9, %s9817_s29  ;;  %v4156_v9 = vld [vmem:[%s11659_s2 + $0x20] sm:$0xe]  ;;  %v5182_v18 = vrot.slane %v5181_v3, 4  ;;  %v5186_v19 = vrot.slane %v5184_v4, 5  ;;  %v4902_v22 = vrot.slane %v4900_v7, 4  ;;  %v4905_v23 = vrot.slane %v4903_v8, 5 }
 0x3c0   : >> { %4563 = vrot.lane.b32.xlu0 %v8741_v15, %s9817_s29  ;;  %v4917_v15 = vshll.u32 %v8797_v5, 16  ;;  %v8685_v27 = vrot.slane %v4156_v9, 9  ;;  %v4201_v28 = vrot.slane %v4157_v10, 5  ;;  %v8686_v29 = vrot.slane %v4158_v11, 9  ;;  %v11834_v37 = vld [vmem:[%s11659_s2 + $0x58] sm:$0xe] }
 0x3c1   : >> { %v5201_v31 = vsel %vm10447_vm13, %v5196_v56, %v5200_v12  ;;  %v4909_v32 = vshll.u32 %v8796_v20, 16  ;;  %v4916_v33 = vrot.slane %v4914_v14, 4  ;;  %v5187_v35 = vsel %vm10447_vm13, %v5182_v18, %v5186_v19  ;;  %v9609_v38 = vld [vmem:[%s13525_s3 + $0xf8] sm:$0xff]   ;;  %v11840_v40 = vld [vmem:[%s11659_s2 + $0x60] sm:$0xe]  ;;  %v9612_v11 = vld [vmem:[%s13525_s3 + $0xb0] sm:$0xff]  }
 0x3c2   : >> { %v4919_v34 = vrot.slane %v4917_v15, 5  ;;  %v11843_v41 = vld [vmem:[%s11659_s2 + $0x64] sm:$0x1]  ;;  %v9610_v42 = vld [vmem:[%s13525_s3 + $0xb8] sm:$0xff]   ;;  %v8755_v43 = vld [vmem:[%s11659_s2 + $0x30] sm:$0xf]  ;;  %9258 = vmatprep.subr.bf16.mxu1 %v9609_v38 }
 0x3c3   : >> { %4273 = vrot.lane.b32.xlu1 %v8693_v26, %s9819_s1  ;;  %v8798_v26 = vld [vmem:[%s11659_s2 + $0x5c] sm:$0x1]  ;;  %v11855_v48 = vrot.slane %v4909_v32, 5  ;;  %9259 = vmatpush3.bf16.msra.mxu1 %v9610_v42  ;;  %v8876_v51 = vrot.slane %v11834_v37, 9  ;;  %v8877_v52 = vrot.slane %v11840_v40, 9  ;;  %v5356_v25 = vrot.slane %v11843_v41, 5 }
 0x3c4   : >> { %4271 = vrot.lane.b32.xlu0 %v8692_v30, %s9819_s1  ;;  %v4205_v30 = vrot.slane %v4159_v13, 5  ;;  %v4923_v36 = vshll.u32 %v8798_v26, 16  ;;  %v4920_v49 = vor.u32 %v4919_v34, %v4916_v33  ;;  %v8744_v44 = vld [vmem:[%s11659_s2 + $0x38] sm:$0xf]  ;;  %v4664_v1 = vshrl.u32 %v8755_v43, 16  ;;  %v9613_v15 = vld [vmem:[%s13525_s3 + $0xe8] sm:$0xff]  }
 0x3c5   : >> { %v8699_v55 = vld [vmem:[%s11659_s2 + $0xc] sm:$0x1]  ;;  %v8743_v57 = vld [vmem:[%s11659_s2 + $0x30] sm:$0xf]  ;;  %v8756_v58 = vld [vmem:[%s11659_s2 + $0x34] sm:$0x1] }
 0x3c6   : >> { %v4206_v46 = vsel %vm10482_vm1, %v8686_v29, %v4205_v30  ;;  %v4925_v50 = vrot.slane %v4923_v36, 5  ;;  %v4667_v59 = vshll.u32 %v8755_v43, 16  ;;  %v4921_v63 = vrot.slane %v4920_v49, 4  ;;  %v8861_v0 = vld [vmem:[%s11659_s2 + $0x5c] sm:$0x1]  ;;  %v9615_v38 = vld [vmem:[%s13525_s3 + $0xe0] sm:$0xff]  }
 0x3c7   : >> { %4725 = vrot.lane.b32.xlu1 %v4662_v39, %s9819_s1  ;;  %v4906_v39 = vor.u32 %v4905_v23, %v4902_v22  ;;  %v4326_v5 = vshll.u32 %v8699_v55, 16  ;;  %v8701_v9 = vld [vmem:[%s11659_s2 + $0x14] sm:$0x1]  ;;  %v11878_v56 = vrot.slane %v4664_v1, 4  ;;  %v4673_v12 = vshll.u32 %v8756_v58, 16  ;;  %v9614_v22 = vld [vmem:[%s13525_s3 + $0xa8] sm:$0xff]  }
 0x3c8   : >> { %4723 = vrot.lane.b32.xlu0 %v4648_v45, %s9819_s1  ;;  %v4202_v45 = vsel %vm10482_vm1, %v8685_v27, %v4201_v28  ;;  %v4340_v14 = vshll.u32 %v8701_v9, 16  ;;  %v4926_v23 = vsel %vm10447_vm13, %v4921_v63, %v4925_v50  ;;  %v5352_v30 = vrot.slane %v8861_v0, 5  ;;  %v11894_v33 = vld [vmem:[%s11659_s2 + $0x50] sm:$0xe]  ;;  %v3968_v36 = vld [vmem:[%s11659_s2] sm:$0xf] }
 0x3c9   : >> { %v4907_v54 = vrot.slane %v4906_v39, 4  ;;  %v4328_v19 = vrot.slane %v4326_v5, 5  ;;  %v5357_v39 = vsel %vm10482_vm1, %v8877_v52, %v5356_v25  ;;  %v3996_v40 = vld [vmem:[%s11659_s2 + $0x30] sm:$0xf]  ;;  %v3998_v41 = vld [vmem:[%s11659_s2 + $0x38] sm:$0xf] }
 0x3ca   : >> { %3976 = vst.msk [vmem:[#allocation5] sm:$0xf] %vm511_vm6, %v3968_v36  ;;  %v9616_v43 = vld [vmem:[%s13525_s3 + $0xa0] sm:$0xff]   ;;  %v5353_v50 = vsel %vm10482_vm1, %v8876_v51, %v5352_v30  ;;  %v8812_v25 = vld [vmem:[%s11659_s2 + $0x54] sm:$0x1]  ;;  %v4088_v1 = vshrl.u32 %v3996_v40, 16 }
 0x3cb   : >> { %4125 = vrot.lane.b32.xlu1 %v4086_v53, %s9818_s0  ;;  %v8757_v53 = vld [vmem:[%s11659_s2 + $0x38] sm:$0xf]  ;;  %v4912_v29 = vsel %vm10447_vm13, %v4907_v54, %v11855_v48  ;;  %v8695_v54 = vld [vmem:[%s11659_s2 + $0x30] sm:$0xf]  ;;  %v4102_v55 = vshrl.u32 %v3998_v41, 16 }
 0x3cc   : >> { %4123 = vrot.lane.b32.xlu0 %v4072_v47, %s9818_s0  ;;  %v8698_v47 = vld [vmem:[%s11659_s2 + $0x8] sm:$0xf]  ;;  %v4678_v3 = vshrl.u32 %v8757_v53, 16  ;;  %v4681_v4 = vshll.u32 %v8757_v53, 16  ;;  %v8827_v53 = vrot.slane %v11894_v33, 9  ;;  %v9617_v37 = vld [vmem:[%s13525_s3 + $0xd8] sm:$0xff]  }
 0x3cd   : >> { %v4317_v60 = vshrl.u32 %v8698_v47, 16  ;;  %v4320_v61 = vshll.u32 %v8698_v47, 16  ;;  %v4091_v47 = vshll.u32 %v3996_v40, 16  ;;  %v3969_v58 = vld [vmem:[%s11659_s2 + $0x8] sm:$0xf]  ;;  %v4090_v5 = vrot.slane %v4088_v1, 4 }
 0x3ce   : >> { %v4680_v26 = vrot.slane %v4678_v3, 4  ;;  %v4683_v27 = vrot.slane %v4681_v4, 5  ;;  %v8694_v51 = vld [vmem:[%s11659_s2 + $0x28] sm:$0xf]  ;;  %3977 = vst.msk [vmem:[#allocation5 + $0x1c] sm:$0xf] %vm511_vm6, %v3969_v58 }
 0x3cf   : >> { %4518 = vrot.lane.b32.xlu1 %v4499_v62, %s9818_s0  ;;  %v9611_v62 = vld [vmem:[%s13525_s3 + $0xf0] sm:$0xff]   ;;  %v4319_v7 = vrot.slane %v4317_v60, 4  ;;  %v4322_v8 = vrot.slane %v4320_v61, 5  ;;  %v4105_v60 = vshll.u32 %v3998_v41, 16  ;;  %v9618_v61 = vld [vmem:[%s13525_s3 + $0x98] sm:$0xff]   ;;  %v5077_v3 = vrot.slane %v8812_v25, 5 }
 0x3d0   : >> { %4516 = vrot.lane.b32.xlu0 %v4495_v2, %s9818_s0  ;;  %v8758_v2 = vld [vmem:[%s11659_s2 + $0x3c] sm:$0x1]  ;;  %9260 = vmatprep.subr.bf16.mxu1 %v9611_v62  ;;  %v4684_v48 = vor.u32 %v4683_v27, %v4680_v26  ;;  %v3997_v0 = vld [vmem:[%s11659_s2 + $0x34] sm:$0x1]  ;;  %v8729_v27 = vld [vmem:[%s11659_s2 + $0x44] sm:$0x1] }
 0x3d1   : >> { %v4323_v18 = vor.u32 %v4322_v8, %v4319_v7  ;;  %9261 = vmatpush3.bf16.msra.mxu1 %v9612_v11  ;;  %v4097_v7 = vshll.u32 %v3997_v0, 16  ;;  %v4104_v8 = vrot.slane %v4102_v55, 4  ;;  %v4107_v9 = vrot.slane %v4105_v60, 5  ;;  %v8851_v1 = vld [vmem:[%s11659_s2 + $0x74] sm:$0x1]  ;;  %v9625_v58 = vld [vmem:[%s13525_s3 + $0xc0] sm:$0xff]  }
 0x3d2   : >> { %9262 = vmatprep.subr.bf16.mxu1 %v9613_v15  ;;  %v4685_v63 = vrot.slane %v4684_v48, 4  ;;  %v11952_v15 = vld [vmem:[%s11659_s2 + $0x3c] sm:$0x1]  ;;  %v4506_v41 = vrot.slane %v8729_v27, 5  ;;  %v3971_v48 = vld [vmem:[%s11659_s2 + $0x18] sm:$0xf] }
 0x3d3   : >> { %4853 = vrot.lane.b32.xlu1 %v8788_v6, %s9818_s0  ;;  %v8700_v6 = vld [vmem:[%s11659_s2 + $0x10] sm:$0xf]  ;;  %v4324_v32 = vrot.slane %v4323_v18, 4  ;;  %v4108_v26 = vor.u32 %v4107_v9, %v4104_v8  ;;  %v4502_v33 = vrot.slane %v11952_v15, 5  ;;  %3979 = vst.msk [vmem:[#allocation5 + $0x54] sm:$0xf] %vm511_vm6, %v3971_v48 }
 0x3d4   : >> { %4851 = vrot.lane.b32.xlu0 %v8787_v16, %s9818_s0  ;;  %v4331_v10 = vshrl.u32 %v8700_v6, 16  ;;  %v4334_v13 = vshll.u32 %v8700_v6, 16  ;;  %v4669_v16 = vrot.slane %v4667_v59, 5  ;;  %v8814_v59 = vld [vmem:[%s11659_s2 + $0x5c] sm:$0x1]  ;;  %v4093_v6 = vrot.slane %v4091_v47, 5 }
 0x3d5   : >> { %v4329_v42 = vsel %vm10447_vm13, %v4324_v32, %v4328_v19  ;;  %9263 = vmatpush3.bf16.msra.mxu1 %v9614_v22  ;;  %v8728_v19 = vld [vmem:[%s11659_s2 + $0x40] sm:$0xe]  ;;  %v5078_v22 = vsel %vm10482_vm1, %v8827_v53, %v5077_v3  ;;  %v9620_v32 = vld [vmem:[%s13525_s3 + $0x90] sm:$0xff]   ;;  %v8702_v53 = vld [vmem:[%s11659_s2 + $0x18] sm:$0xf] }
 0x3d6   : >> { %v4333_v20 = vrot.slane %v4331_v10, 4  ;;  %v4336_v28 = vrot.slane %v4334_v13, 5  ;;  %4436 = vst.msk [vmem:[#allocation5 + $0x4] sm:$0xf] %vm511_vm6, %v4329_v42  ;;  %9264 = vmatprep.subr.bf16.mxu1 %v9615_v38  ;;  %v9619_v10 = vld [vmem:[%s13525_s3 + $0xd0] sm:$0xff]   ;;  %v4094_v18 = vor.u32 %v4093_v6, %v4090_v5  ;;  %v9623_v38 = vld [vmem:[%s13525_s3 + $0xc8] sm:$0xff]  }
 0x3d7   : >> { %5288 = vrot.lane.b32.xlu1 %v5201_v31, %s9818_s0  ;;  %v4687_v31 = vshll.u32 %v8758_v2, 16  ;;  %v3999_v2 = vld [vmem:[%s11659_s2 + $0x3c] sm:$0x1]  ;;  %v11947_v13 = vld [vmem:[%s11659_s2 + $0x38] sm:$0xe]  ;;  %v4345_v47 = vshrl.u32 %v8702_v53, 16 }
 0x3d8   : >> { %5286 = vrot.lane.b32.xlu0 %v5187_v35, %s9818_s0  ;;  %v4337_v34 = vor.u32 %v4336_v28, %v4333_v20  ;;  %v4342_v35 = vrot.slane %v4340_v14, 5  ;;  %v8850_v20 = vld [vmem:[%s11659_s2 + $0x70] sm:$0xf]  ;;  %v8736_v30 = vrot.slane %v11947_v13, 9  ;;  %v4095_v40 = vrot.slane %v4094_v18, 4 }
 0x3d9   : >> { %v4689_v52 = vrot.slane %v4687_v31, 5  ;;  %9265 = vmatpush3.bf16.msra.mxu1 %v9616_v43  ;;  %v5217_v36 = vshrl.u32 %v8850_v20, 16  ;;  %v3970_v42 = vld [vmem:[%s11659_s2 + $0x10] sm:$0xf]  ;;  %v8885_v43 = vld [vmem:[%s11659_s2 + $0x60] sm:$0xf] }
 0x3da   : >> { %v4338_v49 = vrot.slane %v4337_v34, 4  ;;  %9266 = vmatprep.subr.bf16.mxu1 %v9617_v37  ;;  %v8737_v34 = vrot.slane %v8728_v19, 9  ;;  %3978 = vst.msk [vmem:[#allocation5 + $0x38] sm:$0xf] %vm511_vm6, %v3970_v42  ;;  %v4348_v55 = vshll.u32 %v8702_v53, 16  ;;  %v4503_v3 = vsel %vm10482_vm1, %v8736_v30, %v4502_v33 }
 0x3db   : >> { %4225 = vrot.lane.b32.xlu1 %v4206_v46, %s9817_s29  ;;  %v4675_v46 = vrot.slane %v4673_v12, 5  ;;  %v4690_v11 = vsel %vm10447_vm13, %v4685_v63, %v4689_v52  ;;  %v4111_v12 = vshll.u32 %v3999_v2, 16  ;;  %v5219_v25 = vrot.slane %v5217_v36, 4  ;;  %v8790_v27 = vld [vmem:[%s11659_s2 + $0x68] sm:$0xf] }
 0x3dc   : >> { %4223 = vrot.lane.b32.xlu0 %v4202_v45, %s9817_s29  ;;  %v4670_v45 = vor.u32 %v4669_v16, %v11878_v56  ;;  %v5081_v56 = vrot.slane %v8814_v59, 5  ;;  %v8848_v16 = vld [vmem:[%s11659_s2 + $0x68] sm:$0xf]  ;;  %v8705_v59 = vld [vmem:[%s11659_s2 + $0x24] sm:$0x1]  ;;  %v4350_v63 = vrot.slane %v4348_v55, 5  ;;  %v4507_v6 = vsel %vm10482_vm1, %v8737_v34, %v4506_v41 }
 0x3dd   : >> { %9267 = vmatpush3.bf16.msra.mxu1 %v9618_v61  ;;  %v5203_v31 = vshrl.u32 %v8848_v16, 16  ;;  %v8799_v61 = vld [vmem:[%s11659_s2 + $0x60] sm:$0xf]  ;;  %v4368_v5 = vshll.u32 %v8705_v59, 16  ;;  %v5226_v13 = vshll.u32 %v8851_v1, 16 }
 0x3de   : >> { %v4671_v62 = vrot.slane %v4670_v45, 4  ;;  %9268 = vmatprep.subr.bf16.mxu1 %v9619_v10  ;;  %v4109_v45 = vrot.slane %v4108_v26, 4  ;;  %v4931_v18 = vshll.u32 %v8799_v61, 16  ;;  %v4162_v33 = vld [vmem:[%s11659_s2 + $0x38] sm:$0xe] }
 0x3df   : >> { %4569 = vrot.lane.b32.xlu1 %v8744_v44, %s9817_s29  ;;  %v8813_v44 = vld [vmem:[%s11659_s2 + $0x58] sm:$0xe]  ;;  %v4370_v26 = vrot.slane %v4368_v5, 5  ;;  %v4163_v34 = vld [vmem:[%s11659_s2 + $0x3c] sm:$0x1] }
 0x3e0   : >> { %4567 = vrot.lane.b32.xlu0 %v8743_v57, %s9817_s29  ;;  %v4343_v57 = vsel %vm10447_vm13, %v4338_v49, %v4342_v35  ;;  %v8828_v4 = vrot.slane %v8813_v44, 9  ;;  %v4676_v14 = vsel %vm10447_vm13, %v4671_v62, %v4675_v46  ;;  %v5206_v35 = vshll.u32 %v8848_v16, 16  ;;  %v8703_v44 = vld [vmem:[%s11659_s2 + $0x1c] sm:$0x1] }
 0x3e1   : >> { %4437 = vst.msk [vmem:[#allocation5 + $0x20] sm:$0xf] %vm511_vm6, %v4343_v57  ;;  %9269 = vmatpush3.bf16.msra.mxu1 %v9620_v32  ;;  %v5220_v46 = vshll.u32 %v8850_v20, 16  ;;  %v5205_v49 = vrot.slane %v5203_v31, 4  ;;  %v4354_v57 = vshll.u32 %v8703_v44, 16  ;;  %v4347_v62 = vrot.slane %v4345_v47, 4 }
 0x3e2   : >> { %v5082_v28 = vsel %vm10482_vm1, %v8828_v4, %v5081_v56  ;;  %9270 = vmatprep.subr.bf16.mxu1 %v9623_v38  ;;  %v5208_v52 = vrot.slane %v5206_v35, 5  ;;  %v4928_v16 = vshrl.u32 %v8799_v61, 16  ;;  %v8789_v31 = vld [vmem:[%s11659_s2 + $0x60] sm:$0xf]  ;;  %v4933_v42 = vrot.slane %v4931_v18, 5 }
 0x3e3   : >> { %5013 = vrot.lane.b32.xlu1 %v4926_v23, %s9817_s29  ;;  %v11960_v23 = vrot.slane %v4097_v7, 5  ;;  %v5222_v60 = vrot.slane %v5220_v46, 5  ;;  %v8801_v7 = vld [vmem:[%s11659_s2 + $0x68] sm:$0xf]  ;;  %v4351_v8 = vor.u32 %v4350_v63, %v4347_v62  ;;  %v4356_v9 = vrot.slane %v4354_v57, 5 }
 0x3e4   : >> { %5011 = vrot.lane.b32.xlu0 %v4912_v29, %s9817_s29  ;;  %v4113_v29 = vrot.slane %v4111_v12, 5  ;;  %v5209_v56 = vor.u32 %v5208_v52, %v5205_v49  ;;  %v4942_v20 = vshrl.u32 %v8801_v7, 16  ;;  %v4930_v41 = vrot.slane %v4928_v16, 4  ;;  %v3973_v47 = vld [vmem:[%s11659_s2 + $0x28] sm:$0xf] }
 0x3e5   : >> { %v4100_v2 = vsel %vm10447_vm13, %v4095_v40, %v11960_v23  ;;  %v5223_v15 = vor.u32 %v5222_v60, %v5219_v25  ;;  %v4352_v19 = vrot.slane %v4351_v8, 4  ;;  %v8800_v40 = vld [vmem:[%s11659_s2 + $0x64] sm:$0x1]  ;;  %v3972_v25 = vld [vmem:[%s11659_s2 + $0x20] sm:$0xf]  ;;  %v8688_v44 = vrot.slane %v4162_v33, 9 }
 0x3e6   : >> { %v4114_v37 = vsel %vm10447_vm13, %v4109_v45, %v4113_v29  ;;  %v4161_v29 = vld [vmem:[%s11659_s2 + $0x34] sm:$0x1]  ;;  %v5210_v36 = vrot.slane %v5209_v56, 4  ;;  %v4944_v45 = vrot.slane %v4942_v20, 4  ;;  %v4937_v52 = vshll.u32 %v8800_v40, 16 }
 0x3e7   : >> { %5384 = vrot.lane.b32.xlu1 %v5357_v39, %s9817_s29  ;;  %v8886_v39 = vld [vmem:[%s11659_s2 + $0x68] sm:$0xf]  ;;  %v4357_v30 = vsel %vm10447_vm13, %v4352_v19, %v4356_v9  ;;  %v5224_v38 = vrot.slane %v5223_v15, 4  ;;  %3980 = vst.msk [vmem:[#allocation5 + $0x70] sm:$0xf] %vm511_vm6, %v3972_v25  ;;  %v4934_v57 = vor.u32 %v4933_v42, %v4930_v41 }
 0x3e8   : >> { %5382 = vrot.lane.b32.xlu0 %v5353_v50, %s9817_s29  ;;  %v9624_v50 = vld [vmem:[%s13525_s3 + $0x88] sm:$0xff]   ;;  %4438 = vst.msk [vmem:[#allocation5 + $0x3c] sm:$0xf] %vm511_vm6, %v4357_v30  ;;  %3981 = vst.msk [vmem:[#allocation5 + $0x8c] sm:$0xf] %vm511_vm6, %v3973_v47  ;;  %v12045_v59 = vrot.slane %v4937_v52, 5 }
 0x3e9   : >> { %9271 = vmatpush3.bf16.msra.mxu1 %v9624_v50  ;;  %v4209_v50 = vrot.slane %v4161_v29, 5  ;;  %v12048_v60 = vld [vmem:[%s11659_s2 + $0x74] sm:$0x1]  ;;  %v12051_v61 = vld [vmem:[%s11659_s2 + $0x40] sm:$0xf]  ;;  %v12063_v5 = vrot.slane %v4934_v57, 4 }
 0x3ea   : >> { %9272 = vmatprep.subr.bf16.mxu1 %v9625_v58  ;;  %v8707_v8 = vld [vmem:[%s11659_s2 + $0x2c] sm:$0x1]  ;;  %v5364_v56 = vrot.slane %v12048_v60, 5  ;;  %v8708_v15 = vld [vmem:[%s11659_s2 + $0x30] sm:$0xf] }
 0x3eb   : >> { %4277 = vrot.lane.b32.xlu1 %v8695_v54, %s9819_s1  ;;  %v8849_v54 = vld [vmem:[%s11659_s2 + $0x6c] sm:$0x1]  ;;  %v8745_v16 = vld [vmem:[%s11659_s2 + $0x40] sm:$0xf]  ;;  %v4390_v30 = vshll.u32 %v8708_v15, 16  ;;  %v4940_v47 = vsel %vm10447_vm13, %v12063_v5, %v12045_v59 }
 0x3ec   : >> { %4275 = vrot.lane.b32.xlu0 %v8694_v51, %s9819_s1  ;;  %v8704_v51 = vld [vmem:[%s11659_s2 + $0x20] sm:$0xf]  ;;  %v5212_v12 = vshll.u32 %v8849_v54, 16  ;;  %v4213_v54 = vrot.slane %v4163_v34, 5  ;;  %v8765_v42 = vld [vmem:[%s11659_s2 + $0x18] sm:$0xe] }
 0x3ed   : >> { %v4359_v0 = vshrl.u32 %v8704_v51, 16  ;;  %v4362_v4 = vshll.u32 %v8704_v51, 16  ;;  %v12042_v51 = vld [vmem:[%s11659_s2 + $0x70] sm:$0xe]  ;;  %v8762_v52 = vld [vmem:[%s11659_s2 + $0x4c] sm:$0x1] }
 0x3ee   : >> { %v5214_v32 = vrot.slane %v5212_v12, 5  ;;  %v4214_v63 = vsel %vm10482_vm1, %v8688_v44, %v4213_v54  ;;  %v4692_v12 = vshrl.u32 %v12051_v61, 16  ;;  %v8760_v57 = vld [vmem:[%s11659_s2 + $0x44] sm:$0x1]  ;;  %v4715_v5 = vshll.u32 %v8762_v52, 16 }
 0x3ef   : >> { %4729 = vrot.lane.b32.xlu1 %v4690_v11, %s9819_s1  ;;  %v4361_v10 = vrot.slane %v4359_v0, 4  ;;  %v9626_v11 = vld [vmem:[%s13525_s3 + $0x80] sm:$0xff]   ;;  %v8696_v60 = vld [vmem:[%s11659_s2 + $0x38] sm:$0xf] }
 0x3f0   : >> { %4727 = vrot.lane.b32.xlu0 %v4676_v14, %s9819_s1  ;;  %v4364_v14 = vrot.slane %v4362_v4, 5  ;;  %9273 = vmatpush3.bf16.msra.mxu1 %v9626_v11  ;;  %v5215_v55 = vsel %vm10447_vm13, %v5210_v36, %v5214_v32  ;;  %v8706_v4 = vld [vmem:[%s11659_s2 + $0x28] sm:$0xf]  ;;  %v8764_v36 = vld [vmem:[%s11659_s2 + $0x14] sm:$0x1] }
 0x3f1   : >> { %v4373_v9 = vshrl.u32 %v8706_v4, 16  ;;  %v8746_v11 = vld [vmem:[%s11659_s2 + $0x48] sm:$0xf]  ;;  %v4785_v41 = vrot.slane %v8764_v36, 5 }
 0x3f2   : >> { %v4365_v23 = vor.u32 %v4364_v14, %v4361_v10  ;;  %v4382_v14 = vshll.u32 %v8707_v8, 16 }
 0x3f3   : >> { %5109 = vrot.lane.b32.xlu1 %v5082_v28, %s9819_s1  ;;  %v4160_v28 = vld [vmem:[%s11659_s2 + $0x30] sm:$0xe]  ;;  %v4375_v20 = vrot.slane %v4373_v9, 4 }
 0x3f4   : >> { %5107 = vrot.lane.b32.xlu0 %v5078_v22, %s9819_s1  ;;  %v4945_v22 = vshll.u32 %v8801_v7, 16  ;;  %v4366_v35 = vrot.slane %v4365_v23, 4  ;;  %v8687_v49 = vrot.slane %v4160_v28, 9  ;;  %v8879_v7 = vrot.slane %v12042_v51, 9 }
 0x3f5   : >> { %v4387_v23 = vshrl.u32 %v8708_v15, 16  ;;  %v4384_v29 = vrot.slane %v4382_v14, 5 }
 0x3f6   : >> { %v4947_v46 = vrot.slane %v4945_v22, 5  ;;  %v4371_v48 = vsel %vm10447_vm13, %v4366_v35, %v4370_v26  ;;  %v4210_v62 = vsel %vm10482_vm1, %v8687_v49, %v4209_v50  ;;  %v8709_v22 = vld [vmem:[%s11659_s2 + $0x34] sm:$0x1]  ;;  %v8865_v26 = vld [vmem:[%s11659_s2 + $0x6c] sm:$0x1]  ;;  %v8780_v49 = vrot.slane %v8765_v42, 9 }
 0x3f7   : >> { %5435 = vrot.lane.b32.xlu1 %v8886_v39, %s9819_s1  ;;  %v5228_v39 = vrot.slane %v5226_v13, 5  ;;  %4439 = vst.msk [vmem:[#allocation5 + $0x58] sm:$0xf] %vm511_vm6, %v4371_v48  ;;  %v4376_v13 = vshll.u32 %v8706_v4, 16  ;;  %v4389_v33 = vrot.slane %v4387_v23, 4  ;;  %v4396_v34 = vshll.u32 %v8709_v22, 16 }
 0x3f8   : >> { %5433 = vrot.lane.b32.xlu0 %v8885_v43, %s9819_s1  ;;  %v8802_v43 = vld [vmem:[%s11659_s2 + $0x6c] sm:$0x1]  ;;  %v4948_v58 = vor.u32 %v4947_v46, %v4944_v45  ;;  %v8763_v35 = vld [vmem:[%s11659_s2 + $0x10] sm:$0xe]  ;;  %v8766_v48 = vld [vmem:[%s11659_s2 + $0x1c] sm:$0x1] }
 0x3f9   : >> { %v5229_v53 = vsel %vm10447_vm13, %v5224_v38, %v5228_v39  ;;  %v4951_v1 = vshll.u32 %v8802_v43, 16  ;;  %v4378_v28 = vrot.slane %v4376_v13, 5  ;;  %v4392_v39 = vrot.slane %v4390_v30, 5  ;;  %v8837_v4 = vld [vmem:[%s11659_s2 + $0x60] sm:$0xf] }
 0x3fa   : >> { %v8779_v40 = vrot.slane %v8763_v35, 9  ;;  %v4398_v46 = vrot.slane %v4396_v34, 5  ;;  %v4789_v54 = vrot.slane %v8766_v48, 5  ;;  %5151 = vst.msk [vmem:[#allocation5 + $0x28] sm:$0xf] %vm511_vm6, %v8837_v4 }
 0x3fb   : >> { %4129 = vrot.lane.b32.xlu1 %v4114_v37, %s9818_s0  ;;  %v12038_v37 = vld [vmem:[%s11659_s2 + $0x68] sm:$0xe]  ;;  %v12058_v0 = vrot.slane %v4951_v1, 5  ;;  %v4379_v38 = vor.u32 %v4378_v28, %v4375_v20  ;;  %v8818_v13 = vld [vmem:[%s11659_s2 + $0x6c] sm:$0x1] }
 0x3fc   : >> { %4127 = vrot.lane.b32.xlu0 %v4100_v2, %s9818_s0  ;;  %v8878_v2 = vrot.slane %v12038_v37, 9  ;;  %v4786_v44 = vsel %vm10482_vm1, %v8779_v40, %v4785_v41  ;;  %v8697_v37 = vld [vmem:[%s11659_s2 + $0x40] sm:$0xf]  ;;  %v8816_v23 = vld [vmem:[%s11659_s2 + $0x64] sm:$0x1]  ;;  %v5089_v28 = vrot.slane %v8818_v13, 5 }
 0x3fd   : >> { %v4380_v25 = vrot.slane %v4379_v38, 4  ;;  %4823 = vst.msk [vmem:[#allocation5 + $0x8] sm:$0xf] %vm511_vm6, %v4786_v44  ;;  %v8815_v22 = vld [vmem:[%s11659_s2 + $0x60] sm:$0xe]  ;;  %v5085_v36 = vrot.slane %v8816_v23, 5 }
 0x3fe   : >> { %v8829_v35 = vrot.slane %v8815_v22, 9  ;;  %v8853_v40 = vld [vmem:[%s11659_s2 + $0x7c] sm:$0x1]  ;;  %v8855_v41 = vld [vmem:[%s11659_s2 + $0x84] sm:$0x1] }
 0x3ff   : >> { %4522 = vrot.lane.b32.xlu1 %v4507_v6, %s9818_s0  ;;  %v12065_v6 = vrot.slane %v4948_v58, 4  ;;  %v4694_v58 = vrot.slane %v4692_v12, 4  ;;  %v4701_v12 = vshll.u32 %v8760_v57, 16  ;;  %v5240_v52 = vshll.u32 %v8853_v40, 16  ;;  %v12162_v44 = vld [vmem:[%s11659_s2 + $0x60] sm:$0xe] }
 0x400   : >> { %4520 = vrot.lane.b32.xlu0 %v4503_v3, %s9818_s0  ;;  %v8761_v3 = vld [vmem:[%s11659_s2 + $0x48] sm:$0xf]  ;;  %v8869_v40 = vld [vmem:[%s11659_s2 + $0x7c] sm:$0x1] }
 0x401   : >> { %v4706_v18 = vshrl.u32 %v8761_v3, 16  ;;  %v4709_v19 = vshll.u32 %v8761_v3, 16  ;;  %v4954_v32 = vsel %vm10447_vm13, %v12065_v6, %v12058_v0  ;;  %v4790_v0 = vsel %vm10482_vm1, %v8780_v49, %v4789_v54  ;;  %v8836_v3 = vld [vmem:[%s11659_s2 + $0x58] sm:$0xf]  ;;  %v8911_v4 = vld [vmem:[%s11659_s2 + $0x68] sm:$0xe] }
 0x402   : >> { %4824 = vst.msk [vmem:[#allocation5 + $0x24] sm:$0xf] %vm511_vm6, %v4790_v0  ;;  %5150 = vst.msk [vmem:[#allocation5 + $0xc] sm:$0xf] %vm511_vm6, %v8836_v3  ;;  %v5365_v6 = vsel %vm10482_vm1, %v8879_v7, %v5364_v56  ;;  %v4717_v56 = vrot.slane %v4715_v5, 5  ;;  %v5086_v49 = vsel %vm10482_vm1, %v8829_v35, %v5085_v36  ;;  %v5242_v0 = vrot.slane %v5240_v52, 5 }
 0x403   : >> { %4857 = vrot.lane.b32.xlu1 %v8790_v27, %s9818_s0  ;;  %v4695_v27 = vshll.u32 %v12051_v61, 16  ;;  %v4708_v43 = vrot.slane %v4706_v18, 4  ;;  %v4711_v45 = vrot.slane %v4709_v19, 5  ;;  %v8852_v18 = vld [vmem:[%s11659_s2 + $0x78] sm:$0xf]  ;;  %v8925_v3 = vrot.slane %v12162_v44, 9 }
 0x404   : >> { %4855 = vrot.lane.b32.xlu0 %v8789_v31, %s9818_s0  ;;  %v8854_v19 = vld [vmem:[%s11659_s2 + $0x80] sm:$0xf]  ;;  %v5234_v30 = vshll.u32 %v8852_v18, 16  ;;  %v8888_v54 = vld [vmem:[%s11659_s2 + $0x78] sm:$0xf] }
 0x405   : >> { %v4697_v61 = vrot.slane %v4695_v27, 5  ;;  %v4712_v59 = vor.u32 %v4711_v45, %v4708_v43  ;;  %v8992_v35 = vld [vmem:[%s11659_s2 + $0xb0] sm:$0xf] }
 0x406   : >> { %v5236_v43 = vrot.slane %v5234_v30, 5  ;;  %v8983_v52 = vld [vmem:[%s11659_s2 + $0xb0] sm:$0xf]  ;;  %v6082_v44 = vshll.u32 %v8992_v35, 16 }
 0x407   : >> { %5292 = vrot.lane.b32.xlu1 %v5229_v53, %s9818_s0  ;;  %v4393_v53 = vor.u32 %v4392_v39, %v4389_v33  ;;  %v4713_v7 = vrot.slane %v4712_v59, 4  ;;  %v8791_v59 = vld [vmem:[%s11659_s2 + $0x70] sm:$0xf] }
 0x408   : >> { %5290 = vrot.lane.b32.xlu0 %v5215_v55, %s9818_s0  ;;  %v5360_v55 = vrot.slane %v8865_v26, 5 }
 0x409   : >> { %v4718_v26 = vsel %vm10447_vm13, %v4713_v7, %v4717_v56  ;;  %v8806_v56 = vld [vmem:[%s11659_s2 + $0x7c] sm:$0x1] }
 0x40a   : >> { %v4560_v10 = vpop.permute.xlu0 %4559  ;;  %v4979_v30 = vshll.u32 %v8806_v56, 16  ;;  %v9635_v56 = vld [vmem:[%s13525_s3 + $0x138] sm:$0xff]  }
 0x40b   : >> { %4229 = vrot.lane.b32.xlu1 %v4214_v63, %s9817_s29  ;;  %v4394_v63 = vrot.slane %v4393_v53, 4  ;;  %v5254_v53 = vshll.u32 %v8855_v41, 16 }
 0x40c   : >> { %4227 = vrot.lane.b32.xlu0 %v4210_v62, %s9817_s29  ;;  %v4385_v62 = vsel %vm10447_vm13, %v4380_v25, %v4384_v29  ;;  %v5231_v29 = vshrl.u32 %v8852_v18, 16  ;;  %v8887_v25 = vld [vmem:[%s11659_s2 + $0x70] sm:$0xf] }
 0x40d   : >> { %v4509_v31 = vpop.permute.xlu1 %4508  ;;  %4440 = vst.msk [vmem:[#allocation5 + $0x74] sm:$0xf] %vm511_vm6, %v4385_v62  ;;  %v4399_v8 = vsel %vm10447_vm13, %v4394_v63, %v4398_v46  ;;  %v8792_v63 = vld [vmem:[%s11659_s2 + $0x78] sm:$0xf]  ;;  %v5256_v5 = vrot.slane %v5254_v53, 5  ;;  %v6079_v53 = vshrl.u32 %v8992_v35, 16 }
 0x40e   : >> { %4532 = vst.msk [vmem:[#allocation5 + $0x4] sm:$0xf] %vm4139_vm0, %v4509_v31  ;;  %v4216_v50 = vpop.permute.xlu0 %4215  ;;  %v5245_v31 = vshrl.u32 %v8854_v19, 16  ;;  %v5233_v42 = vrot.slane %v5231_v29, 4 }
 0x40f   : >> { %4573 = vrot.lane.b32.xlu1 %v8746_v11, %s9817_s29  ;;  %4583 = vst.msk [vmem:[#allocation5 + $0x4] sm:$0xf] %vm4239_vm4, %v4560_v10  ;;  %v5361_v10 = vsel %vm10482_vm1, %v8878_v2, %v5360_v55  ;;  %v4698_v11 = vor.u32 %v4697_v61, %v4694_v58  ;;  %v8817_v2 = vld [vmem:[%s11659_s2 + $0x68] sm:$0xe]  ;;  %v8803_v55 = vld [vmem:[%s11659_s2 + $0x70] sm:$0xf] }
 0x410   : >> { %4571 = vrot.lane.b32.xlu0 %v8745_v16, %s9817_s29  ;;  %4441 = vst.msk [vmem:[#allocation5 + $0x90] sm:$0xf] %vm511_vm6, %v4399_v8  ;;  %v4703_v16 = vrot.slane %v4701_v12, 5  ;;  %v8830_v27 = vrot.slane %v8817_v2, 9  ;;  %v5247_v45 = vrot.slane %v5245_v31, 4  ;;  %v4959_v7 = vshll.u32 %v8803_v55, 16 }
 0x411   : >> { %v4511_v1 = vpop.permute.xlu1 %4510  ;;  %v4699_v15 = vrot.slane %v4698_v11, 4  ;;  %v8910_v58 = vld [vmem:[%s11659_s2 + $0x64] sm:$0x1]  ;;  %v8805_v61 = vld [vmem:[%s11659_s2 + $0x78] sm:$0xf] }
 0x412   : >> { %4533 = vst.msk [vmem:[#allocation5 + $0x20] sm:$0xf] %vm4139_vm0, %v4511_v1  ;;  %v5090_v39 = vsel %vm10482_vm1, %v8830_v27, %v5089_v28  ;;  %v5237_v1 = vor.u32 %v5236_v43, %v5233_v42  ;;  %v12178_v8 = vld [vmem:[%s11659_s2 + $0x74] sm:$0x1]  ;;  %v4970_v12 = vshrl.u32 %v8805_v61, 16  ;;  %v4961_v29 = vrot.slane %v4959_v7, 5 }
 0x413   : >> { %5017 = vrot.lane.b32.xlu1 %v4954_v32, %s9817_s29  ;;  %v5248_v32 = vshll.u32 %v8854_v19, 16  ;;  %v4704_v34 = vsel %vm10447_vm13, %v4699_v15, %v4703_v16  ;;  %v8926_v15 = vrot.slane %v8911_v4, 9  ;;  %v4965_v19 = vshll.u32 %v12178_v8, 16  ;;  %v8710_v7 = vld [vmem:[%s11659_s2 + $0x38] sm:$0xf] }
 0x414   : >> { %5015 = vrot.lane.b32.xlu0 %v4940_v47, %s9817_s29  ;;  %v4972_v22 = vrot.slane %v4970_v12, 4  ;;  %v5368_v4 = vrot.slane %v8869_v40, 5  ;;  %v12237_v12 = vrot.slane %v6079_v53, 4 }
 0x415   : >> { %v4218_v9 = vpop.permute.xlu1 %4217  ;;  %v5250_v46 = vrot.slane %v5248_v32, 5  ;;  %v8991_v32 = vld [vmem:[%s11659_s2 + $0xac] sm:$0x1] }
 0x416   : >> { %v4116_v51 = vpop.permute.xlu0 %4115 }
 0x417   : >> { %4140 = vst.msk [vmem:[#allocation5] sm:$0xf] %vm4139_vm0, %v4116_v51  ;;  %5388 = vrot.lane.b32.xlu1 %v5365_v6, %s9817_s29  ;;  %v5251_v47 = vor.u32 %v5250_v46, %v5247_v45  ;;  %v8912_v6 = vld [vmem:[%s11659_s2 + $0x6c] sm:$0x1]  ;;  %v4973_v51 = vshll.u32 %v8805_v61, 16  ;;  %v4981_v61 = vrot.slane %v4979_v30, 5 }
 0x418   : >> { %5386 = vrot.lane.b32.xlu0 %v5361_v10, %s9817_s29  ;;  %4240 = vst.msk [vmem:[#allocation5] sm:$0xf] %vm4239_vm4, %v4216_v50  ;;  %v5238_v10 = vrot.slane %v5237_v1, 4  ;;  %v5647_v16 = vrot.slane %v8912_v6, 5  ;;  %v12207_v45 = vld [vmem:[%s11659_s2 + $0x80] sm:$0xe] }
 0x419   : >> { %v4562_v14 = vpop.permute.xlu1 %4561  ;;  %v5252_v11 = vrot.slane %v5251_v47, 4  ;;  %v4975_v23 = vrot.slane %v4973_v51, 5  ;;  %v12210_v46 = vld [vmem:[%s11659_s2 + $0x84] sm:$0x1]  ;;  %v8881_v6 = vrot.slane %v12207_v45, 9  ;;  %v12239_v51 = vrot.slane %v6082_v44, 5 }
 0x41a   : >> { %v4118_v20 = vpop.permute.xlu0 %4117  ;;  %4584 = vst.msk [vmem:[#allocation5 + $0x20] sm:$0xf] %vm4239_vm4, %v4562_v14  ;;  %v5643_v14 = vrot.slane %v8910_v58, 5  ;;  %v5243_v28 = vsel %vm10447_vm13, %v5238_v10, %v5242_v0  ;;  %v5648_v36 = vsel %vm10482_vm1, %v8926_v15, %v5647_v16  ;;  %v5372_v8 = vrot.slane %v12210_v46, 5  ;;  %v9634_v10 = vld [vmem:[%s13525_s3 + $0x178] sm:$0xff]  }
 0x41b   : >> { %4141 = vst.msk [vmem:[#allocation5 + $0x1c] sm:$0xf] %vm4139_vm0, %v4118_v20  ;;  %4281 = vrot.lane.b32.xlu1 %v8697_v37, %s9819_s1  ;;  %v5257_v20 = vsel %vm10447_vm13, %v5252_v11, %v5256_v5  ;;  %v4404_v15 = vshll.u32 %v8710_v7, 16  ;;  %9298 = vmatprep.subr.bf16.mxu0 %v9634_v10 }
 0x41c   : >> { %4241 = vst.msk [vmem:[#allocation5 + $0x1c] sm:$0xf] %vm4239_vm4, %v4218_v9  ;;  %4279 = vrot.lane.b32.xlu0 %v8696_v60, %s9819_s1  ;;  %v4956_v9 = vshrl.u32 %v8803_v55, 16  ;;  %v5644_v42 = vsel %vm10482_vm1, %v8925_v3, %v5643_v14  ;;  %v3975_v55 = vld [vmem:[%s11659_s2 + $0x38] sm:$0xf]  ;;  %v4401_v14 = vshrl.u32 %v8710_v7, 16  ;;  %v5373_v35 = vsel %vm10482_vm1, %v8881_v6, %v5372_v8 }
 0x41d   : >> { %v4270_v33 = vpop.permute.xlu1 %4269  ;;  %3983 = vst.msk [vmem:[#allocation5 + $0xc4] sm:$0xf] %vm511_vm6, %v3975_v55  ;;  %v8933_v55 = vld [vmem:[%s11659_s2 + $0xa0] sm:$0xf] }
 0x41e   : >> { %v4268_v38 = vpop.permute.xlu0 %4267  ;;  %4293 = vst.msk [vmem:[#allocation5 + $0x1c] sm:$0xf] %vm4291_vm8, %v4270_v33  ;;  %v4958_v18 = vrot.slane %v4956_v9, 4 }
 0x41f   : >> { %4292 = vst.msk [vmem:[#allocation5] sm:$0xf] %vm4291_vm8, %v4268_v38  ;;  %4733 = vrot.lane.b32.xlu1 %v4718_v26, %s9819_s1  ;;  %v8990_v26 = vld [vmem:[%s11659_s2 + $0xa8] sm:$0xf]  ;;  %v4976_v38 = vor.u32 %v4975_v23, %v4972_v22 }
 0x420   : >> { %4731 = vrot.lane.b32.xlu0 %v4704_v34, %s9819_s1  ;;  %v6065_v33 = vshrl.u32 %v8990_v26, 16  ;;  %v6068_v34 = vshll.u32 %v8990_v26, 16  ;;  %v4962_v43 = vor.u32 %v4961_v29, %v4958_v18  ;;  %v4403_v26 = vrot.slane %v4401_v14, 4  ;;  %v8713_v29 = vld [vmem:[%s11659_s2 + $0x44] sm:$0x1] }
 0x421   : >> { %v4722_v48 = vpop.permute.xlu1 %4721  ;;  %v4977_v58 = vrot.slane %v4976_v38, 4  ;;  %v12275_v38 = vld [vmem:[%s11659_s2 + $0xa0] sm:$0xf]  ;;  %v4424_v40 = vshll.u32 %v8713_v29, 16 }
 0x422   : >> { %v4720_v50 = vpop.permute.xlu0 %4719  ;;  %4744 = vst.msk [vmem:[#allocation5 + $0x20] sm:$0xf] %vm4291_vm8, %v4722_v48  ;;  %v6074_v48 = vshll.u32 %v8991_v32, 16  ;;  %v6067_v1 = vrot.slane %v6065_v33, 4  ;;  %v6070_v47 = vrot.slane %v6068_v34, 5  ;;  %v4963_v0 = vrot.slane %v4962_v43, 4 }
 0x423   : >> { %4743 = vst.msk [vmem:[#allocation5 + $0x4] sm:$0xf] %vm4291_vm8, %v4720_v50  ;;  %5113 = vrot.lane.b32.xlu1 %v5090_v39, %s9819_s1  ;;  %v12201_v39 = vld [vmem:[%s11659_s2 + $0x78] sm:$0xe]  ;;  %v9636_v34 = vld [vmem:[%s13525_s3 + $0x170] sm:$0xff]   ;;  %v4426_v44 = vrot.slane %v4424_v40, 5 }
 0x424   : >> { %5111 = vrot.lane.b32.xlu0 %v5086_v49, %s9819_s1  ;;  %v3974_v49 = vld [vmem:[%s11659_s2 + $0x30] sm:$0xf]  ;;  %v8880_v3 = vrot.slane %v12201_v39, 9  ;;  %v12230_v9 = vrot.slane %v6074_v48, 5  ;;  %v6071_v11 = vor.u32 %v6070_v47, %v6067_v1  ;;  %v12281_v43 = vld [vmem:[%s11659_s2 + $0x74] sm:$0x1] }
 0x425   : >> { %v4122_v57 = vpop.permute.xlu1 %4121  ;;  %3982 = vst.msk [vmem:[#allocation5 + $0xa8] sm:$0xf] %vm511_vm6, %v3974_v49  ;;  %v9638_v47 = vld [vmem:[%s13525_s3 + $0x168] sm:$0xff]   ;;  %v5093_v14 = vrot.slane %v12281_v43, 5  ;;  %v9640_v40 = vld [vmem:[%s13525_s3 + $0x160] sm:$0xff]  }
 0x426   : >> { %v4120_v62 = vpop.permute.xlu0 %4119  ;;  %4143 = vst.msk [vmem:[#allocation5 + $0x54] sm:$0xf] %vm4139_vm0, %v4122_v57  ;;  %v9604_v2 = vld [vmem:[#allocation5] ss:$28 sps:$4 sm:$0xff]   ;;  %v4967_v57 = vrot.slane %v4965_v19, 5  ;;  %v5369_v23 = vsel %vm10482_vm1, %v8880_v3, %v5368_v4  ;;  %v12264_v30 = vrot.slane %v6071_v11, 4 }
 0x427   : >> { %4142 = vst.msk [vmem:[#allocation5 + $0x38] sm:$0xf] %vm4139_vm0, %v4120_v62  ;;  %5439 = vrot.lane.b32.xlu1 %v8888_v54, %s9819_s1  ;;  %v8982_v54 = vld [vmem:[%s11659_s2 + $0xa8] sm:$0xf]  ;;  %v12223_v62 = vld [vmem:[%s11659_s2 + $0x70] sm:$0xe] }
 0x428   : >> { %5437 = vrot.lane.b32.xlu0 %v8887_v25, %s9819_s1  ;;  %v8993_v25 = vld [vmem:[%s11659_s2 + $0xb4] sm:$0x1]  ;;  %v4968_v18 = vsel %vm10447_vm13, %v4963_v0, %v4967_v57  ;;  %v9639_v0 = vld [vmem:[%s13525_s3 + $0x128] sm:$0xff]   ;;  %v8821_v4 = vld [vmem:[%s11659_s2 + $0x78] sm:$0xe] }
 0x429   : >> { %v4515_v60 = vpop.permute.xlu1 %4514  ;;  %v8822_v11 = vld [vmem:[%s11659_s2 + $0x7c] sm:$0x1]  ;;  %v8832_v29 = vrot.slane %v8821_v4, 9 }
 0x42a   : >> { %v4513_v37 = vpop.permute.xlu0 %4512  ;;  %4535 = vst.msk [vmem:[#allocation5 + $0x58] sm:$0xf] %vm4139_vm0, %v4515_v60  ;;  %v9606_v13 = vld [vmem:[#allocation5 + $0x4] ss:$28 sps:$4 sm:$0xff]   ;;  %v8831_v60 = vrot.slane %v12223_v62, 9 }
 0x42b   : >> { %4534 = vst.msk [vmem:[#allocation5 + $0x3c] sm:$0xf] %vm4139_vm0, %v4513_v37  ;;  %4861 = vrot.lane.b32.xlu1 %v8792_v63, %s9818_s0  ;;  %7235 = vmatprep.mubr.bf16.mxu0 %v9606_v13  ;;  %v4982_v37 = vsel %vm10447_vm13, %v4977_v58, %v4981_v61  ;;  %v8711_v13 = vld [vmem:[%s11659_s2 + $0x3c] sm:$0x1]  ;;  %v8769_v61 = vld [vmem:[%s11659_s2 + $0x28] sm:$0xe] }
 0x42c   : >> { %4859 = vrot.lane.b32.xlu0 %v8791_v59, %s9818_s0  ;;  %7236 = vmatmul.mubr.bf16.vlgmr.msra.gmra.mxu0 %v9604_v2  ;;  %v6088_v59 = vshll.u32 %v8993_v25, 16  ;;  %v12250_v2 = vld [vmem:[%s11659_s2 + $0xa8] sm:$0xf]  ;;  %v8889_v62 = vld [vmem:[%s11659_s2 + $0x80] sm:$0xf] }
 0x42d   : >> { %v4222_v27 = vpop.permute.xlu1 %4221  ;;  %9299 = vmatpush3.bf16.msra.mxu0 %v9635_v56  ;;  %v5788_v45 = vshrl.u32 %v12250_v2, 16  ;;  %v5791_v46 = vshll.u32 %v12250_v2, 16  ;;  %v8934_v25 = vld [vmem:[%s11659_s2 + $0xa8] sm:$0xf] }
 0x42e   : >> { %v4220_v31 = vpop.permute.xlu0 %4219  ;;  %4243 = vst.msk [vmem:[#allocation5 + $0x54] sm:$0xf] %vm4239_vm4, %v4222_v27  ;;  %v12255_v19 = vrot.slane %v6088_v59, 5  ;;  %v4406_v27 = vrot.slane %v4404_v15, 5  ;;  %9300 = vmatprep.subr.bf16.mxu0 %v9636_v34  ;;  %v8942_v15 = vld [vmem:[%s11659_s2 + $0xa4] sm:$0x1] }
 0x42f   : >> { %4242 = vst.msk [vmem:[#allocation5 + $0x38] sm:$0xf] %vm4239_vm4, %v4220_v31  ;;  %5296 = vrot.lane.b32.xlu1 %v5257_v20, %s9818_s0  ;;  %v4410_v20 = vshll.u32 %v8711_v13, 16 }
 0x430   : >> { %5294 = vrot.lane.b32.xlu0 %v5243_v28, %s9818_s0  ;;  %v8712_v28 = vld [vmem:[%s11659_s2 + $0x40] sm:$0xf]  ;;  %v4407_v39 = vor.u32 %v4406_v27, %v4403_v26  ;;  %v8838_v26 = vld [vmem:[%s11659_s2 + $0x68] sm:$0xf]  ;;  %v8839_v27 = vld [vmem:[%s11659_s2 + $0x70] sm:$0xf] }
 0x431   : >> { %v4566_v41 = vpop.permute.xlu1 %4565  ;;  %v4412_v31 = vrot.slane %v4410_v20, 5  ;;  %v4415_v32 = vshrl.u32 %v8712_v28, 16  ;;  %v4418_v33 = vshll.u32 %v8712_v28, 16  ;;  %v5790_v20 = vrot.slane %v5788_v45, 4  ;;  %5152 = vst.msk [vmem:[#allocation5 + $0x44] sm:$0xf] %vm511_vm6, %v8838_v26 }
 0x432   : >> { %v4564_v50 = vpop.permute.xlu0 %4563  ;;  %4586 = vst.msk [vmem:[#allocation5 + $0x58] sm:$0xf] %vm4239_vm4, %v4566_v41  ;;  %v9637_v41 = vld [vmem:[%s13525_s3 + $0x130] sm:$0xff]   ;;  %v4408_v53 = vrot.slane %v4407_v39, 4  ;;  %v9641_v45 = vld [vmem:[%s13525_s3 + $0x120] sm:$0xff]  }
 0x433   : >> { %4585 = vst.msk [vmem:[#allocation5 + $0x3c] sm:$0xf] %vm4239_vm4, %v4564_v50  ;;  %5675 = vrot.lane.b32.xlu1 %v5648_v36, %s9818_s0  ;;  %v6085_v36 = vor.u32 %v12239_v51, %v12237_v12  ;;  %v4417_v48 = vrot.slane %v4415_v32, 4  ;;  %v4420_v49 = vrot.slane %v4418_v33, 5  ;;  %v8767_v50 = vld [vmem:[%s11659_s2 + $0x20] sm:$0xe]  ;;  %9301 = vmatpush3.bf16.msra.mxu0 %v9637_v41 }
 0x434   : >> { %5673 = vrot.lane.b32.xlu0 %v5644_v42, %s9818_s0  ;;  %v8781_v1 = vrot.slane %v8767_v50, 9  ;;  %v4413_v59 = vsel %vm10447_vm13, %v4408_v53, %v4412_v31  ;;  %9302 = vmatprep.subr.bf16.mxu0 %v9638_v47  ;;  %v5774_v12 = vshrl.u32 %v12275_v38, 16  ;;  %v5777_v51 = vshll.u32 %v12275_v38, 16  ;;  %v8944_v32 = vld [vmem:[%s11659_s2 + $0xac] sm:$0x1]  ;;  %v9645_v26 = vld [vmem:[%s13525_s3 + $0x110] sm:$0xff]  }
 0x435   : >> { %v4274_v63 = vpop.permute.xlu1 %4273  ;;  %v4421_v57 = vor.u32 %v4420_v49, %v4417_v48  ;;  %v6086_v3 = vrot.slane %v6085_v36, 4  ;;  %4442 = vst.msk [vmem:[#allocation5 + $0xac] sm:$0xf] %vm511_vm6, %v4413_v59  ;;  %v5097_v31 = vrot.slane %v8822_v11, 5  ;;  %v8856_v33 = vld [vmem:[%s11659_s2 + $0x88] sm:$0xf] }
 0x436   : >> { %v4272_v5 = vpop.permute.xlu0 %4271  ;;  %4295 = vst.msk [vmem:[#allocation5 + $0x54] sm:$0xf] %vm4291_vm8, %v4274_v63  ;;  %v8770_v63 = vld [vmem:[%s11659_s2 + $0x2c] sm:$0x1]  ;;  %v5776_v36 = vrot.slane %v5774_v12, 4  ;;  %v5779_v38 = vrot.slane %v5777_v51, 5 }
 0x437   : >> { %4294 = vst.msk [vmem:[#allocation5 + $0x38] sm:$0xf] %vm4291_vm8, %v4272_v5  ;;  %6018 = vrot.lane.b32.xlu1 %v8983_v52, %s9818_s0  ;;  %v8782_v5 = vrot.slane %v8769_v61, 9  ;;  %v4797_v6 = vrot.slane %v8770_v63, 5  ;;  %v4422_v7 = vrot.slane %v4421_v57, 4  ;;  %9303 = vmatpush3.bf16.msra.mxu0 %v9639_v0  ;;  %v6091_v28 = vsel %vm10447_vm13, %v6086_v3, %v12255_v19 }
 0x438   : >> { %6016 = vrot.lane.b32.xlu0 %v8982_v54, %s9818_s0  ;;  %v8768_v54 = vld [vmem:[%s11659_s2 + $0x24] sm:$0x1]  ;;  %5153 = vst.msk [vmem:[#allocation5 + $0x60] sm:$0xf] %vm511_vm6, %v8839_v27  ;;  %v5783_v19 = vshll.u32 %v8942_v15, 16  ;;  %v5262_v43 = vshll.u32 %v8856_v33, 16  ;;  %9304 = vmatprep.subr.bf16.mxu0 %v9640_v40 }
 0x439   : >> { %v4726_v16 = vpop.permute.xlu1 %4725  ;;  %v4793_v58 = vrot.slane %v8768_v54, 5  ;;  %v8858_v39 = vld [vmem:[%s11659_s2 + $0x90] sm:$0xf]  ;;  %v8857_v54 = vld [vmem:[%s11659_s2 + $0x8c] sm:$0x1] }
 0x43a   : >> { %v4724_v22 = vpop.permute.xlu0 %4723  ;;  %4746 = vst.msk [vmem:[#allocation5 + $0x58] sm:$0xf] %vm4291_vm8, %v4726_v16  ;;  %v4798_v16 = vsel %vm10482_vm1, %v8782_v5, %v4797_v6  ;;  %v5273_v48 = vshrl.u32 %v8858_v39, 16  ;;  %v5276_v49 = vshll.u32 %v8858_v39, 16  ;;  %v12353_v53 = vrot.slane %v5783_v19, 5  ;;  %v9648_v19 = vld [vmem:[%s13525_s3 + $0x148] sm:$0xff]  }
 0x43b   : >> { %4745 = vst.msk [vmem:[#allocation5 + $0x3c] sm:$0xf] %vm4291_vm8, %v4724_v22  ;;  %5021 = vrot.lane.b32.xlu1 %v4982_v37, %s9817_s29  ;;  %v4794_v56 = vsel %vm10482_vm1, %v8781_v1, %v4793_v58  ;;  %v5793_v22 = vrot.slane %v5791_v46, 5  ;;  %v5098_v46 = vsel %vm10482_vm1, %v8832_v29, %v5097_v31  ;;  %9305 = vmatpush3.bf16.msra.mxu0 %v9641_v45  ;;  %v8890_v47 = vld [vmem:[%s11659_s2 + $0x88] sm:$0xf]  ;;  %v5264_v0 = vrot.slane %v5262_v43, 5 }
 0x43c   : >> { %5019 = vrot.lane.b32.xlu0 %v4968_v18, %s9817_s29  ;;  %4825 = vst.msk [vmem:[#allocation5 + $0x40] sm:$0xf] %vm511_vm6, %v4794_v56  ;;  %4826 = vst.msk [vmem:[#allocation5 + $0x5c] sm:$0xf] %vm511_vm6, %v4798_v16  ;;  %v9008_v57 = vld [vmem:[%s11659_s2 + $0xb0] sm:$0xe] }
 0x43d   : >> { %v4126_v42 = vpop.permute.xlu1 %4125  ;;  %v9009_v58 = vld [vmem:[%s11659_s2 + $0xb4] sm:$0x1]  ;;  %v5268_v4 = vshll.u32 %v8857_v54, 16  ;;  %v5275_v59 = vrot.slane %v5273_v48, 4  ;;  %v5278_v5 = vrot.slane %v5276_v49, 5  ;;  %v9643_v56 = vld [vmem:[%s13525_s3 + $0x118] sm:$0xff]  }
 0x43e   : >> { %v4124_v52 = vpop.permute.xlu0 %4123  ;;  %4145 = vst.msk [vmem:[#allocation5 + $0x8c] sm:$0xf] %vm4139_vm0, %v4126_v42  ;;  %v5794_v42 = vor.u32 %v5793_v22, %v5790_v20  ;;  %v8859_v3 = vld [vmem:[%s11659_s2 + $0x94] sm:$0x1]  ;;  %v8807_v6 = vld [vmem:[%s11659_s2 + $0x80] sm:$0xf] }
 0x43f   : >> { %4144 = vst.msk [vmem:[#allocation5 + $0x70] sm:$0xf] %vm4139_vm0, %v4124_v52  ;;  %5392 = vrot.lane.b32.xlu1 %v5373_v35, %s9817_s29  ;;  %v6077_v35 = vsel %vm10447_vm13, %v12264_v30, %v12230_v9  ;;  %v5797_v9 = vshll.u32 %v8944_v32, 16  ;;  %v5259_v30 = vshrl.u32 %v8856_v33, 16  ;;  %v5094_v52 = vsel %vm10482_vm1, %v8831_v60, %v5093_v14  ;;  %v8809_v15 = vld [vmem:[%s11659_s2 + $0x88] sm:$0xf] }
 0x440   : >> { %5390 = vrot.lane.b32.xlu0 %v5369_v23, %s9817_s29  ;;  %v4427_v23 = vsel %vm10447_vm13, %v4422_v7, %v4426_v44  ;;  %v9006_v44 = vld [vmem:[%s11659_s2 + $0xa8] sm:$0xe]  ;;  %v5795_v60 = vrot.slane %v5794_v42, 4  ;;  %v12372_v7 = vld [vmem:[%s11659_s2 + $0x70] sm:$0xe]  ;;  %v5282_v14 = vshll.u32 %v8859_v3, 16  ;;  %v5279_v29 = vor.u32 %v5278_v5, %v5275_v59 }
 0x441   : >> { %v4519_v8 = vpop.permute.xlu1 %4518  ;;  %v6591_v10 = vld [vmem:[#allocation5 + $0x54] sm:$0xff]  ;;  %4443 = vst.msk [vmem:[#allocation5 + $0xc8] sm:$0xf] %vm511_vm6, %v4427_v23  ;;  %v5799_v61 = vrot.slane %v5797_v9, 5  ;;  %v5261_v63 = vrot.slane %v5259_v30, 4  ;;  %v9022_v12 = vrot.slane %v9006_v44, 9 }
 0x442   : >> { %v4517_v37 = vpop.permute.xlu0 %4516  ;;  %4537 = vst.msk [vmem:[#allocation5 + $0x90] sm:$0xf] %vm4139_vm0, %v4519_v8  ;;  %v6587_v2 = vld [vmem:[#allocation5 + $0x38] sm:$0xff]  ;;  %v9644_v16 = vld [vmem:[%s13525_s3 + $0x150] sm:$0xff]   ;;  %v4984_v22 = vshrl.u32 %v8807_v6, 16  ;;  %v4987_v23 = vshll.u32 %v8807_v6, 16 }
 0x443   : >> { %v9607_v13 = vld [vmem:[#allocation5 + $0x3c] ss:$28 sps:$4 sm:$0xff]   ;;  %4536 = vst.msk [vmem:[#allocation5 + $0x74] sm:$0xf] %vm4139_vm0, %v4517_v37  ;;  %5727 = vrot.lane.b32.xlu1 %v8934_v25, %s9817_s29  ;;  %v9087_v18 = vcombine.low %v6587_v2, %v6591_v10  ;;  %v5780_v25 = vor.u32 %v5779_v38, %v5776_v36  ;;  %v9023_v2 = vrot.slane %v9008_v57, 9  ;;  %v5800_v27 = vsel %vm10447_vm13, %v5795_v60, %v5799_v61  ;;  %v9650_v6 = vld [vmem:[%s13525_s3 + $0x140] sm:$0xff]  }
 0x444   : >> { %5725 = vrot.lane.b32.xlu0 %v8933_v55, %s9817_s29  ;;  %7243 = vmatprep.mubr.bf16.mxu0 %v9607_v13  ;;  %v9007_v55 = vld [vmem:[%s11659_s2 + $0xac] sm:$0x1]  ;;  %v9642_v8 = vld [vmem:[%s13525_s3 + $0x158] sm:$0xff]   ;;  %v6246_v13 = vrot.slane %v9009_v58, 5  ;;  %v12385_v20 = vld [vmem:[%s11659_s2 + $0x74] sm:$0x1] }
 0x445   : >> { %v4854_v34 = vpop.permute.xlu1 %4853  ;;  %7244 = vmatmul.mubr.bf16.gmra.mxu0 %v9087_v18  ;;  %v5781_v11 = vrot.slane %v5780_v25, 4  ;;  %v6242_v51 = vrot.slane %v9007_v55, 5  ;;  %9306 = vmatprep.subr.bf16.mxu0 %v9642_v8  ;;  %v5265_v18 = vor.u32 %v5264_v0, %v5261_v63  ;;  %v8927_v31 = vrot.slane %v12372_v7, 9  ;;  %v12397_v32 = vld [vmem:[%s11659_s2 + $0x78] sm:$0xe] }
 0x446   : >> { %v4852_v41 = vpop.permute.xlu0 %4851  ;;  %4876 = vst.msk [vmem:[#allocation5 + $0x24] sm:$0xf] %vm4139_vm0, %v4854_v34  ;;  %9307 = vmatpush3.bf16.msra.mxu0 %v9643_v56  ;;  %v8808_v36 = vld [vmem:[%s11659_s2 + $0x84] sm:$0x1]  ;;  %v4998_v38 = vshrl.u32 %v8809_v15, 16  ;;  %v12414_v42 = vrot.slane %v5282_v14, 5 }
 0x447   : >> { %4875 = vst.msk [vmem:[#allocation5 + $0x8] sm:$0xf] %vm4139_vm0, %v4852_v41  ;;  %6178 = vrot.lane.b32.xlu1 %v6091_v28, %s9817_s29  ;;  %v12393_v28 = vrot.slane %v5268_v4, 5  ;;  %9308 = vmatprep.subr.bf16.mxu0 %v9644_v16  ;;  %v5786_v34 = vsel %vm10447_vm13, %v5781_v11, %v12353_v53  ;;  %v6243_v40 = vsel %vm10482_vm1, %v9022_v12, %v6242_v51  ;;  %v5651_v9 = vrot.slane %v12385_v20, 5  ;;  %v8810_v30 = vld [vmem:[%s11659_s2 + $0x8c] sm:$0x1] }
 0x448   : >> { %6176 = vrot.lane.b32.xlu0 %v6077_v35, %s9817_s29  ;;  %v12403_v35 = vld [vmem:[%s11659_s2 + $0x7c] sm:$0x1]  ;;  %v6247_v41 = vsel %vm10482_vm1, %v9023_v2, %v6246_v13  ;;  %v8994_v43 = vld [vmem:[%s11659_s2 + $0xb8] sm:$0xf]  ;;  %v12421_v45 = vrot.slane %v5265_v18, 4  ;;  %v4989_v48 = vrot.slane %v4987_v23, 5 }
 0x449   : >> { %v5289_v50 = vpop.permute.xlu1 %5288  ;;  %v5001_v49 = vshll.u32 %v8809_v15, 16  ;;  %v8928_v25 = vrot.slane %v12397_v32, 9  ;;  %v5655_v53 = vrot.slane %v12403_v35, 5  ;;  %v4993_v44 = vshll.u32 %v8808_v36, 16  ;;  %v12436_v60 = vld [vmem:[%s11659_s2 + $0x88] sm:$0xe] }
 0x44a   : >> { %v5287_v1 = vpop.permute.xlu0 %5286  ;;  %5311 = vst.msk [vmem:[#allocation5 + $0x28] sm:$0xf] %vm4139_vm0, %v5289_v50  ;;  %9309 = vmatpush3.bf16.msra.mxu0 %v9645_v26  ;;  %v9649_v50 = vld [vmem:[%s13525_s3 + $0x108] sm:$0xff]   ;;  %v6093_v55 = vshrl.u32 %v8994_v43, 16  ;;  %v6096_v57 = vshll.u32 %v8994_v43, 16  ;;  %v5271_v8 = vsel %vm10447_vm13, %v12421_v45, %v12393_v28  ;;  %v9651_v56 = vld [vmem:[%s13525_s3 + $0x100] sm:$0xff]  }
 0x44b   : >> { %5310 = vst.msk [vmem:[#allocation5 + $0xc] sm:$0xf] %vm4139_vm0, %v5287_v1  ;;  %5117 = vrot.lane.b32.xlu1 %v5098_v46, %s9819_s1  ;;  %v4986_v46 = vrot.slane %v4984_v22, 4  ;;  %9310 = vmatprep.subr.bf16.mxu0 %v9648_v19  ;;  %v12431_v1 = vrot.slane %v4998_v38, 4  ;;  %v12439_v61 = vld [vmem:[%s11659_s2 + $0x8c] sm:$0x1] }
 0x44c   : >> { %5115 = vrot.lane.b32.xlu0 %v5094_v52, %s9819_s1  ;;  %v12427_v52 = vrot.slane %v5279_v29, 4  ;;  %v8996_v63 = vld [vmem:[%s11659_s2 + $0xc0] sm:$0xf]  ;;  %v5003_v4 = vrot.slane %v5001_v49, 5  ;;  %v12446_v59 = vld [vmem:[%s11659_s2 + $0x90] sm:$0xe] }
 0x44d   : >> { %v4226_v10 = vpop.permute.xlu1 %4225  ;;  %v8793_v0 = vld [vmem:[%s11659_s2 + $0x80] sm:$0xf]  ;;  %v4990_v3 = vor.u32 %v4989_v48, %v4986_v46  ;;  %v12449_v5 = vld [vmem:[%s11659_s2 + $0xbc] sm:$0x1]  ;;  %v12463_v11 = vrot.slane %v4993_v44, 5  ;;  %v6095_v2 = vrot.slane %v6093_v55, 4  ;;  %v5652_v55 = vsel %vm10482_vm1, %v8927_v31, %v5651_v9 }
 0x44e   : >> { %v4224_v37 = vpop.permute.xlu0 %4223  ;;  %4245 = vst.msk [vmem:[#allocation5 + $0x8c] sm:$0xf] %vm4239_vm4, %v4226_v10  ;;  %9311 = vmatpush3.bf16.msra.mxu0 %v9649_v50  ;;  %v5285_v10 = vsel %vm10447_vm13, %v12427_v52, %v12414_v42  ;;  %v8997_v12 = vld [vmem:[%s11659_s2 + $0xc4] sm:$0x1]  ;;  %v8771_v51 = vld [vmem:[%s11659_s2 + $0x30] sm:$0xe] }
 0x44f   : >> { %4244 = vst.msk [vmem:[#allocation5 + $0x70] sm:$0xf] %vm4239_vm4, %v4224_v37  ;;  %5443 = vrot.lane.b32.xlu1 %v8890_v47, %s9819_s1  ;;  %v5007_v47 = vshll.u32 %v8810_v30, 16  ;;  %v6098_v13 = vrot.slane %v6096_v57, 5  ;;  %v6107_v14 = vshrl.u32 %v8996_v63, 16  ;;  %v6110_v15 = vshll.u32 %v8996_v63, 16  ;;  %9312 = vmatprep.subr.bf16.mxu0 %v9650_v6 }
 0x450   : >> { %5441 = vrot.lane.b32.xlu0 %v8889_v62, %s9819_s1  ;;  %v8794_v62 = vld [vmem:[%s11659_s2 + $0x88] sm:$0xf]  ;;  %v8772_v16 = vld [vmem:[%s11659_s2 + $0x34] sm:$0x1]  ;;  %v8882_v23 = vrot.slane %v12436_v60, 9  ;;  %v5376_v26 = vrot.slane %v12439_v61, 5  ;;  %v5656_v57 = vsel %vm10482_vm1, %v8928_v25, %v5655_v53 }
 0x451   : >> { %v4570_v33 = vpop.permute.xlu1 %4569  ;;  %v12472_v22 = vrot.slane %v5007_v47, 5  ;;  %v8773_v28 = vld [vmem:[%s11659_s2 + $0x38] sm:$0xe]  ;;  %v12479_v29 = vrot.slane %v4990_v3, 4  ;;  %v8774_v36 = vld [vmem:[%s11659_s2 + $0x3c] sm:$0x1]  ;;  %v6099_v43 = vor.u32 %v6098_v13, %v6095_v2 }
 0x452   : >> { %v4568_v39 = vpop.permute.xlu0 %4567  ;;  %4588 = vst.msk [vmem:[#allocation5 + $0x90] sm:$0xf] %vm4239_vm4, %v4570_v33  ;;  %v5004_v33 = vor.u32 %v5003_v4, %v12431_v1  ;;  %v8784_v38 = vrot.slane %v8773_v28, 9  ;;  %9313 = vmatpush3.bf16.msra.mxu0 %v9651_v56  ;;  %v12485_v19 = vld [vmem:[%s11659_s2 + $0x94] sm:$0x1]  ;;  %v4805_v42 = vrot.slane %v8774_v36, 5 }
 0x453   : >> { %4587 = vst.msk [vmem:[#allocation5 + $0x74] sm:$0xf] %vm4239_vm4, %v4568_v39  ;;  %5887 = vrot.lane.b32.xlu1 %v5800_v27, %s9819_s1  ;;  %v8783_v27 = vrot.slane %v8771_v51, 9  ;;  %v8883_v39 = vrot.slane %v12446_v59, 9  ;;  %v6109_v45 = vrot.slane %v6107_v14, 4  ;;  %v6112_v46 = vrot.slane %v6110_v15, 5 }
 0x454   : >> { %5885 = vrot.lane.b32.xlu0 %v5786_v34, %s9819_s1  ;;  %v4801_v34 = vrot.slane %v8772_v16, 5  ;;  %v12490_v48 = vld [vmem:[%s11659_s2 + $0x80] sm:$0xe]  ;;  %v12493_v49 = vld [vmem:[%s11659_s2 + $0x84] sm:$0x1]  ;;  %v4806_v1 = vsel %vm10482_vm1, %v8784_v38, %v4805_v42  ;;  %v12537_v25 = vrot.slane %v6099_v43, 4 }
 0x455   : >> { %v5014_v54 = vpop.permute.xlu1 %5013  ;;  %v12499_v44 = vld [vmem:[%s11659_s2 + $0x88] sm:$0xe]  ;;  %v8840_v47 = vld [vmem:[%s11659_s2 + $0x78] sm:$0xf]  ;;  %v8945_v63 = vld [vmem:[%s11659_s2 + $0xb0] sm:$0xf]  ;;  %v6113_v53 = vor.u32 %v6112_v46, %v6109_v45 }
 0x456   : >> { %v5012_v58 = vpop.permute.xlu0 %5011  ;;  %5036 = vst.msk [vmem:[#allocation5 + $0x24] sm:$0xf] %vm4239_vm4, %v5014_v54  ;;  %v4802_v50 = vsel %vm10482_vm1, %v8783_v27, %v4801_v34  ;;  %v12502_v54 = vld [vmem:[%s11659_s2 + $0x8c] sm:$0x1]  ;;  %v8841_v7 = vld [vmem:[%s11659_s2 + $0x80] sm:$0xf] }
 0x457   : >> { %5035 = vst.msk [vmem:[#allocation5 + $0x8] sm:$0xf] %vm4239_vm4, %v5012_v58  ;;  %6274 = vrot.lane.b32.xlu1 %v6247_v41, %s9819_s1  ;;  %v6116_v41 = vshll.u32 %v8997_v12, 16  ;;  %v12522_v58 = vrot.slane %v5004_v33, 4  ;;  %v8833_v32 = vrot.slane %v12490_v48, 9  ;;  %v5101_v35 = vrot.slane %v12493_v49, 5 }
 0x458   : >> { %6272 = vrot.lane.b32.xlu0 %v6243_v40, %s9819_s1  ;;  %v6102_v40 = vshll.u32 %v12449_v5, 16  ;;  %4827 = vst.msk [vmem:[#allocation5 + $0x78] sm:$0xf] %vm511_vm6, %v4802_v50  ;;  %4828 = vst.msk [vmem:[#allocation5 + $0x94] sm:$0xf] %vm511_vm6, %v4806_v1  ;;  %v5105_v3 = vrot.slane %v12502_v54, 5 }
 0x459   : >> { %v5385_v37 = vpop.permute.xlu1 %5384  ;;  %5154 = vst.msk [vmem:[#allocation5 + $0x7c] sm:$0xf] %vm511_vm6, %v8840_v47  ;;  %v12532_v31 = vrot.slane %v6116_v41, 5  ;;  %5155 = vst.msk [vmem:[#allocation5 + $0x98] sm:$0xf] %vm511_vm6, %v8841_v7  ;;  %v5010_v2 = vsel %vm10447_vm13, %v12522_v58, %v12472_v22  ;;  %v12562_v36 = vrot.slane %v6113_v53, 4 }
 0x45a   : >> { %v5383_v18 = vpop.permute.xlu0 %5382  ;;  %5407 = vst.msk [vmem:[#allocation5 + $0x28] sm:$0xf] %vm4239_vm4, %v5385_v37  ;;  %v12530_v20 = vrot.slane %v6102_v40, 5  ;;  %v8946_v4 = vld [vmem:[%s11659_s2 + $0xb4] sm:$0x1]  ;;  %v4996_v37 = vsel %vm10447_vm13, %v12479_v29, %v12463_v11 }
 0x45b   : >> { %5406 = vst.msk [vmem:[#allocation5 + $0xc] sm:$0xf] %vm4239_vm4, %v5383_v18  ;;  %4865 = vrot.lane.b32.xlu1 %v8794_v62, %s9818_s0  ;;  %v5380_v62 = vrot.slane %v12485_v19, 5  ;;  %v8985_v6 = vld [vmem:[%s11659_s2 + $0xc0] sm:$0xf]  ;;  %v5811_v38 = vshll.u32 %v8946_v4, 16 }
 0x45c   : >> { %4863 = vrot.lane.b32.xlu0 %v8793_v0, %s9818_s0  ;;  %v8834_v0 = vrot.slane %v12499_v44, 9  ;;  %v8947_v12 = vld [vmem:[%s11659_s2 + $0xb8] sm:$0xf]  ;;  %v8893_v51 = vld [vmem:[%s11659_s2 + $0x60] sm:$0xf] }
 0x45d   : >> { %v4278_v30 = vpop.permute.xlu1 %4277  ;;  %v8984_v56 = vld [vmem:[%s11659_s2 + $0xb8] sm:$0xf]  ;;  %v8948_v13 = vld [vmem:[%s11659_s2 + $0xbc] sm:$0x1]  ;;  %v8894_v14 = vld [vmem:[%s11659_s2 + $0x64] sm:$0x1]  ;;  %v5381_v60 = vsel %vm10482_vm1, %v8883_v39, %v5380_v62 }
 0x45e   : >> { %v4276_v52 = vpop.permute.xlu0 %4275  ;;  %4297 = vst.msk [vmem:[#allocation5 + $0x8c] sm:$0xf] %vm4291_vm8, %v4278_v30  ;;  %v8895_v15 = vld [vmem:[%s11659_s2 + $0x68] sm:$0xf]  ;;  %v5482_v16 = vshrl.u32 %v8893_v51, 16  ;;  %v5485_v18 = vshll.u32 %v8893_v51, 16 }
 0x45f   : >> { %4296 = vst.msk [vmem:[#allocation5 + $0x70] sm:$0xf] %vm4291_vm8, %v4276_v52  ;;  %5300 = vrot.lane.b32.xlu1 %v5285_v10, %s9818_s0  ;;  %v5805_v10 = vshll.u32 %v8945_v63, 16  ;;  %v5491_v27 = vshll.u32 %v8894_v14, 16  ;;  %v8896_v28 = vld [vmem:[%s11659_s2 + $0x6c] sm:$0x1] }
 0x460   : >> { %5298 = vrot.lane.b32.xlu0 %v5271_v8, %s9818_s0  ;;  %v5802_v8 = vshrl.u32 %v8945_v63, 16  ;;  %v5496_v33 = vshrl.u32 %v8895_v15, 16  ;;  %v5816_v11 = vshrl.u32 %v8947_v12, 16  ;;  %v12565_v29 = vld [vmem:[%s11659_s2 + $0xb8] sm:$0xe]  ;;  %v5499_v40 = vshll.u32 %v8895_v15, 16 }
 0x461   : >> { %v4730_v9 = vpop.permute.xlu1 %4729  ;;  %v5819_v22 = vshll.u32 %v8947_v12, 16  ;;  %v5484_v42 = vrot.slane %v5482_v16, 4  ;;  %v5487_v30 = vrot.slane %v5485_v18, 5  ;;  %v12572_v46 = vrot.slane %v5805_v10, 5  ;;  %v12581_v53 = vld [vmem:[%s11659_s2 + $0xbc] sm:$0x1] }
 0x462   : >> { %v4728_v5 = vpop.permute.xlu0 %4727  ;;  %4748 = vst.msk [vmem:[#allocation5 + $0x90] sm:$0xf] %vm4291_vm8, %v4730_v9  ;;  %v5498_v43 = vrot.slane %v5496_v33, 4  ;;  %v12570_v45 = vrot.slane %v5802_v8, 4  ;;  %v5501_v50 = vrot.slane %v5499_v40, 5  ;;  %v5505_v52 = vshll.u32 %v8896_v28, 16 }
 0x463   : >> { %4747 = vst.msk [vmem:[#allocation5 + $0x74] sm:$0xf] %vm4291_vm8, %v4728_v5  ;;  %5679 = vrot.lane.b32.xlu1 %v5656_v57, %s9818_s0  ;;  %v5825_v1 = vshll.u32 %v8948_v13, 16  ;;  %v9024_v47 = vrot.slane %v12565_v29, 9  ;;  %v5493_v57 = vrot.slane %v5491_v27, 5  ;;  %v12576_v7 = vrot.slane %v5811_v38, 5 }
 0x464   : >> { %5677 = vrot.lane.b32.xlu0 %v5652_v55, %s9818_s0  ;;  %v5488_v55 = vor.u32 %v5487_v30, %v5484_v42  ;;  %v12578_v9 = vrot.slane %v5816_v11, 4  ;;  %v5502_v4 = vor.u32 %v5501_v50, %v5498_v43  ;;  %v5507_v5 = vrot.slane %v5505_v52, 5  ;;  %v12595_v16 = vld [vmem:[%s11659_s2 + $0xc0] sm:$0xe]  ;;  %v8959_v27 = vld [vmem:[%s11659_s2 + $0xa8] sm:$0xe] }
 0x465   : >> { %v5110_v34 = vpop.permute.xlu1 %5109  ;;  %v5377_v13 = vsel %vm10482_vm1, %v8882_v23, %v5376_v26  ;;  %v5821_v15 = vrot.slane %v5819_v22, 5  ;;  %v12605_v61 = vrot.slane %v5825_v1, 5  ;;  %v12608_v23 = vld [vmem:[%s11659_s2 + $0xc4] sm:$0x1]  ;;  %v5808_v59 = vor.u32 %v12572_v46, %v12570_v45  ;;  %v8998_v19 = vld [vmem:[%s11659_s2 + $0xc8] sm:$0xf] }
 0x466   : >> { %v5108_v41 = vpop.permute.xlu0 %5107  ;;  %5132 = vst.msk [vmem:[#allocation5 + $0x24] sm:$0xf] %vm4291_vm8, %v5110_v34  ;;  %v5489_v51 = vrot.slane %v5488_v55, 4  ;;  %v5503_v18 = vrot.slane %v5502_v4, 4  ;;  %v8999_v39 = vld [vmem:[%s11659_s2 + $0xcc] sm:$0x1] }
 0x467   : >> { %5131 = vst.msk [vmem:[#allocation5 + $0x8] sm:$0xf] %vm4291_vm8, %v5108_v41  ;;  %6022 = vrot.lane.b32.xlu1 %v8985_v6, %s9818_s0  ;;  %v8957_v6 = vld [vmem:[%s11659_s2 + $0xa0] sm:$0xe]  ;;  %v8974_v34 = vrot.slane %v8959_v27, 9  ;;  %v6250_v40 = vrot.slane %v12581_v53, 5  ;;  %v5822_v43 = vor.u32 %v5821_v15, %v12578_v9 }
 0x468   : >> { %6020 = vrot.lane.b32.xlu0 %v8984_v56, %s9818_s0  ;;  %v8958_v56 = vld [vmem:[%s11659_s2 + $0xa4] sm:$0x1]  ;;  %v5494_v26 = vsel %vm10447_vm13, %v5489_v51, %v5493_v57  ;;  %v5508_v62 = vsel %vm10447_vm13, %v5503_v18, %v5507_v5  ;;  %v8936_v11 = vld [vmem:[%s11659_s2 + $0xb8] sm:$0xf]  ;;  %v12624_v41 = vld [vmem:[%s11659_s2 + $0x80] sm:$0xe] }
 0x469   : >> { %v5436_v58 = vpop.permute.xlu1 %5435  ;;  %v6599_v63 = vld [vmem:[#allocation5 + $0x8c] sm:$0xff]  ;;  %5601 = vst.msk [vmem:[#allocation5 + $0x10] sm:$0xf] %vm511_vm6, %v5494_v26  ;;  %v5951_v33 = vrot.slane %v8958_v56, 5  ;;  %5602 = vst.msk [vmem:[#allocation5 + $0x2c] sm:$0xf] %vm511_vm6, %v5508_v62 }
 0x46a   : >> { %v5434_v8 = vpop.permute.xlu0 %5433  ;;  %5458 = vst.msk [vmem:[#allocation5 + $0x28] sm:$0xf] %vm4291_vm8, %v5436_v58  ;;  %v6595_v10 = vld [vmem:[#allocation5 + $0x70] sm:$0xff]  ;;  %v9025_v45 = vrot.slane %v12595_v16, 9  ;;  %v6254_v46 = vrot.slane %v12608_v23, 5  ;;  %v6121_v57 = vshrl.u32 %v8998_v19, 16 }
 0x46b   : >> { %v9621_v12 = vld [vmem:[#allocation5 + $0x74] ss:$28 sps:$4 sm:$0xff]   ;;  %5457 = vst.msk [vmem:[#allocation5 + $0xc] sm:$0xf] %vm4291_vm8, %v5434_v8  ;;  %5025 = vrot.lane.b32.xlu1 %v5010_v2, %s9817_s29  ;;  %v9094_v14 = vcombine.low %v6595_v10, %v6599_v63  ;;  %v8973_v2 = vrot.slane %v8957_v6, 9  ;;  %v6124_v58 = vshll.u32 %v8998_v19, 16 }
 0x46c   : >> { %5023 = vrot.lane.b32.xlu0 %v4996_v37, %s9817_s29  ;;  %7251 = vmatprep.mubr.bf16.mxu0 %v9621_v12  ;;  %v8960_v37 = vld [vmem:[%s11659_s2 + $0xac] sm:$0x1]  ;;  %v9000_v22 = vld [vmem:[%s11659_s2 + $0xd0] sm:$0xf]  ;;  %v12635_v50 = vld [vmem:[%s11659_s2 + $0x84] sm:$0x1] }
 0x46d   : >> { %v4130_v28 = vpop.permute.xlu1 %4129  ;;  %7252 = vmatmul.mubr.bf16.gmra.mxu0 %v9094_v14  ;;  %v5955_v42 = vrot.slane %v8960_v37, 5  ;;  %v8935_v30 = vld [vmem:[%s11659_s2 + $0xb0] sm:$0xf]  ;;  %v12638_v52 = vld [vmem:[%s11659_s2 + $0x88] sm:$0xe]  ;;  %v5952_v1 = vsel %vm10482_vm1, %v8973_v2, %v5951_v33  ;;  %v6130_v63 = vshll.u32 %v8999_v39, 16 }
 0x46e   : >> { %v4128_v38 = vpop.permute.xlu0 %4127  ;;  %4147 = vst.msk [vmem:[#allocation5 + $0xc4] sm:$0xf] %vm4139_vm0, %v4130_v28  ;;  %v12644_v55 = vld [vmem:[%s11659_s2 + $0x8c] sm:$0x1]  ;;  %v12649_v5 = vrot.slane %v5808_v59, 4  ;;  %v8929_v6 = vrot.slane %v12624_v41, 9  ;;  %v6105_v59 = vsel %vm10447_vm13, %v12537_v25, %v12530_v20  ;;  %v5106_v20 = vsel %vm10482_vm1, %v8834_v0, %v5105_v3 }
 0x46f   : >> { %4146 = vst.msk [vmem:[#allocation5 + $0xa8] sm:$0xf] %vm4139_vm0, %v4128_v38  ;;  %5396 = vrot.lane.b32.xlu1 %v5381_v60, %s9817_s29  ;;  %v5956_v9 = vsel %vm10482_vm1, %v8974_v34, %v5955_v42  ;;  %v9001_v8 = vld [vmem:[%s11659_s2 + $0xd4] sm:$0x1]  ;;  %v6135_v10 = vshrl.u32 %v9000_v22, 16  ;;  %v6138_v14 = vshll.u32 %v9000_v22, 16  ;;  %v5102_v22 = vsel %vm10482_vm1, %v8833_v32, %v5101_v35 }
 0x470   : >> { %5394 = vrot.lane.b32.xlu0 %v5377_v13, %s9817_s29  ;;  %5989 = vst.msk [vmem:[#allocation5 + $0x14] sm:$0xf] %vm511_vm6, %v5952_v1  ;;  %5990 = vst.msk [vmem:[#allocation5 + $0x30] sm:$0xf] %vm511_vm6, %v5956_v9  ;;  %v9627_v51 = vld [vmem:[#allocation5 + $0x8] ss:$28 sps:$4 sm:$0xff]   ;;  %v6119_v13 = vsel %vm10447_vm13, %v12562_v36, %v12532_v31 }
 0x471   : >> { %v4523_v4 = vpop.permute.xlu1 %4522  ;;  %v12661_v15 = vrot.slane %v5822_v43, 4  ;;  %v5659_v18 = vrot.slane %v12635_v50, 5  ;;  %v8930_v27 = vrot.slane %v12638_v52, 9  ;;  %v5663_v60 = vrot.slane %v12644_v55, 5  ;;  %v9039_v37 = vld [vmem:[%s11659_s2 + $0xb0] sm:$0xf] }
 0x472   : >> { %v4521_v12 = vpop.permute.xlu0 %4520  ;;  %4539 = vst.msk [vmem:[#allocation5 + $0xc8] sm:$0xf] %vm4139_vm0, %v4523_v4  ;;  %v9629_v56 = vld [vmem:[#allocation5 + $0xc] ss:$28 sps:$4 sm:$0xff]   ;;  %v6123_v26 = vrot.slane %v6121_v57, 4  ;;  %v6126_v2 = vrot.slane %v6124_v58, 5 }
 0x473   : >> { %4538 = vst.msk [vmem:[#allocation5 + $0xac] sm:$0xf] %vm4139_vm0, %v4521_v12  ;;  %5731 = vrot.lane.b32.xlu1 %v8936_v11, %s9817_s29  ;;  %7300 = vmatprep.mubr.bf16.mxu1 %v9629_v56  ;;  %v12667_v31 = vrot.slane %v6130_v63, 5  ;;  %v6144_v36 = vshll.u32 %v9001_v8, 16  ;;  %v9040_v19 = vld [vmem:[%s11659_s2 + $0xb4] sm:$0x1]  ;;  %v5660_v53 = vsel %vm10482_vm1, %v8929_v6, %v5659_v18  ;;  %v5664_v41 = vsel %vm10482_vm1, %v8930_v27, %v5663_v60 }
 0x474   : >> { %5729 = vrot.lane.b32.xlu0 %v8935_v30, %s9817_s29  ;;  %7301 = vmatmul.mubr.bf16.vlgmr.msra.gmra.mxu1 %v9627_v51  ;;  %v6137_v62 = vrot.slane %v6135_v10, 4  ;;  %v6140_v33 = vrot.slane %v6138_v14, 5  ;;  %v6340_v34 = vshrl.u32 %v9039_v37, 16  ;;  %v6343_v38 = vshll.u32 %v9039_v37, 16  ;;  %v9041_v11 = vld [vmem:[%s11659_s2 + $0xb8] sm:$0xf] }
 0x475   : >> { %v4858_v28 = vpop.permute.xlu1 %4857  ;;  %v6127_v42 = vor.u32 %v6126_v2, %v6123_v26  ;;  %v12692_v30 = vrot.slane %v6144_v36, 5  ;;  %v6349_v43 = vshll.u32 %v9040_v19, 16  ;;  %v8949_v54 = vld [vmem:[%s11659_s2 + $0xc0] sm:$0xf]  ;;  %v8951_v1 = vld [vmem:[%s11659_s2 + $0xc8] sm:$0xf] }
 0x476   : >> { %v4856_v39 = vpop.permute.xlu0 %4855  ;;  %4878 = vst.msk [vmem:[#allocation5 + $0x5c] sm:$0xf] %vm4139_vm0, %v4858_v28  ;;  %v6354_v57 = vshrl.u32 %v9041_v11, 16  ;;  %v6357_v0 = vshll.u32 %v9041_v11, 16  ;;  %v9043_v3 = vld [vmem:[%s11659_s2 + $0xc0] sm:$0xf]  ;;  %v6141_v49 = vor.u32 %v6140_v33, %v6137_v62  ;;  %v5828_v28 = vsel %vm10447_vm13, %v12661_v15, %v12605_v61 }
 0x477   : >> { %4877 = vst.msk [vmem:[#allocation5 + $0x40] sm:$0xf] %vm4139_vm0, %v4856_v39  ;;  %6182 = vrot.lane.b32.xlu1 %v6119_v13, %s9817_s29  ;;  %v8891_v48 = vld [vmem:[%s11659_s2 + $0x90] sm:$0xf]  ;;  %v8892_v32 = vld [vmem:[%s11659_s2 + $0x98] sm:$0xf]  ;;  %v5814_v11 = vsel %vm10447_vm13, %v12649_v5, %v12576_v7 }
 0x478   : >> { %6180 = vrot.lane.b32.xlu0 %v6105_v59, %s9817_s29  ;;  %v5830_v35 = vshrl.u32 %v8949_v54, 16  ;;  %v5833_v58 = vshll.u32 %v8949_v54, 16  ;;  %v5844_v63 = vshrl.u32 %v8951_v1, 16  ;;  %v5847_v9 = vshll.u32 %v8951_v1, 16  ;;  %v9042_v56 = vld [vmem:[%s11659_s2 + $0xbc] sm:$0x1] }
 0x479   : >> { %v5293_v25 = vpop.permute.xlu1 %5292  ;;  %v12703_v8 = vrot.slane %v6127_v42, 4  ;;  %v6342_v10 = vrot.slane %v6340_v34, 4  ;;  %v6345_v12 = vrot.slane %v6343_v38, 5  ;;  %v12705_v51 = vrot.slane %v6349_v43, 5  ;;  %v9045_v37 = vld [vmem:[%s11659_s2 + $0xc8] sm:$0xf] }
 0x47a   : >> { %v5291_v44 = vpop.permute.xlu0 %5290  ;;  %5313 = vst.msk [vmem:[#allocation5 + $0x60] sm:$0xf] %vm4139_vm0, %v5293_v25  ;;  %v6356_v14 = vrot.slane %v6354_v57, 4  ;;  %v6359_v26 = vrot.slane %v6357_v0, 5  ;;  %v6368_v2 = vshrl.u32 %v9043_v3, 16  ;;  %v6371_v36 = vshll.u32 %v9043_v3, 16 }
 0x47b   : >> { %5312 = vst.msk [vmem:[#allocation5 + $0x44] sm:$0xf] %vm4139_vm0, %v5291_v44  ;;  %5121 = vrot.lane.b32.xlu1 %v5106_v20, %s9819_s1  ;;  %v8950_v59 = vld [vmem:[%s11659_s2 + $0xc4] sm:$0x1]  ;;  %v8952_v19 = vld [vmem:[%s11659_s2 + $0xcc] sm:$0x1]  ;;  %v6346_v54 = vor.u32 %v6345_v12, %v6342_v10  ;;  %v6251_v0 = vsel %vm10482_vm1, %v9024_v47, %v6250_v40  ;;  %v6255_v3 = vsel %vm10482_vm1, %v9025_v45, %v6254_v46 }
 0x47c   : >> { %5119 = vrot.lane.b32.xlu0 %v5102_v22, %s9819_s1  ;;  %v5832_v39 = vrot.slane %v5830_v35, 4  ;;  %v5835_v62 = vrot.slane %v5833_v58, 5  ;;  %v5846_v33 = vrot.slane %v5844_v63, 4  ;;  %v5849_v34 = vrot.slane %v5847_v9, 5  ;;  %v12729_v44 = vld [vmem:[%s11659_s2 + $0xc8] sm:$0xe] }
 0x47d   : >> { %v4230_v4 = vpop.permute.xlu1 %4229  ;;  %v6382_v20 = vshrl.u32 %v9045_v37, 16  ;;  %v6385_v25 = vshll.u32 %v9045_v37, 16  ;;  %v12724_v61 = vrot.slane %v6141_v49, 4  ;;  %v6363_v15 = vshll.u32 %v9042_v56, 16  ;;  %v9044_v57 = vld [vmem:[%s11659_s2 + $0xc4] sm:$0x1] }
 0x47e   : >> { %v4228_v13 = vpop.permute.xlu0 %4227  ;;  %4247 = vst.msk [vmem:[#allocation5 + $0xc4] sm:$0xf] %vm4239_vm4, %v4230_v4  ;;  %v6370_v42 = vrot.slane %v6368_v2, 4  ;;  %v6373_v43 = vrot.slane %v6371_v36, 5  ;;  %v6360_v7 = vor.u32 %v6359_v26, %v6356_v14  ;;  %v5839_v5 = vshll.u32 %v8950_v59, 16 }
 0x47f   : >> { %4246 = vst.msk [vmem:[#allocation5 + $0xa8] sm:$0xf] %vm4239_vm4, %v4228_v13  ;;  %5447 = vrot.lane.b32.xlu1 %v8892_v32, %s9819_s1  ;;  %v5853_v1 = vshll.u32 %v8952_v19, 16  ;;  %v9046_v29 = vld [vmem:[%s11659_s2 + $0xcc] sm:$0x1]  ;;  %v5836_v32 = vor.u32 %v5835_v62, %v5832_v39  ;;  %v5850_v47 = vor.u32 %v5849_v34, %v5846_v33  ;;  %v6384_v23 = vrot.slane %v6382_v20, 4 }
 0x480   : >> { %5445 = vrot.lane.b32.xlu0 %v8891_v48, %s9819_s1  ;;  %v12752_v48 = vld [vmem:[%s11659_s2 + $0xcc] sm:$0x1]  ;;  %v12756_v40 = vld [vmem:[%s11659_s2 + $0xd0] sm:$0xe]  ;;  %v6387_v16 = vrot.slane %v6385_v25, 5  ;;  %v12765_v45 = vrot.slane %v6363_v15, 5  ;;  %v6374_v50 = vor.u32 %v6373_v43, %v6370_v42 }
 0x481   : >> { %v4574_v38 = vpop.permute.xlu1 %4573  ;;  %v12768_v46 = vld [vmem:[%s11659_s2 + $0xd4] sm:$0x1]  ;;  %v6377_v6 = vshll.u32 %v9044_v57, 16  ;;  %v12772_v18 = vrot.slane %v6346_v54, 4  ;;  %v12774_v58 = vrot.slane %v6360_v7, 4  ;;  %v12776_v52 = vrot.slane %v5839_v5, 5 }
 0x482   : >> { %v4572_v22 = vpop.permute.xlu0 %4571  ;;  %4590 = vst.msk [vmem:[#allocation5 + $0xc8] sm:$0xf] %vm4239_vm4, %v4574_v38  ;;  %v6391_v55 = vshll.u32 %v9046_v29, 16  ;;  %v12779_v27 = vrot.slane %v5853_v1, 5  ;;  %v9026_v60 = vrot.slane %v12729_v44, 9  ;;  %v6258_v63 = vrot.slane %v12752_v48, 5 }
 0x483   : >> { %4589 = vst.msk [vmem:[#allocation5 + $0xac] sm:$0xf] %vm4239_vm4, %v4572_v22  ;;  %5891 = vrot.lane.b32.xlu1 %v5828_v28, %s9819_s1  ;;  %v9027_v9 = vrot.slane %v12756_v40, 9  ;;  %v12785_v4 = vld [vmem:[%s11659_s2 + $0xb0] sm:$0xe]  ;;  %v12787_v12 = vrot.slane %v5836_v32, 4  ;;  %v6388_v14 = vor.u32 %v6387_v16, %v6384_v23 }
 0x484   : >> { %5889 = vrot.lane.b32.xlu0 %v5814_v11, %s9819_s1  ;;  %v12789_v56 = vrot.slane %v5850_v47, 4  ;;  %v6262_v13 = vrot.slane %v12768_v46, 5  ;;  %v8987_v2 = vld [vmem:[%s11659_s2 + $0xd0] sm:$0xf]  ;;  %v12794_v36 = vrot.slane %v6374_v50, 4  ;;  %v12796_v37 = vrot.slane %v6377_v6, 5 }
 0x485   : >> { %v5018_v49 = vpop.permute.xlu1 %5017  ;;  %v12799_v28 = vld [vmem:[%s11659_s2 + $0xb4] sm:$0x1]  ;;  %v8986_v59 = vld [vmem:[%s11659_s2 + $0xc8] sm:$0xf]  ;;  %v12804_v19 = vrot.slane %v6391_v55, 5  ;;  %v9071_v39 = vrot.slane %v12785_v4, 9  ;;  %v5842_v44 = vsel %vm10447_vm13, %v12787_v12, %v12776_v52 }
 0x486   : >> { %v5016_v35 = vpop.permute.xlu0 %5015  ;;  %5038 = vst.msk [vmem:[#allocation5 + $0x5c] sm:$0xf] %vm4239_vm4, %v5018_v49  ;;  %v12809_v62 = vld [vmem:[%s11659_s2 + $0xb8] sm:$0xe]  ;;  %v12812_v33 = vld [vmem:[%s11659_s2 + $0xbc] sm:$0x1] }
 0x487   : >> { %5037 = vst.msk [vmem:[#allocation5 + $0x40] sm:$0xf] %vm4239_vm4, %v5016_v35  ;;  %6278 = vrot.lane.b32.xlu1 %v6255_v3, %s9819_s1  ;;  %v12815_v34 = vld [vmem:[%s11659_s2 + $0xc0] sm:$0xe]  ;;  %v12818_v20 = vrot.slane %v6388_v14, 4  ;;  %v6517_v1 = vrot.slane %v12799_v28, 5 }
 0x488   : >> { %6276 = vrot.lane.b32.xlu0 %v6251_v0, %s9819_s1  ;;  %v8775_v38 = vld [vmem:[%s11659_s2 + $0x40] sm:$0xe]  ;;  %v12821_v25 = vld [vmem:[%s11659_s2 + $0xc4] sm:$0x1]  ;;  %v12824_v22 = vld [vmem:[%s11659_s2 + $0xc8] sm:$0xe] }
 0x489   : >> { %v5389_v10 = vpop.permute.xlu1 %5388  ;;  %v12827_v15 = vld [vmem:[%s11659_s2 + $0xcc] sm:$0x1]  ;;  %v12830_v42 = vld [vmem:[%s11659_s2 + $0x90] sm:$0xe]  ;;  %v8776_v43 = vld [vmem:[%s11659_s2 + $0x44] sm:$0x1] }
 0x48a   : >> { %v5387_v26 = vpop.permute.xlu0 %5386  ;;  %5409 = vst.msk [vmem:[#allocation5 + $0x60] sm:$0xf] %vm4239_vm4, %v5389_v10  ;;  %v8785_v54 = vrot.slane %v8775_v38, 9  ;;  %v8938_v5 = vld [vmem:[%s11659_s2 + $0xc8] sm:$0xf]  ;;  %v4809_v0 = vrot.slane %v8776_v43, 5 }
 0x48b   : >> { %5408 = vst.msk [vmem:[#allocation5 + $0x44] sm:$0xf] %vm4239_vm4, %v5387_v26  ;;  %5683 = vrot.lane.b32.xlu1 %v5664_v41, %s9818_s0  ;;  %v12837_v57 = vld [vmem:[%s11659_s2 + $0x94] sm:$0x1]  ;;  %v8777_v3 = vld [vmem:[%s11659_s2 + $0x48] sm:$0xe] }
 0x48c   : >> { %5681 = vrot.lane.b32.xlu0 %v5660_v53, %s9818_s0  ;;  %v8778_v53 = vld [vmem:[%s11659_s2 + $0x4c] sm:$0x1]  ;;  %v8786_v29 = vrot.slane %v8777_v3, 9  ;;  %v9002_v32 = vld [vmem:[%s11659_s2 + $0xd8] sm:$0xf]  ;;  %v4810_v47 = vsel %vm10482_vm1, %v8785_v54, %v4809_v0  ;;  %v9072_v35 = vrot.slane %v12809_v62, 9 }
 0x48d   : >> { %v4282_v11 = vpop.permute.xlu1 %4281  ;;  %v4813_v49 = vrot.slane %v8778_v53, 5  ;;  %v8937_v16 = vld [vmem:[%s11659_s2 + $0xc0] sm:$0xf]  ;;  %v6521_v41 = vrot.slane %v12812_v33, 5  ;;  %v9073_v50 = vrot.slane %v12815_v34, 9  ;;  %v6525_v10 = vrot.slane %v12821_v25, 5 }
 0x48e   : >> { %v4280_v7 = vpop.permute.xlu0 %4279  ;;  %4299 = vst.msk [vmem:[#allocation5 + $0xc4] sm:$0xf] %vm4291_vm8, %v4282_v11  ;;  %v9074_v14 = vrot.slane %v12824_v22, 9  ;;  %v6529_v26 = vrot.slane %v12827_v15, 5  ;;  %v12867_v11 = vld [vmem:[%s11659_s2 + $0x9c] sm:$0x1]  ;;  %v6518_v33 = vsel %vm10482_vm1, %v9071_v39, %v6517_v1 }
 0x48f   : >> { %4298 = vst.msk [vmem:[#allocation5 + $0xa8] sm:$0xf] %vm4291_vm8, %v4280_v7  ;;  %6026 = vrot.lane.b32.xlu1 %v8987_v2, %s9818_s0  ;;  %v4814_v6 = vsel %vm10482_vm1, %v8786_v29, %v4813_v49  ;;  %v6149_v43 = vshrl.u32 %v9002_v32, 16  ;;  %v8842_v54 = vld [vmem:[%s11659_s2 + $0x88] sm:$0xf]  ;;  %v6147_v7 = vsel %vm10447_vm13, %v12724_v61, %v12692_v30  ;;  %v6152_v3 = vshll.u32 %v9002_v32, 16 }
 0x490   : >> { %6024 = vrot.lane.b32.xlu0 %v8986_v59, %s9818_s0  ;;  %4829 = vst.msk [vmem:[#allocation5 + $0xb0] sm:$0xf] %vm511_vm6, %v4810_v47  ;;  %v12860_v59 = vld [vmem:[%s11659_s2 + $0x98] sm:$0xe]  ;;  %4830 = vst.msk [vmem:[#allocation5 + $0xcc] sm:$0xf] %vm511_vm6, %v4814_v6  ;;  %v6133_v49 = vsel %vm10447_vm13, %v12703_v8, %v12667_v31  ;;  %v6366_v6 = vsel %vm10447_vm13, %v12774_v58, %v12765_v45  ;;  %v12926_v45 = vsel %vm10482_vm1, %v9026_v60, %v6258_v63 }
 0x491   : >> { %v4734_v23 = vpop.permute.xlu1 %4733  ;;  %v12876_v0 = vld [vmem:[%s11659_s2 + $0xdc] sm:$0x1]  ;;  %5156 = vst.msk [vmem:[#allocation5 + $0xb4] sm:$0xf] %vm511_vm6, %v8842_v54  ;;  %v9659_v53 = vld [vmem:[%s13525_s3 + $0x1a8] sm:$0xff]   ;;  %v8932_v32 = vrot.slane %v12860_v59, 9 }
 0x492   : >> { %v4732_v55 = vpop.permute.xlu0 %4731  ;;  %4750 = vst.msk [vmem:[#allocation5 + $0xc8] sm:$0xf] %vm4291_vm8, %v4734_v23  ;;  %v9004_v47 = vld [vmem:[%s11659_s2 + $0xe0] sm:$0xf]  ;;  %v12891_v61 = vld [vmem:[%s11659_s2 + $0xe4] sm:$0x1]  ;;  %9386 = vmatprep.subr.bf16.mxu1 %v9659_v53 }
 0x493   : >> { %4749 = vst.msk [vmem:[#allocation5 + $0xac] sm:$0xf] %vm4291_vm8, %v4732_v55  ;;  %5735 = vrot.lane.b32.xlu1 %v8938_v5, %s9817_s29  ;;  %v8843_v5 = vld [vmem:[%s11659_s2 + $0x90] sm:$0xf]  ;;  %v5671_v23 = vrot.slane %v12867_v11, 5  ;;  %9387 = vmatpush3.bf16.msra.mxu1 %v9659_v53  ;;  %v12908_v55 = vrot.slane %v6152_v3, 5  ;;  %v6352_v53 = vsel %vm10447_vm13, %v12772_v18, %v12705_v51 }
 0x494   : >> { %5733 = vrot.lane.b32.xlu0 %v8937_v16, %s9817_s29  ;;  %5157 = vst.msk [vmem:[#allocation5 + $0xd0] sm:$0xf] %vm511_vm6, %v8843_v5  ;;  %v12897_v16 = vrot.slane %v6149_v43, 4  ;;  %v12901_v8 = vld [vmem:[%s11659_s2 + $0xd0] sm:$0xf]  ;;  %v6163_v54 = vshrl.u32 %v9004_v47, 16 }
 0x495   : >> { %v5114_v29 = vpop.permute.xlu1 %5113  ;;  %v12911_v43 = vld [vmem:[%s11659_s2 + $0xd4] sm:$0x1]  ;;  %v9660_v5 = vld [vmem:[%s13525_s3 + $0x1a0] sm:$0xff]   ;;  %v6172_v58 = vshll.u32 %v12891_v61, 16  ;;  %v8897_v3 = vld [vmem:[%s11659_s2 + $0x70] sm:$0xf] }
 0x496   : >> { %v5112_v30 = vpop.permute.xlu0 %5111  ;;  %5134 = vst.msk [vmem:[#allocation5 + $0x5c] sm:$0xf] %vm4291_vm8, %v5114_v29  ;;  %v12938_v18 = vld [vmem:[%s11659_s2 + $0xd8] sm:$0xf]  ;;  %v5510_v60 = vshrl.u32 %v8897_v3, 16  ;;  %v5513_v63 = vshll.u32 %v8897_v3, 16  ;;  %9388 = vmatprep.subr.bf16.mxu1 %v9660_v5 }
 0x497   : >> { %5133 = vst.msk [vmem:[#allocation5 + $0x40] sm:$0xf] %vm4291_vm8, %v5112_v30  ;;  %6186 = vrot.lane.b32.xlu1 %v6147_v7, %s9817_s29  ;;  %v6166_v7 = vshll.u32 %v9004_v47, 16  ;;  %v8898_v47 = vld [vmem:[%s11659_s2 + $0x74] sm:$0x1]  ;;  %9389 = vmatpush3.bf16.msra.mxu1 %v9660_v5  ;;  %v12953_v38 = vrot.slane %v6163_v54, 4 }
 0x498   : >> { %6184 = vrot.lane.b32.xlu0 %v6133_v49, %s9817_s29  ;;  %v5519_v12 = vshll.u32 %v8898_v47, 16  ;;  %v8899_v31 = vld [vmem:[%s11659_s2 + $0x78] sm:$0xf]  ;;  %v8900_v48 = vld [vmem:[%s11659_s2 + $0x7c] sm:$0x1]  ;;  %v5515_v2 = vrot.slane %v5513_v63, 5 }
 0x499   : >> { %v5440_v29 = vpop.permute.xlu1 %5439  ;;  %v6607_v49 = vld [vmem:[#allocation5 + $0xc4] sm:$0xff]  ;;  %v12951_v3 = vld [vmem:[%s11659_s2 + $0xd0] sm:$0xf]  ;;  %v5533_v47 = vshll.u32 %v8900_v48, 16  ;;  %v9661_v5 = vld [vmem:[%s13525_s3 + $0x198] sm:$0xff]   ;;  %v6410_v48 = vshrl.u32 %v12938_v18, 16 }
 0x49a   : >> { %v5438_v30 = vpop.permute.xlu0 %5437  ;;  %5460 = vst.msk [vmem:[#allocation5 + $0x60] sm:$0xf] %vm4291_vm8, %v5440_v29  ;;  %v6603_v24 = vld [vmem:[#allocation5 + $0xa8] sm:$0xff]  ;;  %v5856_v29 = vsel %vm10447_vm13, %v12789_v56, %v12779_v27  ;;  %v12955_v27 = vrot.slane %v6166_v7, 5  ;;  %v12964_v7 = vrot.slane %v6172_v58, 5  ;;  %v6413_v63 = vshll.u32 %v12938_v18, 16  ;;  %9390 = vmatprep.subr.bf16.mxu1 %v9661_v5 }
 0x49b   : >> { %v9630_v51 = vld [vmem:[#allocation5 + $0xac] ss:$28 sps:$4 sm:$0xff]   ;;  %5459 = vst.msk [vmem:[#allocation5 + $0x44] sm:$0xf] %vm4291_vm8, %v5438_v30  ;;  %6453 = vrot.lane.b32.xlu1 %v6366_v6, %s9818_s0  ;;  %v9101_v61 = vcombine.low %v6603_v24, %v6607_v49  ;;  %v5512_v30 = vrot.slane %v5510_v60, 4  ;;  %v5524_v6 = vshrl.u32 %v8899_v31, 16  ;;  %9391 = vmatpush3.bf16.msra.mxu1 %v9661_v5 }
 0x49c   : >> { %6451 = vrot.lane.b32.xlu0 %v6352_v53, %s9818_s0  ;;  %7259 = vmatprep.mubr.bf16.mxu0 %v9630_v51  ;;  %v5527_v24 = vshll.u32 %v8899_v31, 16  ;;  %v5521_v60 = vrot.slane %v5519_v12, 5  ;;  %v5535_v12 = vrot.slane %v5533_v47, 5  ;;  %v6394_v47 = vsel %vm10447_vm13, %v12818_v20, %v12804_v19  ;;  %v9033_v1 = vld [vmem:[%s11659_s2 + $0xc0] sm:$0xf] }
 0x49d   : >> { %v4862_v49 = vpop.permute.xlu1 %4861  ;;  %7260 = vmatmul.mubr.bf16.gmra.mxu0 %v9101_v61  ;;  %v5516_v51 = vor.u32 %v5515_v2, %v5512_v30  ;;  %v5526_v31 = vrot.slane %v5524_v6, 4  ;;  %v6263_v2 = vsel %vm10482_vm1, %v9027_v9, %v6262_v13  ;;  %v8962_v30 = vld [vmem:[%s11659_s2 + $0xb4] sm:$0x1]  ;;  %v8963_v6 = vld [vmem:[%s11659_s2 + $0xb8] sm:$0xe]  ;;  %v5861_v19 = vshll.u32 %v12951_v3, 16 }
 0x49e   : >> { %v4860_v53 = vpop.permute.xlu0 %4859  ;;  %4880 = vst.msk [vmem:[#allocation5 + $0x94] sm:$0xf] %vm4139_vm0, %v4862_v49  ;;  %v5529_v54 = vrot.slane %v5527_v24, 5  ;;  %v8961_v49 = vld [vmem:[%s11659_s2 + $0xb0] sm:$0xe]  ;;  %v5959_v46 = vrot.slane %v8962_v30, 5 }
 0x49f   : >> { %4879 = vst.msk [vmem:[#allocation5 + $0x78] sm:$0xf] %vm4139_vm0, %v4860_v53  ;;  %5895 = vrot.lane.b32.xlu1 %v5856_v29, %s9819_s1  ;;  %v5517_v58 = vrot.slane %v5516_v51, 4  ;;  %v8975_v56 = vrot.slane %v8961_v49, 9  ;;  %v8964_v61 = vld [vmem:[%s11659_s2 + $0xbc] sm:$0x1] }
 0x4a0   : >> { %5893 = vrot.lane.b32.xlu0 %v5842_v44, %s9819_s1  ;;  %v5530_v29 = vor.u32 %v5529_v54, %v5526_v31  ;;  %v6380_v44 = vsel %vm10447_vm13, %v12794_v36, %v12796_v37  ;;  %v8976_v40 = vrot.slane %v8963_v6, 9  ;;  %v5963_v37 = vrot.slane %v8964_v61, 5  ;;  %v9664_v51 = vld [vmem:[%s13525_s3 + $0x190] sm:$0xff]   ;;  %v8902_v61 = vld [vmem:[%s11659_s2 + $0x84] sm:$0x1] }
 0x4a1   : >> { %v5297_v24 = vpop.permute.xlu1 %5296  ;;  %v6592_v53 = vld [vmem:[#allocation5 + $0x5c] sm:$0xff]  ;;  %v5522_v5 = vsel %vm10447_vm13, %v5517_v58, %v5521_v60  ;;  %v12996_v54 = vrot.slane %v6410_v48, 4  ;;  %v5960_v20 = vsel %vm10482_vm1, %v8975_v56, %v5959_v46  ;;  %v8903_v58 = vld [vmem:[%s11659_s2 + $0x88] sm:$0xf]  ;;  %v8904_v56 = vld [vmem:[%s11659_s2 + $0x8c] sm:$0x1]  ;;  %9392 = vmatprep.subr.bf16.mxu1 %v9664_v51 }
 0x4a2   : >> { %v5295_v52 = vpop.permute.xlu0 %5294  ;;  %5315 = vst.msk [vmem:[#allocation5 + $0x98] sm:$0xf] %vm4139_vm0, %v5297_v24  ;;  %v6588_v9 = vld [vmem:[#allocation5 + $0x40] sm:$0xff]  ;;  %v5531_v36 = vrot.slane %v5530_v29, 4  ;;  %v5964_v48 = vsel %vm10482_vm1, %v8976_v40, %v5963_v37  ;;  %v5552_v30 = vshrl.u32 %v8903_v58, 16  ;;  %v5561_v6 = vshll.u32 %v8904_v56, 16  ;;  %9393 = vmatpush3.bf16.msra.mxu1 %v9664_v51 }
 0x4a3   : >> { %v9632_v13 = vld [vmem:[#allocation5 + $0x44] ss:$28 sps:$4 sm:$0xff]   ;;  %5314 = vst.msk [vmem:[#allocation5 + $0x7c] sm:$0xf] %vm4139_vm0, %v5295_v52  ;;  %6282 = vrot.lane.b32.xlu1 %v6263_v2, %s9819_s1  ;;  %v9089_v31 = vcombine.low %v6588_v9, %v6592_v53  ;;  %v13018_v46 = vld [vmem:[%s11659_s2 + $0xd8] sm:$0xf]  ;;  %v6522_v51 = vsel %vm10482_vm1, %v9072_v35, %v6521_v41 }
 0x4a4   : >> { %5603 = vst.msk [vmem:[#allocation5 + $0x48] sm:$0xf] %vm511_vm6, %v5522_v5  ;;  %v8901_v60 = vld [vmem:[%s11659_s2 + $0x80] sm:$0xf]  ;;  %6280 = vrot.lane.b32.xlu0 %v12926_v45, %s9819_s1  ;;  %7308 = vmatprep.mubr.bf16.mxu1 %v9632_v13  ;;  %v5536_v52 = vsel %vm10447_vm13, %v5531_v36, %v5535_v12  ;;  %5991 = vst.msk [vmem:[#allocation5 + $0x4c] sm:$0xf] %vm511_vm6, %v5960_v20 }
 0x4a5   : >> { %v5538_v49 = vshrl.u32 %v8901_v60, 16  ;;  %v5541_v2 = vshll.u32 %v8901_v60, 16  ;;  %v5676_v29 = vpop.permute.xlu1 %5675  ;;  %7309 = vmatmul.mubr.bf16.gmra.mxu1 %v9089_v31  ;;  %5604 = vst.msk [vmem:[#allocation5 + $0x64] sm:$0xf] %vm511_vm6, %v5536_v52  ;;  %5992 = vst.msk [vmem:[#allocation5 + $0x68] sm:$0xf] %vm511_vm6, %v5964_v48 }
 0x4a6   : >> { %v5547_v45 = vshll.u32 %v8902_v61, 16  ;;  %v5555_v12 = vshll.u32 %v8903_v58, 16  ;;  %v8965_v24 = vld [vmem:[%s11659_s2 + $0xc0] sm:$0xe]  ;;  %v5674_v53 = vpop.permute.xlu0 %5673  ;;  %5698 = vst.msk [vmem:[#allocation5 + $0x2c] sm:$0xf] %vm4139_vm0, %v5676_v29 }
 0x4a7   : >> { %v5540_v40 = vrot.slane %v5538_v49, 4  ;;  %v5543_v9 = vrot.slane %v5541_v2, 5  ;;  %v8966_v13 = vld [vmem:[%s11659_s2 + $0xc4] sm:$0x1]  ;;  %v8977_v5 = vrot.slane %v8965_v24, 9  ;;  %v9665_v36 = vld [vmem:[%s13525_s3 + $0x188] sm:$0xff]   ;;  %6457 = vrot.lane.b32.xlu1 %v6394_v47, %s9818_s0  ;;  %v6526_v24 = vsel %vm10482_vm1, %v9073_v50, %v6525_v10 }
 0x4a8   : >> { %5697 = vst.msk [vmem:[#allocation5 + $0x10] sm:$0xf] %vm4139_vm0, %v5674_v53  ;;  %v5549_v37 = vrot.slane %v5547_v45, 5  ;;  %v5554_v31 = vrot.slane %v5552_v30, 4  ;;  %v5557_v20 = vrot.slane %v5555_v12, 5  ;;  %v5563_v60 = vrot.slane %v5561_v6, 5  ;;  %6455 = vrot.lane.b32.xlu0 %v6380_v44, %s9818_s0  ;;  %9394 = vmatprep.subr.bf16.mxu1 %v9665_v36 }
 0x4a9   : >> { %v8967_v61 = vld [vmem:[%s11659_s2 + $0xc8] sm:$0xe]  ;;  %v5544_v52 = vor.u32 %v5543_v9, %v5540_v40  ;;  %v5967_v48 = vrot.slane %v8966_v13, 5  ;;  %v8968_v49 = vld [vmem:[%s11659_s2 + $0xcc] sm:$0x1]  ;;  %v6019_v58 = vpop.permute.xlu1 %6018  ;;  %v9666_v41 = vld [vmem:[%s13525_s3 + $0x180] sm:$0xff]   ;;  %9395 = vmatpush3.bf16.msra.mxu1 %v9665_v36  ;;  %v5672_v50 = vsel %vm10482_vm1, %v8932_v32, %v5671_v23  ;;  %v6169_v23 = vor.u32 %v12955_v27, %v12953_v38 }
 0x4aa   : >> { %v8978_v2 = vrot.slane %v8967_v61, 9  ;;  %v9031_v47 = vld [vmem:[%s11659_s2 + $0xb0] sm:$0xf]  ;;  %v5558_v44 = vor.u32 %v5557_v20, %v5554_v31  ;;  %v5971_v62 = vrot.slane %v8968_v49, 5  ;;  %v9032_v35 = vld [vmem:[%s11659_s2 + $0xb8] sm:$0xf]  ;;  %v6017_v56 = vpop.permute.xlu0 %6016  ;;  %9396 = vmatprep.subr.bf16.mxu1 %v9666_v41 }
 0x4ab   : >> { %6315 = vst.msk [vmem:[#allocation5 + $0x18] sm:$0xf] %vm511_vm6, %v9031_v47  ;;  %v13050_v28 = vrot.slane %v6413_v63, 5  ;;  %v5545_v4 = vrot.slane %v5544_v52, 4  ;;  %v5968_v39 = vsel %vm10482_vm1, %v8977_v5, %v5967_v48  ;;  %6316 = vst.msk [vmem:[#allocation5 + $0x34] sm:$0xf] %vm511_vm6, %v9032_v35  ;;  %6549 = vrot.lane.b32.xlu1 %v6522_v51, %s9817_s29  ;;  %v6530_v63 = vsel %vm10482_vm1, %v9074_v14, %v6529_v26 }
 0x4ac   : >> { %6041 = vst.msk [vmem:[#allocation5 + $0x30] sm:$0xf] %vm4139_vm0, %v6019_v58  ;;  %6040 = vst.msk [vmem:[#allocation5 + $0x14] sm:$0xf] %vm4139_vm0, %v6017_v56  ;;  %v5872_v29 = vshrl.u32 %v13018_v46, 16  ;;  %v5559_v45 = vrot.slane %v5558_v44, 4  ;;  %v5972_v18 = vsel %vm10482_vm1, %v8978_v2, %v5971_v62  ;;  %6547 = vrot.lane.b32.xlu0 %v6518_v33, %s9817_s29  ;;  %v6155_v33 = vor.u32 %v12908_v55, %v12897_v16 }
 0x4ad   : >> { %5993 = vst.msk [vmem:[#allocation5 + $0x84] sm:$0xf] %vm511_vm6, %v5968_v39  ;;  %6317 = vst.msk [vmem:[#allocation5 + $0x50] sm:$0xf] %vm511_vm6, %v9033_v1  ;;  %v5550_v30 = vsel %vm10447_vm13, %v5545_v4, %v5549_v37  ;;  %v9034_v12 = vld [vmem:[%s11659_s2 + $0xc8] sm:$0xf]  ;;  %v5022_v6 = vpop.permute.xlu1 %5021  ;;  %9397 = vmatpush3.bf16.msra.mxu1 %v9666_v41 }
 0x4ae   : >> { %5994 = vst.msk [vmem:[#allocation5 + $0xa0] sm:$0xf] %vm511_vm6, %v5972_v18  ;;  %5605 = vst.msk [vmem:[#allocation5 + $0x80] sm:$0xf] %vm511_vm6, %v5550_v30  ;;  %v5564_v22 = vsel %vm10447_vm13, %v5559_v45, %v5563_v60  ;;  %v8905_v15 = vld [vmem:[%s11659_s2 + $0x90] sm:$0xf]  ;;  %v5020_v14 = vpop.permute.xlu0 %5019 }
 0x4af   : >> { %6318 = vst.msk [vmem:[#allocation5 + $0x6c] sm:$0xf] %vm511_vm6, %v9034_v12  ;;  %5606 = vst.msk [vmem:[#allocation5 + $0x9c] sm:$0xf] %vm511_vm6, %v5564_v22  ;;  %v8906_v25 = vld [vmem:[%s11659_s2 + $0x94] sm:$0x1]  ;;  %6553 = vrot.lane.b32.xlu1 %v6530_v63, %s9817_s29 }
 0x4b0   : >> { %5040 = vst.msk [vmem:[#allocation5 + $0x94] sm:$0xf] %vm4239_vm4, %v5022_v6  ;;  %v5566_v34 = vshrl.u32 %v8905_v15, 16  ;;  %v5569_v26 = vshll.u32 %v8905_v15, 16  ;;  %5039 = vst.msk [vmem:[#allocation5 + $0x78] sm:$0xf] %vm4239_vm4, %v5020_v14  ;;  %6551 = vrot.lane.b32.xlu0 %v6526_v24, %s9817_s29 }
 0x4b1   : >> { %v5875_v10 = vshll.u32 %v13018_v46, 16  ;;  %v5575_v53 = vshll.u32 %v8906_v25, 16  ;;  %v8907_v40 = vld [vmem:[%s11659_s2 + $0x98] sm:$0xf]  ;;  %v8908_v5 = vld [vmem:[%s11659_s2 + $0x9c] sm:$0x1]  ;;  %v5393_v11 = vpop.permute.xlu1 %5392 }
 0x4b2   : >> { %v5568_v9 = vrot.slane %v5566_v34, 4  ;;  %v5571_v13 = vrot.slane %v5569_v26, 5  ;;  %v5580_v36 = vshrl.u32 %v8907_v40, 16  ;;  %v5583_v37 = vshll.u32 %v8907_v40, 16  ;;  %v13109_v20 = vld [vmem:[%s11659_s2 + $0xdc] sm:$0x1]  ;;  %v5391_v48 = vpop.permute.xlu0 %5390 }
 0x4b3   : >> { %v13561_v59 = vrot.slane %v12837_v57, 5  ;;  %v13562_v31 = vrot.slane %v12830_v42, 9  ;;  %v5577_v60 = vrot.slane %v5575_v53, 5  ;;  %v5589_v61 = vshll.u32 %v8908_v5, 16  ;;  %v8969_v51 = vld [vmem:[%s11659_s2 + $0xd0] sm:$0xe]  ;;  %5687 = vrot.lane.b32.xlu1 %v5672_v50, %s9818_s0 }
 0x4b4   : >> { %v8970_v52 = vld [vmem:[%s11659_s2 + $0xd4] sm:$0x1]  ;;  %5411 = vst.msk [vmem:[#allocation5 + $0x98] sm:$0xf] %vm4239_vm4, %v5393_v11  ;;  %v8989_v57 = vld [vmem:[%s11659_s2 + $0xe0] sm:$0xf]  ;;  %v5572_v42 = vor.u32 %v5571_v13, %v5568_v9  ;;  %v6416_v53 = vor.u32 %v13050_v28, %v12996_v54 }
 0x4b5   : >> { %v5668_v32 = vsel %vm10482_vm1, %v13562_v31, %v13561_v59  ;;  %v5582_v49 = vrot.slane %v5580_v36, 4  ;;  %v5585_v2 = vrot.slane %v5583_v37, 5  ;;  %v8979_v47 = vrot.slane %v8969_v51, 9  ;;  %5410 = vst.msk [vmem:[#allocation5 + $0x7c] sm:$0xf] %vm4239_vm4, %v5391_v48  ;;  %v5728_v4 = vpop.permute.xlu1 %5727 }
 0x4b6   : >> { %v5591_v38 = vrot.slane %v5589_v61, 5  ;;  %v5975_v27 = vrot.slane %v8970_v52, 5  ;;  %v8971_v58 = vld [vmem:[%s11659_s2 + $0xd8] sm:$0xe]  ;;  %5685 = vrot.lane.b32.xlu0 %v5668_v32, %s9818_s0  ;;  %v5573_v44 = vrot.slane %v5572_v42, 4  ;;  %v13563_v1 = vshrl.u32 %v12901_v8, 16  ;;  %v5726_v16 = vpop.permute.xlu0 %5725 }
 0x4b7   : >> { %v5586_v62 = vor.u32 %v5585_v2, %v5582_v49  ;;  %v8972_v35 = vld [vmem:[%s11659_s2 + $0xdc] sm:$0x1]  ;;  %v8980_v41 = vrot.slane %v8971_v58, 9  ;;  %v9035_v56 = vld [vmem:[%s11659_s2 + $0xd0] sm:$0xf]  ;;  %v13564_v18 = vshll.u32 %v12901_v8, 16  ;;  %6030 = vrot.lane.b32.xlu1 %v8989_v57, %s9818_s0 }
 0x4b8   : >> { %v8988_v39 = vld [vmem:[%s11659_s2 + $0xd8] sm:$0xf]  ;;  %v6398_v45 = vrot.slane %v13563_v1, 4  ;;  %v5976_v30 = vsel %vm10482_vm1, %v8979_v47, %v5975_v27  ;;  %v5979_v12 = vrot.slane %v8972_v35, 5  ;;  %6319 = vst.msk [vmem:[#allocation5 + $0x88] sm:$0xf] %vm511_vm6, %v9035_v56  ;;  %v5578_v24 = vsel %vm10447_vm13, %v5573_v44, %v5577_v60 }
 0x4b9   : >> { %v6401_v63 = vrot.slane %v13564_v18, 5  ;;  %5750 = vst.msk [vmem:[#allocation5 + $0x2c] sm:$0xf] %vm4239_vm4, %v5728_v4  ;;  %v6170_v55 = vrot.slane %v6169_v23, 4  ;;  %v6419_v6 = vshll.u32 %v13109_v20, 16  ;;  %v5587_v8 = vrot.slane %v5586_v62, 4  ;;  %v6179_v13 = vpop.permute.xlu1 %6178 }
 0x4ba   : >> { %5995 = vst.msk [vmem:[#allocation5 + $0xbc] sm:$0xf] %vm511_vm6, %v5976_v30  ;;  %v8954_v22 = vld [vmem:[%s11659_s2 + $0xd4] sm:$0x1]  ;;  %v13565_v15 = vshrl.u32 %v12951_v3, 16  ;;  %v5863_v25 = vrot.slane %v5861_v19, 5  ;;  %v5980_v34 = vsel %vm10482_vm1, %v8980_v41, %v5979_v12  ;;  %6028 = vrot.lane.b32.xlu0 %v8988_v39, %s9818_s0  ;;  %v6177_v46 = vpop.permute.xlu0 %6176 }
 0x4bb   : >> { %5749 = vst.msk [vmem:[#allocation5 + $0x10] sm:$0xf] %vm4239_vm4, %v5726_v16  ;;  %v9036_v26 = vld [vmem:[%s11659_s2 + $0xd8] sm:$0xf]  ;;  %v8956_v40 = vld [vmem:[%s11659_s2 + $0xdc] sm:$0x1]  ;;  %v5592_v19 = vsel %vm10447_vm13, %v5587_v8, %v5591_v38  ;;  %v6402_v54 = vor.u32 %v6401_v63, %v6398_v45 }
 0x4bc   : >> { %v5860_v14 = vrot.slane %v13565_v15, 4  ;;  %5607 = vst.msk [vmem:[#allocation5 + $0xb8] sm:$0xf] %vm511_vm6, %v5578_v24  ;;  %v8940_v50 = vld [vmem:[%s11659_s2 + $0xd8] sm:$0xf]  ;;  %v5874_v9 = vrot.slane %v5872_v29, 4 }
 0x4bd   : >> { %v5877_v3 = vrot.slane %v5875_v10, 5  ;;  %5996 = vst.msk [vmem:[#allocation5 + $0xd8] sm:$0xf] %vm511_vm6, %v5980_v34  ;;  %6320 = vst.msk [vmem:[#allocation5 + $0xa4] sm:$0xf] %vm511_vm6, %v9036_v26  ;;  %v6156_v36 = vrot.slane %v6155_v33, 4  ;;  %5739 = vrot.lane.b32.xlu1 %v8940_v50, %s9817_s29  ;;  %v5118_v52 = vpop.permute.xlu1 %5117 }
 0x4be   : >> { %v8939_v5 = vld [vmem:[%s11659_s2 + $0xd0] sm:$0xf]  ;;  %v13566_v37 = vshll.u32 %v12876_v0, 16  ;;  %v9053_v28 = vld [vmem:[%s11659_s2 + $0xe8] sm:$0xf]  ;;  %v13567_v29 = vshll.u32 %v12911_v43, 16  ;;  %v6175_v0 = vsel %vm10447_vm13, %v6170_v55, %v12964_v7  ;;  %v5864_v23 = vor.u32 %v5863_v25, %v5860_v14  ;;  %v5116_v7 = vpop.permute.xlu0 %5115 }
 0x4bf   : >> { %5608 = vst.msk [vmem:[#allocation5 + $0xd4] sm:$0xf] %vm511_vm6, %v5592_v19  ;;  %v5867_v59 = vshll.u32 %v8954_v22, 16  ;;  %v9051_v31 = vld [vmem:[%s11659_s2 + $0xe0] sm:$0xf]  ;;  %v6421_v32 = vrot.slane %v6419_v6, 5  ;;  %5737 = vrot.lane.b32.xlu0 %v8939_v5, %s9817_s29  ;;  %v5878_v61 = vor.u32 %v5877_v3, %v5874_v9 }
 0x4c0   : >> { %v6160_v11 = vrot.slane %v13566_v37, 5  ;;  %6201 = vst.msk [vmem:[#allocation5 + $0x30] sm:$0xf] %vm4239_vm4, %v6179_v13  ;;  %v6407_v10 = vrot.slane %v13567_v29, 5  ;;  %6200 = vst.msk [vmem:[#allocation5 + $0x14] sm:$0xf] %vm4239_vm4, %v6177_v46 }
 0x4c1   : >> { %v5881_v20 = vshll.u32 %v8956_v40, 16  ;;  %v6417_v60 = vrot.slane %v6416_v53, 4  ;;  %v6438_v43 = vshrl.u32 %v9053_v28, 16  ;;  %v6441_v51 = vshll.u32 %v9053_v28, 16  ;;  %5136 = vst.msk [vmem:[#allocation5 + $0x94] sm:$0xf] %vm4291_vm8, %v5118_v52  ;;  %6190 = vrot.lane.b32.xlu1 %v6175_v0, %s9817_s29  ;;  %v5444_v56 = vpop.permute.xlu1 %5443 }
 0x4c2   : >> { %v6161_v48 = vsel %vm10447_vm13, %v6156_v36, %v6160_v11  ;;  %v6403_v57 = vrot.slane %v6402_v54, 4  ;;  %v6424_v42 = vshrl.u32 %v9051_v31, 16  ;;  %v6427_v49 = vshll.u32 %v9051_v31, 16  ;;  %5135 = vst.msk [vmem:[#allocation5 + $0x78] sm:$0xf] %vm4291_vm8, %v5116_v7  ;;  %v5442_v63 = vpop.permute.xlu0 %5441 }
 0x4c3   : >> { %v5869_v2 = vrot.slane %v5867_v59, 5  ;;  %v5865_v47 = vrot.slane %v5864_v23, 4  ;;  %v5883_v38 = vrot.slane %v5881_v20, 5  ;;  %v9020_v27 = vld [vmem:[%s11659_s2 + $0xe0] sm:$0xe]  ;;  %6188 = vrot.lane.b32.xlu0 %v6161_v48, %s9817_s29  ;;  %v6422_v33 = vsel %vm10447_vm13, %v6417_v60, %v6421_v32 }
 0x4c4   : >> { %v9038_v58 = vld [vmem:[%s11659_s2 + $0xe8] sm:$0xf]  ;;  %v5879_v44 = vrot.slane %v5878_v61, 4  ;;  %v9021_v62 = vld [vmem:[%s11659_s2 + $0xe4] sm:$0x1]  ;;  %v6440_v35 = vrot.slane %v6438_v43, 4  ;;  %v6408_v4 = vsel %vm10447_vm13, %v6403_v57, %v6407_v10 }
 0x4c5   : >> { %v6443_v41 = vrot.slane %v6441_v51, 5  ;;  %6322 = vst.msk [vmem:[#allocation5 + $0xdc] sm:$0xf] %vm511_vm6, %v9038_v58  ;;  %v9054_v39 = vld [vmem:[%s11659_s2 + $0xec] sm:$0x1]  ;;  %v6426_v45 = vrot.slane %v6424_v42, 4  ;;  %6461 = vrot.lane.b32.xlu1 %v6422_v33, %s9818_s0  ;;  %v5888_v14 = vpop.permute.xlu1 %5887  ;;  %v5870_v25 = vsel %vm10447_vm13, %v5865_v47, %v5869_v2 }
 0x4c6   : >> { %v9052_v1 = vld [vmem:[%s11659_s2 + $0xe4] sm:$0x1]  ;;  %v6429_v18 = vrot.slane %v6427_v49, 5  ;;  %5462 = vst.msk [vmem:[#allocation5 + $0x98] sm:$0xf] %vm4291_vm8, %v5444_v56  ;;  %v9029_v55 = vrot.slane %v9020_v27, 9  ;;  %v5884_v24 = vsel %vm10447_vm13, %v5879_v44, %v5883_v38  ;;  %v5886_v53 = vpop.permute.xlu0 %5885 }
 0x4c7   : >> { %v9018_v30 = vld [vmem:[%s11659_s2 + $0xd8] sm:$0xe]  ;;  %v9019_v12 = vld [vmem:[%s11659_s2 + $0xdc] sm:$0x1]  ;;  %v9037_v16 = vld [vmem:[%s11659_s2 + $0xe0] sm:$0xf]  ;;  %6459 = vrot.lane.b32.xlu0 %v6408_v4, %s9818_s0  ;;  %v6444_v8 = vor.u32 %v6443_v41, %v6440_v35 }
 0x4c8   : >> { %5461 = vst.msk [vmem:[#allocation5 + $0x7c] sm:$0xf] %vm4291_vm8, %v5442_v63  ;;  %v6270_v6 = vrot.slane %v9021_v62, 5  ;;  %v6447_v22 = vshll.u32 %v9054_v39, 16  ;;  %v6433_v15 = vshll.u32 %v9052_v1, 16  ;;  %v9028_v34 = vrot.slane %v9018_v30, 9 }
 0x4c9   : >> { %6321 = vst.msk [vmem:[#allocation5 + $0xc0] sm:$0xf] %vm511_vm6, %v9037_v16  ;;  %v6266_v26 = vrot.slane %v9019_v12, 5  ;;  %v6430_v50 = vor.u32 %v6429_v18, %v6426_v45  ;;  %5899 = vrot.lane.b32.xlu1 %v5884_v24, %s9819_s1  ;;  %v6445_v9 = vrot.slane %v6444_v8, 4  ;;  %v9065_v13 = vld [vmem:[%s11659_s2 + $0xd8] sm:$0xe]  ;;  %v6275_v5 = vpop.permute.xlu1 %6274 }
 0x4ca   : >> { %5910 = vst.msk [vmem:[#allocation5 + $0x2c] sm:$0xf] %vm4291_vm8, %v5888_v14  ;;  %5909 = vst.msk [vmem:[#allocation5 + $0x10] sm:$0xf] %vm4291_vm8, %v5886_v53  ;;  %v6271_v40 = vsel %vm10482_vm1, %v9029_v55, %v6270_v6  ;;  %v6449_v3 = vrot.slane %v6447_v22, 5  ;;  %v6435_v19 = vrot.slane %v6433_v15, 5  ;;  %v6273_v46 = vpop.permute.xlu0 %6272 }
 0x4cb   : >> { %5897 = vrot.lane.b32.xlu0 %v5870_v25, %s9819_s1  ;;  %v6267_v36 = vsel %vm10482_vm1, %v9028_v34, %v6266_v26  ;;  %v6431_v11 = vrot.slane %v6430_v50, 4  ;;  %v9066_v54 = vld [vmem:[%s11659_s2 + $0xdc] sm:$0x1]  ;;  %v9063_v28 = vld [vmem:[%s11659_s2 + $0xd0] sm:$0xe]  ;;  %v9076_v32 = vrot.slane %v9065_v13, 9 }
 0x4cc   : >> { %6297 = vst.msk [vmem:[#allocation5 + $0x30] sm:$0xf] %vm4291_vm8, %v6275_v5  ;;  %v9064_v59 = vld [vmem:[%s11659_s2 + $0xd4] sm:$0x1]  ;;  %6296 = vst.msk [vmem:[#allocation5 + $0x14] sm:$0xf] %vm4291_vm8, %v6273_v46  ;;  %v6450_v0 = vsel %vm10447_vm13, %v6445_v9, %v6449_v3 }
 0x4cd   : >> { %v6600_v37 = vld [vmem:[#allocation5 + $0x94] sm:$0xff]  ;;  %6286 = vrot.lane.b32.xlu1 %v6271_v40, %s9819_s1  ;;  %v6537_v23 = vrot.slane %v9066_v54, 5  ;;  %v4866_v20 = vpop.permute.xlu1 %4865  ;;  %v6436_v60 = vsel %vm10447_vm13, %v6431_v11, %v6435_v19  ;;  %v9075_v61 = vrot.slane %v9063_v28, 9  ;;  %v6533_v43 = vrot.slane %v9064_v59, 5  ;;  %v9069_v51 = vld [vmem:[%s11659_s2 + $0xe8] sm:$0xe] }
 0x4ce   : >> { %v9070_v52 = vld [vmem:[%s11659_s2 + $0xec] sm:$0x1]  ;;  %v4864_v48 = vpop.permute.xlu0 %4863  ;;  %4882 = vst.msk [vmem:[#allocation5 + $0xcc] sm:$0xf] %vm4139_vm0, %v4866_v20  ;;  %v9067_v57 = vld [vmem:[%s11659_s2 + $0xe0] sm:$0xe] }
 0x4cf   : >> { %v6596_v29 = vld [vmem:[#allocation5 + $0x78] sm:$0xff]  ;;  %6284 = vrot.lane.b32.xlu0 %v6267_v36, %s9819_s1  ;;  %v9068_v42 = vld [vmem:[%s11659_s2 + $0xe4] sm:$0x1]  ;;  %4881 = vst.msk [vmem:[#allocation5 + $0xb0] sm:$0xf] %vm4139_vm0, %v4864_v48  ;;  %v6538_v49 = vsel %vm10482_vm1, %v9076_v32, %v6537_v23  ;;  %v9078_v7 = vrot.slane %v9069_v51, 9  ;;  %v6534_v38 = vsel %vm10482_vm1, %v9075_v61, %v6533_v43 }
 0x4d0   : >> { %v9646_v10 = vld [vmem:[#allocation5 + $0x7c] ss:$28 sps:$4 sm:$0xff]   ;;  %v9096_v31 = vcombine.low %v6596_v29, %v6600_v37  ;;  %v6545_v2 = vrot.slane %v9070_v52, 5  ;;  %v9077_v27 = vrot.slane %v9067_v57, 9  ;;  %v6541_v58 = vrot.slane %v9068_v42, 5 }
 0x4d1   : >> { %7316 = vmatprep.mubr.bf16.mxu1 %v9646_v10  ;;  %6465 = vrot.lane.b32.xlu1 %v6450_v0, %s9818_s0  ;;  %v5301_v47 = vpop.permute.xlu1 %5300  ;;  %v9652_v44 = vld [vmem:[#allocation5 + $0x10] ss:$28 sps:$4 sm:$0xff]  }
 0x4d2   : >> { %7317 = vmatmul.mubr.bf16.gmra.mxu1 %v9096_v31  ;;  %v5299_v33 = vpop.permute.xlu0 %5298  ;;  %5317 = vst.msk [vmem:[#allocation5 + $0xd0] sm:$0xf] %vm4139_vm0, %v5301_v47  ;;  %v6546_v35 = vsel %vm10482_vm1, %v9078_v7, %v6545_v2  ;;  %v6542_v56 = vsel %vm10482_vm1, %v9077_v27, %v6541_v58 }
 0x4d3   : >> { %6463 = vrot.lane.b32.xlu0 %v6436_v60, %s9818_s0  ;;  %v9654_v62 = vld [vmem:[#allocation5 + $0x14] ss:$28 sps:$4 sm:$0xff]   ;;  %5316 = vst.msk [vmem:[#allocation5 + $0xb4] sm:$0xf] %vm4139_vm0, %v5299_v33  ;;  %s9166_s0 = sshll.u32 %s9781_s14, 6  ;;  %s3964_s14 = sadd.s32 1, %s9781_s14  }
 0x4d4   : >> { %7365 = vmatprep.mubr.bf16.mxu0 %v9654_v62  ;;  %s13342_s1 = scalar_lea.vmem %s10027_s22, %s9166_s0 [#allocation7]  ;;  %p3961_p1 = scmp.ge.s32.totalorder %s3964_s14, 8  }
 0x4d5   : >> { %6557 = vrot.lane.b32.xlu1 %v6538_v49, %s9817_s29  ;;  %v5680_v41 = vpop.permute.xlu1 %5679  ;;  %7366 = vmatmul.mubr.bf16.vlgmr.msra.gmra.mxu0 %v9652_v44  ;;  %vm9820_vm9 = vmmov (%p3961_p1), 0   ;;  %v7501_v17 = vld [vmem:[%s13529_s7 + $0x8] sm:$0xff] (%p3961_p1)  ;;  %v7500_v21 = vld [vmem:[%s13529_s7] sm:$0xff] (%p3961_p1)  ;;  %vm7586_vm6 = vcmask (%p3961_p1), 1041408   ;;  %s13419_s13 = smov (%p3961_p1), 0  }
 0x4d6   : >> { %v5678_v4 = vpop.permute.xlu0 %5677  ;;  %5700 = vst.msk [vmem:[#allocation5 + $0x64] sm:$0xf] %vm4139_vm0, %v5680_v41 }
 0x4d7   : >> { %6555 = vrot.lane.b32.xlu0 %v6534_v38, %s9817_s29  ;;  %5699 = vst.msk [vmem:[#allocation5 + $0x48] sm:$0xf] %vm4139_vm0, %v5678_v4 }
 0x4d9   : >> { %6561 = vrot.lane.b32.xlu1 %v6546_v35, %s9817_s29  ;;  %v6023_v39 = vpop.permute.xlu1 %6022 }
 0x4da   : >> { %v6021_v1 = vpop.permute.xlu0 %6020  ;;  %6043 = vst.msk [vmem:[#allocation5 + $0x68] sm:$0xf] %vm4139_vm0, %v6023_v39 }
 0x4db   : >> { %6559 = vrot.lane.b32.xlu0 %v6542_v56, %s9817_s29  ;;  %6042 = vst.msk [vmem:[#allocation5 + $0x4c] sm:$0xf] %vm4139_vm0, %v6021_v1 }
 0x4dd   : >> { %v5026_v45 = vpop.permute.xlu1 %5025 }
 0x4de   : >> { %v5024_v18 = vpop.permute.xlu0 %5023  ;;  %5042 = vst.msk [vmem:[#allocation5 + $0xcc] sm:$0xf] %vm4239_vm4, %v5026_v45 }
 0x4df   : >> { %5041 = vst.msk [vmem:[#allocation5 + $0xb0] sm:$0xf] %vm4239_vm4, %v5024_v18 }
 0x4e1   : >> { %v5397_v63 = vpop.permute.xlu1 %5396 }
 0x4e2   : >> { %v5395_v30 = vpop.permute.xlu0 %5394  ;;  %5413 = vst.msk [vmem:[#allocation5 + $0xd0] sm:$0xf] %vm4239_vm4, %v5397_v63 }
 0x4e3   : >> { %5412 = vst.msk [vmem:[#allocation5 + $0xb4] sm:$0xf] %vm4239_vm4, %v5395_v30 }
 0x4e5   : >> { %v5732_v12 = vpop.permute.xlu1 %5731 }
 0x4e6   : >> { %v5730_v16 = vpop.permute.xlu0 %5729  ;;  %5752 = vst.msk [vmem:[#allocation5 + $0x64] sm:$0xf] %vm4239_vm4, %v5732_v12 }
 0x4e7   : >> { %5751 = vst.msk [vmem:[#allocation5 + $0x48] sm:$0xf] %vm4239_vm4, %v5730_v16 }
 0x4e9   : >> { %v6183_v55 = vpop.permute.xlu1 %6182 }
 0x4ea   : >> { %v6181_v6 = vpop.permute.xlu0 %6180  ;;  %6203 = vst.msk [vmem:[#allocation5 + $0x68] sm:$0xf] %vm4239_vm4, %v6183_v55 }
 0x4eb   : >> { %6202 = vst.msk [vmem:[#allocation5 + $0x4c] sm:$0xf] %vm4239_vm4, %v6181_v6 }
 0x4ed   : >> { %v5122_v24 = vpop.permute.xlu1 %5121 }
 0x4ee   : >> { %v5120_v8 = vpop.permute.xlu0 %5119  ;;  %5138 = vst.msk [vmem:[#allocation5 + $0xcc] sm:$0xf] %vm4291_vm8, %v5122_v24 }
 0x4ef   : >> { %5137 = vst.msk [vmem:[#allocation5 + $0xb0] sm:$0xf] %vm4291_vm8, %v5120_v8 }
 0x4f1   : >> { %v5448_v22 = vpop.permute.xlu1 %5447 }
 0x4f2   : >> { %v5446_v15 = vpop.permute.xlu0 %5445  ;;  %5464 = vst.msk [vmem:[#allocation5 + $0xd0] sm:$0xf] %vm4291_vm8, %v5448_v22 }
 0x4f3   : >> { %5463 = vst.msk [vmem:[#allocation5 + $0xb4] sm:$0xf] %vm4291_vm8, %v5446_v15 }
 0x4f5   : >> { %v5892_v14 = vpop.permute.xlu1 %5891 }
 0x4f6   : >> { %v5890_v25 = vpop.permute.xlu0 %5889  ;;  %5912 = vst.msk [vmem:[#allocation5 + $0x64] sm:$0xf] %vm4291_vm8, %v5892_v14 }
 0x4f7   : >> { %5911 = vst.msk [vmem:[#allocation5 + $0x48] sm:$0xf] %vm4291_vm8, %v5890_v25 }
 0x4f9   : >> { %v6279_v34 = vpop.permute.xlu1 %6278  ;;  %v6608_v26 = vld [vmem:[#allocation5 + $0xcc] sm:$0xff] }
 0x4fa   : >> { %v6277_v50 = vpop.permute.xlu0 %6276  ;;  %6299 = vst.msk [vmem:[#allocation5 + $0x68] sm:$0xf] %vm4291_vm8, %v6279_v34  ;;  %v6604_v53 = vld [vmem:[#allocation5 + $0xb0] sm:$0xff]  ;;  %v9234_v34 = vpop.f32.mrf.mxu0 }
 0x4fb   : >> { %v9655_v40 = vld [vmem:[#allocation5 + $0xb4] ss:$28 sps:$4 sm:$0xff]   ;;  %6298 = vst.msk [vmem:[#allocation5 + $0x4c] sm:$0xf] %vm4291_vm8, %v6277_v50  ;;  %v9103_v9 = vcombine.low %v6604_v53, %v6608_v26 }
 0x4fc   : >> { %7324 = vmatprep.mubr.bf16.mxu1 %v9655_v40  ;;  %v9235_v26 = vpop.f32.mrf.mxu0 }
 0x4fd   : >> { %v5684_v3 = vpop.permute.xlu1 %5683  ;;  %7325 = vmatmul.mubr.bf16.gmra.mxu1 %v9103_v9 }
 0x4fe   : >> { %v5682_v19 = vpop.permute.xlu0 %5681  ;;  %5702 = vst.msk [vmem:[#allocation5 + $0x9c] sm:$0xf] %vm4139_vm0, %v5684_v3  ;;  %v9237_v50 = vpop.f32.mrf.mxu0 }
 0x4ff   : >> { %5701 = vst.msk [vmem:[#allocation5 + $0x80] sm:$0xf] %vm4139_vm0, %v5682_v19 }
 0x500   : >> { %v9238_v53 = vpop.f32.mrf.mxu0 }
 0x501   : >> { %v6027_v13 = vpop.permute.xlu1 %6026  ;;  %v6593_v5 = vld [vmem:[#allocation5 + $0x64] sm:$0xff] }
 0x502   : >> { %v6025_v36 = vpop.permute.xlu0 %6024  ;;  %6045 = vst.msk [vmem:[#allocation5 + $0xa0] sm:$0xf] %vm4139_vm0, %v6027_v13  ;;  %v6589_v37 = vld [vmem:[#allocation5 + $0x48] sm:$0xff] }
 0x503   : >> { %v9657_v11 = vld [vmem:[#allocation5 + $0x4c] ss:$28 sps:$4 sm:$0xff]   ;;  %6044 = vst.msk [vmem:[#allocation5 + $0x84] sm:$0xf] %vm4139_vm0, %v6025_v36  ;;  %v9091_v54 = vcombine.low %v6589_v37, %v6593_v5 }
 0x504   : >> { %7373 = vmatprep.mubr.bf16.mxu0 %v9657_v11 }
 0x505   : >> { %v5736_v28 = vpop.permute.xlu1 %5735  ;;  %7374 = vmatmul.mubr.bf16.gmra.mxu0 %v9091_v54  ;;  %v9240_v40 = vpop.f32.mrf.mxu0 }
 0x506   : >> { %v5734_v46 = vpop.permute.xlu0 %5733  ;;  %5754 = vst.msk [vmem:[#allocation5 + $0x9c] sm:$0xf] %vm4239_vm4, %v5736_v28 }
 0x507   : >> { %5753 = vst.msk [vmem:[#allocation5 + $0x80] sm:$0xf] %vm4239_vm4, %v5734_v46  ;;  %v9241_v9 = vpop.f32.mrf.mxu0 }
 0x509   : >> { %v6187_v29 = vpop.permute.xlu1 %6186  ;;  %v9243_v3 = vpop.f32.mrf.mxu0 }
 0x50a   : >> { %v6185_v10 = vpop.permute.xlu0 %6184  ;;  %6205 = vst.msk [vmem:[#allocation5 + $0xa0] sm:$0xf] %vm4239_vm4, %v6187_v29 }
 0x50b   : >> { %6204 = vst.msk [vmem:[#allocation5 + $0x84] sm:$0xf] %vm4239_vm4, %v6185_v10  ;;  %v9244_v19 = vpop.f32.mrf.mxu0 }
 0x50d   : >> { %v6454_v59 = vpop.permute.xlu1 %6453 }
 0x50e   : >> { %v6452_v31 = vpop.permute.xlu0 %6451  ;;  %6476 = vst.msk [vmem:[#allocation5 + $0x34] sm:$0xf] %vm4139_vm0, %v6454_v59 }
 0x50f   : >> { %6475 = vst.msk [vmem:[#allocation5 + $0x18] sm:$0xf] %vm4139_vm0, %v6452_v31 }
 0x511   : >> { %v5896_v0 = vpop.permute.xlu1 %5895 }
 0x512   : >> { %v5894_v32 = vpop.permute.xlu0 %5893  ;;  %5914 = vst.msk [vmem:[#allocation5 + $0x9c] sm:$0xf] %vm4291_vm8, %v5896_v0 }
 0x513   : >> { %5913 = vst.msk [vmem:[#allocation5 + $0x80] sm:$0xf] %vm4291_vm8, %v5894_v32 }
 0x515   : >> { %v6283_v23 = vpop.permute.xlu1 %6282 }
 0x516   : >> { %v6281_v20 = vpop.permute.xlu0 %6280  ;;  %6301 = vst.msk [vmem:[#allocation5 + $0xa0] sm:$0xf] %vm4291_vm8, %v6283_v23 }
 0x517   : >> { %6300 = vst.msk [vmem:[#allocation5 + $0x84] sm:$0xf] %vm4291_vm8, %v6281_v20 }
 0x519   : >> { %v6458_v60 = vpop.permute.xlu1 %6457 }
 0x51a   : >> { %v6456_v61 = vpop.permute.xlu0 %6455  ;;  %6478 = vst.msk [vmem:[#allocation5 + $0x6c] sm:$0xf] %vm4139_vm0, %v6458_v60 }
 0x51b   : >> { %6477 = vst.msk [vmem:[#allocation5 + $0x50] sm:$0xf] %vm4139_vm0, %v6456_v61 }
 0x51d   : >> { %v6550_v43 = vpop.permute.xlu1 %6549  ;;  %v6601_v51 = vld [vmem:[#allocation5 + $0x9c] sm:$0xff] }
 0x51e   : >> { %v6548_v52 = vpop.permute.xlu0 %6547  ;;  %6572 = vst.msk [vmem:[#allocation5 + $0x34] sm:$0xf] %vm4239_vm4, %v6550_v43  ;;  %v6597_v48 = vld [vmem:[#allocation5 + $0x80] sm:$0xff] }
 0x51f   : >> { %v9662_v57 = vld [vmem:[#allocation5 + $0x84] ss:$28 sps:$4 sm:$0xff]   ;;  %6571 = vst.msk [vmem:[#allocation5 + $0x18] sm:$0xf] %vm4239_vm4, %v6548_v52  ;;  %v9098_v42 = vcombine.low %v6597_v48, %v6601_v51 }
 0x520   : >> { %7381 = vmatprep.mubr.bf16.mxu0 %v9662_v57 }
 0x521   : >> { %v6554_v49 = vpop.permute.xlu1 %6553  ;;  %7382 = vmatmul.mubr.bf16.gmra.mxu0 %v9098_v42 }
 0x522   : >> { %v6552_v7 = vpop.permute.xlu0 %6551  ;;  %6574 = vst.msk [vmem:[#allocation5 + $0x6c] sm:$0xf] %vm4239_vm4, %v6554_v49 }
 0x523   : >> { %6573 = vst.msk [vmem:[#allocation5 + $0x50] sm:$0xf] %vm4239_vm4, %v6552_v7 }
 0x525   : >> { %v5688_v2 = vpop.permute.xlu1 %5687 }
 0x526   : >> { %5704 = vst.msk [vmem:[#allocation5 + $0xd4] sm:$0xf] %vm4139_vm0, %v5688_v2  ;;  %v9667_v38 = vld [vmem:[#allocation5 + $0x18] ss:$28 sps:$4 sm:$0xff]  }
 0x527   : >> { %9398 = vmatprep.mubr.msk.bf16.mxu1 %vm7190_vm3, %v9667_v38  ;;  %v9242_v38 = vadd.f32 %v9241_v9, %v9240_v40 }
 0x528   : >> { %v5686_v47 = vpop.permute.xlu0 %5685 }
 0x529   : >> { %5703 = vst.msk [vmem:[#allocation5 + $0xb8] sm:$0xf] %vm4139_vm0, %v5686_v47  ;;  %v6031_v27 = vpop.permute.xlu1 %6030 }
 0x52a   : >> { %6047 = vst.msk [vmem:[#allocation5 + $0xd8] sm:$0xf] %vm4139_vm0, %v6031_v27  ;;  %v9668_v33 = vld [vmem:[#allocation5 + $0x50] ss:$28 sps:$4 sm:$0xff]  }
 0x52b   : >> { %9399 = vmatmul.mubr.msk.bf16.vlgmr.msra.gmra.mxu1 %vm7190_vm3, %v9668_v33 }
 0x52c   : >> { %v6029_v58 = vpop.permute.xlu0 %6028 }
 0x52d   : >> { %6046 = vst.msk [vmem:[#allocation5 + $0xbc] sm:$0xf] %vm4139_vm0, %v6029_v58  ;;  %v13307_v13 = vpop.f32.mrf.mxu0  ;;  %v9236_v58 = vadd.f32 %v9235_v26, %v9234_v34 }
 0x52f   : >> { %v5740_v44 = vpop.permute.xlu1 %5739  ;;  %v13309_v36 = vpop.f32.mrf.mxu0 }
 0x530   : >> { %5756 = vst.msk [vmem:[#allocation5 + $0xd4] sm:$0xf] %vm4239_vm4, %v5740_v44  ;;  %v13334_v44 = vld [vmem:[%s13526_s4] ss:$0 sm:$0xff] }
 0x531   : >> { %v5738_v62 = vpop.permute.xlu0 %5737  ;;  %v13311_v11 = vpop.f32.mrf.mxu0 }
 0x532   : >> { %5755 = vst.msk [vmem:[#allocation5 + $0xb8] sm:$0xf] %vm4239_vm4, %v5738_v62  ;;  %v9245_v62 = vadd.f32 %v9244_v19, %v9243_v3 }
 0x533   : >> { %v6191_v35 = vpop.permute.xlu1 %6190  ;;  %v13313_v28 = vpop.f32.mrf.mxu0 }
 0x534   : >> { %6207 = vst.msk [vmem:[#allocation5 + $0xd8] sm:$0xf] %vm4239_vm4, %v6191_v35  ;;  %v9274_v5 = vpop.f32.mrf.mxu1 }
 0x535   : >> { %v6189_v41 = vpop.permute.xlu0 %6188 }
 0x536   : >> { %6206 = vst.msk [vmem:[#allocation5 + $0xbc] sm:$0xf] %vm4239_vm4, %v6189_v41  ;;  %v9275_v37 = vpop.f32.mrf.mxu1  ;;  %v7246_v41 = vadd.f32 %v9242_v38, %v13334_v44 }
 0x537   : >> { %v6462_v56 = vpop.permute.xlu1 %6461 }
 0x538   : >> { %6480 = vst.msk [vmem:[#allocation5 + $0xa4] sm:$0xf] %vm4139_vm0, %v6462_v56  ;;  %v9277_v54 = vpop.f32.mrf.mxu1  ;;  %v9276_v56 = vadd.f32 %v9275_v37, %v9274_v5 }
 0x539   : >> { %v6460_v4 = vpop.permute.xlu0 %6459 }
 0x53a   : >> { %6479 = vst.msk [vmem:[#allocation5 + $0x88] sm:$0xf] %vm4139_vm0, %v6460_v4  ;;  %v9278_v46 = vpop.f32.mrf.mxu1 }
 0x53b   : >> { %v5900_v39 = vpop.permute.xlu1 %5899 }
 0x53c   : >> { %5916 = vst.msk [vmem:[#allocation5 + $0xd4] sm:$0xf] %vm4291_vm8, %v5900_v39  ;;  %v9239_v39 = vadd.f32 %v9238_v53, %v9237_v50 }
 0x53d   : >> { %v5898_v1 = vpop.permute.xlu0 %5897 }
 0x53e   : >> { %5915 = vst.msk [vmem:[#allocation5 + $0xb8] sm:$0xf] %vm4291_vm8, %v5898_v1 }
 0x53f   : >> { %v6287_v45 = vpop.permute.xlu1 %6286 }
 0x540   : >> { %6303 = vst.msk [vmem:[#allocation5 + $0xd8] sm:$0xf] %vm4291_vm8, %v6287_v45  ;;  %v7238_v45 = vadd.f32 %v9236_v58, %v13334_v44 }
 0x541   : >> { %v6285_v18 = vpop.permute.xlu0 %6284 }
 0x542   : >> { %6302 = vst.msk [vmem:[#allocation5 + $0xbc] sm:$0xf] %vm4291_vm8, %v6285_v18 }
 0x543   : >> { %v6466_v63 = vpop.permute.xlu1 %6465 }
 0x544   : >> { %6482 = vst.msk [vmem:[#allocation5 + $0xdc] sm:$0xf] %vm4139_vm0, %v6466_v63 }
 0x545   : >> { %v6464_v30 = vpop.permute.xlu0 %6463 }
 0x546   : >> { %6481 = vst.msk [vmem:[#allocation5 + $0xc0] sm:$0xf] %vm4139_vm0, %v6464_v30 }
 0x547   : >> { %v6558_v12 = vpop.permute.xlu1 %6557  ;;  %v6609_v16 = vld [vmem:[#allocation5 + $0xd4] sm:$0xff] }
 0x548   : >> { %6576 = vst.msk [vmem:[#allocation5 + $0xa4] sm:$0xf] %vm4239_vm4, %v6558_v12  ;;  %v7249_v12 = vadd.f32 %v9245_v62, %v13334_v44 }
 0x549   : >> { %v6556_v55 = vpop.permute.xlu0 %6555  ;;  %v6605_v6 = vld [vmem:[#allocation5 + $0xb8] sm:$0xff] }
 0x54a   : >> { %v9669_v24 = vld [vmem:[#allocation5 + $0xbc] ss:$28 sps:$4 sm:$0xff]   ;;  %6575 = vst.msk [vmem:[#allocation5 + $0x88] sm:$0xf] %vm4239_vm4, %v6556_v55  ;;  %v9105_v8 = vcombine.low %v6605_v6, %v6609_v16  ;;  %v7303_v55 = vadd.f32 %v9276_v56, %v7238_v45  ;;  %v9279_v6 = vadd.f32 %v9278_v46, %v9277_v54 }
 0x54b   : >> { %7389 = vmatprep.mubr.bf16.mxu0 %v9669_v24  ;;  %v6562_v22 = vpop.permute.xlu1 %6561 }
 0x54c   : >> { %7390 = vmatmul.mubr.bf16.gmra.mxu0 %v9105_v8  ;;  %6578 = vst.msk [vmem:[#allocation5 + $0xdc] sm:$0xf] %vm4239_vm4, %v6562_v22  ;;  %v7241_v22 = vadd.f32 %v9239_v39, %v13334_v44 }
 0x54d   : >> { %v6560_v15 = vpop.permute.xlu0 %6559 }
 0x54e   : >> { %6577 = vst.msk [vmem:[#allocation5 + $0xc0] sm:$0xf] %vm4239_vm4, %v6560_v15  ;;  %v7306_v53 = vadd.f32 %v9279_v6, %v7241_v22 }
 0x551   : >> { %v9671_v14 = vld [vmem:[#allocation5 + $0x88] ss:$28 sps:$4 sm:$0xff]  }
 0x552   : >> { %9402 = vmatprep.mubr.msk.bf16.mxu1 %vm7190_vm3, %v9671_v14 }
 0x555   : >> { %v9672_v25 = vld [vmem:[#allocation5 + $0xc0] ss:$28 sps:$4 sm:$0xff]  }
 0x556   : >> { %9403 = vmatmul.mubr.msk.bf16.gmra.mxu1 %vm7190_vm3, %v9672_v25 }
 0x55d   : >> { %v13315_v29 = vpop.f32.mrf.mxu0 }
 0x55f   : >> { %v13317_v59 = vpop.f32.mrf.mxu0 }
 0x561   : >> { %v13319_v0 = vpop.f32.mrf.mxu0 }
 0x563   : >> { %v13321_v23 = vpop.f32.mrf.mxu0 }
 0x565   : >> { %v9280_v10 = vpop.f32.mrf.mxu1 }
 0x567   : >> { %v9281_v31 = vpop.f32.mrf.mxu1 }
 0x568   : >> { %v9282_v33 = vadd.f32 %v9281_v31, %v9280_v10 }
 0x569   : >> { %v9283_v32 = vpop.f32.mrf.mxu1 }
 0x56a   : >> { %v7311_v18 = vadd.f32 %v9282_v33, %v7246_v41 }
 0x56b   : >> { %v9284_v20 = vpop.f32.mrf.mxu1 }
 0x56c   : >> { %v9285_v63 = vadd.f32 %v9284_v20, %v9283_v32 }
 0x56e   : >> { %v7314_v14 = vadd.f32 %v9285_v63, %v7249_v12 }
 0x592   : >> { %v13323_v61 = vpop.f32.mrf.mxu1 }
 0x594   : >> { %v13325_v51 = vpop.f32.mrf.mxu1 }
 0x595   : >> { %v9314_v60 = vpop.f32.mrf.mxu0 }
 0x596   : >> { %v13327_v48 = vpop.f32.mrf.mxu1 }
 0x597   : >> { %v9315_v43 = vpop.f32.mrf.mxu0 }
 0x598   : >> { %v13329_v42 = vpop.f32.mrf.mxu1  ;;  %v9316_v30 = vadd.f32 %v9315_v43, %v9314_v60  ;;  %v9254_v60 = vadd.f32 %v13317_v59, %v13315_v29  ;;  %v9251_v29 = vadd.f32 %v13313_v28, %v13311_v11 }
 0x599   : >> { %v9317_v52 = vpop.f32.mrf.mxu0 }
 0x59a   : >> { %v7368_v26 = vadd.f32 %v9316_v30, %v7303_v55  ;;  %v7262_v38 = vadd.f32 %v9254_v60, %v13334_v44  ;;  %v7257_v11 = vadd.f32 %v9251_v29, %v13334_v44 }
 0x59b   : >> { %v9318_v57 = vpop.f32.mrf.mxu0 }
 0x59c   : >> { %v9319_v25 = vadd.f32 %v9318_v57, %v9317_v52  ;;  %v9248_v52 = vadd.f32 %v13309_v36, %v13307_v13 }
 0x59e   : >> { %v7371_v5 = vadd.f32 %v9319_v25, %v7306_v53  ;;  %v7254_v13 = vadd.f32 %v9248_v52, %v13334_v44  ;;  %v7504_v52 = vld [vmem:[%s13530_s8] sm:$0x1] (%p3961_p1) }
 0x5bd   : >> { %v9292_v7 = vpop.f32.mrf.mxu1 }
 0x5bf   : >> { %v9293_v47 = vpop.f32.mrf.mxu1 }
 0x5c0   : >> { %v9294_v57 = vadd.f32 %v9293_v47, %v9292_v7 }
 0x5c1   : >> { %v9295_v35 = vpop.f32.mrf.mxu1 }
 0x5c2   : >> { %v7327_v36 = vadd.f32 %v9294_v57, %v7262_v38 }
 0x5c3   : >> { %v9296_v16 = vpop.f32.mrf.mxu1 }
 0x5c4   : >> { %v9297_v59 = vadd.f32 %v9296_v16, %v9295_v35 }
 0x5c5   : >> { %v9320_v49 = vpop.f32.mrf.mxu0 }
 0x5c7   : >> { %v9321_v2 = vpop.f32.mrf.mxu0 }
 0x5c8   : >> { %v9322_v4 = vadd.f32 %v9321_v2, %v9320_v49  ;;  %v9257_v2 = vadd.f32 %v13321_v23, %v13319_v0 }
 0x5c9   : >> { %v9323_v27 = vpop.f32.mrf.mxu0 }
 0x5ca   : >> { %v7376_v8 = vadd.f32 %v9322_v4, %v7311_v18  ;;  %v7265_v0 = vadd.f32 %v9257_v2, %v13334_v44 }
 0x5cb   : >> { %v9324_v1 = vpop.f32.mrf.mxu0 }
 0x5cc   : >> { %v9325_v24 = vadd.f32 %v9324_v1, %v9323_v27  ;;  %v9288_v27 = vadd.f32 %v13325_v51, %v13323_v61  ;;  %v9291_v61 = vadd.f32 %v13329_v42, %v13327_v48  ;;  %v7330_v28 = vadd.f32 %v9297_v59, %v7265_v0 }
 0x5ce   : >> { %v7379_v9 = vadd.f32 %v9325_v24, %v7314_v14  ;;  %v7319_v41 = vadd.f32 %v9288_v27, %v7254_v13  ;;  %v7322_v30 = vadd.f32 %v9291_v61, %v7257_v11  ;;  %v7581_v27 = vld [vmem:[%s13532_s10] sm:$0x1] (%p3961_p1) }
 0x5e1   : >> { %v9326_v46 = vpop.f32.mrf.mxu0 }
 0x5e3   : >> { %v9327_v10 = vpop.f32.mrf.mxu0 }
 0x5e4   : >> { %v9328_v7 = vadd.f32 %v9327_v10, %v9326_v46  ;;  %v13568_v10 = vmov (%p3961_p1), 0.0  }
 0x5e5   : >> { %v9329_v31 = vpop.f32.mrf.mxu0  ;;  %9406 = vmatprep.subr.mxu0 (%p3961_p1), %v13568_v10  ;;  %9417 = vmatprep.subr.mxu1 (%p3961_p1), %v13568_v10 }
 0x5e6   : >> { %v7384_v45 = vadd.f32 %v9328_v7, %v7319_v41  ;;  %9414 = vmatprep.mubr.msk.f32.mxu0 (%p3961_p1), %vm9820_vm9, %v13568_v10  ;;  %9419 = vmatprep.mubr.msk.f32.mxu1 (%p3961_p1), %vm9820_vm9, %v13568_v10 }
 0x5e7   : >> { %v9330_v32 = vpop.f32.mrf.mxu0 }
 0x5e8   : >> { %v9331_v4 = vadd.f32 %v9330_v32, %v9329_v31  ;;  %v7503_v31 = vld [vmem:[%s13529_s7 + $0x18] sm:$0xff] (%p3961_p1)  ;;  %v7502_v32 = vld [vmem:[%s13529_s7 + $0x10] sm:$0xff] (%p3961_p1) }
 0x5e9   : > { %9407 = vmatpush3.msra.mxu0 (%p3961_p1), %v7503_v31 }
 0x5ea   : >> { %v7387_v6 = vadd.f32 %v9331_v4, %v7322_v30  ;;  %9408 = vmatprep.subr.mxu0 (%p3961_p1), %v13568_v10 }
 0x5eb   : >> { %v9400_v15 = vpop.f32.mrf.mxu1  ;;  %9409 = vmatpush3.msra.mxu0 (%p3961_p1), %v7502_v32 }
 0x5ec   : >> { %v7441_v34 = vadd.f32 %v9400_v15, %v7376_v8  ;;  %9410 = vmatprep.subr.mxu0 (%p3961_p1), %v13568_v10 }
 0x5ed   : >> { %v7432_v50 = vpop.f32.mrf.mxu1  ;;  %9411 = vmatpush3.msra.mxu0 (%p3961_p1), %v7501_v17 }
 0x5ee   : >> { %7468 = vst.msk [vmem:[%s13342_s1 + $0x10] sm:$0xff] %vm7465_vm5, %v7441_v34  ;;  %v7433_v40 = vadd.f32 %v7432_v50, %v7368_v26  ;;  %v7478_v39 = vsel %vm7465_vm5, %v7441_v34, 0.0  ;;  %9412 = vmatprep.subr.mxu0 (%p3961_p1), %v13568_v10 }
 0x5ef   : >> { %v9401_v3 = vpop.f32.mrf.mxu1  ;;  %9413 = vmatpush3.msra.mxu0 (%p3961_p1), %v7500_v21 }
 0x5f0   : >> { %7466 = vst.msk [vmem:[%s13342_s1] sm:$0xff] %vm7465_vm5, %v7433_v40  ;;  %v7444_v19 = vadd.f32 %v9401_v3, %v7379_v9  ;;  %v7475_v47 = vsel %vm7465_vm5, %v7433_v40, 0.0 }
 0x5f1   : >> { %v7435_v37 = vpop.f32.mrf.mxu1 }
 0x5f2   : >> { %7469 = vst.msk [vmem:[%s13342_s1 + $0x18] sm:$0xff] %vm7465_vm5, %v7444_v19  ;;  %v7436_v54 = vadd.f32 %v7435_v37, %v7371_v5  ;;  %v7480_v16 = vsel %vm7465_vm5, %v7444_v19, 0.0  ;;  %v7474_v37 = vld [vmem:[#allocation6] sm:$0x1] }
 0x5f4   : >> { %7467 = vst.msk [vmem:[%s13342_s1 + $0x8] sm:$0xff] %vm7465_vm5, %v7436_v54  ;;  %v7476_v58 = vsel %vm7465_vm5, %v7436_v54, 0.0 }
 0x5f5   : >> { %v7477_v23 = vadd.f32 %v7476_v58, %v7475_v47 }
 0x5f7   : >> { %v7479_v18 = vadd.f32 %v7478_v39, %v7477_v23 }
 0x5f9   : >> { %v7481_v24 = vadd.f32 %v7480_v16, %v7479_v18 }
 0x60c   : >> { %v9332_v20 = vpop.f32.mrf.mxu0 }
 0x60e   : >> { %v9333_v43 = vpop.f32.mrf.mxu0 }
 0x60f   : >> { %v9334_v33 = vadd.f32 %v9333_v43, %v9332_v20  ;;  %v7580_v43 = vld [vmem:[%s13531_s9] sm:$0x3] (%p3961_p1) }
 0x610   : >> { %v9335_v49 = vpop.f32.mrf.mxu0  ;;  %9418 = vmatpush3.msk.msra.mxu1 (%p3961_p1), %vm7586_vm6, %v7580_v43 }
 0x611   : >> { %v7392_v56 = vadd.f32 %v9334_v33, %v7327_v36 }
 0x612   : >> { %v9336_v62 = vpop.f32.mrf.mxu0 }
 0x613   : >> { %v9337_v51 = vadd.f32 %v9336_v62, %v9335_v49 }
 0x615   : >> { %v7395_v42 = vadd.f32 %v9337_v51, %v7330_v28 }
 0x616   : >> { %v9404_v35 = vpop.f32.mrf.mxu1 }
 0x617   : >> { %v7457_v1 = vadd.f32 %v9404_v35, %v7392_v56 }
 0x618   : >> { %v7448_v63 = vpop.f32.mrf.mxu1 }
 0x619   : >> { %7472 = vst.msk [vmem:[%s13342_s1 + $0x30] sm:$0xff] %vm7465_vm5, %v7457_v1  ;;  %v7449_v48 = vadd.f32 %v7448_v63, %v7384_v45  ;;  %v7486_v34 = vsel %vm7465_vm5, %v7457_v1, 0.0 }
 0x61a   : >> { %v9405_v12 = vpop.f32.mrf.mxu1 }
 0x61b   : >> { %7470 = vst.msk [vmem:[%s13342_s1 + $0x20] sm:$0xff] %vm7465_vm5, %v7449_v48  ;;  %v7482_v44 = vsel %vm7465_vm5, %v7449_v48, 0.0  ;;  %v7460_v55 = vadd.f32 %v9405_v12, %v7395_v42 }
 0x61c   : >> { %v7451_v8 = vpop.f32.mrf.mxu1  ;;  %v7483_v15 = vadd.f32 %v7482_v44, %v7481_v24 }
 0x61d   : >> { %7473 = vst.msk [vmem:[%s13342_s1 + $0x38] sm:$0xff] %vm7465_vm5, %v7460_v55  ;;  %v7452_v22 = vadd.f32 %v7451_v8, %v7387_v6  ;;  %v7488_v50 = vsel %vm7465_vm5, %v7460_v55, 0.0 }
 0x61f   : >> { %7471 = vst.msk [vmem:[%s13342_s1 + $0x28] sm:$0xff] %vm7465_vm5, %v7452_v22  ;;  %v7484_v14 = vsel %vm7465_vm5, %v7452_v22, 0.0 }
 0x620   : >> { %v7485_v25 = vadd.f32 %v7484_v14, %v7483_v15 }
 0x622   : >> { %v7487_v26 = vadd.f32 %v7486_v34, %v7485_v25 }
 0x624   : >> { %v7489_v53 = vadd.f32 %v7488_v50, %v7487_v26 }
 0x626   : >> { %v7490_v40 = vrot.slane %v7489_v53, 4 }
 0x628   : >> { %v7491_v9 = vadd.f32 %v7490_v40, %v7489_v53 }
 0x62a   : >> { %v7492_v3 = vrot.slane %v7491_v9, 2 }
 0x62c   : >> { %v7493_v19 = vadd.f32 %v7492_v3, %v7491_v9 }
 0x62e   : >> { %v7494_v5 = vrot.slane %v7493_v19, 1 }
 0x630   : >> { %v7495_v54 = vadd.f32 %v7494_v5, %v7493_v19  ;;  %3963 = sbr.rel (!%p3961_p1) target bundleno = 913 (0x391), region = 215 }
 0x632   : >> { %v7496_v46 = vadd.f32 %v7495_v54, %v7474_v37 }
 0x634   : >> { %7497 = vst.msk [vmem:[#allocation6] sm:$0x1] %vm513_vm7, %v7496_v46  ;;  %vm7582_vm7 = vcmask (%p3961_p1), 15360  }
 0x63b   : > { %v7498_v20 = vld [vmem:[#allocation6] sm:$0x1] }
 0x63c   : > { %v7499_v60 = vmul.f32 0.001953125, %v7498_v20 }
 0x63e   : > { %9415 = vmatmul.mubr.msk.f32.vlgmr.msra.gmra.mxu0 %vm7465_vm5, %v7499_v60 }
 0x6fe   : > { %v7575_v57 = vpop.f32.mrf.mxu0 }
 0x6ff   : > { %v7576_v49 = vadd.f32 %v7575_v57, %v7504_v52 }
 0x700   : > { %v9416_v2 = vpop.f32.mrf.mxu0 }
 0x701   : > { %v7579_v38 = vmax.f32 %v7576_v49, 0.0 }
 0x703   : > { %9420 = vmatmul.mubr.msk.f32.vlgmr.msra.gmra.mxu1 %vm7582_vm7, %v7579_v38 }
 0x7c3   : > { %v7656_v58 = vpop.f32.mrf.mxu1 }
 0x7c4   : > { %v7657_v33 = vadd.f32 %v7656_v58, %v7581_v27 }
 0x7c5   : > { %v9421_v29 = vpop.f32.mrf.mxu1 }
 0x7c6   : > { %v9170_v59 = vmul.f32 -1.442695, %v7657_v33 }
 0x7c8   : > { %9673 = vpow2.f32 %v9170_v59 }
 0x7d5   : > { %v9674_v62 = vpop.eup %9673 }
 0x7d6   : > { %v7663_v13 = vadd.f32 1.0, %v9674_v62 }
 0x7d8   : > { %9675 = vrcp.f32 %v7663_v13 }
 0x7e5   : > { %v13417_v36 = vpop.eup %9675 }
 0x7e6 LB: >> { %v7691_v7 = vld [vmem:[%s13527_s5] sm:$0xf]  ;;  %vm7724_vm13 = vcmask 1043456   ;;  %s9171_s25 = sshll.u32 %s9785_s13, 6  ;;  %vm7699_vm1 = vcmask 31744   ;;  %v7833_v28 = vlaneseq  ;;  %s7671_s13 = sadd.s32 1, %s9785_s13   ;;  %s9785_s13 = sphi %s13419_s13, %s7671_s13  }
 0x7e7   : >> { %9422 = vmatprep.subr.msk.mxu0 %vm7724_vm13, %v7691_v7  ;;  %9450 = vmatprep.subr.msk.mxu1 %vm7724_vm13, %v7691_v7  ;;  %s7682_s2 = scalar_lea.vmem %s10024_s16, %s9171_s25  ;;  %s13438_s29 = scalar_lea.vmem %s10027_s22, %s9171_s25 [#allocation7]  ;;  %v9172_v18 = vld [vmem:[%s13528_s6] ss:$0 sm:$0xff] }
 0x7e8   : >> { %9423 = vmatpush3.msk.msra.mxu0 %vm7724_vm13, %v7691_v7  ;;  %9451 = vmatpush3.msk.msra.mxu1 %vm7724_vm13, %v7691_v7  ;;  %v7683_v47 = vld [vmem:[%s7682_s2] sm:$0xff]  ;;  %v7684_v23 = vld [vmem:[%s7682_s2 + $0x8] sm:$0xff]  ;;  %v7685_v61 = vld [vmem:[%s7682_s2 + $0x10] sm:$0xff]  ;;  %v7834_v35 = vshrl.u32 %v7833_v28, 7  ;;  %p7668_p2 = scmp.ge.s32.totalorder %s7671_s13, 8  }
 0x7e9   : >> { %v7687_v0 = vld [vmem:[%s7682_s2 + $0x20] sm:$0xff]  ;;  %9424 = vmatprep.mubr.msk.f32.mxu0 %vm7699_vm1, %v7683_v47  ;;  %v7688_v41 = vld [vmem:[%s7682_s2 + $0x28] sm:$0xff]  ;;  %v7689_v51 = vld [vmem:[%s7682_s2 + $0x30] sm:$0xff]  ;;  %s9206_s24 = sshll.u32 (%p7668_p2), %s9905_s21, 13  ;;  %s7899_s30 = sshll.u32 (%p7668_p2), %s10027_s22, 4  ;;  %s13478_s30 = int_to_ptr.vmem [resolvable:$true] %s7899_s30 }
 0x7ea   : >> { %9430 = vmatprep.mubr.msk.f32.mxu1 %vm7699_vm1, %v7687_v0  ;;  %9425 = vmatmul.mubr.msk.f32.vlgmr.msra.gmra.mxu0 %vm7699_vm1, %v7684_v23  ;;  %v7686_v56 = vld [vmem:[%s7682_s2 + $0x18] sm:$0xff]  ;;  %v7835_v4 = vsub.s32 0, %v7834_v35  ;;  %v7675_v1 = vld [vmem:[%s13438_s29 + $0x8] sm:$0xff]  ;;  %v7674_v48 = vld [vmem:[%s13438_s29] sm:$0xff]  ;;  %s13475_s14 = scalar_lea.hbm (%p7668_p2), %s13533_s11, %s9206_s24  ;;  %s13569_s25 = sand.u32 (%p7668_p2), 1, %s9753_s18  }
 0x7eb   : >> { %9431 = vmatmul.mubr.msk.f32.vlgmr.msra.gmra.mxu1 %vm7699_vm1, %v7688_v41  ;;  %9427 = vmatprep.mubr.msk.f32.mxu0 %vm7699_vm1, %v7685_v61  ;;  %v7690_v11 = vld [vmem:[%s7682_s2 + $0x38] sm:$0xff]  ;;  %v7679_v45 = vld [vmem:[%s13438_s29 + $0x28] sm:$0xff]  ;;  %v7678_v42 = vld [vmem:[%s13438_s29 + $0x20] sm:$0xff]  ;;  %s13482_s2 = scalar_lea.sflag (%p7668_p2), [#allocation8], %s13569_s25  ;;  %s9677_s13 = scalar_lea.vmem (%p7668_p2), %s13478_s30, 8192 }
 0x7ec   : >> { %9433 = vmatprep.mubr.msk.f32.mxu1 %vm7699_vm1, %v7689_v51  ;;  %v7836_v39 = vrot.slane %v13417_v36, %v7835_v4  ;;  %v7677_v44 = vld [vmem:[%s13438_s29 + $0x18] sm:$0xff]  ;;  %v7676_v8 = vld [vmem:[%s13438_s29 + $0x10] sm:$0xff]  ;;  %p9678_p3 = scmp.ne.s32.totalorder (%p7668_p2), %s13478_s30, %s9677_s13  ;;  %s9821_s21 = smov (%p7668_p2), [#allocation7]  }
 0x7ed   : >> { %v7681_v24 = vld [vmem:[%s13438_s29 + $0x38] sm:$0xff]  ;;  %v7680_v22 = vld [vmem:[%s13438_s29 + $0x30] sm:$0xff]  ;;  %s9681_s16 = sshll.u32 (%p7668_p2), %s9821_s21, 4  ;;  %s9682_s16 = int_to_ptr.vmem [resolvable:$false] %s9681_s16 }
 0x7ee   : >> { %9428 = vmatmul.mubr.msk.f32.gmra.mxu0 %vm7699_vm1, %v7686_v56  ;;  %v7838_v63 = vmul.f32 %v7836_v39, %v7675_v1  ;;  %v7842_v30 = vmul.f32 %v7836_v39, %v7679_v45  ;;  %v7837_v14 = vmul.f32 %v7836_v39, %v7674_v48  ;;  %v7841_v34 = vmul.f32 %v7836_v39, %v7678_v42  ;;  %p9679_p4 = pnand (%p7668_p2), %p9678_p3, %p9922_p5  ;;  %p9684_p8 = scmp.lt.s32.totalorder (%p7668_p2), %s13478_s30, %s9682_s16 }
 0x7ef   : >> { %9434 = vmatmul.mubr.msk.f32.gmra.mxu1 %vm7699_vm1, %v7690_v11  ;;  %v7840_v3 = vmul.f32 %v7836_v39, %v7677_v44  ;;  %v7844_v5 = vmul.f32 %v7836_v39, %v7681_v24  ;;  %v7839_v37 = vmul.f32 %v7836_v39, %v7676_v8  ;;  %v7843_v54 = vmul.f32 %v7836_v39, %v7680_v22 }
 0x7f0   : > { %p9680_p7 = pneg (%p7668_p2), %p9679_p4 }
 0x8aa   : >> { %v9426_v12 = vpop.f32.mrf.mxu0 }
 0x8ab   : >> { %v9432_v16 = vpop.f32.mrf.mxu1  ;;  %v7800_v55 = vadd.f32 %v9426_v12, %v9172_v18 }
 0x8ac   : >> { %v7820_v6 = vadd.f32 %v9432_v16, %v9172_v18  ;;  %v7794_v15 = vpop.f32.mrf.mxu0 }
 0x8ad   : >> { %v7814_v25 = vpop.f32.mrf.mxu1  ;;  %v7846_v26 = vadd.f32 %v7838_v63, %v7800_v55  ;;  %v7795_v53 = vadd.f32 %v9172_v18, %v7794_v15 }
 0x8ae   : >> { %v7850_v50 = vadd.f32 %v7842_v30, %v7820_v6  ;;  %v7815_v40 = vadd.f32 %v9172_v18, %v7814_v25  ;;  %v9429_v9 = vpop.f32.mrf.mxu0 }
 0x8af   : >> { %v9435_v19 = vpop.f32.mrf.mxu1  ;;  %vm7854_vm10 = vcmp.gt.f32.partialorder %v7846_v26, 0.0  ;;  %v7862_v46 = vmul.f32 0.01, %v7846_v26  ;;  %v7845_v31 = vadd.f32 %v7837_v14, %v7795_v53  ;;  %v7810_v20 = vadd.f32 %v9429_v9, %v9172_v18 }
 0x8b0   : >> { %vm7858_vm11 = vcmp.gt.f32.partialorder %v7850_v50, 0.0  ;;  %v7866_v10 = vmul.f32 0.01, %v7850_v50  ;;  %v7849_v32 = vadd.f32 %v7841_v34, %v7815_v40  ;;  %v7830_v17 = vadd.f32 %v9435_v19, %v9172_v18  ;;  %v7804_v21 = vpop.f32.mrf.mxu0 }
 0x8b1   : >> { %v7824_v60 = vpop.f32.mrf.mxu1  ;;  %v7870_v43 = vsel %vm7854_vm10, %v7846_v26, %v7862_v46  ;;  %v7805_v57 = vadd.f32 %v9172_v18, %v7804_v21  ;;  %vm7853_vm12 = vcmp.gt.f32.partialorder %v7845_v31, 0.0  ;;  %v7861_v2 = vmul.f32 0.01, %v7845_v31 }
 0x8b2   : >> { %v7874_v52 = vsel %vm7858_vm11, %v7850_v50, %v7866_v10  ;;  %v7825_v49 = vadd.f32 %v9172_v18, %v7824_v60  ;;  %7878 = vst.msk [vmem:[%s13438_s29 + $0x8] sm:$0xff] %vm7465_vm5, %v7870_v43  ;;  %vm7857_vm14 = vcmp.gt.f32.partialorder %v7849_v32, 0.0  ;;  %v7865_v38 = vmul.f32 0.01, %v7849_v32 }
 0x8b3   : >> { %7882 = vst.msk [vmem:[%s13438_s29 + $0x28] sm:$0xff] %vm7465_vm5, %v7874_v52  ;;  %v7848_v27 = vadd.f32 %v7840_v3, %v7810_v20  ;;  %v7852_v58 = vadd.f32 %v7844_v5, %v7830_v17  ;;  %v7847_v33 = vadd.f32 %v7839_v37, %v7805_v57  ;;  %v7869_v59 = vsel %vm7853_vm12, %v7845_v31, %v7861_v2 }
 0x8b4   : >> { %v7851_v29 = vadd.f32 %v7843_v54, %v7825_v49  ;;  %v7873_v62 = vsel %vm7857_vm14, %v7849_v32, %v7865_v38  ;;  %7877 = vst.msk [vmem:[%s13438_s29] sm:$0xff] %vm7465_vm5, %v7869_v59 }
 0x8b5   : >> { %7881 = vst.msk [vmem:[%s13438_s29 + $0x20] sm:$0xff] %vm7465_vm5, %v7873_v62  ;;  %vm7856_vm15 = vcmp.gt.f32.partialorder %v7848_v27, 0.0  ;;  %v7864_v13 = vmul.f32 0.01, %v7848_v27  ;;  %vm7860_vm2 = vcmp.gt.f32.partialorder %v7852_v58, 0.0  ;;  %vm7855_vm0 = vcmp.gt.f32.partialorder %v7847_v33, 0.0 }
 0x8b6   : >> { %v7868_v7 = vmul.f32 0.01, %v7852_v58  ;;  %v7863_v47 = vmul.f32 0.01, %v7847_v33  ;;  %vm7859_vm4 = vcmp.gt.f32.partialorder %v7851_v29, 0.0  ;;  %7670 = sbr.rel (!%p7668_p2) target bundleno = 2022 (0x7e6), region = 226 }
 0x8b7   : >> { %v7867_v0 = vmul.f32 0.01, %v7851_v29  ;;  %v7872_v23 = vsel %vm7856_vm15, %v7848_v27, %v7864_v13 }
 0x8b8   : >> { %v7876_v41 = vsel %vm7860_vm2, %v7852_v58, %v7868_v7  ;;  %7880 = vst.msk [vmem:[%s13438_s29 + $0x18] sm:$0xff] %vm7465_vm5, %v7872_v23  ;;  %v7871_v61 = vsel %vm7855_vm0, %v7847_v33, %v7863_v47 }
 0x8b9   : >> { %7884 = vst.msk [vmem:[%s13438_s29 + $0x38] sm:$0xff] %vm7465_vm5, %v7876_v41  ;;  %v7875_v51 = vsel %vm7859_vm4, %v7851_v29, %v7867_v0  ;;  %7879 = vst.msk [vmem:[%s13438_s29 + $0x10] sm:$0xff] %vm7465_vm5, %v7871_v61 }
 0x8ba   : >> { %7883 = vst.msk [vmem:[%s13438_s29 + $0x30] sm:$0xff] %vm7465_vm5, %v7875_v51  ;;  %s9683_s29 = scalar_lea.vmem (%p7668_p2), %s9682_s16, 16384 }
 0x8bb   : > { %p9685_p9 = scmp.lt.s32.totalorder %s9683_s29, %s9677_s13 }
 0x8bd   : > { %p9686_p10 = por %p9685_p9, %p9684_p8 }
 0x8bf   : > { %p9687_p11 = pnand %p9686_p10, %p9680_p7 }
 0x8c1   : > { %9690 = shalt.err (!%p9687_p11)
}
 0x8c2   : > { %s9691_s22 = scalar_lea.hbm %s13475_s14, 8192  ;;  %s9695_s24 = scalar_lea.hbm %s13533_s11, 16384 }
 0x8c3   : > { %p9692_p12 = scmp.ne.s32.totalorder %s13475_s14, %s9691_s22  ;;  %p9696_p1 = scmp.lt.s32.totalorder %s13475_s14, %s13533_s11 }
 0x8c4   : > { %p9697_p2 = scmp.lt.s32.totalorder %s9695_s24, %s9691_s22 }
 0x8c5   : > { %p9693_p13 = pnand %p9692_p12, %p9922_p5 }
 0x8c6   : > { %p9698_p3 = por %p9697_p2, %p9696_p1 }
 0x8c7   : > { %p9694_p0 = pneg %p9693_p13 }
 0x8c9   : > { %p9699_p4 = pnand %p9698_p3, %p9694_p0 }
 0x8cb   : > { %9702 = shalt.err (!%p9699_p4)
}
 0x8cc   : > { %s9822_s25 = smov 128   ;;  %s9823_s13 = smov 8  }
 0x8cd   : > { %9454 = dma.vmem_to_hbm [thread:$0]  (%p9922_p5), %s13478_s30, 8192, %s13475_s14, %s13482_s2, %s9822_s25, %s9822_s25, %s9823_s13  }
 0x8ce PF: > { %p9460_p7 = scmp.ge.s32.totalorder %s9761_s20, 2  ;;  %s7914_s21 = sand.u32 1, %s9749_s17  }
 0x8cf   : > { %s7915_s16 = scalar_lea.sflag [#allocation8], %s7914_s21 }
 0x8d0   : > { %p9457_p8 = pnand %p9460_p7, %p9926_p6 }
 0x8d2   : > { %p9458_p9 = pneg %p9457_p8 }
 0x8d4   : > { %9744 = dma.done.wait (%p9458_p9), %s7915_s16, 8192  }
 0x8d5   : > { %9746 = vsyncadd (%p9458_p9), %s7915_s16, 4294959104  ;;  %p21_p10 = scmp.ge.s32.totalorder %s9909_s23, 4   ;;  %s13570_s17 = smov %s9753_s18 }
 0x8d6   : > { %s13571_s18 = smov %s9757_s19  ;;  %s13572_s19 = smov %s9920_s26 }
 0x8d7   : > { %s13573_s20 = smov %s9909_s23  ;;  %23 = sbr.rel (!%p21_p10) target bundleno = 7 (0x7), region = 237 }
 0x8dc   :  { %7920 = vsyncpa [#allocation8], 1 }
 0x8dd   :  { %7922 = vsyncpa [#allocation8 + $0x1], 1 }

</bundles_post_ra>
